<compile_context>
chip_gen: v6e
topology: v6e:2x2x1
jax: 0.10.0
libtpu: 0.0.40
codegen_flags: <defaults>
</compile_context>

<pallas_src>
import functools

import jax
import jax.numpy as jnp
from jax.experimental import pallas as pl

EMBEDDING_DIM = 32
N_HIDDEN = 32
DAY_HIDDEN = 64          # lstm_day hidden size (hard-coded 64 in the module)
ATTN_MATRIX = 64         # w2 / day attention dims
LINEAR_MATRIX = 64       # linear: 64 -> 48
PREV_DIM = 8
FINAL_MAT = 16 + PREV_DIM


# ------------------------- in-kernel building blocks -------------------------

def _lstm_layer(x_steps, wih_ref, whh_ref, b_ref):
    """One LSTM layer, fully unrolled over time.

    x_steps: python list over time of (B, Din) f32 values (already in vregs).
    wih_ref: (4, Din, H) per-gate input weights  (gate order [i, f, g, o])
    whh_ref: (4, H, H)   per-gate recurrent weights
    b_ref:   (4, 1, H)   per-gate combined bias (b_ih + b_hh)

    The input projections are computed before the recurrence starts (hoisted),
    so the serial per-step chain is a single (B,H)x(H,H) dot per gate plus VPU
    work; h/c live in registers (no VMEM scratch round-trips).
    """
    wih = [wih_ref[g] for g in range(4)]
    whh = [whh_ref[g] for g in range(4)]
    b = [b_ref[g] for g in range(4)]
    H = whh[0].shape[-1]
    B = x_steps[0].shape[0]

    # hoisted input projections (independent of the recurrence)
    gin = [[jnp.dot(x_t, wih[g], preferred_element_type=jnp.float32) + b[g]
            for g in range(4)] for x_t in x_steps]

    h = jnp.zeros((B, H), jnp.float32)
    c = jnp.zeros((B, H), jnp.float32)
    outs = []
    for t in range(len(x_steps)):
        i_g = jax.nn.sigmoid(gin[t][0] + jnp.dot(h, whh[0], preferred_element_type=jnp.float32))
        f_g = jax.nn.sigmoid(gin[t][1] + jnp.dot(h, whh[1], preferred_element_type=jnp.float32))
        g_g = jnp.tanh(gin[t][2] + jnp.dot(h, whh[2], preferred_element_type=jnp.float32))
        o_g = jax.nn.sigmoid(gin[t][3] + jnp.dot(h, whh[3], preferred_element_type=jnp.float32))
        c = f_g * c + i_g * g_g
        h = o_g * jnp.tanh(c)
        outs.append(h)
    return outs, h            # per-step hidden states, final hidden state


def _topic_attention(outs_topic, fstate, w1w, w1b):
    """attention_net_topic, vectorised over days and made sort-free.

    outs_topic: list over topic index j of (days, H) top-layer LSTM outputs.
    fstate:     (days, H) layer-0 final hidden states.

    Keep rule, equivalent to the original "sort descending, accumulate until the
    inclusive cumsum exceeds 0.8" loop: topic j is kept iff the sum of weights
    that would precede it in a stable descending sort (strictly greater, index
    tie-break) is <= 0.8.
    """
    n = len(outs_topic)
    scores = [jnp.sum((jnp.dot(o, w1w, preferred_element_type=jnp.float32) + w1b) * fstate,
                      axis=1, keepdims=True) for o in outs_topic]          # (days, 1) each
    m = scores[0]
    for s in scores[1:]:
        m = jnp.maximum(m, s)
    es = [jnp.exp(s - m) for s in scores]
    z = es[0]
    for e in es[1:]:
        z = z + e
    w = [e / z for e in es]                                                # softmax weights

    ctx = jnp.zeros_like(outs_topic[0])
    for j in range(n):
        excl = jnp.zeros_like(w[j])
        for k in range(n):
            if k == j:
                continue
            before = (w[k] >= w[j]) if k < j else (w[k] > w[j])
            excl = excl + jnp.where(before, w[k], 0.0)
        coeff = jnp.where(excl <= 0.8, w[j], 0.0)                          # (days, 1)
        ctx = ctx + coeff * outs_topic[j]
    return ctx                                                             # (days, H)


# ------------------------- fused forward kernel -------------------------

def _model_kernel(x_ref, prev_ref,
                  t1_wih, t1_whh, t1_b,
                  p1_wih, p1_whh, p1_b, p2_wih, p2_whh, p2_b,
                  d1_wih, d1_whh, d1_b, d2_wih, d2_whh, d2_b,
                  w1w_ref, w1b_ref, w2w_ref, w2b_ref,
                  linw_ref, linb_ref, lin2w_ref, lin2b_ref,
                  hwa_ref, hwb_ref, hb_ref,
                  out_ref, *, days, topics):
    B, T, D = x_ref.shape                     # B = days * topics

    # ---- lstm_text over all (day, topic) sequences batched together ---------
    # The module only uses final_hidden_state[0] (first-layer final hidden);
    # the second text-LSTM layer can never affect it, so it is skipped.
    x = x_ref[...]                            # (B, T, D) stays resident in VMEM
    x_steps = [x[:, t, :] for t in range(T)]
    _, h_text = _lstm_layer(x_steps, t1_wih, t1_whh, t1_b)       # (B, 32)

    # ---- lstm_topic: per-day topic sequences, batched over days -------------
    # rows of h_text are (day-major, topic-minor); regroup into per-topic steps.
    xsteps_topic = [
        jnp.concatenate(
            [h_text[d * topics + j:d * topics + j + 1, :] for d in range(days)],
            axis=0)
        for j in range(topics)]                                  # each (days, 32)
    outs_p1, h_topic = _lstm_layer(xsteps_topic, p1_wih, p1_whh, p1_b)   # layer 0
    outs_p2, _ = _lstm_layer(outs_p1, p2_wih, p2_whh, p2_b)              # top layer

    # ---- per-day topic attention (sort-free truncation) ----------------------
    day_ctx = _topic_attention(outs_p2, h_topic, w1w_ref[...], w1b_ref[...])  # (days, 32)

    # ---- lstm_day over the day sequence (batch = 1) --------------------------
    xsteps_day = [day_ctx[d:d + 1, :] for d in range(days)]      # (1, 32) each
    outs_d1, h_day = _lstm_layer(xsteps_day, d1_wih, d1_whh, d1_b)       # layer 0, H=64
    outs_d2, _ = _lstm_layer(outs_d1, d2_wih, d2_whh, d2_b)              # top layer, H=64
    seq = jnp.concatenate(outs_d2, axis=0)                       # output[0]  (days, 64)

    # ---- attention_net_day ----------------------------------------------------
    proj = jnp.dot(seq, w2w_ref[...], preferred_element_type=jnp.float32) + w2b_ref[...]
    score = jnp.sum(proj * h_day, axis=1, keepdims=True)         # (days, 1)
    score = score - jnp.max(score, axis=0, keepdims=True)
    e = jnp.exp(score)
    attn = e / jnp.sum(e, axis=0, keepdims=True)
    ctx = jnp.sum(attn * seq, axis=0, keepdims=True)             # (1, 64)

    # ---- linear -> linear_2 -> 4 output heads --------------------------------
    h = jnp.dot(ctx, linw_ref[...], preferred_element_type=jnp.float32) + linb_ref[...]   # (1, 48)
    h = jnp.dot(h, lin2w_ref[...], preferred_element_type=jnp.float32) + lin2b_ref[...]   # (1, 16)
    out_a = jnp.sum(hwa_ref[...] * h, axis=1, keepdims=True)              # (4, 1)
    out_b = jnp.sum(hwb_ref[...] * prev_ref[...], axis=1, keepdims=True)  # (4, 1)
    out_ref[...] = out_a + out_b + hb_ref[...]


# ------------------------- wrapper -------------------------

def model_forward(params, X, previous_labels):
    """X: (days, topics, seq_len, embedding_dim); previous_labels: (4, PREV_DIM)."""
    days, topics, T, D = X.shape
    x = X.reshape(days * topics, T, D)   # metadata-only reshape (no transpose / copy)
    t = params['lstm_text']
    p = params['lstm_topic']
    d = params['lstm_day']
    kernel = functools.partial(_model_kernel, days=days, topics=topics)
    out = pl.pallas_call(
        kernel,
        out_shape=jax.ShapeDtypeStruct((4, 1), jnp.float32),
    )(x, previous_labels,
      t['wih1'], t['whh1'], t['b1'],
      p['wih1'], p['whh1'], p['b1'], p['wih2'], p['whh2'], p['b2'],
      d['wih1'], d['whh1'], d['b1'], d['wih2'], d['whh2'], d['b2'],
      params['w1_w'], params['w1_b'], params['w2_w'], params['w2_b'],
      params['lin_w'], params['lin_b'], params['lin2_w'], params['lin2_b'],
      params['head_wa'], params['head_wb'], params['head_b'])
    # order matches the module: [PCEDG, CCI, Retails, CPI]
    return [out[0], out[1], out[2], out[3]], True


# ------------------------- deterministic parameter init -------------------------

def init_params(key):
    keys = iter(jax.random.split(key, 40))

    def unif(shape, scale=0.1):
        return jax.random.uniform(next(keys), shape, jnp.float32, -scale, scale)

    def lstm_layer_p(d_in, h):
        # per-gate blocks (gate order [i, f, g, o]); bias = b_ih + b_hh combined
        return dict(wih=unif((4, d_in, h)), whh=unif((4, h, h)), b=unif((4, 1, h)))

    tl1 = lstm_layer_p(EMBEDDING_DIM, N_HIDDEN)
    pl1 = lstm_layer_p(N_HIDDEN, N_HIDDEN)
    pl2 = lstm_layer_p(N_HIDDEN, N_HIDDEN)
    dl1 = lstm_layer_p(N_HIDDEN, DAY_HIDDEN)
    dl2 = lstm_layer_p(DAY_HIDDEN, DAY_HIDDEN)

    # TODO(synk): W1/W2/V, linear_3, module-level Dropout and lstm_text layer-2
    # are declared in __init__ but never influence the eval-mode forward output;
    # they are omitted here.
    return dict(
        lstm_text=dict(wih1=tl1['wih'], whh1=tl1['whh'], b1=tl1['b']),
        lstm_topic=dict(wih1=pl1['wih'], whh1=pl1['whh'], b1=pl1['b'],
                        wih2=pl2['wih'], whh2=pl2['whh'], b2=pl2['b']),
        lstm_day=dict(wih1=dl1['wih'], whh1=dl1['whh'], b1=dl1['b'],
                      wih2=dl2['wih'], whh2=dl2['whh'], b2=dl2['b']),
        # attention linears used in forward: w1 (n_hidden) and w2 (attn_matrix)
        w1_w=unif((N_HIDDEN, N_HIDDEN)), w1_b=unif((1, N_HIDDEN)),
        w2_w=unif((ATTN_MATRIX, ATTN_MATRIX)), w2_b=unif((1, ATTN_MATRIX)),
        # linear stack
        lin_w=unif((LINEAR_MATRIX, 48)), lin_b=unif((1, 48)),
        lin2_w=unif((48, 16)), lin2_b=unif((1, 16)),
        # 4 heads (rows: PCEDG, CCI, Retails, CPI); weight split into the part
        # multiplying _output (16) and the part multiplying previous_labels[i].
        head_wa=unif((4, 16)), head_wb=unif((4, PREV_DIM)), head_b=unif((4, 1)),
    )


# ------------------------- main -------------------------

if __name__ == "__main__":
    key = jax.random.PRNGKey(0)
    kp, kx, kl = jax.random.split(key, 3)
    params = init_params(kp)

    days, topics, seq_len = 4, 3, 8
    X = jax.random.normal(kx, (days, topics, seq_len, EMBEDDING_DIM), jnp.float32)
    previous_labels = jax.random.normal(kl, (4, PREV_DIM), jnp.float32)

    outputs, ok = model_forward(params, X, previous_labels)
    outputs = jax.block_until_ready(outputs)
    assert ok and all(o.shape == (1,) for o in outputs)
    print("KERNEL_OK")
</pallas_src>

<mosaic_0001>
module attributes {stable_mosaic.version = 11 : i64} {
  func.func @_model_kernel(%arg0: memref<12x8x32xf32, #tpu.memory_space<vmem>>, %arg1: memref<4x8xf32, #tpu.memory_space<vmem>>, %arg2: memref<4x32x32xf32, #tpu.memory_space<vmem>>, %arg3: memref<4x32x32xf32, #tpu.memory_space<vmem>>, %arg4: memref<4x1x32xf32, #tpu.memory_space<vmem>>, %arg5: memref<4x32x32xf32, #tpu.memory_space<vmem>>, %arg6: memref<4x32x32xf32, #tpu.memory_space<vmem>>, %arg7: memref<4x1x32xf32, #tpu.memory_space<vmem>>, %arg8: memref<4x32x32xf32, #tpu.memory_space<vmem>>, %arg9: memref<4x32x32xf32, #tpu.memory_space<vmem>>, %arg10: memref<4x1x32xf32, #tpu.memory_space<vmem>>, %arg11: memref<4x32x64xf32, #tpu.memory_space<vmem>>, %arg12: memref<4x64x64xf32, #tpu.memory_space<vmem>>, %arg13: memref<4x1x64xf32, #tpu.memory_space<vmem>>, %arg14: memref<4x64x64xf32, #tpu.memory_space<vmem>>, %arg15: memref<4x64x64xf32, #tpu.memory_space<vmem>>, %arg16: memref<4x1x64xf32, #tpu.memory_space<vmem>>, %arg17: memref<32x32xf32, #tpu.memory_space<vmem>>, %arg18: memref<1x32xf32, #tpu.memory_space<vmem>>, %arg19: memref<64x64xf32, #tpu.memory_space<vmem>>, %arg20: memref<1x64xf32, #tpu.memory_space<vmem>>, %arg21: memref<64x48xf32, #tpu.memory_space<vmem>>, %arg22: memref<1x48xf32, #tpu.memory_space<vmem>>, %arg23: memref<48x16xf32, #tpu.memory_space<vmem>>, %arg24: memref<1x16xf32, #tpu.memory_space<vmem>>, %arg25: memref<4x16xf32, #tpu.memory_space<vmem>>, %arg26: memref<4x8xf32, #tpu.memory_space<vmem>>, %arg27: memref<4x1xf32, #tpu.memory_space<vmem>>, %arg28: memref<4x1xf32, #tpu.memory_space<vmem>>) attributes {dimension_semantics = [], scalar_prefetch = 0 : i64, scratch_operands = 0 : i64, tpu.core_type = #tpu.core_type<tc>} {
    %c0 = arith.constant 0 : index
    %c0_0 = arith.constant 0 : index
    %c0_1 = arith.constant 0 : index
    %0 = vector.load %arg0[%c0, %c0_0, %c0_1] : memref<12x8x32xf32, #tpu.memory_space<vmem>>, vector<12x8x32xf32>
    %1 = vector.extract_strided_slice %0 {offsets = [0, 0, 0], sizes = [12, 1, 32], strides = [1, 1, 1]} : vector<12x8x32xf32> to vector<12x1x32xf32>
    %2 = vector.shape_cast %1 : vector<12x1x32xf32> to vector<12x32xf32>
    %3 = vector.extract_strided_slice %0 {offsets = [0, 1, 0], sizes = [12, 1, 32], strides = [1, 1, 1]} : vector<12x8x32xf32> to vector<12x1x32xf32>
    %4 = vector.shape_cast %3 : vector<12x1x32xf32> to vector<12x32xf32>
    %5 = vector.extract_strided_slice %0 {offsets = [0, 2, 0], sizes = [12, 1, 32], strides = [1, 1, 1]} : vector<12x8x32xf32> to vector<12x1x32xf32>
    %6 = vector.shape_cast %5 : vector<12x1x32xf32> to vector<12x32xf32>
    %7 = vector.extract_strided_slice %0 {offsets = [0, 3, 0], sizes = [12, 1, 32], strides = [1, 1, 1]} : vector<12x8x32xf32> to vector<12x1x32xf32>
    %8 = vector.shape_cast %7 : vector<12x1x32xf32> to vector<12x32xf32>
    %9 = vector.extract_strided_slice %0 {offsets = [0, 4, 0], sizes = [12, 1, 32], strides = [1, 1, 1]} : vector<12x8x32xf32> to vector<12x1x32xf32>
    %10 = vector.shape_cast %9 : vector<12x1x32xf32> to vector<12x32xf32>
    %11 = vector.extract_strided_slice %0 {offsets = [0, 5, 0], sizes = [12, 1, 32], strides = [1, 1, 1]} : vector<12x8x32xf32> to vector<12x1x32xf32>
    %12 = vector.shape_cast %11 : vector<12x1x32xf32> to vector<12x32xf32>
    %13 = vector.extract_strided_slice %0 {offsets = [0, 6, 0], sizes = [12, 1, 32], strides = [1, 1, 1]} : vector<12x8x32xf32> to vector<12x1x32xf32>
    %14 = vector.shape_cast %13 : vector<12x1x32xf32> to vector<12x32xf32>
    %15 = vector.extract_strided_slice %0 {offsets = [0, 7, 0], sizes = [12, 1, 32], strides = [1, 1, 1]} : vector<12x8x32xf32> to vector<12x1x32xf32>
    %16 = vector.shape_cast %15 : vector<12x1x32xf32> to vector<12x32xf32>
    %c0_2 = arith.constant 0 : index
    %c0_3 = arith.constant 0 : index
    %c0_4 = arith.constant 0 : index
    %17 = vector.load %arg2[%c0_2, %c0_3, %c0_4] : memref<4x32x32xf32, #tpu.memory_space<vmem>>, vector<1x32x32xf32>
    %18 = vector.shape_cast %17 : vector<1x32x32xf32> to vector<32x32xf32>
    %c1 = arith.constant 1 : index
    %c0_5 = arith.constant 0 : index
    %c0_6 = arith.constant 0 : index
    %19 = vector.load %arg2[%c1, %c0_5, %c0_6] : memref<4x32x32xf32, #tpu.memory_space<vmem>>, vector<1x32x32xf32>
    %20 = vector.shape_cast %19 : vector<1x32x32xf32> to vector<32x32xf32>
    %c2 = arith.constant 2 : index
    %c0_7 = arith.constant 0 : index
    %c0_8 = arith.constant 0 : index
    %21 = vector.load %arg2[%c2, %c0_7, %c0_8] : memref<4x32x32xf32, #tpu.memory_space<vmem>>, vector<1x32x32xf32>
    %22 = vector.shape_cast %21 : vector<1x32x32xf32> to vector<32x32xf32>
    %c3 = arith.constant 3 : index
    %c0_9 = arith.constant 0 : index
    %c0_10 = arith.constant 0 : index
    %23 = vector.load %arg2[%c3, %c0_9, %c0_10] : memref<4x32x32xf32, #tpu.memory_space<vmem>>, vector<1x32x32xf32>
    %24 = vector.shape_cast %23 : vector<1x32x32xf32> to vector<32x32xf32>
    %c0_11 = arith.constant 0 : index
    %c0_12 = arith.constant 0 : index
    %c0_13 = arith.constant 0 : index
    %25 = vector.load %arg3[%c0_11, %c0_12, %c0_13] : memref<4x32x32xf32, #tpu.memory_space<vmem>>, vector<1x32x32xf32>
    %26 = vector.shape_cast %25 : vector<1x32x32xf32> to vector<32x32xf32>
    %c1_14 = arith.constant 1 : index
    %c0_15 = arith.constant 0 : index
    %c0_16 = arith.constant 0 : index
    %27 = vector.load %arg3[%c1_14, %c0_15, %c0_16] : memref<4x32x32xf32, #tpu.memory_space<vmem>>, vector<1x32x32xf32>
    %28 = vector.shape_cast %27 : vector<1x32x32xf32> to vector<32x32xf32>
    %c2_17 = arith.constant 2 : index
    %c0_18 = arith.constant 0 : index
    %c0_19 = arith.constant 0 : index
    %29 = vector.load %arg3[%c2_17, %c0_18, %c0_19] : memref<4x32x32xf32, #tpu.memory_space<vmem>>, vector<1x32x32xf32>
    %30 = vector.shape_cast %29 : vector<1x32x32xf32> to vector<32x32xf32>
    %c3_20 = arith.constant 3 : index
    %c0_21 = arith.constant 0 : index
    %c0_22 = arith.constant 0 : index
    %31 = vector.load %arg3[%c3_20, %c0_21, %c0_22] : memref<4x32x32xf32, #tpu.memory_space<vmem>>, vector<1x32x32xf32>
    %32 = vector.shape_cast %31 : vector<1x32x32xf32> to vector<32x32xf32>
    %c0_23 = arith.constant 0 : index
    %c0_24 = arith.constant 0 : index
    %c0_25 = arith.constant 0 : index
    %33 = vector.load %arg4[%c0_23, %c0_24, %c0_25] : memref<4x1x32xf32, #tpu.memory_space<vmem>>, vector<1x1x32xf32>
    %34 = vector.shape_cast %33 : vector<1x1x32xf32> to vector<1x32xf32>
    %c1_26 = arith.constant 1 : index
    %c0_27 = arith.constant 0 : index
    %c0_28 = arith.constant 0 : index
    %35 = vector.load %arg4[%c1_26, %c0_27, %c0_28] : memref<4x1x32xf32, #tpu.memory_space<vmem>>, vector<1x1x32xf32>
    %36 = vector.shape_cast %35 : vector<1x1x32xf32> to vector<1x32xf32>
    %c2_29 = arith.constant 2 : index
    %c0_30 = arith.constant 0 : index
    %c0_31 = arith.constant 0 : index
    %37 = vector.load %arg4[%c2_29, %c0_30, %c0_31] : memref<4x1x32xf32, #tpu.memory_space<vmem>>, vector<1x1x32xf32>
    %38 = vector.shape_cast %37 : vector<1x1x32xf32> to vector<1x32xf32>
    %c3_32 = arith.constant 3 : index
    %c0_33 = arith.constant 0 : index
    %c0_34 = arith.constant 0 : index
    %39 = vector.load %arg4[%c3_32, %c0_33, %c0_34] : memref<4x1x32xf32, #tpu.memory_space<vmem>>, vector<1x1x32xf32>
    %40 = vector.shape_cast %39 : vector<1x1x32xf32> to vector<1x32xf32>
    %cst = arith.constant dense<0.000000e+00> : vector<12x32xf32>
    %41 = tpu.matmul %2, %18, %cst {dimension_numbers = #tpu.dot_dimension_numbers<[1], [0], [0], [1], [0, 0, 1, 1], [], []>} : vector<12x32xf32>, vector<32x32xf32>, vector<12x32xf32> -> vector<12x32xf32>
    %42 = vector.broadcast %34 : vector<1x32xf32> to vector<12x32xf32>
    %43 = arith.addf %41, %42 : vector<12x32xf32>
    %cst_35 = arith.constant dense<0.000000e+00> : vector<12x32xf32>
    %44 = tpu.matmul %2, %20, %cst_35 {dimension_numbers = #tpu.dot_dimension_numbers<[1], [0], [0], [1], [0, 0, 1, 1], [], []>} : vector<12x32xf32>, vector<32x32xf32>, vector<12x32xf32> -> vector<12x32xf32>
    %45 = vector.broadcast %36 : vector<1x32xf32> to vector<12x32xf32>
    %46 = arith.addf %44, %45 : vector<12x32xf32>
    %cst_36 = arith.constant dense<0.000000e+00> : vector<12x32xf32>
    %47 = tpu.matmul %2, %22, %cst_36 {dimension_numbers = #tpu.dot_dimension_numbers<[1], [0], [0], [1], [0, 0, 1, 1], [], []>} : vector<12x32xf32>, vector<32x32xf32>, vector<12x32xf32> -> vector<12x32xf32>
    %48 = vector.broadcast %38 : vector<1x32xf32> to vector<12x32xf32>
    %49 = arith.addf %47, %48 : vector<12x32xf32>
    %cst_37 = arith.constant dense<0.000000e+00> : vector<12x32xf32>
    %50 = tpu.matmul %2, %24, %cst_37 {dimension_numbers = #tpu.dot_dimension_numbers<[1], [0], [0], [1], [0, 0, 1, 1], [], []>} : vector<12x32xf32>, vector<32x32xf32>, vector<12x32xf32> -> vector<12x32xf32>
    %51 = vector.broadcast %40 : vector<1x32xf32> to vector<12x32xf32>
    %52 = arith.addf %50, %51 : vector<12x32xf32>
    %cst_38 = arith.constant dense<0.000000e+00> : vector<12x32xf32>
    %53 = tpu.matmul %4, %18, %cst_38 {dimension_numbers = #tpu.dot_dimension_numbers<[1], [0], [0], [1], [0, 0, 1, 1], [], []>} : vector<12x32xf32>, vector<32x32xf32>, vector<12x32xf32> -> vector<12x32xf32>
    %54 = vector.broadcast %34 : vector<1x32xf32> to vector<12x32xf32>
    %55 = arith.addf %53, %54 : vector<12x32xf32>
    %cst_39 = arith.constant dense<0.000000e+00> : vector<12x32xf32>
    %56 = tpu.matmul %4, %20, %cst_39 {dimension_numbers = #tpu.dot_dimension_numbers<[1], [0], [0], [1], [0, 0, 1, 1], [], []>} : vector<12x32xf32>, vector<32x32xf32>, vector<12x32xf32> -> vector<12x32xf32>
    %57 = vector.broadcast %36 : vector<1x32xf32> to vector<12x32xf32>
    %58 = arith.addf %56, %57 : vector<12x32xf32>
    %cst_40 = arith.constant dense<0.000000e+00> : vector<12x32xf32>
    %59 = tpu.matmul %4, %22, %cst_40 {dimension_numbers = #tpu.dot_dimension_numbers<[1], [0], [0], [1], [0, 0, 1, 1], [], []>} : vector<12x32xf32>, vector<32x32xf32>, vector<12x32xf32> -> vector<12x32xf32>
    %60 = vector.broadcast %38 : vector<1x32xf32> to vector<12x32xf32>
    %61 = arith.addf %59, %60 : vector<12x32xf32>
    %cst_41 = arith.constant dense<0.000000e+00> : vector<12x32xf32>
    %62 = tpu.matmul %4, %24, %cst_41 {dimension_numbers = #tpu.dot_dimension_numbers<[1], [0], [0], [1], [0, 0, 1, 1], [], []>} : vector<12x32xf32>, vector<32x32xf32>, vector<12x32xf32> -> vector<12x32xf32>
    %63 = vector.broadcast %40 : vector<1x32xf32> to vector<12x32xf32>
    %64 = arith.addf %62, %63 : vector<12x32xf32>
    %cst_42 = arith.constant dense<0.000000e+00> : vector<12x32xf32>
    %65 = tpu.matmul %6, %18, %cst_42 {dimension_numbers = #tpu.dot_dimension_numbers<[1], [0], [0], [1], [0, 0, 1, 1], [], []>} : vector<12x32xf32>, vector<32x32xf32>, vector<12x32xf32> -> vector<12x32xf32>
    %66 = vector.broadcast %34 : vector<1x32xf32> to vector<12x32xf32>
    %67 = arith.addf %65, %66 : vector<12x32xf32>
    %cst_43 = arith.constant dense<0.000000e+00> : vector<12x32xf32>
    %68 = tpu.matmul %6, %20, %cst_43 {dimension_numbers = #tpu.dot_dimension_numbers<[1], [0], [0], [1], [0, 0, 1, 1], [], []>} : vector<12x32xf32>, vector<32x32xf32>, vector<12x32xf32> -> vector<12x32xf32>
    %69 = vector.broadcast %36 : vector<1x32xf32> to vector<12x32xf32>
    %70 = arith.addf %68, %69 : vector<12x32xf32>
    %cst_44 = arith.constant dense<0.000000e+00> : vector<12x32xf32>
    %71 = tpu.matmul %6, %22, %cst_44 {dimension_numbers = #tpu.dot_dimension_numbers<[1], [0], [0], [1], [0, 0, 1, 1], [], []>} : vector<12x32xf32>, vector<32x32xf32>, vector<12x32xf32> -> vector<12x32xf32>
    %72 = vector.broadcast %38 : vector<1x32xf32> to vector<12x32xf32>
    %73 = arith.addf %71, %72 : vector<12x32xf32>
    %cst_45 = arith.constant dense<0.000000e+00> : vector<12x32xf32>
    %74 = tpu.matmul %6, %24, %cst_45 {dimension_numbers = #tpu.dot_dimension_numbers<[1], [0], [0], [1], [0, 0, 1, 1], [], []>} : vector<12x32xf32>, vector<32x32xf32>, vector<12x32xf32> -> vector<12x32xf32>
    %75 = vector.broadcast %40 : vector<1x32xf32> to vector<12x32xf32>
    %76 = arith.addf %74, %75 : vector<12x32xf32>
    %cst_46 = arith.constant dense<0.000000e+00> : vector<12x32xf32>
    %77 = tpu.matmul %8, %18, %cst_46 {dimension_numbers = #tpu.dot_dimension_numbers<[1], [0], [0], [1], [0, 0, 1, 1], [], []>} : vector<12x32xf32>, vector<32x32xf32>, vector<12x32xf32> -> vector<12x32xf32>
    %78 = vector.broadcast %34 : vector<1x32xf32> to vector<12x32xf32>
    %79 = arith.addf %77, %78 : vector<12x32xf32>
    %cst_47 = arith.constant dense<0.000000e+00> : vector<12x32xf32>
    %80 = tpu.matmul %8, %20, %cst_47 {dimension_numbers = #tpu.dot_dimension_numbers<[1], [0], [0], [1], [0, 0, 1, 1], [], []>} : vector<12x32xf32>, vector<32x32xf32>, vector<12x32xf32> -> vector<12x32xf32>
    %81 = vector.broadcast %36 : vector<1x32xf32> to vector<12x32xf32>
    %82 = arith.addf %80, %81 : vector<12x32xf32>
    %cst_48 = arith.constant dense<0.000000e+00> : vector<12x32xf32>
    %83 = tpu.matmul %8, %22, %cst_48 {dimension_numbers = #tpu.dot_dimension_numbers<[1], [0], [0], [1], [0, 0, 1, 1], [], []>} : vector<12x32xf32>, vector<32x32xf32>, vector<12x32xf32> -> vector<12x32xf32>
    %84 = vector.broadcast %38 : vector<1x32xf32> to vector<12x32xf32>
    %85 = arith.addf %83, %84 : vector<12x32xf32>
    %cst_49 = arith.constant dense<0.000000e+00> : vector<12x32xf32>
    %86 = tpu.matmul %8, %24, %cst_49 {dimension_numbers = #tpu.dot_dimension_numbers<[1], [0], [0], [1], [0, 0, 1, 1], [], []>} : vector<12x32xf32>, vector<32x32xf32>, vector<12x32xf32> -> vector<12x32xf32>
    %87 = vector.broadcast %40 : vector<1x32xf32> to vector<12x32xf32>
    %88 = arith.addf %86, %87 : vector<12x32xf32>
    %cst_50 = arith.constant dense<0.000000e+00> : vector<12x32xf32>
    %89 = tpu.matmul %10, %18, %cst_50 {dimension_numbers = #tpu.dot_dimension_numbers<[1], [0], [0], [1], [0, 0, 1, 1], [], []>} : vector<12x32xf32>, vector<32x32xf32>, vector<12x32xf32> -> vector<12x32xf32>
    %90 = vector.broadcast %34 : vector<1x32xf32> to vector<12x32xf32>
    %91 = arith.addf %89, %90 : vector<12x32xf32>
    %cst_51 = arith.constant dense<0.000000e+00> : vector<12x32xf32>
    %92 = tpu.matmul %10, %20, %cst_51 {dimension_numbers = #tpu.dot_dimension_numbers<[1], [0], [0], [1], [0, 0, 1, 1], [], []>} : vector<12x32xf32>, vector<32x32xf32>, vector<12x32xf32> -> vector<12x32xf32>
    %93 = vector.broadcast %36 : vector<1x32xf32> to vector<12x32xf32>
    %94 = arith.addf %92, %93 : vector<12x32xf32>
    %cst_52 = arith.constant dense<0.000000e+00> : vector<12x32xf32>
    %95 = tpu.matmul %10, %22, %cst_52 {dimension_numbers = #tpu.dot_dimension_numbers<[1], [0], [0], [1], [0, 0, 1, 1], [], []>} : vector<12x32xf32>, vector<32x32xf32>, vector<12x32xf32> -> vector<12x32xf32>
    %96 = vector.broadcast %38 : vector<1x32xf32> to vector<12x32xf32>
    %97 = arith.addf %95, %96 : vector<12x32xf32>
    %cst_53 = arith.constant dense<0.000000e+00> : vector<12x32xf32>
    %98 = tpu.matmul %10, %24, %cst_53 {dimension_numbers = #tpu.dot_dimension_numbers<[1], [0], [0], [1], [0, 0, 1, 1], [], []>} : vector<12x32xf32>, vector<32x32xf32>, vector<12x32xf32> -> vector<12x32xf32>
    %99 = vector.broadcast %40 : vector<1x32xf32> to vector<12x32xf32>
    %100 = arith.addf %98, %99 : vector<12x32xf32>
    %cst_54 = arith.constant dense<0.000000e+00> : vector<12x32xf32>
    %101 = tpu.matmul %12, %18, %cst_54 {dimension_numbers = #tpu.dot_dimension_numbers<[1], [0], [0], [1], [0, 0, 1, 1], [], []>} : vector<12x32xf32>, vector<32x32xf32>, vector<12x32xf32> -> vector<12x32xf32>
    %102 = vector.broadcast %34 : vector<1x32xf32> to vector<12x32xf32>
    %103 = arith.addf %101, %102 : vector<12x32xf32>
    %cst_55 = arith.constant dense<0.000000e+00> : vector<12x32xf32>
    %104 = tpu.matmul %12, %20, %cst_55 {dimension_numbers = #tpu.dot_dimension_numbers<[1], [0], [0], [1], [0, 0, 1, 1], [], []>} : vector<12x32xf32>, vector<32x32xf32>, vector<12x32xf32> -> vector<12x32xf32>
    %105 = vector.broadcast %36 : vector<1x32xf32> to vector<12x32xf32>
    %106 = arith.addf %104, %105 : vector<12x32xf32>
    %cst_56 = arith.constant dense<0.000000e+00> : vector<12x32xf32>
    %107 = tpu.matmul %12, %22, %cst_56 {dimension_numbers = #tpu.dot_dimension_numbers<[1], [0], [0], [1], [0, 0, 1, 1], [], []>} : vector<12x32xf32>, vector<32x32xf32>, vector<12x32xf32> -> vector<12x32xf32>
    %108 = vector.broadcast %38 : vector<1x32xf32> to vector<12x32xf32>
    %109 = arith.addf %107, %108 : vector<12x32xf32>
    %cst_57 = arith.constant dense<0.000000e+00> : vector<12x32xf32>
    %110 = tpu.matmul %12, %24, %cst_57 {dimension_numbers = #tpu.dot_dimension_numbers<[1], [0], [0], [1], [0, 0, 1, 1], [], []>} : vector<12x32xf32>, vector<32x32xf32>, vector<12x32xf32> -> vector<12x32xf32>
    %111 = vector.broadcast %40 : vector<1x32xf32> to vector<12x32xf32>
    %112 = arith.addf %110, %111 : vector<12x32xf32>
    %cst_58 = arith.constant dense<0.000000e+00> : vector<12x32xf32>
    %113 = tpu.matmul %14, %18, %cst_58 {dimension_numbers = #tpu.dot_dimension_numbers<[1], [0], [0], [1], [0, 0, 1, 1], [], []>} : vector<12x32xf32>, vector<32x32xf32>, vector<12x32xf32> -> vector<12x32xf32>
    %114 = vector.broadcast %34 : vector<1x32xf32> to vector<12x32xf32>
    %115 = arith.addf %113, %114 : vector<12x32xf32>
    %cst_59 = arith.constant dense<0.000000e+00> : vector<12x32xf32>
    %116 = tpu.matmul %14, %20, %cst_59 {dimension_numbers = #tpu.dot_dimension_numbers<[1], [0], [0], [1], [0, 0, 1, 1], [], []>} : vector<12x32xf32>, vector<32x32xf32>, vector<12x32xf32> -> vector<12x32xf32>
    %117 = vector.broadcast %36 : vector<1x32xf32> to vector<12x32xf32>
    %118 = arith.addf %116, %117 : vector<12x32xf32>
    %cst_60 = arith.constant dense<0.000000e+00> : vector<12x32xf32>
    %119 = tpu.matmul %14, %22, %cst_60 {dimension_numbers = #tpu.dot_dimension_numbers<[1], [0], [0], [1], [0, 0, 1, 1], [], []>} : vector<12x32xf32>, vector<32x32xf32>, vector<12x32xf32> -> vector<12x32xf32>
    %120 = vector.broadcast %38 : vector<1x32xf32> to vector<12x32xf32>
    %121 = arith.addf %119, %120 : vector<12x32xf32>
    %cst_61 = arith.constant dense<0.000000e+00> : vector<12x32xf32>
    %122 = tpu.matmul %14, %24, %cst_61 {dimension_numbers = #tpu.dot_dimension_numbers<[1], [0], [0], [1], [0, 0, 1, 1], [], []>} : vector<12x32xf32>, vector<32x32xf32>, vector<12x32xf32> -> vector<12x32xf32>
    %123 = vector.broadcast %40 : vector<1x32xf32> to vector<12x32xf32>
    %124 = arith.addf %122, %123 : vector<12x32xf32>
    %cst_62 = arith.constant dense<0.000000e+00> : vector<12x32xf32>
    %125 = tpu.matmul %16, %18, %cst_62 {dimension_numbers = #tpu.dot_dimension_numbers<[1], [0], [0], [1], [0, 0, 1, 1], [], []>} : vector<12x32xf32>, vector<32x32xf32>, vector<12x32xf32> -> vector<12x32xf32>
    %126 = vector.broadcast %34 : vector<1x32xf32> to vector<12x32xf32>
    %127 = arith.addf %125, %126 : vector<12x32xf32>
    %cst_63 = arith.constant dense<0.000000e+00> : vector<12x32xf32>
    %128 = tpu.matmul %16, %20, %cst_63 {dimension_numbers = #tpu.dot_dimension_numbers<[1], [0], [0], [1], [0, 0, 1, 1], [], []>} : vector<12x32xf32>, vector<32x32xf32>, vector<12x32xf32> -> vector<12x32xf32>
    %129 = vector.broadcast %36 : vector<1x32xf32> to vector<12x32xf32>
    %130 = arith.addf %128, %129 : vector<12x32xf32>
    %cst_64 = arith.constant dense<0.000000e+00> : vector<12x32xf32>
    %131 = tpu.matmul %16, %22, %cst_64 {dimension_numbers = #tpu.dot_dimension_numbers<[1], [0], [0], [1], [0, 0, 1, 1], [], []>} : vector<12x32xf32>, vector<32x32xf32>, vector<12x32xf32> -> vector<12x32xf32>
    %132 = vector.broadcast %38 : vector<1x32xf32> to vector<12x32xf32>
    %133 = arith.addf %131, %132 : vector<12x32xf32>
    %cst_65 = arith.constant dense<0.000000e+00> : vector<12x32xf32>
    %134 = tpu.matmul %16, %24, %cst_65 {dimension_numbers = #tpu.dot_dimension_numbers<[1], [0], [0], [1], [0, 0, 1, 1], [], []>} : vector<12x32xf32>, vector<32x32xf32>, vector<12x32xf32> -> vector<12x32xf32>
    %135 = vector.broadcast %40 : vector<1x32xf32> to vector<12x32xf32>
    %136 = arith.addf %134, %135 : vector<12x32xf32>
    %cst_66 = arith.constant 0.000000e+00 : f32
    %137 = vector.broadcast %cst_66 : f32 to vector<12x32xf32>
    %cst_67 = arith.constant 0.000000e+00 : f32
    %138 = vector.broadcast %cst_67 : f32 to vector<12x32xf32>
    %cst_68 = arith.constant dense<0.000000e+00> : vector<12x32xf32>
    %139 = tpu.matmul %137, %26, %cst_68 {dimension_numbers = #tpu.dot_dimension_numbers<[1], [0], [0], [1], [0, 0, 1, 1], [], []>} : vector<12x32xf32>, vector<32x32xf32>, vector<12x32xf32> -> vector<12x32xf32>
    %140 = arith.addf %43, %139 : vector<12x32xf32>
    %141 = arith.negf %140 : vector<12x32xf32>
    %142 = math.exp %141 : vector<12x32xf32>
    %cst_69 = arith.constant 1.000000e+00 : f32
    %143 = vector.broadcast %cst_69 : f32 to vector<12x32xf32>
    %144 = arith.addf %143, %142 : vector<12x32xf32>
    %145 = arith.divf %143, %144 : vector<12x32xf32>
    %cst_70 = arith.constant dense<0.000000e+00> : vector<12x32xf32>
    %146 = tpu.matmul %137, %28, %cst_70 {dimension_numbers = #tpu.dot_dimension_numbers<[1], [0], [0], [1], [0, 0, 1, 1], [], []>} : vector<12x32xf32>, vector<32x32xf32>, vector<12x32xf32> -> vector<12x32xf32>
    %147 = arith.addf %46, %146 : vector<12x32xf32>
    %148 = arith.negf %147 : vector<12x32xf32>
    %149 = math.exp %148 : vector<12x32xf32>
    %cst_71 = arith.constant 1.000000e+00 : f32
    %150 = vector.broadcast %cst_71 : f32 to vector<12x32xf32>
    %151 = arith.addf %150, %149 : vector<12x32xf32>
    %152 = arith.divf %150, %151 : vector<12x32xf32>
    %cst_72 = arith.constant dense<0.000000e+00> : vector<12x32xf32>
    %153 = tpu.matmul %137, %30, %cst_72 {dimension_numbers = #tpu.dot_dimension_numbers<[1], [0], [0], [1], [0, 0, 1, 1], [], []>} : vector<12x32xf32>, vector<32x32xf32>, vector<12x32xf32> -> vector<12x32xf32>
    %154 = arith.addf %49, %153 : vector<12x32xf32>
    %155 = math.tanh %154 : vector<12x32xf32>
    %cst_73 = arith.constant dense<0.000000e+00> : vector<12x32xf32>
    %156 = tpu.matmul %137, %32, %cst_73 {dimension_numbers = #tpu.dot_dimension_numbers<[1], [0], [0], [1], [0, 0, 1, 1], [], []>} : vector<12x32xf32>, vector<32x32xf32>, vector<12x32xf32> -> vector<12x32xf32>
    %157 = arith.addf %52, %156 : vector<12x32xf32>
    %158 = arith.negf %157 : vector<12x32xf32>
    %159 = math.exp %158 : vector<12x32xf32>
    %cst_74 = arith.constant 1.000000e+00 : f32
    %160 = vector.broadcast %cst_74 : f32 to vector<12x32xf32>
    %161 = arith.addf %160, %159 : vector<12x32xf32>
    %162 = arith.divf %160, %161 : vector<12x32xf32>
    %163 = arith.mulf %152, %138 : vector<12x32xf32>
    %164 = arith.mulf %145, %155 : vector<12x32xf32>
    %165 = arith.addf %163, %164 : vector<12x32xf32>
    %166 = math.tanh %165 : vector<12x32xf32>
    %167 = arith.mulf %162, %166 : vector<12x32xf32>
    %cst_75 = arith.constant dense<0.000000e+00> : vector<12x32xf32>
    %168 = tpu.matmul %167, %26, %cst_75 {dimension_numbers = #tpu.dot_dimension_numbers<[1], [0], [0], [1], [0, 0, 1, 1], [], []>} : vector<12x32xf32>, vector<32x32xf32>, vector<12x32xf32> -> vector<12x32xf32>
    %169 = arith.addf %55, %168 : vector<12x32xf32>
    %170 = arith.negf %169 : vector<12x32xf32>
    %171 = math.exp %170 : vector<12x32xf32>
    %cst_76 = arith.constant 1.000000e+00 : f32
    %172 = vector.broadcast %cst_76 : f32 to vector<12x32xf32>
    %173 = arith.addf %172, %171 : vector<12x32xf32>
    %174 = arith.divf %172, %173 : vector<12x32xf32>
    %cst_77 = arith.constant dense<0.000000e+00> : vector<12x32xf32>
    %175 = tpu.matmul %167, %28, %cst_77 {dimension_numbers = #tpu.dot_dimension_numbers<[1], [0], [0], [1], [0, 0, 1, 1], [], []>} : vector<12x32xf32>, vector<32x32xf32>, vector<12x32xf32> -> vector<12x32xf32>
    %176 = arith.addf %58, %175 : vector<12x32xf32>
    %177 = arith.negf %176 : vector<12x32xf32>
    %178 = math.exp %177 : vector<12x32xf32>
    %cst_78 = arith.constant 1.000000e+00 : f32
    %179 = vector.broadcast %cst_78 : f32 to vector<12x32xf32>
    %180 = arith.addf %179, %178 : vector<12x32xf32>
    %181 = arith.divf %179, %180 : vector<12x32xf32>
    %cst_79 = arith.constant dense<0.000000e+00> : vector<12x32xf32>
    %182 = tpu.matmul %167, %30, %cst_79 {dimension_numbers = #tpu.dot_dimension_numbers<[1], [0], [0], [1], [0, 0, 1, 1], [], []>} : vector<12x32xf32>, vector<32x32xf32>, vector<12x32xf32> -> vector<12x32xf32>
    %183 = arith.addf %61, %182 : vector<12x32xf32>
    %184 = math.tanh %183 : vector<12x32xf32>
    %cst_80 = arith.constant dense<0.000000e+00> : vector<12x32xf32>
    %185 = tpu.matmul %167, %32, %cst_80 {dimension_numbers = #tpu.dot_dimension_numbers<[1], [0], [0], [1], [0, 0, 1, 1], [], []>} : vector<12x32xf32>, vector<32x32xf32>, vector<12x32xf32> -> vector<12x32xf32>
    %186 = arith.addf %64, %185 : vector<12x32xf32>
    %187 = arith.negf %186 : vector<12x32xf32>
    %188 = math.exp %187 : vector<12x32xf32>
    %cst_81 = arith.constant 1.000000e+00 : f32
    %189 = vector.broadcast %cst_81 : f32 to vector<12x32xf32>
    %190 = arith.addf %189, %188 : vector<12x32xf32>
    %191 = arith.divf %189, %190 : vector<12x32xf32>
    %192 = arith.mulf %181, %165 : vector<12x32xf32>
    %193 = arith.mulf %174, %184 : vector<12x32xf32>
    %194 = arith.addf %192, %193 : vector<12x32xf32>
    %195 = math.tanh %194 : vector<12x32xf32>
    %196 = arith.mulf %191, %195 : vector<12x32xf32>
    %cst_82 = arith.constant dense<0.000000e+00> : vector<12x32xf32>
    %197 = tpu.matmul %196, %26, %cst_82 {dimension_numbers = #tpu.dot_dimension_numbers<[1], [0], [0], [1], [0, 0, 1, 1], [], []>} : vector<12x32xf32>, vector<32x32xf32>, vector<12x32xf32> -> vector<12x32xf32>
    %198 = arith.addf %67, %197 : vector<12x32xf32>
    %199 = arith.negf %198 : vector<12x32xf32>
    %200 = math.exp %199 : vector<12x32xf32>
    %cst_83 = arith.constant 1.000000e+00 : f32
    %201 = vector.broadcast %cst_83 : f32 to vector<12x32xf32>
    %202 = arith.addf %201, %200 : vector<12x32xf32>
    %203 = arith.divf %201, %202 : vector<12x32xf32>
    %cst_84 = arith.constant dense<0.000000e+00> : vector<12x32xf32>
    %204 = tpu.matmul %196, %28, %cst_84 {dimension_numbers = #tpu.dot_dimension_numbers<[1], [0], [0], [1], [0, 0, 1, 1], [], []>} : vector<12x32xf32>, vector<32x32xf32>, vector<12x32xf32> -> vector<12x32xf32>
    %205 = arith.addf %70, %204 : vector<12x32xf32>
    %206 = arith.negf %205 : vector<12x32xf32>
    %207 = math.exp %206 : vector<12x32xf32>
    %cst_85 = arith.constant 1.000000e+00 : f32
    %208 = vector.broadcast %cst_85 : f32 to vector<12x32xf32>
    %209 = arith.addf %208, %207 : vector<12x32xf32>
    %210 = arith.divf %208, %209 : vector<12x32xf32>
    %cst_86 = arith.constant dense<0.000000e+00> : vector<12x32xf32>
    %211 = tpu.matmul %196, %30, %cst_86 {dimension_numbers = #tpu.dot_dimension_numbers<[1], [0], [0], [1], [0, 0, 1, 1], [], []>} : vector<12x32xf32>, vector<32x32xf32>, vector<12x32xf32> -> vector<12x32xf32>
    %212 = arith.addf %73, %211 : vector<12x32xf32>
    %213 = math.tanh %212 : vector<12x32xf32>
    %cst_87 = arith.constant dense<0.000000e+00> : vector<12x32xf32>
    %214 = tpu.matmul %196, %32, %cst_87 {dimension_numbers = #tpu.dot_dimension_numbers<[1], [0], [0], [1], [0, 0, 1, 1], [], []>} : vector<12x32xf32>, vector<32x32xf32>, vector<12x32xf32> -> vector<12x32xf32>
    %215 = arith.addf %76, %214 : vector<12x32xf32>
    %216 = arith.negf %215 : vector<12x32xf32>
    %217 = math.exp %216 : vector<12x32xf32>
    %cst_88 = arith.constant 1.000000e+00 : f32
    %218 = vector.broadcast %cst_88 : f32 to vector<12x32xf32>
    %219 = arith.addf %218, %217 : vector<12x32xf32>
    %220 = arith.divf %218, %219 : vector<12x32xf32>
    %221 = arith.mulf %210, %194 : vector<12x32xf32>
    %222 = arith.mulf %203, %213 : vector<12x32xf32>
    %223 = arith.addf %221, %222 : vector<12x32xf32>
    %224 = math.tanh %223 : vector<12x32xf32>
    %225 = arith.mulf %220, %224 : vector<12x32xf32>
    %cst_89 = arith.constant dense<0.000000e+00> : vector<12x32xf32>
    %226 = tpu.matmul %225, %26, %cst_89 {dimension_numbers = #tpu.dot_dimension_numbers<[1], [0], [0], [1], [0, 0, 1, 1], [], []>} : vector<12x32xf32>, vector<32x32xf32>, vector<12x32xf32> -> vector<12x32xf32>
    %227 = arith.addf %79, %226 : vector<12x32xf32>
    %228 = arith.negf %227 : vector<12x32xf32>
    %229 = math.exp %228 : vector<12x32xf32>
    %cst_90 = arith.constant 1.000000e+00 : f32
    %230 = vector.broadcast %cst_90 : f32 to vector<12x32xf32>
    %231 = arith.addf %230, %229 : vector<12x32xf32>
    %232 = arith.divf %230, %231 : vector<12x32xf32>
    %cst_91 = arith.constant dense<0.000000e+00> : vector<12x32xf32>
    %233 = tpu.matmul %225, %28, %cst_91 {dimension_numbers = #tpu.dot_dimension_numbers<[1], [0], [0], [1], [0, 0, 1, 1], [], []>} : vector<12x32xf32>, vector<32x32xf32>, vector<12x32xf32> -> vector<12x32xf32>
    %234 = arith.addf %82, %233 : vector<12x32xf32>
    %235 = arith.negf %234 : vector<12x32xf32>
    %236 = math.exp %235 : vector<12x32xf32>
    %cst_92 = arith.constant 1.000000e+00 : f32
    %237 = vector.broadcast %cst_92 : f32 to vector<12x32xf32>
    %238 = arith.addf %237, %236 : vector<12x32xf32>
    %239 = arith.divf %237, %238 : vector<12x32xf32>
    %cst_93 = arith.constant dense<0.000000e+00> : vector<12x32xf32>
    %240 = tpu.matmul %225, %30, %cst_93 {dimension_numbers = #tpu.dot_dimension_numbers<[1], [0], [0], [1], [0, 0, 1, 1], [], []>} : vector<12x32xf32>, vector<32x32xf32>, vector<12x32xf32> -> vector<12x32xf32>
    %241 = arith.addf %85, %240 : vector<12x32xf32>
    %242 = math.tanh %241 : vector<12x32xf32>
    %cst_94 = arith.constant dense<0.000000e+00> : vector<12x32xf32>
    %243 = tpu.matmul %225, %32, %cst_94 {dimension_numbers = #tpu.dot_dimension_numbers<[1], [0], [0], [1], [0, 0, 1, 1], [], []>} : vector<12x32xf32>, vector<32x32xf32>, vector<12x32xf32> -> vector<12x32xf32>
    %244 = arith.addf %88, %243 : vector<12x32xf32>
    %245 = arith.negf %244 : vector<12x32xf32>
    %246 = math.exp %245 : vector<12x32xf32>
    %cst_95 = arith.constant 1.000000e+00 : f32
    %247 = vector.broadcast %cst_95 : f32 to vector<12x32xf32>
    %248 = arith.addf %247, %246 : vector<12x32xf32>
    %249 = arith.divf %247, %248 : vector<12x32xf32>
    %250 = arith.mulf %239, %223 : vector<12x32xf32>
    %251 = arith.mulf %232, %242 : vector<12x32xf32>
    %252 = arith.addf %250, %251 : vector<12x32xf32>
    %253 = math.tanh %252 : vector<12x32xf32>
    %254 = arith.mulf %249, %253 : vector<12x32xf32>
    %cst_96 = arith.constant dense<0.000000e+00> : vector<12x32xf32>
    %255 = tpu.matmul %254, %26, %cst_96 {dimension_numbers = #tpu.dot_dimension_numbers<[1], [0], [0], [1], [0, 0, 1, 1], [], []>} : vector<12x32xf32>, vector<32x32xf32>, vector<12x32xf32> -> vector<12x32xf32>
    %256 = arith.addf %91, %255 : vector<12x32xf32>
    %257 = arith.negf %256 : vector<12x32xf32>
    %258 = math.exp %257 : vector<12x32xf32>
    %cst_97 = arith.constant 1.000000e+00 : f32
    %259 = vector.broadcast %cst_97 : f32 to vector<12x32xf32>
    %260 = arith.addf %259, %258 : vector<12x32xf32>
    %261 = arith.divf %259, %260 : vector<12x32xf32>
    %cst_98 = arith.constant dense<0.000000e+00> : vector<12x32xf32>
    %262 = tpu.matmul %254, %28, %cst_98 {dimension_numbers = #tpu.dot_dimension_numbers<[1], [0], [0], [1], [0, 0, 1, 1], [], []>} : vector<12x32xf32>, vector<32x32xf32>, vector<12x32xf32> -> vector<12x32xf32>
    %263 = arith.addf %94, %262 : vector<12x32xf32>
    %264 = arith.negf %263 : vector<12x32xf32>
    %265 = math.exp %264 : vector<12x32xf32>
    %cst_99 = arith.constant 1.000000e+00 : f32
    %266 = vector.broadcast %cst_99 : f32 to vector<12x32xf32>
    %267 = arith.addf %266, %265 : vector<12x32xf32>
    %268 = arith.divf %266, %267 : vector<12x32xf32>
    %cst_100 = arith.constant dense<0.000000e+00> : vector<12x32xf32>
    %269 = tpu.matmul %254, %30, %cst_100 {dimension_numbers = #tpu.dot_dimension_numbers<[1], [0], [0], [1], [0, 0, 1, 1], [], []>} : vector<12x32xf32>, vector<32x32xf32>, vector<12x32xf32> -> vector<12x32xf32>
    %270 = arith.addf %97, %269 : vector<12x32xf32>
    %271 = math.tanh %270 : vector<12x32xf32>
    %cst_101 = arith.constant dense<0.000000e+00> : vector<12x32xf32>
    %272 = tpu.matmul %254, %32, %cst_101 {dimension_numbers = #tpu.dot_dimension_numbers<[1], [0], [0], [1], [0, 0, 1, 1], [], []>} : vector<12x32xf32>, vector<32x32xf32>, vector<12x32xf32> -> vector<12x32xf32>
    %273 = arith.addf %100, %272 : vector<12x32xf32>
    %274 = arith.negf %273 : vector<12x32xf32>
    %275 = math.exp %274 : vector<12x32xf32>
    %cst_102 = arith.constant 1.000000e+00 : f32
    %276 = vector.broadcast %cst_102 : f32 to vector<12x32xf32>
    %277 = arith.addf %276, %275 : vector<12x32xf32>
    %278 = arith.divf %276, %277 : vector<12x32xf32>
    %279 = arith.mulf %268, %252 : vector<12x32xf32>
    %280 = arith.mulf %261, %271 : vector<12x32xf32>
    %281 = arith.addf %279, %280 : vector<12x32xf32>
    %282 = math.tanh %281 : vector<12x32xf32>
    %283 = arith.mulf %278, %282 : vector<12x32xf32>
    %cst_103 = arith.constant dense<0.000000e+00> : vector<12x32xf32>
    %284 = tpu.matmul %283, %26, %cst_103 {dimension_numbers = #tpu.dot_dimension_numbers<[1], [0], [0], [1], [0, 0, 1, 1], [], []>} : vector<12x32xf32>, vector<32x32xf32>, vector<12x32xf32> -> vector<12x32xf32>
    %285 = arith.addf %103, %284 : vector<12x32xf32>
    %286 = arith.negf %285 : vector<12x32xf32>
    %287 = math.exp %286 : vector<12x32xf32>
    %cst_104 = arith.constant 1.000000e+00 : f32
    %288 = vector.broadcast %cst_104 : f32 to vector<12x32xf32>
    %289 = arith.addf %288, %287 : vector<12x32xf32>
    %290 = arith.divf %288, %289 : vector<12x32xf32>
    %cst_105 = arith.constant dense<0.000000e+00> : vector<12x32xf32>
    %291 = tpu.matmul %283, %28, %cst_105 {dimension_numbers = #tpu.dot_dimension_numbers<[1], [0], [0], [1], [0, 0, 1, 1], [], []>} : vector<12x32xf32>, vector<32x32xf32>, vector<12x32xf32> -> vector<12x32xf32>
    %292 = arith.addf %106, %291 : vector<12x32xf32>
    %293 = arith.negf %292 : vector<12x32xf32>
    %294 = math.exp %293 : vector<12x32xf32>
    %cst_106 = arith.constant 1.000000e+00 : f32
    %295 = vector.broadcast %cst_106 : f32 to vector<12x32xf32>
    %296 = arith.addf %295, %294 : vector<12x32xf32>
    %297 = arith.divf %295, %296 : vector<12x32xf32>
    %cst_107 = arith.constant dense<0.000000e+00> : vector<12x32xf32>
    %298 = tpu.matmul %283, %30, %cst_107 {dimension_numbers = #tpu.dot_dimension_numbers<[1], [0], [0], [1], [0, 0, 1, 1], [], []>} : vector<12x32xf32>, vector<32x32xf32>, vector<12x32xf32> -> vector<12x32xf32>
    %299 = arith.addf %109, %298 : vector<12x32xf32>
    %300 = math.tanh %299 : vector<12x32xf32>
    %cst_108 = arith.constant dense<0.000000e+00> : vector<12x32xf32>
    %301 = tpu.matmul %283, %32, %cst_108 {dimension_numbers = #tpu.dot_dimension_numbers<[1], [0], [0], [1], [0, 0, 1, 1], [], []>} : vector<12x32xf32>, vector<32x32xf32>, vector<12x32xf32> -> vector<12x32xf32>
    %302 = arith.addf %112, %301 : vector<12x32xf32>
    %303 = arith.negf %302 : vector<12x32xf32>
    %304 = math.exp %303 : vector<12x32xf32>
    %cst_109 = arith.constant 1.000000e+00 : f32
    %305 = vector.broadcast %cst_109 : f32 to vector<12x32xf32>
    %306 = arith.addf %305, %304 : vector<12x32xf32>
    %307 = arith.divf %305, %306 : vector<12x32xf32>
    %308 = arith.mulf %297, %281 : vector<12x32xf32>
    %309 = arith.mulf %290, %300 : vector<12x32xf32>
    %310 = arith.addf %308, %309 : vector<12x32xf32>
    %311 = math.tanh %310 : vector<12x32xf32>
    %312 = arith.mulf %307, %311 : vector<12x32xf32>
    %cst_110 = arith.constant dense<0.000000e+00> : vector<12x32xf32>
    %313 = tpu.matmul %312, %26, %cst_110 {dimension_numbers = #tpu.dot_dimension_numbers<[1], [0], [0], [1], [0, 0, 1, 1], [], []>} : vector<12x32xf32>, vector<32x32xf32>, vector<12x32xf32> -> vector<12x32xf32>
    %314 = arith.addf %115, %313 : vector<12x32xf32>
    %315 = arith.negf %314 : vector<12x32xf32>
    %316 = math.exp %315 : vector<12x32xf32>
    %cst_111 = arith.constant 1.000000e+00 : f32
    %317 = vector.broadcast %cst_111 : f32 to vector<12x32xf32>
    %318 = arith.addf %317, %316 : vector<12x32xf32>
    %319 = arith.divf %317, %318 : vector<12x32xf32>
    %cst_112 = arith.constant dense<0.000000e+00> : vector<12x32xf32>
    %320 = tpu.matmul %312, %28, %cst_112 {dimension_numbers = #tpu.dot_dimension_numbers<[1], [0], [0], [1], [0, 0, 1, 1], [], []>} : vector<12x32xf32>, vector<32x32xf32>, vector<12x32xf32> -> vector<12x32xf32>
    %321 = arith.addf %118, %320 : vector<12x32xf32>
    %322 = arith.negf %321 : vector<12x32xf32>
    %323 = math.exp %322 : vector<12x32xf32>
    %cst_113 = arith.constant 1.000000e+00 : f32
    %324 = vector.broadcast %cst_113 : f32 to vector<12x32xf32>
    %325 = arith.addf %324, %323 : vector<12x32xf32>
    %326 = arith.divf %324, %325 : vector<12x32xf32>
    %cst_114 = arith.constant dense<0.000000e+00> : vector<12x32xf32>
    %327 = tpu.matmul %312, %30, %cst_114 {dimension_numbers = #tpu.dot_dimension_numbers<[1], [0], [0], [1], [0, 0, 1, 1], [], []>} : vector<12x32xf32>, vector<32x32xf32>, vector<12x32xf32> -> vector<12x32xf32>
    %328 = arith.addf %121, %327 : vector<12x32xf32>
    %329 = math.tanh %328 : vector<12x32xf32>
    %cst_115 = arith.constant dense<0.000000e+00> : vector<12x32xf32>
    %330 = tpu.matmul %312, %32, %cst_115 {dimension_numbers = #tpu.dot_dimension_numbers<[1], [0], [0], [1], [0, 0, 1, 1], [], []>} : vector<12x32xf32>, vector<32x32xf32>, vector<12x32xf32> -> vector<12x32xf32>
    %331 = arith.addf %124, %330 : vector<12x32xf32>
    %332 = arith.negf %331 : vector<12x32xf32>
    %333 = math.exp %332 : vector<12x32xf32>
    %cst_116 = arith.constant 1.000000e+00 : f32
    %334 = vector.broadcast %cst_116 : f32 to vector<12x32xf32>
    %335 = arith.addf %334, %333 : vector<12x32xf32>
    %336 = arith.divf %334, %335 : vector<12x32xf32>
    %337 = arith.mulf %326, %310 : vector<12x32xf32>
    %338 = arith.mulf %319, %329 : vector<12x32xf32>
    %339 = arith.addf %337, %338 : vector<12x32xf32>
    %340 = math.tanh %339 : vector<12x32xf32>
    %341 = arith.mulf %336, %340 : vector<12x32xf32>
    %cst_117 = arith.constant dense<0.000000e+00> : vector<12x32xf32>
    %342 = tpu.matmul %341, %26, %cst_117 {dimension_numbers = #tpu.dot_dimension_numbers<[1], [0], [0], [1], [0, 0, 1, 1], [], []>} : vector<12x32xf32>, vector<32x32xf32>, vector<12x32xf32> -> vector<12x32xf32>
    %343 = arith.addf %127, %342 : vector<12x32xf32>
    %344 = arith.negf %343 : vector<12x32xf32>
    %345 = math.exp %344 : vector<12x32xf32>
    %cst_118 = arith.constant 1.000000e+00 : f32
    %346 = vector.broadcast %cst_118 : f32 to vector<12x32xf32>
    %347 = arith.addf %346, %345 : vector<12x32xf32>
    %348 = arith.divf %346, %347 : vector<12x32xf32>
    %cst_119 = arith.constant dense<0.000000e+00> : vector<12x32xf32>
    %349 = tpu.matmul %341, %28, %cst_119 {dimension_numbers = #tpu.dot_dimension_numbers<[1], [0], [0], [1], [0, 0, 1, 1], [], []>} : vector<12x32xf32>, vector<32x32xf32>, vector<12x32xf32> -> vector<12x32xf32>
    %350 = arith.addf %130, %349 : vector<12x32xf32>
    %351 = arith.negf %350 : vector<12x32xf32>
    %352 = math.exp %351 : vector<12x32xf32>
    %cst_120 = arith.constant 1.000000e+00 : f32
    %353 = vector.broadcast %cst_120 : f32 to vector<12x32xf32>
    %354 = arith.addf %353, %352 : vector<12x32xf32>
    %355 = arith.divf %353, %354 : vector<12x32xf32>
    %cst_121 = arith.constant dense<0.000000e+00> : vector<12x32xf32>
    %356 = tpu.matmul %341, %30, %cst_121 {dimension_numbers = #tpu.dot_dimension_numbers<[1], [0], [0], [1], [0, 0, 1, 1], [], []>} : vector<12x32xf32>, vector<32x32xf32>, vector<12x32xf32> -> vector<12x32xf32>
    %357 = arith.addf %133, %356 : vector<12x32xf32>
    %358 = math.tanh %357 : vector<12x32xf32>
    %cst_122 = arith.constant dense<0.000000e+00> : vector<12x32xf32>
    %359 = tpu.matmul %341, %32, %cst_122 {dimension_numbers = #tpu.dot_dimension_numbers<[1], [0], [0], [1], [0, 0, 1, 1], [], []>} : vector<12x32xf32>, vector<32x32xf32>, vector<12x32xf32> -> vector<12x32xf32>
    %360 = arith.addf %136, %359 : vector<12x32xf32>
    %361 = arith.negf %360 : vector<12x32xf32>
    %362 = math.exp %361 : vector<12x32xf32>
    %cst_123 = arith.constant 1.000000e+00 : f32
    %363 = vector.broadcast %cst_123 : f32 to vector<12x32xf32>
    %364 = arith.addf %363, %362 : vector<12x32xf32>
    %365 = arith.divf %363, %364 : vector<12x32xf32>
    %366 = arith.mulf %355, %339 : vector<12x32xf32>
    %367 = arith.mulf %348, %358 : vector<12x32xf32>
    %368 = arith.addf %366, %367 : vector<12x32xf32>
    %369 = math.tanh %368 : vector<12x32xf32>
    %370 = arith.mulf %365, %369 : vector<12x32xf32>
    %371 = vector.extract_strided_slice %370 {offsets = [0, 0], sizes = [1, 32], strides = [1, 1]} : vector<12x32xf32> to vector<1x32xf32>
    %372 = vector.extract_strided_slice %370 {offsets = [3, 0], sizes = [1, 32], strides = [1, 1]} : vector<12x32xf32> to vector<1x32xf32>
    %373 = vector.extract_strided_slice %370 {offsets = [6, 0], sizes = [1, 32], strides = [1, 1]} : vector<12x32xf32> to vector<1x32xf32>
    %374 = vector.extract_strided_slice %370 {offsets = [9, 0], sizes = [1, 32], strides = [1, 1]} : vector<12x32xf32> to vector<1x32xf32>
    %375 = tpu.concatenate %371, %372, %373, %374 in 0 : vector<1x32xf32>, vector<1x32xf32>, vector<1x32xf32>, vector<1x32xf32> -> vector<4x32xf32>
    %376 = vector.extract_strided_slice %370 {offsets = [1, 0], sizes = [1, 32], strides = [1, 1]} : vector<12x32xf32> to vector<1x32xf32>
    %377 = vector.extract_strided_slice %370 {offsets = [4, 0], sizes = [1, 32], strides = [1, 1]} : vector<12x32xf32> to vector<1x32xf32>
    %378 = vector.extract_strided_slice %370 {offsets = [7, 0], sizes = [1, 32], strides = [1, 1]} : vector<12x32xf32> to vector<1x32xf32>
    %379 = vector.extract_strided_slice %370 {offsets = [10, 0], sizes = [1, 32], strides = [1, 1]} : vector<12x32xf32> to vector<1x32xf32>
    %380 = tpu.concatenate %376, %377, %378, %379 in 0 : vector<1x32xf32>, vector<1x32xf32>, vector<1x32xf32>, vector<1x32xf32> -> vector<4x32xf32>
    %381 = vector.extract_strided_slice %370 {offsets = [2, 0], sizes = [1, 32], strides = [1, 1]} : vector<12x32xf32> to vector<1x32xf32>
    %382 = vector.extract_strided_slice %370 {offsets = [5, 0], sizes = [1, 32], strides = [1, 1]} : vector<12x32xf32> to vector<1x32xf32>
    %383 = vector.extract_strided_slice %370 {offsets = [8, 0], sizes = [1, 32], strides = [1, 1]} : vector<12x32xf32> to vector<1x32xf32>
    %384 = vector.extract_strided_slice %370 {offsets = [11, 0], sizes = [1, 32], strides = [1, 1]} : vector<12x32xf32> to vector<1x32xf32>
    %385 = tpu.concatenate %381, %382, %383, %384 in 0 : vector<1x32xf32>, vector<1x32xf32>, vector<1x32xf32>, vector<1x32xf32> -> vector<4x32xf32>
    %c0_124 = arith.constant 0 : index
    %c0_125 = arith.constant 0 : index
    %c0_126 = arith.constant 0 : index
    %386 = vector.load %arg5[%c0_124, %c0_125, %c0_126] : memref<4x32x32xf32, #tpu.memory_space<vmem>>, vector<1x32x32xf32>
    %387 = vector.shape_cast %386 : vector<1x32x32xf32> to vector<32x32xf32>
    %c1_127 = arith.constant 1 : index
    %c0_128 = arith.constant 0 : index
    %c0_129 = arith.constant 0 : index
    %388 = vector.load %arg5[%c1_127, %c0_128, %c0_129] : memref<4x32x32xf32, #tpu.memory_space<vmem>>, vector<1x32x32xf32>
    %389 = vector.shape_cast %388 : vector<1x32x32xf32> to vector<32x32xf32>
    %c2_130 = arith.constant 2 : index
    %c0_131 = arith.constant 0 : index
    %c0_132 = arith.constant 0 : index
    %390 = vector.load %arg5[%c2_130, %c0_131, %c0_132] : memref<4x32x32xf32, #tpu.memory_space<vmem>>, vector<1x32x32xf32>
    %391 = vector.shape_cast %390 : vector<1x32x32xf32> to vector<32x32xf32>
    %c3_133 = arith.constant 3 : index
    %c0_134 = arith.constant 0 : index
    %c0_135 = arith.constant 0 : index
    %392 = vector.load %arg5[%c3_133, %c0_134, %c0_135] : memref<4x32x32xf32, #tpu.memory_space<vmem>>, vector<1x32x32xf32>
    %393 = vector.shape_cast %392 : vector<1x32x32xf32> to vector<32x32xf32>
    %c0_136 = arith.constant 0 : index
    %c0_137 = arith.constant 0 : index
    %c0_138 = arith.constant 0 : index
    %394 = vector.load %arg6[%c0_136, %c0_137, %c0_138] : memref<4x32x32xf32, #tpu.memory_space<vmem>>, vector<1x32x32xf32>
    %395 = vector.shape_cast %394 : vector<1x32x32xf32> to vector<32x32xf32>
    %c1_139 = arith.constant 1 : index
    %c0_140 = arith.constant 0 : index
    %c0_141 = arith.constant 0 : index
    %396 = vector.load %arg6[%c1_139, %c0_140, %c0_141] : memref<4x32x32xf32, #tpu.memory_space<vmem>>, vector<1x32x32xf32>
    %397 = vector.shape_cast %396 : vector<1x32x32xf32> to vector<32x32xf32>
    %c2_142 = arith.constant 2 : index
    %c0_143 = arith.constant 0 : index
    %c0_144 = arith.constant 0 : index
    %398 = vector.load %arg6[%c2_142, %c0_143, %c0_144] : memref<4x32x32xf32, #tpu.memory_space<vmem>>, vector<1x32x32xf32>
    %399 = vector.shape_cast %398 : vector<1x32x32xf32> to vector<32x32xf32>
    %c3_145 = arith.constant 3 : index
    %c0_146 = arith.constant 0 : index
    %c0_147 = arith.constant 0 : index
    %400 = vector.load %arg6[%c3_145, %c0_146, %c0_147] : memref<4x32x32xf32, #tpu.memory_space<vmem>>, vector<1x32x32xf32>
    %401 = vector.shape_cast %400 : vector<1x32x32xf32> to vector<32x32xf32>
    %c0_148 = arith.constant 0 : index
    %c0_149 = arith.constant 0 : index
    %c0_150 = arith.constant 0 : index
    %402 = vector.load %arg7[%c0_148, %c0_149, %c0_150] : memref<4x1x32xf32, #tpu.memory_space<vmem>>, vector<1x1x32xf32>
    %403 = vector.shape_cast %402 : vector<1x1x32xf32> to vector<1x32xf32>
    %c1_151 = arith.constant 1 : index
    %c0_152 = arith.constant 0 : index
    %c0_153 = arith.constant 0 : index
    %404 = vector.load %arg7[%c1_151, %c0_152, %c0_153] : memref<4x1x32xf32, #tpu.memory_space<vmem>>, vector<1x1x32xf32>
    %405 = vector.shape_cast %404 : vector<1x1x32xf32> to vector<1x32xf32>
    %c2_154 = arith.constant 2 : index
    %c0_155 = arith.constant 0 : index
    %c0_156 = arith.constant 0 : index
    %406 = vector.load %arg7[%c2_154, %c0_155, %c0_156] : memref<4x1x32xf32, #tpu.memory_space<vmem>>, vector<1x1x32xf32>
    %407 = vector.shape_cast %406 : vector<1x1x32xf32> to vector<1x32xf32>
    %c3_157 = arith.constant 3 : index
    %c0_158 = arith.constant 0 : index
    %c0_159 = arith.constant 0 : index
    %408 = vector.load %arg7[%c3_157, %c0_158, %c0_159] : memref<4x1x32xf32, #tpu.memory_space<vmem>>, vector<1x1x32xf32>
    %409 = vector.shape_cast %408 : vector<1x1x32xf32> to vector<1x32xf32>
    %cst_160 = arith.constant dense<0.000000e+00> : vector<4x32xf32>
    %410 = tpu.matmul %375, %387, %cst_160 {dimension_numbers = #tpu.dot_dimension_numbers<[1], [0], [0], [1], [0, 0, 1, 1], [], []>} : vector<4x32xf32>, vector<32x32xf32>, vector<4x32xf32> -> vector<4x32xf32>
    %411 = vector.broadcast %403 : vector<1x32xf32> to vector<4x32xf32>
    %412 = arith.addf %410, %411 : vector<4x32xf32>
    %cst_161 = arith.constant dense<0.000000e+00> : vector<4x32xf32>
    %413 = tpu.matmul %375, %389, %cst_161 {dimension_numbers = #tpu.dot_dimension_numbers<[1], [0], [0], [1], [0, 0, 1, 1], [], []>} : vector<4x32xf32>, vector<32x32xf32>, vector<4x32xf32> -> vector<4x32xf32>
    %414 = vector.broadcast %405 : vector<1x32xf32> to vector<4x32xf32>
    %415 = arith.addf %413, %414 : vector<4x32xf32>
    %cst_162 = arith.constant dense<0.000000e+00> : vector<4x32xf32>
    %416 = tpu.matmul %375, %391, %cst_162 {dimension_numbers = #tpu.dot_dimension_numbers<[1], [0], [0], [1], [0, 0, 1, 1], [], []>} : vector<4x32xf32>, vector<32x32xf32>, vector<4x32xf32> -> vector<4x32xf32>
    %417 = vector.broadcast %407 : vector<1x32xf32> to vector<4x32xf32>
    %418 = arith.addf %416, %417 : vector<4x32xf32>
    %cst_163 = arith.constant dense<0.000000e+00> : vector<4x32xf32>
    %419 = tpu.matmul %375, %393, %cst_163 {dimension_numbers = #tpu.dot_dimension_numbers<[1], [0], [0], [1], [0, 0, 1, 1], [], []>} : vector<4x32xf32>, vector<32x32xf32>, vector<4x32xf32> -> vector<4x32xf32>
    %420 = vector.broadcast %409 : vector<1x32xf32> to vector<4x32xf32>
    %421 = arith.addf %419, %420 : vector<4x32xf32>
    %cst_164 = arith.constant dense<0.000000e+00> : vector<4x32xf32>
    %422 = tpu.matmul %380, %387, %cst_164 {dimension_numbers = #tpu.dot_dimension_numbers<[1], [0], [0], [1], [0, 0, 1, 1], [], []>} : vector<4x32xf32>, vector<32x32xf32>, vector<4x32xf32> -> vector<4x32xf32>
    %423 = vector.broadcast %403 : vector<1x32xf32> to vector<4x32xf32>
    %424 = arith.addf %422, %423 : vector<4x32xf32>
    %cst_165 = arith.constant dense<0.000000e+00> : vector<4x32xf32>
    %425 = tpu.matmul %380, %389, %cst_165 {dimension_numbers = #tpu.dot_dimension_numbers<[1], [0], [0], [1], [0, 0, 1, 1], [], []>} : vector<4x32xf32>, vector<32x32xf32>, vector<4x32xf32> -> vector<4x32xf32>
    %426 = vector.broadcast %405 : vector<1x32xf32> to vector<4x32xf32>
    %427 = arith.addf %425, %426 : vector<4x32xf32>
    %cst_166 = arith.constant dense<0.000000e+00> : vector<4x32xf32>
    %428 = tpu.matmul %380, %391, %cst_166 {dimension_numbers = #tpu.dot_dimension_numbers<[1], [0], [0], [1], [0, 0, 1, 1], [], []>} : vector<4x32xf32>, vector<32x32xf32>, vector<4x32xf32> -> vector<4x32xf32>
    %429 = vector.broadcast %407 : vector<1x32xf32> to vector<4x32xf32>
    %430 = arith.addf %428, %429 : vector<4x32xf32>
    %cst_167 = arith.constant dense<0.000000e+00> : vector<4x32xf32>
    %431 = tpu.matmul %380, %393, %cst_167 {dimension_numbers = #tpu.dot_dimension_numbers<[1], [0], [0], [1], [0, 0, 1, 1], [], []>} : vector<4x32xf32>, vector<32x32xf32>, vector<4x32xf32> -> vector<4x32xf32>
    %432 = vector.broadcast %409 : vector<1x32xf32> to vector<4x32xf32>
    %433 = arith.addf %431, %432 : vector<4x32xf32>
    %cst_168 = arith.constant dense<0.000000e+00> : vector<4x32xf32>
    %434 = tpu.matmul %385, %387, %cst_168 {dimension_numbers = #tpu.dot_dimension_numbers<[1], [0], [0], [1], [0, 0, 1, 1], [], []>} : vector<4x32xf32>, vector<32x32xf32>, vector<4x32xf32> -> vector<4x32xf32>
    %435 = vector.broadcast %403 : vector<1x32xf32> to vector<4x32xf32>
    %436 = arith.addf %434, %435 : vector<4x32xf32>
    %cst_169 = arith.constant dense<0.000000e+00> : vector<4x32xf32>
    %437 = tpu.matmul %385, %389, %cst_169 {dimension_numbers = #tpu.dot_dimension_numbers<[1], [0], [0], [1], [0, 0, 1, 1], [], []>} : vector<4x32xf32>, vector<32x32xf32>, vector<4x32xf32> -> vector<4x32xf32>
    %438 = vector.broadcast %405 : vector<1x32xf32> to vector<4x32xf32>
    %439 = arith.addf %437, %438 : vector<4x32xf32>
    %cst_170 = arith.constant dense<0.000000e+00> : vector<4x32xf32>
    %440 = tpu.matmul %385, %391, %cst_170 {dimension_numbers = #tpu.dot_dimension_numbers<[1], [0], [0], [1], [0, 0, 1, 1], [], []>} : vector<4x32xf32>, vector<32x32xf32>, vector<4x32xf32> -> vector<4x32xf32>
    %441 = vector.broadcast %407 : vector<1x32xf32> to vector<4x32xf32>
    %442 = arith.addf %440, %441 : vector<4x32xf32>
    %cst_171 = arith.constant dense<0.000000e+00> : vector<4x32xf32>
    %443 = tpu.matmul %385, %393, %cst_171 {dimension_numbers = #tpu.dot_dimension_numbers<[1], [0], [0], [1], [0, 0, 1, 1], [], []>} : vector<4x32xf32>, vector<32x32xf32>, vector<4x32xf32> -> vector<4x32xf32>
    %444 = vector.broadcast %409 : vector<1x32xf32> to vector<4x32xf32>
    %445 = arith.addf %443, %444 : vector<4x32xf32>
    %cst_172 = arith.constant 0.000000e+00 : f32
    %446 = vector.broadcast %cst_172 : f32 to vector<4x32xf32>
    %cst_173 = arith.constant 0.000000e+00 : f32
    %447 = vector.broadcast %cst_173 : f32 to vector<4x32xf32>
    %cst_174 = arith.constant dense<0.000000e+00> : vector<4x32xf32>
    %448 = tpu.matmul %446, %395, %cst_174 {dimension_numbers = #tpu.dot_dimension_numbers<[1], [0], [0], [1], [0, 0, 1, 1], [], []>} : vector<4x32xf32>, vector<32x32xf32>, vector<4x32xf32> -> vector<4x32xf32>
    %449 = arith.addf %412, %448 : vector<4x32xf32>
    %450 = arith.negf %449 : vector<4x32xf32>
    %451 = math.exp %450 : vector<4x32xf32>
    %cst_175 = arith.constant 1.000000e+00 : f32
    %452 = vector.broadcast %cst_175 : f32 to vector<4x32xf32>
    %453 = arith.addf %452, %451 : vector<4x32xf32>
    %454 = arith.divf %452, %453 : vector<4x32xf32>
    %cst_176 = arith.constant dense<0.000000e+00> : vector<4x32xf32>
    %455 = tpu.matmul %446, %397, %cst_176 {dimension_numbers = #tpu.dot_dimension_numbers<[1], [0], [0], [1], [0, 0, 1, 1], [], []>} : vector<4x32xf32>, vector<32x32xf32>, vector<4x32xf32> -> vector<4x32xf32>
    %456 = arith.addf %415, %455 : vector<4x32xf32>
    %457 = arith.negf %456 : vector<4x32xf32>
    %458 = math.exp %457 : vector<4x32xf32>
    %cst_177 = arith.constant 1.000000e+00 : f32
    %459 = vector.broadcast %cst_177 : f32 to vector<4x32xf32>
    %460 = arith.addf %459, %458 : vector<4x32xf32>
    %461 = arith.divf %459, %460 : vector<4x32xf32>
    %cst_178 = arith.constant dense<0.000000e+00> : vector<4x32xf32>
    %462 = tpu.matmul %446, %399, %cst_178 {dimension_numbers = #tpu.dot_dimension_numbers<[1], [0], [0], [1], [0, 0, 1, 1], [], []>} : vector<4x32xf32>, vector<32x32xf32>, vector<4x32xf32> -> vector<4x32xf32>
    %463 = arith.addf %418, %462 : vector<4x32xf32>
    %464 = math.tanh %463 : vector<4x32xf32>
    %cst_179 = arith.constant dense<0.000000e+00> : vector<4x32xf32>
    %465 = tpu.matmul %446, %401, %cst_179 {dimension_numbers = #tpu.dot_dimension_numbers<[1], [0], [0], [1], [0, 0, 1, 1], [], []>} : vector<4x32xf32>, vector<32x32xf32>, vector<4x32xf32> -> vector<4x32xf32>
    %466 = arith.addf %421, %465 : vector<4x32xf32>
    %467 = arith.negf %466 : vector<4x32xf32>
    %468 = math.exp %467 : vector<4x32xf32>
    %cst_180 = arith.constant 1.000000e+00 : f32
    %469 = vector.broadcast %cst_180 : f32 to vector<4x32xf32>
    %470 = arith.addf %469, %468 : vector<4x32xf32>
    %471 = arith.divf %469, %470 : vector<4x32xf32>
    %472 = arith.mulf %461, %447 : vector<4x32xf32>
    %473 = arith.mulf %454, %464 : vector<4x32xf32>
    %474 = arith.addf %472, %473 : vector<4x32xf32>
    %475 = math.tanh %474 : vector<4x32xf32>
    %476 = arith.mulf %471, %475 : vector<4x32xf32>
    %cst_181 = arith.constant dense<0.000000e+00> : vector<4x32xf32>
    %477 = tpu.matmul %476, %395, %cst_181 {dimension_numbers = #tpu.dot_dimension_numbers<[1], [0], [0], [1], [0, 0, 1, 1], [], []>} : vector<4x32xf32>, vector<32x32xf32>, vector<4x32xf32> -> vector<4x32xf32>
    %478 = arith.addf %424, %477 : vector<4x32xf32>
    %479 = arith.negf %478 : vector<4x32xf32>
    %480 = math.exp %479 : vector<4x32xf32>
    %cst_182 = arith.constant 1.000000e+00 : f32
    %481 = vector.broadcast %cst_182 : f32 to vector<4x32xf32>
    %482 = arith.addf %481, %480 : vector<4x32xf32>
    %483 = arith.divf %481, %482 : vector<4x32xf32>
    %cst_183 = arith.constant dense<0.000000e+00> : vector<4x32xf32>
    %484 = tpu.matmul %476, %397, %cst_183 {dimension_numbers = #tpu.dot_dimension_numbers<[1], [0], [0], [1], [0, 0, 1, 1], [], []>} : vector<4x32xf32>, vector<32x32xf32>, vector<4x32xf32> -> vector<4x32xf32>
    %485 = arith.addf %427, %484 : vector<4x32xf32>
    %486 = arith.negf %485 : vector<4x32xf32>
    %487 = math.exp %486 : vector<4x32xf32>
    %cst_184 = arith.constant 1.000000e+00 : f32
    %488 = vector.broadcast %cst_184 : f32 to vector<4x32xf32>
    %489 = arith.addf %488, %487 : vector<4x32xf32>
    %490 = arith.divf %488, %489 : vector<4x32xf32>
    %cst_185 = arith.constant dense<0.000000e+00> : vector<4x32xf32>
    %491 = tpu.matmul %476, %399, %cst_185 {dimension_numbers = #tpu.dot_dimension_numbers<[1], [0], [0], [1], [0, 0, 1, 1], [], []>} : vector<4x32xf32>, vector<32x32xf32>, vector<4x32xf32> -> vector<4x32xf32>
    %492 = arith.addf %430, %491 : vector<4x32xf32>
    %493 = math.tanh %492 : vector<4x32xf32>
    %cst_186 = arith.constant dense<0.000000e+00> : vector<4x32xf32>
    %494 = tpu.matmul %476, %401, %cst_186 {dimension_numbers = #tpu.dot_dimension_numbers<[1], [0], [0], [1], [0, 0, 1, 1], [], []>} : vector<4x32xf32>, vector<32x32xf32>, vector<4x32xf32> -> vector<4x32xf32>
    %495 = arith.addf %433, %494 : vector<4x32xf32>
    %496 = arith.negf %495 : vector<4x32xf32>
    %497 = math.exp %496 : vector<4x32xf32>
    %cst_187 = arith.constant 1.000000e+00 : f32
    %498 = vector.broadcast %cst_187 : f32 to vector<4x32xf32>
    %499 = arith.addf %498, %497 : vector<4x32xf32>
    %500 = arith.divf %498, %499 : vector<4x32xf32>
    %501 = arith.mulf %490, %474 : vector<4x32xf32>
    %502 = arith.mulf %483, %493 : vector<4x32xf32>
    %503 = arith.addf %501, %502 : vector<4x32xf32>
    %504 = math.tanh %503 : vector<4x32xf32>
    %505 = arith.mulf %500, %504 : vector<4x32xf32>
    %cst_188 = arith.constant dense<0.000000e+00> : vector<4x32xf32>
    %506 = tpu.matmul %505, %395, %cst_188 {dimension_numbers = #tpu.dot_dimension_numbers<[1], [0], [0], [1], [0, 0, 1, 1], [], []>} : vector<4x32xf32>, vector<32x32xf32>, vector<4x32xf32> -> vector<4x32xf32>
    %507 = arith.addf %436, %506 : vector<4x32xf32>
    %508 = arith.negf %507 : vector<4x32xf32>
    %509 = math.exp %508 : vector<4x32xf32>
    %cst_189 = arith.constant 1.000000e+00 : f32
    %510 = vector.broadcast %cst_189 : f32 to vector<4x32xf32>
    %511 = arith.addf %510, %509 : vector<4x32xf32>
    %512 = arith.divf %510, %511 : vector<4x32xf32>
    %cst_190 = arith.constant dense<0.000000e+00> : vector<4x32xf32>
    %513 = tpu.matmul %505, %397, %cst_190 {dimension_numbers = #tpu.dot_dimension_numbers<[1], [0], [0], [1], [0, 0, 1, 1], [], []>} : vector<4x32xf32>, vector<32x32xf32>, vector<4x32xf32> -> vector<4x32xf32>
    %514 = arith.addf %439, %513 : vector<4x32xf32>
    %515 = arith.negf %514 : vector<4x32xf32>
    %516 = math.exp %515 : vector<4x32xf32>
    %cst_191 = arith.constant 1.000000e+00 : f32
    %517 = vector.broadcast %cst_191 : f32 to vector<4x32xf32>
    %518 = arith.addf %517, %516 : vector<4x32xf32>
    %519 = arith.divf %517, %518 : vector<4x32xf32>
    %cst_192 = arith.constant dense<0.000000e+00> : vector<4x32xf32>
    %520 = tpu.matmul %505, %399, %cst_192 {dimension_numbers = #tpu.dot_dimension_numbers<[1], [0], [0], [1], [0, 0, 1, 1], [], []>} : vector<4x32xf32>, vector<32x32xf32>, vector<4x32xf32> -> vector<4x32xf32>
    %521 = arith.addf %442, %520 : vector<4x32xf32>
    %522 = math.tanh %521 : vector<4x32xf32>
    %cst_193 = arith.constant dense<0.000000e+00> : vector<4x32xf32>
    %523 = tpu.matmul %505, %401, %cst_193 {dimension_numbers = #tpu.dot_dimension_numbers<[1], [0], [0], [1], [0, 0, 1, 1], [], []>} : vector<4x32xf32>, vector<32x32xf32>, vector<4x32xf32> -> vector<4x32xf32>
    %524 = arith.addf %445, %523 : vector<4x32xf32>
    %525 = arith.negf %524 : vector<4x32xf32>
    %526 = math.exp %525 : vector<4x32xf32>
    %cst_194 = arith.constant 1.000000e+00 : f32
    %527 = vector.broadcast %cst_194 : f32 to vector<4x32xf32>
    %528 = arith.addf %527, %526 : vector<4x32xf32>
    %529 = arith.divf %527, %528 : vector<4x32xf32>
    %530 = arith.mulf %519, %503 : vector<4x32xf32>
    %531 = arith.mulf %512, %522 : vector<4x32xf32>
    %532 = arith.addf %530, %531 : vector<4x32xf32>
    %533 = math.tanh %532 : vector<4x32xf32>
    %534 = arith.mulf %529, %533 : vector<4x32xf32>
    %c0_195 = arith.constant 0 : index
    %c0_196 = arith.constant 0 : index
    %c0_197 = arith.constant 0 : index
    %535 = vector.load %arg8[%c0_195, %c0_196, %c0_197] : memref<4x32x32xf32, #tpu.memory_space<vmem>>, vector<1x32x32xf32>
    %536 = vector.shape_cast %535 : vector<1x32x32xf32> to vector<32x32xf32>
    %c1_198 = arith.constant 1 : index
    %c0_199 = arith.constant 0 : index
    %c0_200 = arith.constant 0 : index
    %537 = vector.load %arg8[%c1_198, %c0_199, %c0_200] : memref<4x32x32xf32, #tpu.memory_space<vmem>>, vector<1x32x32xf32>
    %538 = vector.shape_cast %537 : vector<1x32x32xf32> to vector<32x32xf32>
    %c2_201 = arith.constant 2 : index
    %c0_202 = arith.constant 0 : index
    %c0_203 = arith.constant 0 : index
    %539 = vector.load %arg8[%c2_201, %c0_202, %c0_203] : memref<4x32x32xf32, #tpu.memory_space<vmem>>, vector<1x32x32xf32>
    %540 = vector.shape_cast %539 : vector<1x32x32xf32> to vector<32x32xf32>
    %c3_204 = arith.constant 3 : index
    %c0_205 = arith.constant 0 : index
    %c0_206 = arith.constant 0 : index
    %541 = vector.load %arg8[%c3_204, %c0_205, %c0_206] : memref<4x32x32xf32, #tpu.memory_space<vmem>>, vector<1x32x32xf32>
    %542 = vector.shape_cast %541 : vector<1x32x32xf32> to vector<32x32xf32>
    %c0_207 = arith.constant 0 : index
    %c0_208 = arith.constant 0 : index
    %c0_209 = arith.constant 0 : index
    %543 = vector.load %arg9[%c0_207, %c0_208, %c0_209] : memref<4x32x32xf32, #tpu.memory_space<vmem>>, vector<1x32x32xf32>
    %544 = vector.shape_cast %543 : vector<1x32x32xf32> to vector<32x32xf32>
    %c1_210 = arith.constant 1 : index
    %c0_211 = arith.constant 0 : index
    %c0_212 = arith.constant 0 : index
    %545 = vector.load %arg9[%c1_210, %c0_211, %c0_212] : memref<4x32x32xf32, #tpu.memory_space<vmem>>, vector<1x32x32xf32>
    %546 = vector.shape_cast %545 : vector<1x32x32xf32> to vector<32x32xf32>
    %c2_213 = arith.constant 2 : index
    %c0_214 = arith.constant 0 : index
    %c0_215 = arith.constant 0 : index
    %547 = vector.load %arg9[%c2_213, %c0_214, %c0_215] : memref<4x32x32xf32, #tpu.memory_space<vmem>>, vector<1x32x32xf32>
    %548 = vector.shape_cast %547 : vector<1x32x32xf32> to vector<32x32xf32>
    %c3_216 = arith.constant 3 : index
    %c0_217 = arith.constant 0 : index
    %c0_218 = arith.constant 0 : index
    %549 = vector.load %arg9[%c3_216, %c0_217, %c0_218] : memref<4x32x32xf32, #tpu.memory_space<vmem>>, vector<1x32x32xf32>
    %550 = vector.shape_cast %549 : vector<1x32x32xf32> to vector<32x32xf32>
    %c0_219 = arith.constant 0 : index
    %c0_220 = arith.constant 0 : index
    %c0_221 = arith.constant 0 : index
    %551 = vector.load %arg10[%c0_219, %c0_220, %c0_221] : memref<4x1x32xf32, #tpu.memory_space<vmem>>, vector<1x1x32xf32>
    %552 = vector.shape_cast %551 : vector<1x1x32xf32> to vector<1x32xf32>
    %c1_222 = arith.constant 1 : index
    %c0_223 = arith.constant 0 : index
    %c0_224 = arith.constant 0 : index
    %553 = vector.load %arg10[%c1_222, %c0_223, %c0_224] : memref<4x1x32xf32, #tpu.memory_space<vmem>>, vector<1x1x32xf32>
    %554 = vector.shape_cast %553 : vector<1x1x32xf32> to vector<1x32xf32>
    %c2_225 = arith.constant 2 : index
    %c0_226 = arith.constant 0 : index
    %c0_227 = arith.constant 0 : index
    %555 = vector.load %arg10[%c2_225, %c0_226, %c0_227] : memref<4x1x32xf32, #tpu.memory_space<vmem>>, vector<1x1x32xf32>
    %556 = vector.shape_cast %555 : vector<1x1x32xf32> to vector<1x32xf32>
    %c3_228 = arith.constant 3 : index
    %c0_229 = arith.constant 0 : index
    %c0_230 = arith.constant 0 : index
    %557 = vector.load %arg10[%c3_228, %c0_229, %c0_230] : memref<4x1x32xf32, #tpu.memory_space<vmem>>, vector<1x1x32xf32>
    %558 = vector.shape_cast %557 : vector<1x1x32xf32> to vector<1x32xf32>
    %cst_231 = arith.constant dense<0.000000e+00> : vector<4x32xf32>
    %559 = tpu.matmul %476, %536, %cst_231 {dimension_numbers = #tpu.dot_dimension_numbers<[1], [0], [0], [1], [0, 0, 1, 1], [], []>} : vector<4x32xf32>, vector<32x32xf32>, vector<4x32xf32> -> vector<4x32xf32>
    %560 = vector.broadcast %552 : vector<1x32xf32> to vector<4x32xf32>
    %561 = arith.addf %559, %560 : vector<4x32xf32>
    %cst_232 = arith.constant dense<0.000000e+00> : vector<4x32xf32>
    %562 = tpu.matmul %476, %538, %cst_232 {dimension_numbers = #tpu.dot_dimension_numbers<[1], [0], [0], [1], [0, 0, 1, 1], [], []>} : vector<4x32xf32>, vector<32x32xf32>, vector<4x32xf32> -> vector<4x32xf32>
    %563 = vector.broadcast %554 : vector<1x32xf32> to vector<4x32xf32>
    %564 = arith.addf %562, %563 : vector<4x32xf32>
    %cst_233 = arith.constant dense<0.000000e+00> : vector<4x32xf32>
    %565 = tpu.matmul %476, %540, %cst_233 {dimension_numbers = #tpu.dot_dimension_numbers<[1], [0], [0], [1], [0, 0, 1, 1], [], []>} : vector<4x32xf32>, vector<32x32xf32>, vector<4x32xf32> -> vector<4x32xf32>
    %566 = vector.broadcast %556 : vector<1x32xf32> to vector<4x32xf32>
    %567 = arith.addf %565, %566 : vector<4x32xf32>
    %cst_234 = arith.constant dense<0.000000e+00> : vector<4x32xf32>
    %568 = tpu.matmul %476, %542, %cst_234 {dimension_numbers = #tpu.dot_dimension_numbers<[1], [0], [0], [1], [0, 0, 1, 1], [], []>} : vector<4x32xf32>, vector<32x32xf32>, vector<4x32xf32> -> vector<4x32xf32>
    %569 = vector.broadcast %558 : vector<1x32xf32> to vector<4x32xf32>
    %570 = arith.addf %568, %569 : vector<4x32xf32>
    %cst_235 = arith.constant dense<0.000000e+00> : vector<4x32xf32>
    %571 = tpu.matmul %505, %536, %cst_235 {dimension_numbers = #tpu.dot_dimension_numbers<[1], [0], [0], [1], [0, 0, 1, 1], [], []>} : vector<4x32xf32>, vector<32x32xf32>, vector<4x32xf32> -> vector<4x32xf32>
    %572 = vector.broadcast %552 : vector<1x32xf32> to vector<4x32xf32>
    %573 = arith.addf %571, %572 : vector<4x32xf32>
    %cst_236 = arith.constant dense<0.000000e+00> : vector<4x32xf32>
    %574 = tpu.matmul %505, %538, %cst_236 {dimension_numbers = #tpu.dot_dimension_numbers<[1], [0], [0], [1], [0, 0, 1, 1], [], []>} : vector<4x32xf32>, vector<32x32xf32>, vector<4x32xf32> -> vector<4x32xf32>
    %575 = vector.broadcast %554 : vector<1x32xf32> to vector<4x32xf32>
    %576 = arith.addf %574, %575 : vector<4x32xf32>
    %cst_237 = arith.constant dense<0.000000e+00> : vector<4x32xf32>
    %577 = tpu.matmul %505, %540, %cst_237 {dimension_numbers = #tpu.dot_dimension_numbers<[1], [0], [0], [1], [0, 0, 1, 1], [], []>} : vector<4x32xf32>, vector<32x32xf32>, vector<4x32xf32> -> vector<4x32xf32>
    %578 = vector.broadcast %556 : vector<1x32xf32> to vector<4x32xf32>
    %579 = arith.addf %577, %578 : vector<4x32xf32>
    %cst_238 = arith.constant dense<0.000000e+00> : vector<4x32xf32>
    %580 = tpu.matmul %505, %542, %cst_238 {dimension_numbers = #tpu.dot_dimension_numbers<[1], [0], [0], [1], [0, 0, 1, 1], [], []>} : vector<4x32xf32>, vector<32x32xf32>, vector<4x32xf32> -> vector<4x32xf32>
    %581 = vector.broadcast %558 : vector<1x32xf32> to vector<4x32xf32>
    %582 = arith.addf %580, %581 : vector<4x32xf32>
    %cst_239 = arith.constant dense<0.000000e+00> : vector<4x32xf32>
    %583 = tpu.matmul %534, %536, %cst_239 {dimension_numbers = #tpu.dot_dimension_numbers<[1], [0], [0], [1], [0, 0, 1, 1], [], []>} : vector<4x32xf32>, vector<32x32xf32>, vector<4x32xf32> -> vector<4x32xf32>
    %584 = vector.broadcast %552 : vector<1x32xf32> to vector<4x32xf32>
    %585 = arith.addf %583, %584 : vector<4x32xf32>
    %cst_240 = arith.constant dense<0.000000e+00> : vector<4x32xf32>
    %586 = tpu.matmul %534, %538, %cst_240 {dimension_numbers = #tpu.dot_dimension_numbers<[1], [0], [0], [1], [0, 0, 1, 1], [], []>} : vector<4x32xf32>, vector<32x32xf32>, vector<4x32xf32> -> vector<4x32xf32>
    %587 = vector.broadcast %554 : vector<1x32xf32> to vector<4x32xf32>
    %588 = arith.addf %586, %587 : vector<4x32xf32>
    %cst_241 = arith.constant dense<0.000000e+00> : vector<4x32xf32>
    %589 = tpu.matmul %534, %540, %cst_241 {dimension_numbers = #tpu.dot_dimension_numbers<[1], [0], [0], [1], [0, 0, 1, 1], [], []>} : vector<4x32xf32>, vector<32x32xf32>, vector<4x32xf32> -> vector<4x32xf32>
    %590 = vector.broadcast %556 : vector<1x32xf32> to vector<4x32xf32>
    %591 = arith.addf %589, %590 : vector<4x32xf32>
    %cst_242 = arith.constant dense<0.000000e+00> : vector<4x32xf32>
    %592 = tpu.matmul %534, %542, %cst_242 {dimension_numbers = #tpu.dot_dimension_numbers<[1], [0], [0], [1], [0, 0, 1, 1], [], []>} : vector<4x32xf32>, vector<32x32xf32>, vector<4x32xf32> -> vector<4x32xf32>
    %593 = vector.broadcast %558 : vector<1x32xf32> to vector<4x32xf32>
    %594 = arith.addf %592, %593 : vector<4x32xf32>
    %cst_243 = arith.constant 0.000000e+00 : f32
    %595 = vector.broadcast %cst_243 : f32 to vector<4x32xf32>
    %cst_244 = arith.constant 0.000000e+00 : f32
    %596 = vector.broadcast %cst_244 : f32 to vector<4x32xf32>
    %cst_245 = arith.constant dense<0.000000e+00> : vector<4x32xf32>
    %597 = tpu.matmul %595, %544, %cst_245 {dimension_numbers = #tpu.dot_dimension_numbers<[1], [0], [0], [1], [0, 0, 1, 1], [], []>} : vector<4x32xf32>, vector<32x32xf32>, vector<4x32xf32> -> vector<4x32xf32>
    %598 = arith.addf %561, %597 : vector<4x32xf32>
    %599 = arith.negf %598 : vector<4x32xf32>
    %600 = math.exp %599 : vector<4x32xf32>
    %cst_246 = arith.constant 1.000000e+00 : f32
    %601 = vector.broadcast %cst_246 : f32 to vector<4x32xf32>
    %602 = arith.addf %601, %600 : vector<4x32xf32>
    %603 = arith.divf %601, %602 : vector<4x32xf32>
    %cst_247 = arith.constant dense<0.000000e+00> : vector<4x32xf32>
    %604 = tpu.matmul %595, %546, %cst_247 {dimension_numbers = #tpu.dot_dimension_numbers<[1], [0], [0], [1], [0, 0, 1, 1], [], []>} : vector<4x32xf32>, vector<32x32xf32>, vector<4x32xf32> -> vector<4x32xf32>
    %605 = arith.addf %564, %604 : vector<4x32xf32>
    %606 = arith.negf %605 : vector<4x32xf32>
    %607 = math.exp %606 : vector<4x32xf32>
    %cst_248 = arith.constant 1.000000e+00 : f32
    %608 = vector.broadcast %cst_248 : f32 to vector<4x32xf32>
    %609 = arith.addf %608, %607 : vector<4x32xf32>
    %610 = arith.divf %608, %609 : vector<4x32xf32>
    %cst_249 = arith.constant dense<0.000000e+00> : vector<4x32xf32>
    %611 = tpu.matmul %595, %548, %cst_249 {dimension_numbers = #tpu.dot_dimension_numbers<[1], [0], [0], [1], [0, 0, 1, 1], [], []>} : vector<4x32xf32>, vector<32x32xf32>, vector<4x32xf32> -> vector<4x32xf32>
    %612 = arith.addf %567, %611 : vector<4x32xf32>
    %613 = math.tanh %612 : vector<4x32xf32>
    %cst_250 = arith.constant dense<0.000000e+00> : vector<4x32xf32>
    %614 = tpu.matmul %595, %550, %cst_250 {dimension_numbers = #tpu.dot_dimension_numbers<[1], [0], [0], [1], [0, 0, 1, 1], [], []>} : vector<4x32xf32>, vector<32x32xf32>, vector<4x32xf32> -> vector<4x32xf32>
    %615 = arith.addf %570, %614 : vector<4x32xf32>
    %616 = arith.negf %615 : vector<4x32xf32>
    %617 = math.exp %616 : vector<4x32xf32>
    %cst_251 = arith.constant 1.000000e+00 : f32
    %618 = vector.broadcast %cst_251 : f32 to vector<4x32xf32>
    %619 = arith.addf %618, %617 : vector<4x32xf32>
    %620 = arith.divf %618, %619 : vector<4x32xf32>
    %621 = arith.mulf %610, %596 : vector<4x32xf32>
    %622 = arith.mulf %603, %613 : vector<4x32xf32>
    %623 = arith.addf %621, %622 : vector<4x32xf32>
    %624 = math.tanh %623 : vector<4x32xf32>
    %625 = arith.mulf %620, %624 : vector<4x32xf32>
    %cst_252 = arith.constant dense<0.000000e+00> : vector<4x32xf32>
    %626 = tpu.matmul %625, %544, %cst_252 {dimension_numbers = #tpu.dot_dimension_numbers<[1], [0], [0], [1], [0, 0, 1, 1], [], []>} : vector<4x32xf32>, vector<32x32xf32>, vector<4x32xf32> -> vector<4x32xf32>
    %627 = arith.addf %573, %626 : vector<4x32xf32>
    %628 = arith.negf %627 : vector<4x32xf32>
    %629 = math.exp %628 : vector<4x32xf32>
    %cst_253 = arith.constant 1.000000e+00 : f32
    %630 = vector.broadcast %cst_253 : f32 to vector<4x32xf32>
    %631 = arith.addf %630, %629 : vector<4x32xf32>
    %632 = arith.divf %630, %631 : vector<4x32xf32>
    %cst_254 = arith.constant dense<0.000000e+00> : vector<4x32xf32>
    %633 = tpu.matmul %625, %546, %cst_254 {dimension_numbers = #tpu.dot_dimension_numbers<[1], [0], [0], [1], [0, 0, 1, 1], [], []>} : vector<4x32xf32>, vector<32x32xf32>, vector<4x32xf32> -> vector<4x32xf32>
    %634 = arith.addf %576, %633 : vector<4x32xf32>
    %635 = arith.negf %634 : vector<4x32xf32>
    %636 = math.exp %635 : vector<4x32xf32>
    %cst_255 = arith.constant 1.000000e+00 : f32
    %637 = vector.broadcast %cst_255 : f32 to vector<4x32xf32>
    %638 = arith.addf %637, %636 : vector<4x32xf32>
    %639 = arith.divf %637, %638 : vector<4x32xf32>
    %cst_256 = arith.constant dense<0.000000e+00> : vector<4x32xf32>
    %640 = tpu.matmul %625, %548, %cst_256 {dimension_numbers = #tpu.dot_dimension_numbers<[1], [0], [0], [1], [0, 0, 1, 1], [], []>} : vector<4x32xf32>, vector<32x32xf32>, vector<4x32xf32> -> vector<4x32xf32>
    %641 = arith.addf %579, %640 : vector<4x32xf32>
    %642 = math.tanh %641 : vector<4x32xf32>
    %cst_257 = arith.constant dense<0.000000e+00> : vector<4x32xf32>
    %643 = tpu.matmul %625, %550, %cst_257 {dimension_numbers = #tpu.dot_dimension_numbers<[1], [0], [0], [1], [0, 0, 1, 1], [], []>} : vector<4x32xf32>, vector<32x32xf32>, vector<4x32xf32> -> vector<4x32xf32>
    %644 = arith.addf %582, %643 : vector<4x32xf32>
    %645 = arith.negf %644 : vector<4x32xf32>
    %646 = math.exp %645 : vector<4x32xf32>
    %cst_258 = arith.constant 1.000000e+00 : f32
    %647 = vector.broadcast %cst_258 : f32 to vector<4x32xf32>
    %648 = arith.addf %647, %646 : vector<4x32xf32>
    %649 = arith.divf %647, %648 : vector<4x32xf32>
    %650 = arith.mulf %639, %623 : vector<4x32xf32>
    %651 = arith.mulf %632, %642 : vector<4x32xf32>
    %652 = arith.addf %650, %651 : vector<4x32xf32>
    %653 = math.tanh %652 : vector<4x32xf32>
    %654 = arith.mulf %649, %653 : vector<4x32xf32>
    %cst_259 = arith.constant dense<0.000000e+00> : vector<4x32xf32>
    %655 = tpu.matmul %654, %544, %cst_259 {dimension_numbers = #tpu.dot_dimension_numbers<[1], [0], [0], [1], [0, 0, 1, 1], [], []>} : vector<4x32xf32>, vector<32x32xf32>, vector<4x32xf32> -> vector<4x32xf32>
    %656 = arith.addf %585, %655 : vector<4x32xf32>
    %657 = arith.negf %656 : vector<4x32xf32>
    %658 = math.exp %657 : vector<4x32xf32>
    %cst_260 = arith.constant 1.000000e+00 : f32
    %659 = vector.broadcast %cst_260 : f32 to vector<4x32xf32>
    %660 = arith.addf %659, %658 : vector<4x32xf32>
    %661 = arith.divf %659, %660 : vector<4x32xf32>
    %cst_261 = arith.constant dense<0.000000e+00> : vector<4x32xf32>
    %662 = tpu.matmul %654, %546, %cst_261 {dimension_numbers = #tpu.dot_dimension_numbers<[1], [0], [0], [1], [0, 0, 1, 1], [], []>} : vector<4x32xf32>, vector<32x32xf32>, vector<4x32xf32> -> vector<4x32xf32>
    %663 = arith.addf %588, %662 : vector<4x32xf32>
    %664 = arith.negf %663 : vector<4x32xf32>
    %665 = math.exp %664 : vector<4x32xf32>
    %cst_262 = arith.constant 1.000000e+00 : f32
    %666 = vector.broadcast %cst_262 : f32 to vector<4x32xf32>
    %667 = arith.addf %666, %665 : vector<4x32xf32>
    %668 = arith.divf %666, %667 : vector<4x32xf32>
    %cst_263 = arith.constant dense<0.000000e+00> : vector<4x32xf32>
    %669 = tpu.matmul %654, %548, %cst_263 {dimension_numbers = #tpu.dot_dimension_numbers<[1], [0], [0], [1], [0, 0, 1, 1], [], []>} : vector<4x32xf32>, vector<32x32xf32>, vector<4x32xf32> -> vector<4x32xf32>
    %670 = arith.addf %591, %669 : vector<4x32xf32>
    %671 = math.tanh %670 : vector<4x32xf32>
    %cst_264 = arith.constant dense<0.000000e+00> : vector<4x32xf32>
    %672 = tpu.matmul %654, %550, %cst_264 {dimension_numbers = #tpu.dot_dimension_numbers<[1], [0], [0], [1], [0, 0, 1, 1], [], []>} : vector<4x32xf32>, vector<32x32xf32>, vector<4x32xf32> -> vector<4x32xf32>
    %673 = arith.addf %594, %672 : vector<4x32xf32>
    %674 = arith.negf %673 : vector<4x32xf32>
    %675 = math.exp %674 : vector<4x32xf32>
    %cst_265 = arith.constant 1.000000e+00 : f32
    %676 = vector.broadcast %cst_265 : f32 to vector<4x32xf32>
    %677 = arith.addf %676, %675 : vector<4x32xf32>
    %678 = arith.divf %676, %677 : vector<4x32xf32>
    %679 = arith.mulf %668, %652 : vector<4x32xf32>
    %680 = arith.mulf %661, %671 : vector<4x32xf32>
    %681 = arith.addf %679, %680 : vector<4x32xf32>
    %682 = math.tanh %681 : vector<4x32xf32>
    %683 = arith.mulf %678, %682 : vector<4x32xf32>
    %c0_266 = arith.constant 0 : index
    %c0_267 = arith.constant 0 : index
    %684 = vector.load %arg17[%c0_266, %c0_267] : memref<32x32xf32, #tpu.memory_space<vmem>>, vector<32x32xf32>
    %c0_268 = arith.constant 0 : index
    %c0_269 = arith.constant 0 : index
    %685 = vector.load %arg18[%c0_268, %c0_269] : memref<1x32xf32, #tpu.memory_space<vmem>>, vector<1x32xf32>
    %cst_270 = arith.constant dense<0.000000e+00> : vector<4x32xf32>
    %686 = tpu.matmul %625, %684, %cst_270 {dimension_numbers = #tpu.dot_dimension_numbers<[1], [0], [0], [1], [0, 0, 1, 1], [], []>} : vector<4x32xf32>, vector<32x32xf32>, vector<4x32xf32> -> vector<4x32xf32>
    %687 = vector.broadcast %685 : vector<1x32xf32> to vector<4x32xf32>
    %688 = arith.addf %686, %687 : vector<4x32xf32>
    %689 = arith.mulf %688, %534 : vector<4x32xf32>
    %cst_271 = arith.constant dense<0.000000e+00> : vector<4xf32>
    %690 = vector.multi_reduction <add>, %689, %cst_271 [1] : vector<4x32xf32> to vector<4xf32>
    %691 = vector.shape_cast %690 : vector<4xf32> to vector<4x1xf32>
    %cst_272 = arith.constant dense<0.000000e+00> : vector<4x32xf32>
    %692 = tpu.matmul %654, %684, %cst_272 {dimension_numbers = #tpu.dot_dimension_numbers<[1], [0], [0], [1], [0, 0, 1, 1], [], []>} : vector<4x32xf32>, vector<32x32xf32>, vector<4x32xf32> -> vector<4x32xf32>
    %693 = vector.broadcast %685 : vector<1x32xf32> to vector<4x32xf32>
    %694 = arith.addf %692, %693 : vector<4x32xf32>
    %695 = arith.mulf %694, %534 : vector<4x32xf32>
    %cst_273 = arith.constant dense<0.000000e+00> : vector<4xf32>
    %696 = vector.multi_reduction <add>, %695, %cst_273 [1] : vector<4x32xf32> to vector<4xf32>
    %697 = vector.shape_cast %696 : vector<4xf32> to vector<4x1xf32>
    %cst_274 = arith.constant dense<0.000000e+00> : vector<4x32xf32>
    %698 = tpu.matmul %683, %684, %cst_274 {dimension_numbers = #tpu.dot_dimension_numbers<[1], [0], [0], [1], [0, 0, 1, 1], [], []>} : vector<4x32xf32>, vector<32x32xf32>, vector<4x32xf32> -> vector<4x32xf32>
    %699 = vector.broadcast %685 : vector<1x32xf32> to vector<4x32xf32>
    %700 = arith.addf %698, %699 : vector<4x32xf32>
    %701 = arith.mulf %700, %534 : vector<4x32xf32>
    %cst_275 = arith.constant dense<0.000000e+00> : vector<4xf32>
    %702 = vector.multi_reduction <add>, %701, %cst_275 [1] : vector<4x32xf32> to vector<4xf32>
    %703 = vector.shape_cast %702 : vector<4xf32> to vector<4x1xf32>
    %704 = arith.maximumf %691, %697 : vector<4x1xf32>
    %705 = arith.maximumf %704, %703 : vector<4x1xf32>
    %706 = arith.subf %691, %705 : vector<4x1xf32>
    %707 = math.exp %706 : vector<4x1xf32>
    %708 = arith.subf %697, %705 : vector<4x1xf32>
    %709 = math.exp %708 : vector<4x1xf32>
    %710 = arith.subf %703, %705 : vector<4x1xf32>
    %711 = math.exp %710 : vector<4x1xf32>
    %712 = arith.addf %707, %709 : vector<4x1xf32>
    %713 = arith.addf %712, %711 : vector<4x1xf32>
    %714 = arith.divf %707, %713 : vector<4x1xf32>
    %715 = arith.divf %709, %713 : vector<4x1xf32>
    %716 = arith.divf %711, %713 : vector<4x1xf32>
    %cst_276 = arith.constant 0.000000e+00 : f32
    %717 = vector.broadcast %cst_276 : f32 to vector<4x32xf32>
    %cst_277 = arith.constant 0.000000e+00 : f32
    %718 = vector.broadcast %cst_277 : f32 to vector<4x1xf32>
    %719 = arith.cmpf ogt, %715, %714 : vector<4x1xf32>
    %cst_278 = arith.constant 0.000000e+00 : f32
    %720 = vector.broadcast %cst_278 : f32 to vector<4x1xf32>
    %721 = arith.select %719, %715, %720 : vector<4x1xi1>, vector<4x1xf32>
    %722 = arith.addf %718, %721 : vector<4x1xf32>
    %723 = arith.cmpf ogt, %716, %714 : vector<4x1xf32>
    %cst_279 = arith.constant 0.000000e+00 : f32
    %724 = vector.broadcast %cst_279 : f32 to vector<4x1xf32>
    %725 = arith.select %723, %716, %724 : vector<4x1xi1>, vector<4x1xf32>
    %726 = arith.addf %722, %725 : vector<4x1xf32>
    %cst_280 = arith.constant 8.000000e-01 : f32
    %727 = vector.broadcast %cst_280 : f32 to vector<4x1xf32>
    %728 = arith.cmpf ole, %726, %727 : vector<4x1xf32>
    %cst_281 = arith.constant 0.000000e+00 : f32
    %729 = vector.broadcast %cst_281 : f32 to vector<4x1xf32>
    %730 = arith.select %728, %714, %729 : vector<4x1xi1>, vector<4x1xf32>
    %731 = vector.broadcast %730 : vector<4x1xf32> to vector<4x32xf32>
    %732 = arith.mulf %731, %625 : vector<4x32xf32>
    %733 = arith.addf %717, %732 : vector<4x32xf32>
    %cst_282 = arith.constant 0.000000e+00 : f32
    %734 = vector.broadcast %cst_282 : f32 to vector<4x1xf32>
    %735 = arith.cmpf oge, %714, %715 : vector<4x1xf32>
    %cst_283 = arith.constant 0.000000e+00 : f32
    %736 = vector.broadcast %cst_283 : f32 to vector<4x1xf32>
    %737 = arith.select %735, %714, %736 : vector<4x1xi1>, vector<4x1xf32>
    %738 = arith.addf %734, %737 : vector<4x1xf32>
    %739 = arith.cmpf ogt, %716, %715 : vector<4x1xf32>
    %cst_284 = arith.constant 0.000000e+00 : f32
    %740 = vector.broadcast %cst_284 : f32 to vector<4x1xf32>
    %741 = arith.select %739, %716, %740 : vector<4x1xi1>, vector<4x1xf32>
    %742 = arith.addf %738, %741 : vector<4x1xf32>
    %cst_285 = arith.constant 8.000000e-01 : f32
    %743 = vector.broadcast %cst_285 : f32 to vector<4x1xf32>
    %744 = arith.cmpf ole, %742, %743 : vector<4x1xf32>
    %cst_286 = arith.constant 0.000000e+00 : f32
    %745 = vector.broadcast %cst_286 : f32 to vector<4x1xf32>
    %746 = arith.select %744, %715, %745 : vector<4x1xi1>, vector<4x1xf32>
    %747 = vector.broadcast %746 : vector<4x1xf32> to vector<4x32xf32>
    %748 = arith.mulf %747, %654 : vector<4x32xf32>
    %749 = arith.addf %733, %748 : vector<4x32xf32>
    %cst_287 = arith.constant 0.000000e+00 : f32
    %750 = vector.broadcast %cst_287 : f32 to vector<4x1xf32>
    %751 = arith.cmpf oge, %714, %716 : vector<4x1xf32>
    %cst_288 = arith.constant 0.000000e+00 : f32
    %752 = vector.broadcast %cst_288 : f32 to vector<4x1xf32>
    %753 = arith.select %751, %714, %752 : vector<4x1xi1>, vector<4x1xf32>
    %754 = arith.addf %750, %753 : vector<4x1xf32>
    %755 = arith.cmpf oge, %715, %716 : vector<4x1xf32>
    %cst_289 = arith.constant 0.000000e+00 : f32
    %756 = vector.broadcast %cst_289 : f32 to vector<4x1xf32>
    %757 = arith.select %755, %715, %756 : vector<4x1xi1>, vector<4x1xf32>
    %758 = arith.addf %754, %757 : vector<4x1xf32>
    %cst_290 = arith.constant 8.000000e-01 : f32
    %759 = vector.broadcast %cst_290 : f32 to vector<4x1xf32>
    %760 = arith.cmpf ole, %758, %759 : vector<4x1xf32>
    %cst_291 = arith.constant 0.000000e+00 : f32
    %761 = vector.broadcast %cst_291 : f32 to vector<4x1xf32>
    %762 = arith.select %760, %716, %761 : vector<4x1xi1>, vector<4x1xf32>
    %763 = vector.broadcast %762 : vector<4x1xf32> to vector<4x32xf32>
    %764 = arith.mulf %763, %683 : vector<4x32xf32>
    %765 = arith.addf %749, %764 : vector<4x32xf32>
    %766 = vector.extract_strided_slice %765 {offsets = [0, 0], sizes = [1, 32], strides = [1, 1]} : vector<4x32xf32> to vector<1x32xf32>
    %767 = vector.extract_strided_slice %765 {offsets = [1, 0], sizes = [1, 32], strides = [1, 1]} : vector<4x32xf32> to vector<1x32xf32>
    %768 = vector.extract_strided_slice %765 {offsets = [2, 0], sizes = [1, 32], strides = [1, 1]} : vector<4x32xf32> to vector<1x32xf32>
    %769 = vector.extract_strided_slice %765 {offsets = [3, 0], sizes = [1, 32], strides = [1, 1]} : vector<4x32xf32> to vector<1x32xf32>
    %c0_292 = arith.constant 0 : index
    %c0_293 = arith.constant 0 : index
    %c0_294 = arith.constant 0 : index
    %770 = vector.load %arg11[%c0_292, %c0_293, %c0_294] : memref<4x32x64xf32, #tpu.memory_space<vmem>>, vector<1x32x64xf32>
    %771 = vector.shape_cast %770 : vector<1x32x64xf32> to vector<32x64xf32>
    %c1_295 = arith.constant 1 : index
    %c0_296 = arith.constant 0 : index
    %c0_297 = arith.constant 0 : index
    %772 = vector.load %arg11[%c1_295, %c0_296, %c0_297] : memref<4x32x64xf32, #tpu.memory_space<vmem>>, vector<1x32x64xf32>
    %773 = vector.shape_cast %772 : vector<1x32x64xf32> to vector<32x64xf32>
    %c2_298 = arith.constant 2 : index
    %c0_299 = arith.constant 0 : index
    %c0_300 = arith.constant 0 : index
    %774 = vector.load %arg11[%c2_298, %c0_299, %c0_300] : memref<4x32x64xf32, #tpu.memory_space<vmem>>, vector<1x32x64xf32>
    %775 = vector.shape_cast %774 : vector<1x32x64xf32> to vector<32x64xf32>
    %c3_301 = arith.constant 3 : index
    %c0_302 = arith.constant 0 : index
    %c0_303 = arith.constant 0 : index
    %776 = vector.load %arg11[%c3_301, %c0_302, %c0_303] : memref<4x32x64xf32, #tpu.memory_space<vmem>>, vector<1x32x64xf32>
    %777 = vector.shape_cast %776 : vector<1x32x64xf32> to vector<32x64xf32>
    %c0_304 = arith.constant 0 : index
    %c0_305 = arith.constant 0 : index
    %c0_306 = arith.constant 0 : index
    %778 = vector.load %arg12[%c0_304, %c0_305, %c0_306] : memref<4x64x64xf32, #tpu.memory_space<vmem>>, vector<1x64x64xf32>
    %779 = vector.shape_cast %778 : vector<1x64x64xf32> to vector<64x64xf32>
    %c1_307 = arith.constant 1 : index
    %c0_308 = arith.constant 0 : index
    %c0_309 = arith.constant 0 : index
    %780 = vector.load %arg12[%c1_307, %c0_308, %c0_309] : memref<4x64x64xf32, #tpu.memory_space<vmem>>, vector<1x64x64xf32>
    %781 = vector.shape_cast %780 : vector<1x64x64xf32> to vector<64x64xf32>
    %c2_310 = arith.constant 2 : index
    %c0_311 = arith.constant 0 : index
    %c0_312 = arith.constant 0 : index
    %782 = vector.load %arg12[%c2_310, %c0_311, %c0_312] : memref<4x64x64xf32, #tpu.memory_space<vmem>>, vector<1x64x64xf32>
    %783 = vector.shape_cast %782 : vector<1x64x64xf32> to vector<64x64xf32>
    %c3_313 = arith.constant 3 : index
    %c0_314 = arith.constant 0 : index
    %c0_315 = arith.constant 0 : index
    %784 = vector.load %arg12[%c3_313, %c0_314, %c0_315] : memref<4x64x64xf32, #tpu.memory_space<vmem>>, vector<1x64x64xf32>
    %785 = vector.shape_cast %784 : vector<1x64x64xf32> to vector<64x64xf32>
    %c0_316 = arith.constant 0 : index
    %c0_317 = arith.constant 0 : index
    %c0_318 = arith.constant 0 : index
    %786 = vector.load %arg13[%c0_316, %c0_317, %c0_318] : memref<4x1x64xf32, #tpu.memory_space<vmem>>, vector<1x1x64xf32>
    %787 = vector.shape_cast %786 : vector<1x1x64xf32> to vector<1x64xf32>
    %c1_319 = arith.constant 1 : index
    %c0_320 = arith.constant 0 : index
    %c0_321 = arith.constant 0 : index
    %788 = vector.load %arg13[%c1_319, %c0_320, %c0_321] : memref<4x1x64xf32, #tpu.memory_space<vmem>>, vector<1x1x64xf32>
    %789 = vector.shape_cast %788 : vector<1x1x64xf32> to vector<1x64xf32>
    %c2_322 = arith.constant 2 : index
    %c0_323 = arith.constant 0 : index
    %c0_324 = arith.constant 0 : index
    %790 = vector.load %arg13[%c2_322, %c0_323, %c0_324] : memref<4x1x64xf32, #tpu.memory_space<vmem>>, vector<1x1x64xf32>
    %791 = vector.shape_cast %790 : vector<1x1x64xf32> to vector<1x64xf32>
    %c3_325 = arith.constant 3 : index
    %c0_326 = arith.constant 0 : index
    %c0_327 = arith.constant 0 : index
    %792 = vector.load %arg13[%c3_325, %c0_326, %c0_327] : memref<4x1x64xf32, #tpu.memory_space<vmem>>, vector<1x1x64xf32>
    %793 = vector.shape_cast %792 : vector<1x1x64xf32> to vector<1x64xf32>
    %cst_328 = arith.constant dense<0.000000e+00> : vector<1x64xf32>
    %794 = tpu.matmul %766, %771, %cst_328 {dimension_numbers = #tpu.dot_dimension_numbers<[1], [0], [0], [1], [0, 0, 1, 1], [], []>} : vector<1x32xf32>, vector<32x64xf32>, vector<1x64xf32> -> vector<1x64xf32>
    %795 = arith.addf %794, %787 : vector<1x64xf32>
    %cst_329 = arith.constant dense<0.000000e+00> : vector<1x64xf32>
    %796 = tpu.matmul %766, %773, %cst_329 {dimension_numbers = #tpu.dot_dimension_numbers<[1], [0], [0], [1], [0, 0, 1, 1], [], []>} : vector<1x32xf32>, vector<32x64xf32>, vector<1x64xf32> -> vector<1x64xf32>
    %797 = arith.addf %796, %789 : vector<1x64xf32>
    %cst_330 = arith.constant dense<0.000000e+00> : vector<1x64xf32>
    %798 = tpu.matmul %766, %775, %cst_330 {dimension_numbers = #tpu.dot_dimension_numbers<[1], [0], [0], [1], [0, 0, 1, 1], [], []>} : vector<1x32xf32>, vector<32x64xf32>, vector<1x64xf32> -> vector<1x64xf32>
    %799 = arith.addf %798, %791 : vector<1x64xf32>
    %cst_331 = arith.constant dense<0.000000e+00> : vector<1x64xf32>
    %800 = tpu.matmul %766, %777, %cst_331 {dimension_numbers = #tpu.dot_dimension_numbers<[1], [0], [0], [1], [0, 0, 1, 1], [], []>} : vector<1x32xf32>, vector<32x64xf32>, vector<1x64xf32> -> vector<1x64xf32>
    %801 = arith.addf %800, %793 : vector<1x64xf32>
    %cst_332 = arith.constant dense<0.000000e+00> : vector<1x64xf32>
    %802 = tpu.matmul %767, %771, %cst_332 {dimension_numbers = #tpu.dot_dimension_numbers<[1], [0], [0], [1], [0, 0, 1, 1], [], []>} : vector<1x32xf32>, vector<32x64xf32>, vector<1x64xf32> -> vector<1x64xf32>
    %803 = arith.addf %802, %787 : vector<1x64xf32>
    %cst_333 = arith.constant dense<0.000000e+00> : vector<1x64xf32>
    %804 = tpu.matmul %767, %773, %cst_333 {dimension_numbers = #tpu.dot_dimension_numbers<[1], [0], [0], [1], [0, 0, 1, 1], [], []>} : vector<1x32xf32>, vector<32x64xf32>, vector<1x64xf32> -> vector<1x64xf32>
    %805 = arith.addf %804, %789 : vector<1x64xf32>
    %cst_334 = arith.constant dense<0.000000e+00> : vector<1x64xf32>
    %806 = tpu.matmul %767, %775, %cst_334 {dimension_numbers = #tpu.dot_dimension_numbers<[1], [0], [0], [1], [0, 0, 1, 1], [], []>} : vector<1x32xf32>, vector<32x64xf32>, vector<1x64xf32> -> vector<1x64xf32>
    %807 = arith.addf %806, %791 : vector<1x64xf32>
    %cst_335 = arith.constant dense<0.000000e+00> : vector<1x64xf32>
    %808 = tpu.matmul %767, %777, %cst_335 {dimension_numbers = #tpu.dot_dimension_numbers<[1], [0], [0], [1], [0, 0, 1, 1], [], []>} : vector<1x32xf32>, vector<32x64xf32>, vector<1x64xf32> -> vector<1x64xf32>
    %809 = arith.addf %808, %793 : vector<1x64xf32>
    %cst_336 = arith.constant dense<0.000000e+00> : vector<1x64xf32>
    %810 = tpu.matmul %768, %771, %cst_336 {dimension_numbers = #tpu.dot_dimension_numbers<[1], [0], [0], [1], [0, 0, 1, 1], [], []>} : vector<1x32xf32>, vector<32x64xf32>, vector<1x64xf32> -> vector<1x64xf32>
    %811 = arith.addf %810, %787 : vector<1x64xf32>
    %cst_337 = arith.constant dense<0.000000e+00> : vector<1x64xf32>
    %812 = tpu.matmul %768, %773, %cst_337 {dimension_numbers = #tpu.dot_dimension_numbers<[1], [0], [0], [1], [0, 0, 1, 1], [], []>} : vector<1x32xf32>, vector<32x64xf32>, vector<1x64xf32> -> vector<1x64xf32>
    %813 = arith.addf %812, %789 : vector<1x64xf32>
    %cst_338 = arith.constant dense<0.000000e+00> : vector<1x64xf32>
    %814 = tpu.matmul %768, %775, %cst_338 {dimension_numbers = #tpu.dot_dimension_numbers<[1], [0], [0], [1], [0, 0, 1, 1], [], []>} : vector<1x32xf32>, vector<32x64xf32>, vector<1x64xf32> -> vector<1x64xf32>
    %815 = arith.addf %814, %791 : vector<1x64xf32>
    %cst_339 = arith.constant dense<0.000000e+00> : vector<1x64xf32>
    %816 = tpu.matmul %768, %777, %cst_339 {dimension_numbers = #tpu.dot_dimension_numbers<[1], [0], [0], [1], [0, 0, 1, 1], [], []>} : vector<1x32xf32>, vector<32x64xf32>, vector<1x64xf32> -> vector<1x64xf32>
    %817 = arith.addf %816, %793 : vector<1x64xf32>
    %cst_340 = arith.constant dense<0.000000e+00> : vector<1x64xf32>
    %818 = tpu.matmul %769, %771, %cst_340 {dimension_numbers = #tpu.dot_dimension_numbers<[1], [0], [0], [1], [0, 0, 1, 1], [], []>} : vector<1x32xf32>, vector<32x64xf32>, vector<1x64xf32> -> vector<1x64xf32>
    %819 = arith.addf %818, %787 : vector<1x64xf32>
    %cst_341 = arith.constant dense<0.000000e+00> : vector<1x64xf32>
    %820 = tpu.matmul %769, %773, %cst_341 {dimension_numbers = #tpu.dot_dimension_numbers<[1], [0], [0], [1], [0, 0, 1, 1], [], []>} : vector<1x32xf32>, vector<32x64xf32>, vector<1x64xf32> -> vector<1x64xf32>
    %821 = arith.addf %820, %789 : vector<1x64xf32>
    %cst_342 = arith.constant dense<0.000000e+00> : vector<1x64xf32>
    %822 = tpu.matmul %769, %775, %cst_342 {dimension_numbers = #tpu.dot_dimension_numbers<[1], [0], [0], [1], [0, 0, 1, 1], [], []>} : vector<1x32xf32>, vector<32x64xf32>, vector<1x64xf32> -> vector<1x64xf32>
    %823 = arith.addf %822, %791 : vector<1x64xf32>
    %cst_343 = arith.constant dense<0.000000e+00> : vector<1x64xf32>
    %824 = tpu.matmul %769, %777, %cst_343 {dimension_numbers = #tpu.dot_dimension_numbers<[1], [0], [0], [1], [0, 0, 1, 1], [], []>} : vector<1x32xf32>, vector<32x64xf32>, vector<1x64xf32> -> vector<1x64xf32>
    %825 = arith.addf %824, %793 : vector<1x64xf32>
    %cst_344 = arith.constant 0.000000e+00 : f32
    %826 = vector.broadcast %cst_344 : f32 to vector<1x64xf32>
    %cst_345 = arith.constant 0.000000e+00 : f32
    %827 = vector.broadcast %cst_345 : f32 to vector<1x64xf32>
    %cst_346 = arith.constant dense<0.000000e+00> : vector<1x64xf32>
    %828 = tpu.matmul %826, %779, %cst_346 {dimension_numbers = #tpu.dot_dimension_numbers<[1], [0], [0], [1], [0, 0, 1, 1], [], []>} : vector<1x64xf32>, vector<64x64xf32>, vector<1x64xf32> -> vector<1x64xf32>
    %829 = arith.addf %795, %828 : vector<1x64xf32>
    %830 = arith.negf %829 : vector<1x64xf32>
    %831 = math.exp %830 : vector<1x64xf32>
    %cst_347 = arith.constant 1.000000e+00 : f32
    %832 = vector.broadcast %cst_347 : f32 to vector<1x64xf32>
    %833 = arith.addf %832, %831 : vector<1x64xf32>
    %834 = arith.divf %832, %833 : vector<1x64xf32>
    %cst_348 = arith.constant dense<0.000000e+00> : vector<1x64xf32>
    %835 = tpu.matmul %826, %781, %cst_348 {dimension_numbers = #tpu.dot_dimension_numbers<[1], [0], [0], [1], [0, 0, 1, 1], [], []>} : vector<1x64xf32>, vector<64x64xf32>, vector<1x64xf32> -> vector<1x64xf32>
    %836 = arith.addf %797, %835 : vector<1x64xf32>
    %837 = arith.negf %836 : vector<1x64xf32>
    %838 = math.exp %837 : vector<1x64xf32>
    %cst_349 = arith.constant 1.000000e+00 : f32
    %839 = vector.broadcast %cst_349 : f32 to vector<1x64xf32>
    %840 = arith.addf %839, %838 : vector<1x64xf32>
    %841 = arith.divf %839, %840 : vector<1x64xf32>
    %cst_350 = arith.constant dense<0.000000e+00> : vector<1x64xf32>
    %842 = tpu.matmul %826, %783, %cst_350 {dimension_numbers = #tpu.dot_dimension_numbers<[1], [0], [0], [1], [0, 0, 1, 1], [], []>} : vector<1x64xf32>, vector<64x64xf32>, vector<1x64xf32> -> vector<1x64xf32>
    %843 = arith.addf %799, %842 : vector<1x64xf32>
    %844 = math.tanh %843 : vector<1x64xf32>
    %cst_351 = arith.constant dense<0.000000e+00> : vector<1x64xf32>
    %845 = tpu.matmul %826, %785, %cst_351 {dimension_numbers = #tpu.dot_dimension_numbers<[1], [0], [0], [1], [0, 0, 1, 1], [], []>} : vector<1x64xf32>, vector<64x64xf32>, vector<1x64xf32> -> vector<1x64xf32>
    %846 = arith.addf %801, %845 : vector<1x64xf32>
    %847 = arith.negf %846 : vector<1x64xf32>
    %848 = math.exp %847 : vector<1x64xf32>
    %cst_352 = arith.constant 1.000000e+00 : f32
    %849 = vector.broadcast %cst_352 : f32 to vector<1x64xf32>
    %850 = arith.addf %849, %848 : vector<1x64xf32>
    %851 = arith.divf %849, %850 : vector<1x64xf32>
    %852 = arith.mulf %841, %827 : vector<1x64xf32>
    %853 = arith.mulf %834, %844 : vector<1x64xf32>
    %854 = arith.addf %852, %853 : vector<1x64xf32>
    %855 = math.tanh %854 : vector<1x64xf32>
    %856 = arith.mulf %851, %855 : vector<1x64xf32>
    %cst_353 = arith.constant dense<0.000000e+00> : vector<1x64xf32>
    %857 = tpu.matmul %856, %779, %cst_353 {dimension_numbers = #tpu.dot_dimension_numbers<[1], [0], [0], [1], [0, 0, 1, 1], [], []>} : vector<1x64xf32>, vector<64x64xf32>, vector<1x64xf32> -> vector<1x64xf32>
    %858 = arith.addf %803, %857 : vector<1x64xf32>
    %859 = arith.negf %858 : vector<1x64xf32>
    %860 = math.exp %859 : vector<1x64xf32>
    %cst_354 = arith.constant 1.000000e+00 : f32
    %861 = vector.broadcast %cst_354 : f32 to vector<1x64xf32>
    %862 = arith.addf %861, %860 : vector<1x64xf32>
    %863 = arith.divf %861, %862 : vector<1x64xf32>
    %cst_355 = arith.constant dense<0.000000e+00> : vector<1x64xf32>
    %864 = tpu.matmul %856, %781, %cst_355 {dimension_numbers = #tpu.dot_dimension_numbers<[1], [0], [0], [1], [0, 0, 1, 1], [], []>} : vector<1x64xf32>, vector<64x64xf32>, vector<1x64xf32> -> vector<1x64xf32>
    %865 = arith.addf %805, %864 : vector<1x64xf32>
    %866 = arith.negf %865 : vector<1x64xf32>
    %867 = math.exp %866 : vector<1x64xf32>
    %cst_356 = arith.constant 1.000000e+00 : f32
    %868 = vector.broadcast %cst_356 : f32 to vector<1x64xf32>
    %869 = arith.addf %868, %867 : vector<1x64xf32>
    %870 = arith.divf %868, %869 : vector<1x64xf32>
    %cst_357 = arith.constant dense<0.000000e+00> : vector<1x64xf32>
    %871 = tpu.matmul %856, %783, %cst_357 {dimension_numbers = #tpu.dot_dimension_numbers<[1], [0], [0], [1], [0, 0, 1, 1], [], []>} : vector<1x64xf32>, vector<64x64xf32>, vector<1x64xf32> -> vector<1x64xf32>
    %872 = arith.addf %807, %871 : vector<1x64xf32>
    %873 = math.tanh %872 : vector<1x64xf32>
    %cst_358 = arith.constant dense<0.000000e+00> : vector<1x64xf32>
    %874 = tpu.matmul %856, %785, %cst_358 {dimension_numbers = #tpu.dot_dimension_numbers<[1], [0], [0], [1], [0, 0, 1, 1], [], []>} : vector<1x64xf32>, vector<64x64xf32>, vector<1x64xf32> -> vector<1x64xf32>
    %875 = arith.addf %809, %874 : vector<1x64xf32>
    %876 = arith.negf %875 : vector<1x64xf32>
    %877 = math.exp %876 : vector<1x64xf32>
    %cst_359 = arith.constant 1.000000e+00 : f32
    %878 = vector.broadcast %cst_359 : f32 to vector<1x64xf32>
    %879 = arith.addf %878, %877 : vector<1x64xf32>
    %880 = arith.divf %878, %879 : vector<1x64xf32>
    %881 = arith.mulf %870, %854 : vector<1x64xf32>
    %882 = arith.mulf %863, %873 : vector<1x64xf32>
    %883 = arith.addf %881, %882 : vector<1x64xf32>
    %884 = math.tanh %883 : vector<1x64xf32>
    %885 = arith.mulf %880, %884 : vector<1x64xf32>
    %cst_360 = arith.constant dense<0.000000e+00> : vector<1x64xf32>
    %886 = tpu.matmul %885, %779, %cst_360 {dimension_numbers = #tpu.dot_dimension_numbers<[1], [0], [0], [1], [0, 0, 1, 1], [], []>} : vector<1x64xf32>, vector<64x64xf32>, vector<1x64xf32> -> vector<1x64xf32>
    %887 = arith.addf %811, %886 : vector<1x64xf32>
    %888 = arith.negf %887 : vector<1x64xf32>
    %889 = math.exp %888 : vector<1x64xf32>
    %cst_361 = arith.constant 1.000000e+00 : f32
    %890 = vector.broadcast %cst_361 : f32 to vector<1x64xf32>
    %891 = arith.addf %890, %889 : vector<1x64xf32>
    %892 = arith.divf %890, %891 : vector<1x64xf32>
    %cst_362 = arith.constant dense<0.000000e+00> : vector<1x64xf32>
    %893 = tpu.matmul %885, %781, %cst_362 {dimension_numbers = #tpu.dot_dimension_numbers<[1], [0], [0], [1], [0, 0, 1, 1], [], []>} : vector<1x64xf32>, vector<64x64xf32>, vector<1x64xf32> -> vector<1x64xf32>
    %894 = arith.addf %813, %893 : vector<1x64xf32>
    %895 = arith.negf %894 : vector<1x64xf32>
    %896 = math.exp %895 : vector<1x64xf32>
    %cst_363 = arith.constant 1.000000e+00 : f32
    %897 = vector.broadcast %cst_363 : f32 to vector<1x64xf32>
    %898 = arith.addf %897, %896 : vector<1x64xf32>
    %899 = arith.divf %897, %898 : vector<1x64xf32>
    %cst_364 = arith.constant dense<0.000000e+00> : vector<1x64xf32>
    %900 = tpu.matmul %885, %783, %cst_364 {dimension_numbers = #tpu.dot_dimension_numbers<[1], [0], [0], [1], [0, 0, 1, 1], [], []>} : vector<1x64xf32>, vector<64x64xf32>, vector<1x64xf32> -> vector<1x64xf32>
    %901 = arith.addf %815, %900 : vector<1x64xf32>
    %902 = math.tanh %901 : vector<1x64xf32>
    %cst_365 = arith.constant dense<0.000000e+00> : vector<1x64xf32>
    %903 = tpu.matmul %885, %785, %cst_365 {dimension_numbers = #tpu.dot_dimension_numbers<[1], [0], [0], [1], [0, 0, 1, 1], [], []>} : vector<1x64xf32>, vector<64x64xf32>, vector<1x64xf32> -> vector<1x64xf32>
    %904 = arith.addf %817, %903 : vector<1x64xf32>
    %905 = arith.negf %904 : vector<1x64xf32>
    %906 = math.exp %905 : vector<1x64xf32>
    %cst_366 = arith.constant 1.000000e+00 : f32
    %907 = vector.broadcast %cst_366 : f32 to vector<1x64xf32>
    %908 = arith.addf %907, %906 : vector<1x64xf32>
    %909 = arith.divf %907, %908 : vector<1x64xf32>
    %910 = arith.mulf %899, %883 : vector<1x64xf32>
    %911 = arith.mulf %892, %902 : vector<1x64xf32>
    %912 = arith.addf %910, %911 : vector<1x64xf32>
    %913 = math.tanh %912 : vector<1x64xf32>
    %914 = arith.mulf %909, %913 : vector<1x64xf32>
    %cst_367 = arith.constant dense<0.000000e+00> : vector<1x64xf32>
    %915 = tpu.matmul %914, %779, %cst_367 {dimension_numbers = #tpu.dot_dimension_numbers<[1], [0], [0], [1], [0, 0, 1, 1], [], []>} : vector<1x64xf32>, vector<64x64xf32>, vector<1x64xf32> -> vector<1x64xf32>
    %916 = arith.addf %819, %915 : vector<1x64xf32>
    %917 = arith.negf %916 : vector<1x64xf32>
    %918 = math.exp %917 : vector<1x64xf32>
    %cst_368 = arith.constant 1.000000e+00 : f32
    %919 = vector.broadcast %cst_368 : f32 to vector<1x64xf32>
    %920 = arith.addf %919, %918 : vector<1x64xf32>
    %921 = arith.divf %919, %920 : vector<1x64xf32>
    %cst_369 = arith.constant dense<0.000000e+00> : vector<1x64xf32>
    %922 = tpu.matmul %914, %781, %cst_369 {dimension_numbers = #tpu.dot_dimension_numbers<[1], [0], [0], [1], [0, 0, 1, 1], [], []>} : vector<1x64xf32>, vector<64x64xf32>, vector<1x64xf32> -> vector<1x64xf32>
    %923 = arith.addf %821, %922 : vector<1x64xf32>
    %924 = arith.negf %923 : vector<1x64xf32>
    %925 = math.exp %924 : vector<1x64xf32>
    %cst_370 = arith.constant 1.000000e+00 : f32
    %926 = vector.broadcast %cst_370 : f32 to vector<1x64xf32>
    %927 = arith.addf %926, %925 : vector<1x64xf32>
    %928 = arith.divf %926, %927 : vector<1x64xf32>
    %cst_371 = arith.constant dense<0.000000e+00> : vector<1x64xf32>
    %929 = tpu.matmul %914, %783, %cst_371 {dimension_numbers = #tpu.dot_dimension_numbers<[1], [0], [0], [1], [0, 0, 1, 1], [], []>} : vector<1x64xf32>, vector<64x64xf32>, vector<1x64xf32> -> vector<1x64xf32>
    %930 = arith.addf %823, %929 : vector<1x64xf32>
    %931 = math.tanh %930 : vector<1x64xf32>
    %cst_372 = arith.constant dense<0.000000e+00> : vector<1x64xf32>
    %932 = tpu.matmul %914, %785, %cst_372 {dimension_numbers = #tpu.dot_dimension_numbers<[1], [0], [0], [1], [0, 0, 1, 1], [], []>} : vector<1x64xf32>, vector<64x64xf32>, vector<1x64xf32> -> vector<1x64xf32>
    %933 = arith.addf %825, %932 : vector<1x64xf32>
    %934 = arith.negf %933 : vector<1x64xf32>
    %935 = math.exp %934 : vector<1x64xf32>
    %cst_373 = arith.constant 1.000000e+00 : f32
    %936 = vector.broadcast %cst_373 : f32 to vector<1x64xf32>
    %937 = arith.addf %936, %935 : vector<1x64xf32>
    %938 = arith.divf %936, %937 : vector<1x64xf32>
    %939 = arith.mulf %928, %912 : vector<1x64xf32>
    %940 = arith.mulf %921, %931 : vector<1x64xf32>
    %941 = arith.addf %939, %940 : vector<1x64xf32>
    %942 = math.tanh %941 : vector<1x64xf32>
    %943 = arith.mulf %938, %942 : vector<1x64xf32>
    %c0_374 = arith.constant 0 : index
    %c0_375 = arith.constant 0 : index
    %c0_376 = arith.constant 0 : index
    %944 = vector.load %arg14[%c0_374, %c0_375, %c0_376] : memref<4x64x64xf32, #tpu.memory_space<vmem>>, vector<1x64x64xf32>
    %945 = vector.shape_cast %944 : vector<1x64x64xf32> to vector<64x64xf32>
    %c1_377 = arith.constant 1 : index
    %c0_378 = arith.constant 0 : index
    %c0_379 = arith.constant 0 : index
    %946 = vector.load %arg14[%c1_377, %c0_378, %c0_379] : memref<4x64x64xf32, #tpu.memory_space<vmem>>, vector<1x64x64xf32>
    %947 = vector.shape_cast %946 : vector<1x64x64xf32> to vector<64x64xf32>
    %c2_380 = arith.constant 2 : index
    %c0_381 = arith.constant 0 : index
    %c0_382 = arith.constant 0 : index
    %948 = vector.load %arg14[%c2_380, %c0_381, %c0_382] : memref<4x64x64xf32, #tpu.memory_space<vmem>>, vector<1x64x64xf32>
    %949 = vector.shape_cast %948 : vector<1x64x64xf32> to vector<64x64xf32>
    %c3_383 = arith.constant 3 : index
    %c0_384 = arith.constant 0 : index
    %c0_385 = arith.constant 0 : index
    %950 = vector.load %arg14[%c3_383, %c0_384, %c0_385] : memref<4x64x64xf32, #tpu.memory_space<vmem>>, vector<1x64x64xf32>
    %951 = vector.shape_cast %950 : vector<1x64x64xf32> to vector<64x64xf32>
    %c0_386 = arith.constant 0 : index
    %c0_387 = arith.constant 0 : index
    %c0_388 = arith.constant 0 : index
    %952 = vector.load %arg15[%c0_386, %c0_387, %c0_388] : memref<4x64x64xf32, #tpu.memory_space<vmem>>, vector<1x64x64xf32>
    %953 = vector.shape_cast %952 : vector<1x64x64xf32> to vector<64x64xf32>
    %c1_389 = arith.constant 1 : index
    %c0_390 = arith.constant 0 : index
    %c0_391 = arith.constant 0 : index
    %954 = vector.load %arg15[%c1_389, %c0_390, %c0_391] : memref<4x64x64xf32, #tpu.memory_space<vmem>>, vector<1x64x64xf32>
    %955 = vector.shape_cast %954 : vector<1x64x64xf32> to vector<64x64xf32>
    %c2_392 = arith.constant 2 : index
    %c0_393 = arith.constant 0 : index
    %c0_394 = arith.constant 0 : index
    %956 = vector.load %arg15[%c2_392, %c0_393, %c0_394] : memref<4x64x64xf32, #tpu.memory_space<vmem>>, vector<1x64x64xf32>
    %957 = vector.shape_cast %956 : vector<1x64x64xf32> to vector<64x64xf32>
    %c3_395 = arith.constant 3 : index
    %c0_396 = arith.constant 0 : index
    %c0_397 = arith.constant 0 : index
    %958 = vector.load %arg15[%c3_395, %c0_396, %c0_397] : memref<4x64x64xf32, #tpu.memory_space<vmem>>, vector<1x64x64xf32>
    %959 = vector.shape_cast %958 : vector<1x64x64xf32> to vector<64x64xf32>
    %c0_398 = arith.constant 0 : index
    %c0_399 = arith.constant 0 : index
    %c0_400 = arith.constant 0 : index
    %960 = vector.load %arg16[%c0_398, %c0_399, %c0_400] : memref<4x1x64xf32, #tpu.memory_space<vmem>>, vector<1x1x64xf32>
    %961 = vector.shape_cast %960 : vector<1x1x64xf32> to vector<1x64xf32>
    %c1_401 = arith.constant 1 : index
    %c0_402 = arith.constant 0 : index
    %c0_403 = arith.constant 0 : index
    %962 = vector.load %arg16[%c1_401, %c0_402, %c0_403] : memref<4x1x64xf32, #tpu.memory_space<vmem>>, vector<1x1x64xf32>
    %963 = vector.shape_cast %962 : vector<1x1x64xf32> to vector<1x64xf32>
    %c2_404 = arith.constant 2 : index
    %c0_405 = arith.constant 0 : index
    %c0_406 = arith.constant 0 : index
    %964 = vector.load %arg16[%c2_404, %c0_405, %c0_406] : memref<4x1x64xf32, #tpu.memory_space<vmem>>, vector<1x1x64xf32>
    %965 = vector.shape_cast %964 : vector<1x1x64xf32> to vector<1x64xf32>
    %c3_407 = arith.constant 3 : index
    %c0_408 = arith.constant 0 : index
    %c0_409 = arith.constant 0 : index
    %966 = vector.load %arg16[%c3_407, %c0_408, %c0_409] : memref<4x1x64xf32, #tpu.memory_space<vmem>>, vector<1x1x64xf32>
    %967 = vector.shape_cast %966 : vector<1x1x64xf32> to vector<1x64xf32>
    %cst_410 = arith.constant dense<0.000000e+00> : vector<1x64xf32>
    %968 = tpu.matmul %856, %945, %cst_410 {dimension_numbers = #tpu.dot_dimension_numbers<[1], [0], [0], [1], [0, 0, 1, 1], [], []>} : vector<1x64xf32>, vector<64x64xf32>, vector<1x64xf32> -> vector<1x64xf32>
    %969 = arith.addf %968, %961 : vector<1x64xf32>
    %cst_411 = arith.constant dense<0.000000e+00> : vector<1x64xf32>
    %970 = tpu.matmul %856, %947, %cst_411 {dimension_numbers = #tpu.dot_dimension_numbers<[1], [0], [0], [1], [0, 0, 1, 1], [], []>} : vector<1x64xf32>, vector<64x64xf32>, vector<1x64xf32> -> vector<1x64xf32>
    %971 = arith.addf %970, %963 : vector<1x64xf32>
    %cst_412 = arith.constant dense<0.000000e+00> : vector<1x64xf32>
    %972 = tpu.matmul %856, %949, %cst_412 {dimension_numbers = #tpu.dot_dimension_numbers<[1], [0], [0], [1], [0, 0, 1, 1], [], []>} : vector<1x64xf32>, vector<64x64xf32>, vector<1x64xf32> -> vector<1x64xf32>
    %973 = arith.addf %972, %965 : vector<1x64xf32>
    %cst_413 = arith.constant dense<0.000000e+00> : vector<1x64xf32>
    %974 = tpu.matmul %856, %951, %cst_413 {dimension_numbers = #tpu.dot_dimension_numbers<[1], [0], [0], [1], [0, 0, 1, 1], [], []>} : vector<1x64xf32>, vector<64x64xf32>, vector<1x64xf32> -> vector<1x64xf32>
    %975 = arith.addf %974, %967 : vector<1x64xf32>
    %cst_414 = arith.constant dense<0.000000e+00> : vector<1x64xf32>
    %976 = tpu.matmul %885, %945, %cst_414 {dimension_numbers = #tpu.dot_dimension_numbers<[1], [0], [0], [1], [0, 0, 1, 1], [], []>} : vector<1x64xf32>, vector<64x64xf32>, vector<1x64xf32> -> vector<1x64xf32>
    %977 = arith.addf %976, %961 : vector<1x64xf32>
    %cst_415 = arith.constant dense<0.000000e+00> : vector<1x64xf32>
    %978 = tpu.matmul %885, %947, %cst_415 {dimension_numbers = #tpu.dot_dimension_numbers<[1], [0], [0], [1], [0, 0, 1, 1], [], []>} : vector<1x64xf32>, vector<64x64xf32>, vector<1x64xf32> -> vector<1x64xf32>
    %979 = arith.addf %978, %963 : vector<1x64xf32>
    %cst_416 = arith.constant dense<0.000000e+00> : vector<1x64xf32>
    %980 = tpu.matmul %885, %949, %cst_416 {dimension_numbers = #tpu.dot_dimension_numbers<[1], [0], [0], [1], [0, 0, 1, 1], [], []>} : vector<1x64xf32>, vector<64x64xf32>, vector<1x64xf32> -> vector<1x64xf32>
    %981 = arith.addf %980, %965 : vector<1x64xf32>
    %cst_417 = arith.constant dense<0.000000e+00> : vector<1x64xf32>
    %982 = tpu.matmul %885, %951, %cst_417 {dimension_numbers = #tpu.dot_dimension_numbers<[1], [0], [0], [1], [0, 0, 1, 1], [], []>} : vector<1x64xf32>, vector<64x64xf32>, vector<1x64xf32> -> vector<1x64xf32>
    %983 = arith.addf %982, %967 : vector<1x64xf32>
    %cst_418 = arith.constant dense<0.000000e+00> : vector<1x64xf32>
    %984 = tpu.matmul %914, %945, %cst_418 {dimension_numbers = #tpu.dot_dimension_numbers<[1], [0], [0], [1], [0, 0, 1, 1], [], []>} : vector<1x64xf32>, vector<64x64xf32>, vector<1x64xf32> -> vector<1x64xf32>
    %985 = arith.addf %984, %961 : vector<1x64xf32>
    %cst_419 = arith.constant dense<0.000000e+00> : vector<1x64xf32>
    %986 = tpu.matmul %914, %947, %cst_419 {dimension_numbers = #tpu.dot_dimension_numbers<[1], [0], [0], [1], [0, 0, 1, 1], [], []>} : vector<1x64xf32>, vector<64x64xf32>, vector<1x64xf32> -> vector<1x64xf32>
    %987 = arith.addf %986, %963 : vector<1x64xf32>
    %cst_420 = arith.constant dense<0.000000e+00> : vector<1x64xf32>
    %988 = tpu.matmul %914, %949, %cst_420 {dimension_numbers = #tpu.dot_dimension_numbers<[1], [0], [0], [1], [0, 0, 1, 1], [], []>} : vector<1x64xf32>, vector<64x64xf32>, vector<1x64xf32> -> vector<1x64xf32>
    %989 = arith.addf %988, %965 : vector<1x64xf32>
    %cst_421 = arith.constant dense<0.000000e+00> : vector<1x64xf32>
    %990 = tpu.matmul %914, %951, %cst_421 {dimension_numbers = #tpu.dot_dimension_numbers<[1], [0], [0], [1], [0, 0, 1, 1], [], []>} : vector<1x64xf32>, vector<64x64xf32>, vector<1x64xf32> -> vector<1x64xf32>
    %991 = arith.addf %990, %967 : vector<1x64xf32>
    %cst_422 = arith.constant dense<0.000000e+00> : vector<1x64xf32>
    %992 = tpu.matmul %943, %945, %cst_422 {dimension_numbers = #tpu.dot_dimension_numbers<[1], [0], [0], [1], [0, 0, 1, 1], [], []>} : vector<1x64xf32>, vector<64x64xf32>, vector<1x64xf32> -> vector<1x64xf32>
    %993 = arith.addf %992, %961 : vector<1x64xf32>
    %cst_423 = arith.constant dense<0.000000e+00> : vector<1x64xf32>
    %994 = tpu.matmul %943, %947, %cst_423 {dimension_numbers = #tpu.dot_dimension_numbers<[1], [0], [0], [1], [0, 0, 1, 1], [], []>} : vector<1x64xf32>, vector<64x64xf32>, vector<1x64xf32> -> vector<1x64xf32>
    %995 = arith.addf %994, %963 : vector<1x64xf32>
    %cst_424 = arith.constant dense<0.000000e+00> : vector<1x64xf32>
    %996 = tpu.matmul %943, %949, %cst_424 {dimension_numbers = #tpu.dot_dimension_numbers<[1], [0], [0], [1], [0, 0, 1, 1], [], []>} : vector<1x64xf32>, vector<64x64xf32>, vector<1x64xf32> -> vector<1x64xf32>
    %997 = arith.addf %996, %965 : vector<1x64xf32>
    %cst_425 = arith.constant dense<0.000000e+00> : vector<1x64xf32>
    %998 = tpu.matmul %943, %951, %cst_425 {dimension_numbers = #tpu.dot_dimension_numbers<[1], [0], [0], [1], [0, 0, 1, 1], [], []>} : vector<1x64xf32>, vector<64x64xf32>, vector<1x64xf32> -> vector<1x64xf32>
    %999 = arith.addf %998, %967 : vector<1x64xf32>
    %cst_426 = arith.constant 0.000000e+00 : f32
    %1000 = vector.broadcast %cst_426 : f32 to vector<1x64xf32>
    %cst_427 = arith.constant 0.000000e+00 : f32
    %1001 = vector.broadcast %cst_427 : f32 to vector<1x64xf32>
    %cst_428 = arith.constant dense<0.000000e+00> : vector<1x64xf32>
    %1002 = tpu.matmul %1000, %953, %cst_428 {dimension_numbers = #tpu.dot_dimension_numbers<[1], [0], [0], [1], [0, 0, 1, 1], [], []>} : vector<1x64xf32>, vector<64x64xf32>, vector<1x64xf32> -> vector<1x64xf32>
    %1003 = arith.addf %969, %1002 : vector<1x64xf32>
    %1004 = arith.negf %1003 : vector<1x64xf32>
    %1005 = math.exp %1004 : vector<1x64xf32>
    %cst_429 = arith.constant 1.000000e+00 : f32
    %1006 = vector.broadcast %cst_429 : f32 to vector<1x64xf32>
    %1007 = arith.addf %1006, %1005 : vector<1x64xf32>
    %1008 = arith.divf %1006, %1007 : vector<1x64xf32>
    %cst_430 = arith.constant dense<0.000000e+00> : vector<1x64xf32>
    %1009 = tpu.matmul %1000, %955, %cst_430 {dimension_numbers = #tpu.dot_dimension_numbers<[1], [0], [0], [1], [0, 0, 1, 1], [], []>} : vector<1x64xf32>, vector<64x64xf32>, vector<1x64xf32> -> vector<1x64xf32>
    %1010 = arith.addf %971, %1009 : vector<1x64xf32>
    %1011 = arith.negf %1010 : vector<1x64xf32>
    %1012 = math.exp %1011 : vector<1x64xf32>
    %cst_431 = arith.constant 1.000000e+00 : f32
    %1013 = vector.broadcast %cst_431 : f32 to vector<1x64xf32>
    %1014 = arith.addf %1013, %1012 : vector<1x64xf32>
    %1015 = arith.divf %1013, %1014 : vector<1x64xf32>
    %cst_432 = arith.constant dense<0.000000e+00> : vector<1x64xf32>
    %1016 = tpu.matmul %1000, %957, %cst_432 {dimension_numbers = #tpu.dot_dimension_numbers<[1], [0], [0], [1], [0, 0, 1, 1], [], []>} : vector<1x64xf32>, vector<64x64xf32>, vector<1x64xf32> -> vector<1x64xf32>
    %1017 = arith.addf %973, %1016 : vector<1x64xf32>
    %1018 = math.tanh %1017 : vector<1x64xf32>
    %cst_433 = arith.constant dense<0.000000e+00> : vector<1x64xf32>
    %1019 = tpu.matmul %1000, %959, %cst_433 {dimension_numbers = #tpu.dot_dimension_numbers<[1], [0], [0], [1], [0, 0, 1, 1], [], []>} : vector<1x64xf32>, vector<64x64xf32>, vector<1x64xf32> -> vector<1x64xf32>
    %1020 = arith.addf %975, %1019 : vector<1x64xf32>
    %1021 = arith.negf %1020 : vector<1x64xf32>
    %1022 = math.exp %1021 : vector<1x64xf32>
    %cst_434 = arith.constant 1.000000e+00 : f32
    %1023 = vector.broadcast %cst_434 : f32 to vector<1x64xf32>
    %1024 = arith.addf %1023, %1022 : vector<1x64xf32>
    %1025 = arith.divf %1023, %1024 : vector<1x64xf32>
    %1026 = arith.mulf %1015, %1001 : vector<1x64xf32>
    %1027 = arith.mulf %1008, %1018 : vector<1x64xf32>
    %1028 = arith.addf %1026, %1027 : vector<1x64xf32>
    %1029 = math.tanh %1028 : vector<1x64xf32>
    %1030 = arith.mulf %1025, %1029 : vector<1x64xf32>
    %cst_435 = arith.constant dense<0.000000e+00> : vector<1x64xf32>
    %1031 = tpu.matmul %1030, %953, %cst_435 {dimension_numbers = #tpu.dot_dimension_numbers<[1], [0], [0], [1], [0, 0, 1, 1], [], []>} : vector<1x64xf32>, vector<64x64xf32>, vector<1x64xf32> -> vector<1x64xf32>
    %1032 = arith.addf %977, %1031 : vector<1x64xf32>
    %1033 = arith.negf %1032 : vector<1x64xf32>
    %1034 = math.exp %1033 : vector<1x64xf32>
    %cst_436 = arith.constant 1.000000e+00 : f32
    %1035 = vector.broadcast %cst_436 : f32 to vector<1x64xf32>
    %1036 = arith.addf %1035, %1034 : vector<1x64xf32>
    %1037 = arith.divf %1035, %1036 : vector<1x64xf32>
    %cst_437 = arith.constant dense<0.000000e+00> : vector<1x64xf32>
    %1038 = tpu.matmul %1030, %955, %cst_437 {dimension_numbers = #tpu.dot_dimension_numbers<[1], [0], [0], [1], [0, 0, 1, 1], [], []>} : vector<1x64xf32>, vector<64x64xf32>, vector<1x64xf32> -> vector<1x64xf32>
    %1039 = arith.addf %979, %1038 : vector<1x64xf32>
    %1040 = arith.negf %1039 : vector<1x64xf32>
    %1041 = math.exp %1040 : vector<1x64xf32>
    %cst_438 = arith.constant 1.000000e+00 : f32
    %1042 = vector.broadcast %cst_438 : f32 to vector<1x64xf32>
    %1043 = arith.addf %1042, %1041 : vector<1x64xf32>
    %1044 = arith.divf %1042, %1043 : vector<1x64xf32>
    %cst_439 = arith.constant dense<0.000000e+00> : vector<1x64xf32>
    %1045 = tpu.matmul %1030, %957, %cst_439 {dimension_numbers = #tpu.dot_dimension_numbers<[1], [0], [0], [1], [0, 0, 1, 1], [], []>} : vector<1x64xf32>, vector<64x64xf32>, vector<1x64xf32> -> vector<1x64xf32>
    %1046 = arith.addf %981, %1045 : vector<1x64xf32>
    %1047 = math.tanh %1046 : vector<1x64xf32>
    %cst_440 = arith.constant dense<0.000000e+00> : vector<1x64xf32>
    %1048 = tpu.matmul %1030, %959, %cst_440 {dimension_numbers = #tpu.dot_dimension_numbers<[1], [0], [0], [1], [0, 0, 1, 1], [], []>} : vector<1x64xf32>, vector<64x64xf32>, vector<1x64xf32> -> vector<1x64xf32>
    %1049 = arith.addf %983, %1048 : vector<1x64xf32>
    %1050 = arith.negf %1049 : vector<1x64xf32>
    %1051 = math.exp %1050 : vector<1x64xf32>
    %cst_441 = arith.constant 1.000000e+00 : f32
    %1052 = vector.broadcast %cst_441 : f32 to vector<1x64xf32>
    %1053 = arith.addf %1052, %1051 : vector<1x64xf32>
    %1054 = arith.divf %1052, %1053 : vector<1x64xf32>
    %1055 = arith.mulf %1044, %1028 : vector<1x64xf32>
    %1056 = arith.mulf %1037, %1047 : vector<1x64xf32>
    %1057 = arith.addf %1055, %1056 : vector<1x64xf32>
    %1058 = math.tanh %1057 : vector<1x64xf32>
    %1059 = arith.mulf %1054, %1058 : vector<1x64xf32>
    %cst_442 = arith.constant dense<0.000000e+00> : vector<1x64xf32>
    %1060 = tpu.matmul %1059, %953, %cst_442 {dimension_numbers = #tpu.dot_dimension_numbers<[1], [0], [0], [1], [0, 0, 1, 1], [], []>} : vector<1x64xf32>, vector<64x64xf32>, vector<1x64xf32> -> vector<1x64xf32>
    %1061 = arith.addf %985, %1060 : vector<1x64xf32>
    %1062 = arith.negf %1061 : vector<1x64xf32>
    %1063 = math.exp %1062 : vector<1x64xf32>
    %cst_443 = arith.constant 1.000000e+00 : f32
    %1064 = vector.broadcast %cst_443 : f32 to vector<1x64xf32>
    %1065 = arith.addf %1064, %1063 : vector<1x64xf32>
    %1066 = arith.divf %1064, %1065 : vector<1x64xf32>
    %cst_444 = arith.constant dense<0.000000e+00> : vector<1x64xf32>
    %1067 = tpu.matmul %1059, %955, %cst_444 {dimension_numbers = #tpu.dot_dimension_numbers<[1], [0], [0], [1], [0, 0, 1, 1], [], []>} : vector<1x64xf32>, vector<64x64xf32>, vector<1x64xf32> -> vector<1x64xf32>
    %1068 = arith.addf %987, %1067 : vector<1x64xf32>
    %1069 = arith.negf %1068 : vector<1x64xf32>
    %1070 = math.exp %1069 : vector<1x64xf32>
    %cst_445 = arith.constant 1.000000e+00 : f32
    %1071 = vector.broadcast %cst_445 : f32 to vector<1x64xf32>
    %1072 = arith.addf %1071, %1070 : vector<1x64xf32>
    %1073 = arith.divf %1071, %1072 : vector<1x64xf32>
    %cst_446 = arith.constant dense<0.000000e+00> : vector<1x64xf32>
    %1074 = tpu.matmul %1059, %957, %cst_446 {dimension_numbers = #tpu.dot_dimension_numbers<[1], [0], [0], [1], [0, 0, 1, 1], [], []>} : vector<1x64xf32>, vector<64x64xf32>, vector<1x64xf32> -> vector<1x64xf32>
    %1075 = arith.addf %989, %1074 : vector<1x64xf32>
    %1076 = math.tanh %1075 : vector<1x64xf32>
    %cst_447 = arith.constant dense<0.000000e+00> : vector<1x64xf32>
    %1077 = tpu.matmul %1059, %959, %cst_447 {dimension_numbers = #tpu.dot_dimension_numbers<[1], [0], [0], [1], [0, 0, 1, 1], [], []>} : vector<1x64xf32>, vector<64x64xf32>, vector<1x64xf32> -> vector<1x64xf32>
    %1078 = arith.addf %991, %1077 : vector<1x64xf32>
    %1079 = arith.negf %1078 : vector<1x64xf32>
    %1080 = math.exp %1079 : vector<1x64xf32>
    %cst_448 = arith.constant 1.000000e+00 : f32
    %1081 = vector.broadcast %cst_448 : f32 to vector<1x64xf32>
    %1082 = arith.addf %1081, %1080 : vector<1x64xf32>
    %1083 = arith.divf %1081, %1082 : vector<1x64xf32>
    %1084 = arith.mulf %1073, %1057 : vector<1x64xf32>
    %1085 = arith.mulf %1066, %1076 : vector<1x64xf32>
    %1086 = arith.addf %1084, %1085 : vector<1x64xf32>
    %1087 = math.tanh %1086 : vector<1x64xf32>
    %1088 = arith.mulf %1083, %1087 : vector<1x64xf32>
    %cst_449 = arith.constant dense<0.000000e+00> : vector<1x64xf32>
    %1089 = tpu.matmul %1088, %953, %cst_449 {dimension_numbers = #tpu.dot_dimension_numbers<[1], [0], [0], [1], [0, 0, 1, 1], [], []>} : vector<1x64xf32>, vector<64x64xf32>, vector<1x64xf32> -> vector<1x64xf32>
    %1090 = arith.addf %993, %1089 : vector<1x64xf32>
    %1091 = arith.negf %1090 : vector<1x64xf32>
    %1092 = math.exp %1091 : vector<1x64xf32>
    %cst_450 = arith.constant 1.000000e+00 : f32
    %1093 = vector.broadcast %cst_450 : f32 to vector<1x64xf32>
    %1094 = arith.addf %1093, %1092 : vector<1x64xf32>
    %1095 = arith.divf %1093, %1094 : vector<1x64xf32>
    %cst_451 = arith.constant dense<0.000000e+00> : vector<1x64xf32>
    %1096 = tpu.matmul %1088, %955, %cst_451 {dimension_numbers = #tpu.dot_dimension_numbers<[1], [0], [0], [1], [0, 0, 1, 1], [], []>} : vector<1x64xf32>, vector<64x64xf32>, vector<1x64xf32> -> vector<1x64xf32>
    %1097 = arith.addf %995, %1096 : vector<1x64xf32>
    %1098 = arith.negf %1097 : vector<1x64xf32>
    %1099 = math.exp %1098 : vector<1x64xf32>
    %cst_452 = arith.constant 1.000000e+00 : f32
    %1100 = vector.broadcast %cst_452 : f32 to vector<1x64xf32>
    %1101 = arith.addf %1100, %1099 : vector<1x64xf32>
    %1102 = arith.divf %1100, %1101 : vector<1x64xf32>
    %cst_453 = arith.constant dense<0.000000e+00> : vector<1x64xf32>
    %1103 = tpu.matmul %1088, %957, %cst_453 {dimension_numbers = #tpu.dot_dimension_numbers<[1], [0], [0], [1], [0, 0, 1, 1], [], []>} : vector<1x64xf32>, vector<64x64xf32>, vector<1x64xf32> -> vector<1x64xf32>
    %1104 = arith.addf %997, %1103 : vector<1x64xf32>
    %1105 = math.tanh %1104 : vector<1x64xf32>
    %cst_454 = arith.constant dense<0.000000e+00> : vector<1x64xf32>
    %1106 = tpu.matmul %1088, %959, %cst_454 {dimension_numbers = #tpu.dot_dimension_numbers<[1], [0], [0], [1], [0, 0, 1, 1], [], []>} : vector<1x64xf32>, vector<64x64xf32>, vector<1x64xf32> -> vector<1x64xf32>
    %1107 = arith.addf %999, %1106 : vector<1x64xf32>
    %1108 = arith.negf %1107 : vector<1x64xf32>
    %1109 = math.exp %1108 : vector<1x64xf32>
    %cst_455 = arith.constant 1.000000e+00 : f32
    %1110 = vector.broadcast %cst_455 : f32 to vector<1x64xf32>
    %1111 = arith.addf %1110, %1109 : vector<1x64xf32>
    %1112 = arith.divf %1110, %1111 : vector<1x64xf32>
    %1113 = arith.mulf %1102, %1086 : vector<1x64xf32>
    %1114 = arith.mulf %1095, %1105 : vector<1x64xf32>
    %1115 = arith.addf %1113, %1114 : vector<1x64xf32>
    %1116 = math.tanh %1115 : vector<1x64xf32>
    %1117 = arith.mulf %1112, %1116 : vector<1x64xf32>
    %1118 = tpu.concatenate %1030, %1059, %1088, %1117 in 0 : vector<1x64xf32>, vector<1x64xf32>, vector<1x64xf32>, vector<1x64xf32> -> vector<4x64xf32>
    %c0_456 = arith.constant 0 : index
    %c0_457 = arith.constant 0 : index
    %1119 = vector.load %arg19[%c0_456, %c0_457] : memref<64x64xf32, #tpu.memory_space<vmem>>, vector<64x64xf32>
    %cst_458 = arith.constant dense<0.000000e+00> : vector<4x64xf32>
    %1120 = tpu.matmul %1118, %1119, %cst_458 {dimension_numbers = #tpu.dot_dimension_numbers<[1], [0], [0], [1], [0, 0, 1, 1], [], []>} : vector<4x64xf32>, vector<64x64xf32>, vector<4x64xf32> -> vector<4x64xf32>
    %c0_459 = arith.constant 0 : index
    %c0_460 = arith.constant 0 : index
    %1121 = vector.load %arg20[%c0_459, %c0_460] : memref<1x64xf32, #tpu.memory_space<vmem>>, vector<1x64xf32>
    %1122 = vector.broadcast %1121 : vector<1x64xf32> to vector<4x64xf32>
    %1123 = arith.addf %1120, %1122 : vector<4x64xf32>
    %1124 = vector.broadcast %943 : vector<1x64xf32> to vector<4x64xf32>
    %1125 = arith.mulf %1123, %1124 : vector<4x64xf32>
    %cst_461 = arith.constant dense<0.000000e+00> : vector<4xf32>
    %1126 = vector.multi_reduction <add>, %1125, %cst_461 [1] : vector<4x64xf32> to vector<4xf32>
    %1127 = vector.shape_cast %1126 : vector<4xf32> to vector<4x1xf32>
    %cst_462 = arith.constant dense<0xFF800000> : vector<1xf32>
    %1128 = vector.multi_reduction <maximumf>, %1127, %cst_462 [0] : vector<4x1xf32> to vector<1xf32>
    %1129 = vector.shape_cast %1128 : vector<1xf32> to vector<1x1xf32>
    %1130 = vector.broadcast %1129 : vector<1x1xf32> to vector<4x1xf32>
    %1131 = arith.subf %1127, %1130 : vector<4x1xf32>
    %1132 = math.exp %1131 : vector<4x1xf32>
    %cst_463 = arith.constant dense<0.000000e+00> : vector<1xf32>
    %1133 = vector.multi_reduction <add>, %1132, %cst_463 [0] : vector<4x1xf32> to vector<1xf32>
    %1134 = vector.shape_cast %1133 : vector<1xf32> to vector<1x1xf32>
    %1135 = vector.broadcast %1134 : vector<1x1xf32> to vector<4x1xf32>
    %1136 = arith.divf %1132, %1135 : vector<4x1xf32>
    %1137 = vector.broadcast %1136 : vector<4x1xf32> to vector<4x64xf32>
    %1138 = arith.mulf %1137, %1118 : vector<4x64xf32>
    %cst_464 = arith.constant dense<0.000000e+00> : vector<64xf32>
    %1139 = vector.multi_reduction <add>, %1138, %cst_464 [0] : vector<4x64xf32> to vector<64xf32>
    %1140 = vector.shape_cast %1139 : vector<64xf32> to vector<1x64xf32>
    %c0_465 = arith.constant 0 : index
    %c0_466 = arith.constant 0 : index
    %1141 = vector.load %arg21[%c0_465, %c0_466] : memref<64x48xf32, #tpu.memory_space<vmem>>, vector<64x48xf32>
    %cst_467 = arith.constant dense<0.000000e+00> : vector<1x48xf32>
    %1142 = tpu.matmul %1140, %1141, %cst_467 {dimension_numbers = #tpu.dot_dimension_numbers<[1], [0], [0], [1], [0, 0, 1, 1], [], []>} : vector<1x64xf32>, vector<64x48xf32>, vector<1x48xf32> -> vector<1x48xf32>
    %c0_468 = arith.constant 0 : index
    %c0_469 = arith.constant 0 : index
    %1143 = vector.load %arg22[%c0_468, %c0_469] : memref<1x48xf32, #tpu.memory_space<vmem>>, vector<1x48xf32>
    %1144 = arith.addf %1142, %1143 : vector<1x48xf32>
    %c0_470 = arith.constant 0 : index
    %c0_471 = arith.constant 0 : index
    %1145 = vector.load %arg23[%c0_470, %c0_471] : memref<48x16xf32, #tpu.memory_space<vmem>>, vector<48x16xf32>
    %cst_472 = arith.constant dense<0.000000e+00> : vector<1x16xf32>
    %1146 = tpu.matmul %1144, %1145, %cst_472 {dimension_numbers = #tpu.dot_dimension_numbers<[1], [0], [0], [1], [0, 0, 1, 1], [], []>} : vector<1x48xf32>, vector<48x16xf32>, vector<1x16xf32> -> vector<1x16xf32>
    %c0_473 = arith.constant 0 : index
    %c0_474 = arith.constant 0 : index
    %1147 = vector.load %arg24[%c0_473, %c0_474] : memref<1x16xf32, #tpu.memory_space<vmem>>, vector<1x16xf32>
    %1148 = arith.addf %1146, %1147 : vector<1x16xf32>
    %c0_475 = arith.constant 0 : index
    %c0_476 = arith.constant 0 : index
    %1149 = vector.load %arg25[%c0_475, %c0_476] : memref<4x16xf32, #tpu.memory_space<vmem>>, vector<4x16xf32>
    %1150 = vector.broadcast %1148 : vector<1x16xf32> to vector<4x16xf32>
    %1151 = arith.mulf %1149, %1150 : vector<4x16xf32>
    %cst_477 = arith.constant dense<0.000000e+00> : vector<4xf32>
    %1152 = vector.multi_reduction <add>, %1151, %cst_477 [1] : vector<4x16xf32> to vector<4xf32>
    %1153 = vector.shape_cast %1152 : vector<4xf32> to vector<4x1xf32>
    %c0_478 = arith.constant 0 : index
    %c0_479 = arith.constant 0 : index
    %1154 = vector.load %arg26[%c0_478, %c0_479] : memref<4x8xf32, #tpu.memory_space<vmem>>, vector<4x8xf32>
    %c0_480 = arith.constant 0 : index
    %c0_481 = arith.constant 0 : index
    %1155 = vector.load %arg1[%c0_480, %c0_481] : memref<4x8xf32, #tpu.memory_space<vmem>>, vector<4x8xf32>
    %1156 = arith.mulf %1154, %1155 : vector<4x8xf32>
    %cst_482 = arith.constant dense<0.000000e+00> : vector<4xf32>
    %1157 = vector.multi_reduction <add>, %1156, %cst_482 [1] : vector<4x8xf32> to vector<4xf32>
    %1158 = vector.shape_cast %1157 : vector<4xf32> to vector<4x1xf32>
    %1159 = arith.addf %1153, %1158 : vector<4x1xf32>
    %c0_483 = arith.constant 0 : index
    %c0_484 = arith.constant 0 : index
    %1160 = vector.load %arg27[%c0_483, %c0_484] : memref<4x1xf32, #tpu.memory_space<vmem>>, vector<4x1xf32>
    %1161 = arith.addf %1159, %1160 : vector<4x1xf32>
    %c0_485 = arith.constant 0 : index
    %c0_486 = arith.constant 0 : index
    %1162 = vector.load %arg28[%c0_485, %c0_486] : memref<4x1xf32, #tpu.memory_space<vmem>>, vector<4x1xf32>
    tpu.vector_store %arg28[%c0_485, %c0_486], %1161 {strides = array<i32>} : memref<4x1xf32, #tpu.memory_space<vmem>>, vector<4x1xf32>,
    return
  }
}

</mosaic_0001>

<bundles_post_ra>
// kernel: tpu_custom_call.1
= control target key start
LH: loop header
LB: loop body
LE: loop exit
PB: predicated region body
PF: predicated region fallthrough
CT: control target
= control target key end

     0   :  { %s24128_s0 = inlined_call_operand.hbm [shape: f32[12,8,32], index: 0, kind: input, shape index: {}]   ;;  %s24129_s1 = inlined_call_operand.hbm [shape: f32[4,8], index: 1, kind: input, shape index: {}]   ;;  %s24130_s2 = inlined_call_operand.vmem [shape: f32[4,32,32], index: 2, kind: input, shape index: {}]   ;;  %s24131_s3 = inlined_call_operand.hbm [shape: f32[4,32,32], index: 3, kind: input, shape index: {}]   ;;  %s24132_s4 = inlined_call_operand.hbm [shape: f32[4,1,32], index: 4, kind: input, shape index: {}]   ;;  %s24133_s5 = inlined_call_operand.hbm [shape: f32[4,32,32], index: 5, kind: input, shape index: {}]   ;;  %s24134_s6 = inlined_call_operand.hbm [shape: f32[4,32,32], index: 6, kind: input, shape index: {}]   ;;  %s24135_s7 = inlined_call_operand.hbm [shape: f32[4,1,32], index: 7, kind: input, shape index: {}]   ;;  %s24136_s8 = inlined_call_operand.hbm [shape: f32[4,32,32], index: 8, kind: input, shape index: {}]   ;;  %s24137_s9 = inlined_call_operand.hbm [shape: f32[4,32,32], index: 9, kind: input, shape index: {}]   ;;  %s24138_s10 = inlined_call_operand.hbm [shape: f32[4,1,32], index: 10, kind: input, shape index: {}]   ;;  %s24139_s11 = inlined_call_operand.hbm [shape: f32[4,32,64], index: 11, kind: input, shape index: {}]   ;;  %s24140_s12 = inlined_call_operand.hbm [shape: f32[4,64,64], index: 12, kind: input, shape index: {}]   ;;  %s24141_s13 = inlined_call_operand.hbm [shape: f32[4,1,64], index: 13, kind: input, shape index: {}]   ;;  %s24142_s14 = inlined_call_operand.hbm [shape: f32[4,64,64], index: 14, kind: input, shape index: {}]   ;;  %s24143_s15 = inlined_call_operand.hbm [shape: f32[4,64,64], index: 15, kind: input, shape index: {}]   ;;  %s24144_s16 = inlined_call_operand.hbm [shape: f32[4,1,64], index: 16, kind: input, shape index: {}]   ;;  %s24145_s17 = inlined_call_operand.hbm [shape: f32[32,32], index: 17, kind: input, shape index: {}]   ;;  %s24146_s18 = inlined_call_operand.vmem [shape: f32[1,32], index: 18, kind: input, shape index: {}]   ;;  %s24147_s19 = inlined_call_operand.vmem [shape: f32[64,64], index: 19, kind: input, shape index: {}]   ;;  %s24148_s20 = inlined_call_operand.hbm [shape: f32[1,64], index: 20, kind: input, shape index: {}]   ;;  %s24149_s21 = inlined_call_operand.vmem [shape: f32[64,48], index: 21, kind: input, shape index: {}]   ;;  %s24150_s22 = inlined_call_operand.vmem [shape: f32[1,48], index: 22, kind: input, shape index: {}]   ;;  %s24151_s23 = inlined_call_operand.vmem [shape: f32[48,16], index: 23, kind: input, shape index: {}]   ;;  %s24152_s24 = inlined_call_operand.vmem [shape: f32[1,16], index: 24, kind: input, shape index: {}]   ;;  %s24153_s25 = inlined_call_operand.vmem [shape: f32[4,16], index: 25, kind: input, shape index: {}]   ;;  %s24154_s26 = inlined_call_operand.vmem [shape: f32[4,8], index: 26, kind: input, shape index: {}]   ;;  %s24155_s27 = inlined_call_operand.vmem [shape: f32[4,1], index: 27, kind: input, shape index: {}]   ;;  %s24156_s28 = inlined_call_operand.vmem [shape: f32[4,1], index: 28, kind: output, shape index: {}]  }
   0x1   :  { %24165 = sst [smem:[#allocation74_spill]] %s24128_s0 }
   0x2   :  { %24166 = sst [smem:[#allocation75_spill]] %s24129_s1 }
   0x3   :  { %24167 = sst [smem:[#allocation76_spill]] %s24130_s2 }
   0x4   :  { %24168 = sst [smem:[#allocation77_spill]] %s24131_s3 }
   0x5   :  { %24169 = sst [smem:[#allocation78_spill]] %s24132_s4 }
   0x6   :  { %24170 = sst [smem:[#allocation79_spill]] %s24133_s5 }
   0x7   :  { %24171 = sst [smem:[#allocation80_spill]] %s24134_s6 }
   0x8   :  { %24172 = sst [smem:[#allocation81_spill]] %s24135_s7 }
   0x9   :  { %24173 = sst [smem:[#allocation82_spill]] %s24136_s8 }
   0xa   :  { %24174 = sst [smem:[#allocation83_spill]] %s24137_s9 }
   0xb   :  { %24175 = sst [smem:[#allocation84_spill]] %s24138_s10 }
   0xc   :  { %24176 = sst [smem:[#allocation85_spill]] %s24139_s11 }
   0xd   :  { %24177 = sst [smem:[#allocation86_spill]] %s24140_s12 }
   0xe   :  { %24178 = sst [smem:[#allocation87_spill]] %s24155_s27 }
   0xf   :  { %24179 = sst [smem:[#allocation88_spill]] %s24156_s28 }
  0x10   :  { %33 = vsyncpa [#allocation3], 0 }
  0x11   :  { %34 = vsyncpa [#allocation5], 0 }
  0x12   :  { %35 = vsyncpa [#allocation8], 0 }
  0x13   :  { %36 = vsyncpa [#allocation11], 0 }
  0x14   :  { %37 = vsyncpa [#allocation14], 0 }
  0x15   :  { %38 = vsyncpa [#allocation17], 0 }
  0x16   :  { %39 = vsyncpa [#allocation20], 0 }
  0x17   :  { %40 = vsyncpa [#allocation23], 0 }
  0x18   :  { %41 = vsyncpa [#allocation26], 0 }
  0x19   :  { %42 = vsyncpa [#allocation29], 0  ;;  %s19969_s8 = smov [#allocation4]   ;;  %s19970_s9 = smov [#allocation7]  }
  0x1a   :  { %s61_s5 = sshll.u32 %s19969_s8, 4  ;;  %s84_s30 = sshll.u32 %s19970_s9, 4  ;;  %s62_s5 = int_to_ptr.vmem [resolvable:$true] %s61_s5  ;;  %s85_s30 = int_to_ptr.vmem [resolvable:$true] %s84_s30 }
  0x1b   :  { %s19597_s3 = scalar_lea.vmem %s62_s5, 64  ;;  %p19602_p1 = scmp.lt.s32.totalorder %s62_s5, %s62_s5 }
  0x1c   :  { %p19598_p0 = scmp.ne.s32.totalorder %s62_s5, %s19597_s3  ;;  %p19603_p2 = scmp.lt.s32.totalorder %s19597_s3, %s19597_s3 }
  0x1e   :  { %p19604_p3 = por %p19603_p2, %p19602_p1 }
  0x20   :  { %p19605_p4 = pnand %p19604_p3, %p19598_p0 }
  0x22   :  { %19608 = shalt.err (!%p19605_p4)
}
  0x23   :  { %s24180_s0 = sld [smem:[#allocation75_spill]]  ;;  %s19617_s11 = scalar_lea.vmem %s85_s30, 64 }
  0x24   :  { %p19618_p5 = scmp.ne.s32.totalorder %s85_s30, %s19617_s11  ;;  %p19622_p6 = scmp.lt.s32.totalorder %s85_s30, %s85_s30 }
  0x25   :  { %p19623_p7 = scmp.lt.s32.totalorder %s19617_s11, %s19617_s11 }
  0x27   :  { %p19624_p8 = por %p19623_p7, %p19622_p6 }
  0x29   :  { %64 = dma.hbm_to_vmem [thread:$0]  %s24180_s0, 64, %s62_s5, [#allocation5]  }
  0x2a   :  { %p19625_p9 = pnand %p19624_p8, %p19618_p5 }
  0x2c   :  { %19628 = shalt.err (!%p19625_p9)
}
  0x2d   :  { %s24158_s29 = smov 16   ;;  %s24160_s2 = smov 1  }
  0x2e   :  { %s24181_s1 = sld [smem:[#allocation78_spill]]  ;;  %s19973_s4 = smov [#allocation10]  }
  0x2f   :  { %s108_s8 = sshll.u32 %s19973_s4, 4  ;;  %s19974_s9 = smov [#allocation13]   ;;  %s109_s8 = int_to_ptr.vmem [resolvable:$true] %s108_s8 }
  0x30   :  { %s132_s5 = sshll.u32 %s19974_s9, 4  ;;  %s19637_s3 = scalar_lea.vmem %s109_s8, 2048  ;;  %s133_s5 = int_to_ptr.vmem [resolvable:$true] %s132_s5 }
  0x31   :  { %p19638_p10 = scmp.ne.s32.totalorder %s109_s8, %s19637_s3  ;;  %p19642_p11 = scmp.lt.s32.totalorder %s109_s8, %s109_s8 }
  0x32   :  { %p19643_p12 = scmp.lt.s32.totalorder %s19637_s3, %s19637_s3 }
  0x34   :  { %90 = dma.hbm_to_vmem [thread:$0]  %s24181_s1, 64, %s85_s30, [#allocation8], %s24158_s29, %s24158_s29, %s24160_s2  }
  0x35   :  { %p19644_p13 = por %p19643_p12, %p19642_p11 }
  0x37   :  { %p19645_p0 = pnand %p19644_p13, %p19638_p10 }
  0x39   :  { %19648 = shalt.err (!%p19645_p0)
}
  0x3a   :  { %s19975_s6 = smov 128   ;;  %s19976_s10 = smov 8  }
  0x3b   :  { %s24182_s11 = sld [smem:[#allocation80_spill]]  ;;  %s19657_s7 = scalar_lea.vmem %s133_s5, 2048 }
  0x3c   :  { %p19658_p1 = scmp.ne.s32.totalorder %s133_s5, %s19657_s7  ;;  %p19662_p2 = scmp.lt.s32.totalorder %s133_s5, %s133_s5 }
  0x3d   :  { %p19663_p3 = scmp.lt.s32.totalorder %s19657_s7, %s19657_s7 }
  0x3f   :  { %p19664_p4 = por %p19663_p3, %p19662_p2 }
  0x41   :  { %114 = dma.hbm_to_vmem [thread:$0]  %s24182_s11, 2048, %s109_s8, [#allocation11], %s19975_s6, %s19975_s6, %s19976_s10  }
  0x42   :  { %p19665_p5 = pnand %p19664_p4, %p19658_p1 }
  0x44   :  { %19668 = shalt.err (!%p19665_p5)
}
  0x45   :  { %s24183_s4 = sld [smem:[#allocation82_spill]]  ;;  %s19977_s9 = smov [#allocation16]  }
  0x46   :  { %s156_s3 = sshll.u32 %s19977_s9, 4  ;;  %s19978_s29 = smov [#allocation19]   ;;  %s157_s3 = int_to_ptr.vmem [resolvable:$true] %s156_s3 }
  0x47   :  { %s180_s2 = sshll.u32 %s19978_s29, 4  ;;  %s19677_s8 = scalar_lea.vmem %s157_s3, 64  ;;  %s181_s2 = int_to_ptr.vmem [resolvable:$true] %s180_s2 }
  0x48   :  { %p19678_p6 = scmp.ne.s32.totalorder %s157_s3, %s19677_s8  ;;  %p19682_p7 = scmp.lt.s32.totalorder %s157_s3, %s157_s3 }
  0x49   :  { %p19683_p8 = scmp.lt.s32.totalorder %s19677_s8, %s19677_s8 }
  0x4b   :  { %138 = dma.hbm_to_vmem [thread:$0]  %s24183_s4, 2048, %s133_s5, [#allocation14], %s19975_s6, %s19975_s6, %s19976_s10  }
  0x4c   :  { %p19684_p9 = por %p19683_p8, %p19682_p7 }
  0x4e   :  { %p19685_p10 = pnand %p19684_p9, %p19678_p6 }
  0x50   :  { %19688 = shalt.err (!%p19685_p10)
}
  0x51   :  { %s24184_s0 = smov 1   ;;  %s24185_s30 = smov 16  }
  0x52   :  { %s24186_s12 = sld [smem:[#allocation84_spill]]  ;;  %s19697_s5 = scalar_lea.vmem %s181_s2, 4096 }
  0x53   :  { %p19698_p11 = scmp.ne.s32.totalorder %s181_s2, %s19697_s5  ;;  %p19702_p12 = scmp.lt.s32.totalorder %s181_s2, %s181_s2 }
  0x54   :  { %p19703_p13 = scmp.lt.s32.totalorder %s19697_s5, %s19697_s5 }
  0x56   :  { %p19704_p0 = por %p19703_p13, %p19702_p12 }
  0x58   :  { %162 = dma.hbm_to_vmem [thread:$0]  %s24186_s12, 64, %s157_s3, [#allocation17], %s24185_s30, %s24185_s30, %s24184_s0  }
  0x59   :  { %p19705_p1 = pnand %p19704_p0, %p19698_p11 }
  0x5b   :  { %19708 = shalt.err (!%p19705_p1)
}
  0x5c   :  { %s24187_s4 = sld [smem:[#allocation86_spill]]  ;;  %s19979_s9 = smov [#allocation22]  }
  0x5d   :  { %s204_s8 = sshll.u32 %s19979_s9, 4  ;;  %s19980_s28 = smov [#allocation25]   ;;  %s205_s8 = int_to_ptr.vmem [resolvable:$true] %s204_s8 }
  0x5e   :  { %s228_s27 = sshll.u32 %s19980_s28, 4  ;;  %s19717_s3 = scalar_lea.vmem %s205_s8, 4096  ;;  %s229_s27 = int_to_ptr.vmem [resolvable:$true] %s228_s27 }
  0x5f   :  { %p19718_p2 = scmp.ne.s32.totalorder %s205_s8, %s19717_s3  ;;  %p19722_p3 = scmp.lt.s32.totalorder %s205_s8, %s205_s8 }
  0x60   :  { %p19723_p4 = scmp.lt.s32.totalorder %s19717_s3, %s19717_s3 }
  0x62   :  { %186 = dma.hbm_to_vmem [thread:$0]  %s24187_s4, 4096, %s181_s2, [#allocation20], %s19975_s6, %s19975_s6, %s19976_s10  }
  0x63   :  { %p19724_p5 = por %p19723_p4, %p19722_p3 }
  0x65   :  { %p19725_p6 = pnand %p19724_p5, %p19718_p2 }
  0x67   :  { %19728 = shalt.err (!%p19725_p6)
}
  0x68   :  { %210 = dma.hbm_to_vmem [thread:$0]  %s24142_s14, 4096, %s205_s8, [#allocation23], %s19975_s6, %s19975_s6, %s19976_s10  }
  0x69   :  { %s19737_s2 = scalar_lea.vmem %s229_s27, 64  ;;  %p19742_p8 = scmp.lt.s32.totalorder %s229_s27, %s229_s27 }
  0x6a   :  { %p19738_p7 = scmp.ne.s32.totalorder %s229_s27, %s19737_s2  ;;  %p19743_p9 = scmp.lt.s32.totalorder %s19737_s2, %s19737_s2 }
  0x6c   :  { %p19744_p10 = por %p19743_p9, %p19742_p8 }
  0x6e   :  { %p19745_p11 = pnand %p19744_p10, %p19738_p7 }
  0x70   :  { %19748 = shalt.err (!%p19745_p11)
}
  0x71   :  { %234 = dma.hbm_to_vmem [thread:$0]  %s24144_s16, 64, %s229_s27, [#allocation26], %s24185_s30, %s24185_s30, %s24184_s0  }
  0x72   :  { %s19981_s5 = smov [#allocation2]   ;;  %s19982_s1 = smov [#allocation6]  }
  0x73   :  { %s48_s29 = sshll.u32 %s19981_s5, 4  ;;  %s72_s4 = sshll.u32 %s19982_s1, 4  ;;  %s49_s29 = int_to_ptr.vmem [resolvable:$true] %s48_s29  ;;  %s73_s4 = int_to_ptr.vmem [resolvable:$true] %s72_s4 }
  0x74   :  { %s19757_s14 = scalar_lea.vmem %s49_s29, 1536  ;;  %p19762_p13 = scmp.lt.s32.totalorder %s49_s29, %s49_s29 }
  0x75   :  { %p19758_p12 = scmp.ne.s32.totalorder %s49_s29, %s19757_s14  ;;  %p19763_p0 = scmp.lt.s32.totalorder %s19757_s14, %s19757_s14 }
  0x77   :  { %p19764_p1 = por %p19763_p0, %p19762_p13 }
  0x79   :  { %p19765_p2 = pnand %p19764_p1, %p19758_p12 }
  0x7b   :  { %19768 = shalt.err (!%p19765_p2)
}
  0x7c   :  { %s24188_s3 = sld [smem:[#allocation74_spill]]  ;;  %s19777_s16 = scalar_lea.vmem %s73_s4, 2048 }
  0x7d   :  { %p19778_p3 = scmp.ne.s32.totalorder %s73_s4, %s19777_s16  ;;  %p19782_p4 = scmp.lt.s32.totalorder %s73_s4, %s73_s4 }
  0x7e   :  { %p19783_p5 = scmp.lt.s32.totalorder %s19777_s16, %s19777_s16 }
  0x80   :  { %p19784_p6 = por %p19783_p5, %p19782_p4 }
  0x82   :  { %54 = dma.hbm_to_vmem [thread:$0]  %s24188_s3, 1536, %s49_s29, [#allocation3], %s19975_s6, %s19975_s6, %s19976_s10  }
  0x83   :  { %p19785_p7 = pnand %p19784_p6, %p19778_p3 }
  0x85   :  { %19788 = shalt.err (!%p19785_p7)
}
  0x86   :  { %s24189_s7 = sld [smem:[#allocation77_spill]]  ;;  %s19983_s2 = smov [#allocation9]  }
  0x87   :  { %s96_s28 = sshll.u32 %s19983_s2, 4  ;;  %s19984_s12 = smov [#allocation12]   ;;  %s97_s28 = int_to_ptr.vmem [resolvable:$true] %s96_s28 }
  0x88   :  { %s120_s5 = sshll.u32 %s19984_s12, 4  ;;  %s19797_s29 = scalar_lea.vmem %s97_s28, 2048  ;;  %s121_s5 = int_to_ptr.vmem [resolvable:$true] %s120_s5 }
  0x89   :  { %p19798_p8 = scmp.ne.s32.totalorder %s97_s28, %s19797_s29  ;;  %p19802_p9 = scmp.lt.s32.totalorder %s97_s28, %s97_s28 }
  0x8a   :  { %p19803_p10 = scmp.lt.s32.totalorder %s19797_s29, %s19797_s29 }
  0x8c   :  { %78 = dma.hbm_to_vmem [thread:$0]  %s24189_s7, 2048, %s73_s4, [#allocation5], %s19975_s6, %s19975_s6, %s19976_s10  }
  0x8d   :  { %p19804_p11 = por %p19803_p10, %p19802_p9 }
  0x8f   :  { %p19805_p12 = pnand %p19804_p11, %p19798_p8 }
  0x91   :  { %19808 = shalt.err (!%p19805_p12)
}
  0x92   :  { %s24190_s9 = sld [smem:[#allocation79_spill]]  ;;  %s19817_s4 = scalar_lea.vmem %s121_s5, 64 }
  0x93   :  { %p19818_p13 = scmp.ne.s32.totalorder %s121_s5, %s19817_s4  ;;  %p19822_p0 = scmp.lt.s32.totalorder %s121_s5, %s121_s5 }
  0x94   :  { %p19823_p1 = scmp.lt.s32.totalorder %s19817_s4, %s19817_s4 }
  0x96   :  { %p19824_p2 = por %p19823_p1, %p19822_p0 }
  0x98   :  { %102 = dma.hbm_to_vmem [thread:$0]  %s24190_s9, 2048, %s97_s28, [#allocation8], %s19975_s6, %s19975_s6, %s19976_s10  }
  0x99   :  { %p19825_p3 = pnand %p19824_p2, %p19818_p13 }
  0x9b   :  { %19828 = shalt.err (!%p19825_p3)
}
  0x9c   :  { %s24191_s16 = sld [smem:[#allocation81_spill]]  ;;  %s19985_s27 = smov [#allocation15]  }
  0x9d   :  { %s144_s11 = sshll.u32 %s19985_s27, 4  ;;  %s19986_s7 = smov [#allocation18]   ;;  %s145_s11 = int_to_ptr.vmem [resolvable:$true] %s144_s11 }
  0x9e   :  { %s168_s2 = sshll.u32 %s19986_s7, 4  ;;  %s19837_s28 = scalar_lea.vmem %s145_s11, 2048  ;;  %s169_s2 = int_to_ptr.vmem [resolvable:$true] %s168_s2 }
  0x9f   :  { %p19838_p4 = scmp.ne.s32.totalorder %s145_s11, %s19837_s28  ;;  %p19842_p5 = scmp.lt.s32.totalorder %s145_s11, %s145_s11 }
  0xa0   :  { %p19843_p6 = scmp.lt.s32.totalorder %s19837_s28, %s19837_s28 }
  0xa2   :  { %126 = dma.hbm_to_vmem [thread:$0]  %s24191_s16, 64, %s121_s5, [#allocation11], %s24185_s30, %s24185_s30, %s24184_s0  }
  0xa3   :  { %p19844_p7 = por %p19843_p6, %p19842_p5 }
  0xa5   :  { %p19845_p8 = pnand %p19844_p7, %p19838_p4 }
  0xa7   :  { %19848 = shalt.err (!%p19845_p8)
}
  0xa8   :  { %s24192_s1 = sld [smem:[#allocation83_spill]]  ;;  %s19857_s5 = scalar_lea.vmem %s169_s2, 2048 }
  0xa9   :  { %p19858_p9 = scmp.ne.s32.totalorder %s169_s2, %s19857_s5  ;;  %p19862_p10 = scmp.lt.s32.totalorder %s169_s2, %s169_s2 }
  0xaa   :  { %p19863_p11 = scmp.lt.s32.totalorder %s19857_s5, %s19857_s5 }
  0xac   :  { %p19864_p12 = por %p19863_p11, %p19862_p10 }
  0xae   :  { %150 = dma.hbm_to_vmem [thread:$0]  %s24192_s1, 2048, %s145_s11, [#allocation14], %s19975_s6, %s19975_s6, %s19976_s10  }
  0xaf   :  { %p19865_p13 = pnand %p19864_p12, %p19858_p9 }
  0xb1   :  { %19868 = shalt.err (!%p19865_p13)
}
  0xb2   :  { %s24193_s4 = sld [smem:[#allocation85_spill]]  ;;  %s19987_s8 = smov [#allocation21]  }
  0xb3   :  { %s192_s3 = sshll.u32 %s19987_s8, 4  ;;  %s19988_s16 = smov [#allocation24]   ;;  %s193_s3 = int_to_ptr.vmem [resolvable:$true] %s192_s3 }
  0xb4   :  { %s216_s27 = sshll.u32 %s19988_s16, 4  ;;  %s19877_s11 = scalar_lea.vmem %s193_s3, 64  ;;  %s217_s27 = int_to_ptr.vmem [resolvable:$true] %s216_s27 }
  0xb5   :  { %p19878_p0 = scmp.ne.s32.totalorder %s193_s3, %s19877_s11  ;;  %p19882_p1 = scmp.lt.s32.totalorder %s193_s3, %s193_s3 }
  0xb6   :  { %p19883_p2 = scmp.lt.s32.totalorder %s19877_s11, %s19877_s11 }
  0xb8   :  { %174 = dma.hbm_to_vmem [thread:$0]  %s24193_s4, 2048, %s169_s2, [#allocation17], %s19975_s6, %s19975_s6, %s19976_s10  }
  0xb9   :  { %p19884_p3 = por %p19883_p2, %p19882_p1 }
  0xbb   :  { %p19885_p4 = pnand %p19884_p3, %p19878_p0 }
  0xbd   :  { %19888 = shalt.err (!%p19885_p4)
}
  0xbe   :  { %198 = dma.hbm_to_vmem [thread:$0]  %s24141_s13, 64, %s193_s3, [#allocation20], %s24185_s30, %s24185_s30, %s24184_s0  }
  0xbf   :  { %s19897_s2 = scalar_lea.vmem %s217_s27, 4096  ;;  %p19902_p6 = scmp.lt.s32.totalorder %s217_s27, %s217_s27 }
  0xc0   :  { %p19898_p5 = scmp.ne.s32.totalorder %s217_s27, %s19897_s2  ;;  %p19903_p7 = scmp.lt.s32.totalorder %s19897_s2, %s19897_s2 }
  0xc2   :  { %p19904_p8 = por %p19903_p7, %p19902_p6 }
  0xc4   :  { %p19905_p9 = pnand %p19904_p8, %p19898_p5 }
  0xc6   :  { %19908 = shalt.err (!%p19905_p9)
}
  0xc7   :  { %222 = dma.hbm_to_vmem [thread:$0]  %s24143_s15, 4096, %s217_s27, [#allocation23], %s19975_s6, %s19975_s6, %s19976_s10  }
  0xc8   :  { %s19989_s1 = smov [#allocation27]   ;;  %s19990_s14 = smov [#allocation28]  }
  0xc9   :  { %s240_s5 = sshll.u32 %s19989_s1, 4  ;;  %s257_s9 = sshll.u32 %s19990_s14, 4  ;;  %s241_s5 = int_to_ptr.vmem [resolvable:$true] %s240_s5  ;;  %s258_s9 = int_to_ptr.vmem [resolvable:$true] %s257_s9 }
  0xca   :  { %s19917_s13 = scalar_lea.vmem %s241_s5, 512  ;;  %p19922_p11 = scmp.lt.s32.totalorder %s241_s5, %s241_s5 }
  0xcb   :  { %p19918_p10 = scmp.ne.s32.totalorder %s241_s5, %s19917_s13  ;;  %p19923_p12 = scmp.lt.s32.totalorder %s19917_s13, %s19917_s13 }
  0xcd   :  { %p19924_p13 = por %p19923_p12, %p19922_p11 }
  0xcf   :  { %p19925_p0 = pnand %p19924_p13, %p19918_p10 }
  0xd1   :  { %19928 = shalt.err (!%p19925_p0)
}
  0xd2   :  { %246 = dma.hbm_to_vmem [thread:$0]  %s24145_s17, 512, %s241_s5, [#allocation26], %s19975_s6, %s19975_s6, %s19976_s10  }
  0xd3   :  { %s19937_s15 = scalar_lea.vmem %s258_s9, 16  ;;  %s19941_s4 = scalar_lea.vmem %s258_s9, 32 }
  0xd4   :  { %p19938_p1 = scmp.ne.s32.totalorder %s258_s9, %s19937_s15  ;;  %p19942_p2 = scmp.lt.s32.totalorder %s258_s9, %s258_s9 }
  0xd5   :  { %p19943_p3 = scmp.lt.s32.totalorder %s19941_s4, %s19937_s15 }
  0xd7   :  { %p19944_p4 = por %p19943_p3, %p19942_p2 }
  0xd9   :  { %p19945_p5 = pnand %p19944_p4, %p19938_p1 }
  0xdb   :  { %19948 = shalt.err (!%p19945_p5)
}
  0xdc   :  { %260 = dma.hbm_to_vmem [thread:$0]  %s24148_s20, 16, %s258_s9, [#allocation29]  }
  0xdd   :  { %19949 = dma.done.wait [#allocation3], 1536  }
  0xde   :  { %19950 = vsyncadd [#allocation3], 4294965760 }
  0xdf   :  { %19951 = dma.done.wait [#allocation5], 2112  }
  0xe0   :  { %19952 = vsyncadd [#allocation5], 4294965184 }
  0xe1   :  { %19953 = dma.done.wait [#allocation8], 2112  }
  0xe2   :  { %19954 = vsyncadd [#allocation8], 4294965184 }
  0xe3   :  { %19955 = dma.done.wait [#allocation11], 2112  }
  0xe4   :  { %19956 = vsyncadd [#allocation11], 4294965184 }
  0xe5   :  { %19957 = dma.done.wait [#allocation14], 4096  }
  0xe6   :  { %19958 = vsyncadd [#allocation14], 4294963200 }
  0xe7   :  { %19959 = dma.done.wait [#allocation17], 2112  }
  0xe8   :  { %19960 = vsyncadd [#allocation17], 4294965184 }
  0xe9   :  { %19961 = dma.done.wait [#allocation20], 4160  }
  0xea   :  { %19962 = vsyncadd [#allocation20], 4294963136 }
  0xeb   :  { %19963 = dma.done.wait [#allocation23], 8192  }
  0xec   :  { %19964 = vsyncadd [#allocation23], 4294959104 }
  0xed   :  { %19965 = dma.done.wait [#allocation26], 576  }
  0xee   :  { %19966 = vsyncadd [#allocation26], 4294966720 }
  0xef   :  { %19967 = dma.done.wait [#allocation29], 16  }
  0xf0   :  { %19968 = vsyncadd [#allocation29], 4294967280  ;;  %s24194_s6 = sld [smem:[#allocation76_spill]]  ;;  %vm405_vm0 = vcmask 1041409   ;;  %v20284_v8 = vld [vmem:[#allocation2] sm:$0xff]  ;;  %vm408_vm1 = vcmask 1042434  }
  0xf1   :  { %vm411_vm2 = vcmask 1043459   ;;  %vm414_vm3 = vcmask 1044484   ;;  %v20288_v9 = vld [vmem:[#allocation2 + $0x8] sm:$0xff]  ;;  %v20290_v10 = vld [vmem:[#allocation2 + $0x10] sm:$0xff]  ;;  %v20292_v11 = vld [vmem:[#allocation2 + $0x18] sm:$0xff]  ;;  %vm417_vm4 = vcmask 1045509  }
  0xf2   :  { %vm420_vm5 = vcmask 1046534   ;;  %v754_v12 = vrot.slane %v20284_v8, 1  ;;  %v20297_v13 = vld [vmem:[#allocation2 + $0x20] sm:$0xff]  ;;  %v20299_v14 = vld [vmem:[#allocation2 + $0x28] sm:$0xff]  ;;  %v20301_v15 = vld [vmem:[#allocation2 + $0x30] sm:$0xff]  ;;  %v404_v16 = vrot.slane %v20288_v9, 7 }
  0xf3   :  { %v407_v17 = vrot.slane %v20290_v10, 6  ;;  %v410_v18 = vrot.slane %v20292_v11, 5  ;;  %v20308_v19 = vld [vmem:[#allocation2 + $0x38] sm:$0xff]  ;;  %v413_v20 = vrot.slane %v20297_v13, 4  ;;  %v416_v21 = vrot.slane %v20299_v14, 3  ;;  %v20329_v27 = vld [vmem:[#allocation2 + $0x40] sm:$0xff] }
  0xf4   :  { %vm423_vm6 = vcmask 1047559   ;;  %v755_v24 = vsel %vm405_vm0, %v20288_v9, %v754_v12  ;;  %v406_v25 = vsel %vm405_vm0, %v404_v16, %v20284_v8  ;;  %v419_v26 = vrot.slane %v20301_v15, 2  ;;  %v20331_v28 = vld [vmem:[#allocation2 + $0x48] sm:$0xff]  ;;  %v20333_v29 = vld [vmem:[#allocation2 + $0x50] sm:$0xff]  ;;  %v20340_v33 = vld [vmem:[#allocation2 + $0x58] sm:$0xff]  ;;  %s24293_s5 = sld [smem:[#allocation88_spill]] }
  0xf5   :  { %v756_v30 = vrot.slane %v20290_v10, 7  ;;  %v758_v31 = vrot.slane %v20292_v11, 6  ;;  %v409_v32 = vsel %vm408_vm1, %v407_v17, %v406_v25  ;;  %v425_v34 = vrot.slane %v20331_v28, 7 }
  0xf6   :  { %v20243_v0 = vld [vmem:[%s24194_s6 + $0x18] sm:$0xff]  ;;  %v20253_v2 = vld [vmem:[%s24194_s6 + $0x10] sm:$0xff]  ;;  %v20265_v4 = vld [vmem:[%s24194_s6 + $0x8] sm:$0xff]  ;;  %v427_v35 = vrot.slane %v20333_v29, 6  ;;  %v760_v36 = vrot.slane %v20297_v13, 5  ;;  %v412_v37 = vsel %vm411_vm2, %v410_v18, %v409_v32  ;;  %v422_v38 = vrot.slane %v20308_v19, 1 }
  0xf7   :  { %v20248_v1 = vld [vmem:[%s24194_s6 + $0x38] sm:$0xff]  ;;  %16647 = vmatprep.subr.mxu0 %v20243_v0  ;;  %v20260_v3 = vld [vmem:[%s24194_s6 + $0x30] sm:$0xff]  ;;  %v20270_v5 = vld [vmem:[%s24194_s6 + $0x28] sm:$0xff]  ;;  %v429_v39 = vrot.slane %v20340_v33, 5  ;;  %v757_v40 = vsel %vm408_vm1, %v756_v30, %v755_v24  ;;  %v415_v41 = vsel %vm414_vm3, %v413_v20, %v412_v37  ;;  %vm431_vm7 = vcmask 261120  }
  0xf8   :  { %16658 = vmatprep.subr.mxu1 %v20248_v1  ;;  %16648 = vmatpush3.msra.mxu0 %v20243_v0  ;;  %v20277_v6 = vld [vmem:[%s24194_s6] sm:$0xff]  ;;  %v20315_v22 = vld [vmem:[%s24194_s6 + $0x58] sm:$0xff]  ;;  %v426_v42 = vsel %vm405_vm0, %v425_v34, %v20329_v27  ;;  %v759_v43 = vsel %vm411_vm2, %v758_v31, %v757_v40  ;;  %v418_v44 = vsel %vm417_vm4, %v416_v21, %v415_v41  ;;  %v762_v46 = vrot.slane %v20299_v14, 4  ;;  %v20371_v53 = vld [vmem:[%s24194_s6 + $0x50] sm:$0xff] }
  0xf9   :  { %16659 = vmatpush3.msra.mxu1 %v20248_v1  ;;  %v20282_v7 = vld [vmem:[%s24194_s6 + $0x20] sm:$0xff]  ;;  %16649 = vmatprep.subr.mxu0 %v20253_v2  ;;  %v20320_v23 = vld [vmem:[%s24194_s6 + $0x78] sm:$0xff]  ;;  %v428_v45 = vsel %vm408_vm1, %v427_v35, %v426_v42  ;;  %v1078_v47 = vrot.slane %v20284_v8, 2  ;;  %v421_v48 = vsel %vm420_vm5, %v419_v26, %v418_v44  ;;  %v761_v50 = vsel %vm414_vm3, %v760_v36, %v759_v43  ;;  %v20376_v54 = vld [vmem:[%s24194_s6 + $0x70] sm:$0xff] }
  0xfa   :  { %16660 = vmatprep.subr.mxu1 %v20260_v3  ;;  %16650 = vmatpush3.msra.mxu0 %v20253_v2  ;;  %v430_v49 = vsel %vm411_vm2, %v429_v39, %v428_v45  ;;  %v768_v51 = vrot.slane %v20329_v27, 1  ;;  %v424_v52 = vsel %vm423_vm6, %v422_v38, %v421_v48  ;;  %v764_v55 = vrot.slane %v20301_v15, 3  ;;  %v20389_v59 = vld [vmem:[%s24194_s6 + $0x48] sm:$0xff]  ;;  %v20408_v16 = vld [vmem:[%s24194_s6 + $0x40] sm:$0xff] }
  0xfb   :  { %16661 = vmatpush3.msra.mxu1 %v20260_v3  ;;  %16651 = vmatprep.subr.mxu0 %v20265_v4  ;;  %v1079_v56 = vrot.slane %v20288_v9, 1  ;;  %v763_v57 = vsel %vm417_vm4, %v762_v46, %v761_v50  ;;  %v770_v58 = vrot.slane %v20333_v29, 7  ;;  %v20394_v60 = vld [vmem:[%s24194_s6 + $0x68] sm:$0xff]  ;;  %v766_v63 = vrot.slane %v20308_v19, 2  ;;  %v20413_v17 = vld [vmem:[%s24194_s6 + $0x60] sm:$0xff] }
  0xfc   :  { %16662 = vmatprep.subr.mxu1 %v20270_v5  ;;  %16652 = vmatpush3.msra.mxu0 %v20265_v4  ;;  %v769_v61 = vsel %vm405_vm0, %v20331_v28, %v768_v51  ;;  %v1082_v12 = vrot.slane %v20292_v11, 7  ;;  %v765_v18 = vsel %vm420_vm5, %v764_v55, %v763_v57  ;;  %v772_v20 = vrot.slane %v20340_v33, 6 }
  0xfd   :  { %16663 = vmatpush3.msra.mxu1 %v20270_v5  ;;  %16653 = vmatprep.subr.mxu0 %v20277_v6  ;;  %v1080_v62 = vsel %vm405_vm0, %v1079_v56, %v1078_v47  ;;  %v771_v24 = vsel %vm408_vm1, %v770_v58, %v769_v61  ;;  %v1084_v25 = vrot.slane %v20297_v13, 6  ;;  %v20428_v26 = vsel %vm423_vm6, %v766_v63, %v765_v18 }
  0xfe   :  { %16664 = vmatprep.subr.mxu1 %v20282_v7  ;;  %16654 = vmatpush3.msra.mxu0 %v20277_v6  ;;  %v1081_v21 = vsel %vm408_vm1, %v20290_v10, %v1080_v62  ;;  %v1086_v31 = vrot.slane %v20299_v14, 5  ;;  %v1416_v32 = vrot.slane %v20329_v27, 3  ;;  %v20436_v34 = vsel %vm411_vm2, %v772_v20, %v771_v24 }
  0xff   :  { %16665 = vmatpush3.msra.mxu1 %v20282_v7  ;;  %16669 = vmatprep.subr.mxu0 %v20315_v22  ;;  %v1083_v30 = vsel %vm411_vm2, %v1082_v12, %v1081_v21  ;;  %v1088_v35 = vrot.slane %v20301_v15, 4  ;;  %v1417_v36 = vrot.slane %v20331_v28, 2  ;;  %v1419_v37 = vrot.slane %v20333_v29, 1 }
 0x100   :  { %16680 = vmatprep.subr.mxu1 %v20320_v23  ;;  %16655 = vmatprep.mubr.msk.f32.mxu0 %vm431_vm7, %v424_v52  ;;  %v1092_v38 = vrot.slane %v20329_v27, 2  ;;  %v1726_v39 = vrot.slane %v20284_v8, 4  ;;  %v1727_v40 = vrot.slane %v20288_v9, 3  ;;  %v1729_v41 = vrot.slane %v20290_v10, 2 }
 0x101   :  { %16666 = vmatprep.mubr.msk.f32.mxu1 %vm431_vm7, %v424_v52  ;;  %16656 = vmatmul.mubr.msk.f32.vlgmr.msra.gmra.mxu0 %vm431_vm7, %v430_v49  ;;  %v20450_v42 = vsel %vm414_vm3, %v1084_v25, %v1083_v30  ;;  %v1093_v43 = vrot.slane %v20331_v28, 1  ;;  %v1418_v44 = vsel %vm405_vm0, %v1417_v36, %v1416_v32  ;;  %v1731_v45 = vrot.slane %v20292_v11, 1 }
 0x102   :  { %16667 = vmatmul.mubr.msk.f32.vlgmr.msra.gmra.mxu1 %vm431_vm7, %v430_v49  ;;  %16670 = vmatpush3.msra.mxu0 %v20315_v22  ;;  %v1420_v46 = vsel %vm408_vm1, %v1419_v37, %v1418_v44  ;;  %v1728_v47 = vsel %vm405_vm0, %v1727_v40, %v1726_v39  ;;  %v1734_v48 = vrot.slane %v20299_v14, 7  ;;  %v1740_v55 = vrot.slane %v20329_v27, 4 }
 0x103   :  { %16681 = vmatpush3.msra.mxu1 %v20320_v23  ;;  %16671 = vmatprep.subr.mxu0 %v20371_v53  ;;  %v20465_v50 = vsel %vm411_vm2, %v20340_v33, %v1420_v46  ;;  %v1730_v51 = vsel %vm408_vm1, %v1729_v41, %v1728_v47  ;;  %v1741_v57 = vrot.slane %v20331_v28, 3  ;;  %v1743_v58 = vrot.slane %v20333_v29, 2 }
 0x104   :  { %16682 = vmatprep.subr.mxu1 %v20376_v54  ;;  %16672 = vmatpush3.msra.mxu0 %v20371_v53  ;;  %v1732_v56 = vsel %vm411_vm2, %v1731_v45, %v1730_v51  ;;  %v1745_v61 = vrot.slane %v20340_v33, 1  ;;  %v2051_v63 = vrot.slane %v20284_v8, 5  ;;  %v2052_v12 = vrot.slane %v20288_v9, 4 }
 0x105   :  { %16683 = vmatpush3.msra.mxu1 %v20376_v54  ;;  %16673 = vmatprep.subr.mxu0 %v20389_v59  ;;  %v1733_v62 = vsel %vm414_vm3, %v20297_v13, %v1732_v56  ;;  %v2054_v18 = vrot.slane %v20290_v10, 3  ;;  %v1742_v21 = vsel %vm405_vm0, %v1741_v57, %v1740_v55  ;;  %v2056_v24 = vrot.slane %v20292_v11, 2 }
 0x106   :  { %16684 = vmatprep.subr.mxu1 %v20394_v60  ;;  %16674 = vmatpush3.msra.mxu0 %v20389_v59  ;;  %v1735_v20 = vsel %vm417_vm4, %v1734_v48, %v1733_v62  ;;  %v2058_v25 = vrot.slane %v20297_v13, 1  ;;  %v1744_v32 = vsel %vm408_vm1, %v1743_v58, %v1742_v21  ;;  %v2053_v36 = vsel %vm405_vm0, %v2052_v12, %v2051_v63 }
 0x107   :  { %16685 = vmatpush3.msra.mxu1 %v20394_v60  ;;  %16675 = vmatprep.subr.mxu0 %v20408_v16  ;;  %v2061_v37 = vrot.slane %v20301_v15, 7  ;;  %v20501_v40 = vsel %vm411_vm2, %v1745_v61, %v1744_v32  ;;  %v2055_v41 = vsel %vm408_vm1, %v2054_v18, %v2053_v36  ;;  %v2063_v44 = vrot.slane %v20308_v19, 6 }
 0x108   :  { %16686 = vmatprep.subr.mxu1 %v20413_v17  ;;  %16676 = vmatpush3.msra.mxu0 %v20408_v16  ;;  %v2057_v45 = vsel %vm411_vm2, %v2056_v24, %v2055_v41  ;;  %v2065_v46 = vrot.slane %v20329_v27, 5  ;;  %v2066_v47 = vrot.slane %v20331_v28, 4  ;;  %v2068_v48 = vrot.slane %v20333_v29, 3 }
 0x109   :  { %16677 = vmatprep.mubr.msk.f32.mxu0 %vm431_vm7, %v424_v52  ;;  %16687 = vmatpush3.msra.mxu1 %v20413_v17  ;;  %v2070_v51 = vrot.slane %v20340_v33, 2  ;;  %v2377_v55 = vrot.slane %v20288_v9, 5  ;;  %v2379_v58 = vrot.slane %v20290_v10, 4  ;;  %v2381_v61 = vrot.slane %v20292_v11, 3 }
 0x10a   :  { %16688 = vmatprep.mubr.msk.f32.mxu1 %vm431_vm7, %v424_v52  ;;  %16678 = vmatmul.mubr.msk.f32.vlgmr.msra.gmra.mxu0 %vm431_vm7, %v430_v49  ;;  %v1738_v52 = vrot.slane %v20308_v19, 5  ;;  %v2067_v57 = vsel %vm405_vm0, %v2066_v47, %v2065_v46  ;;  %v2383_v18 = vrot.slane %v20297_v13, 2  ;;  %v2388_v32 = vrot.slane %v20308_v19, 7 }
 0x10b   :  { %16689 = vmatmul.mubr.msk.f32.vlgmr.msra.gmra.mxu1 %vm431_vm7, %v430_v49  ;;  %16691 = vmatprep.subr.mxu0 %v20243_v0  ;;  %v1736_v49 = vrot.slane %v20301_v15, 6  ;;  %v2069_v63 = vsel %vm408_vm1, %v2068_v48, %v2067_v57  ;;  %v2390_v36 = vrot.slane %v20329_v27, 6  ;;  %v2701_v46 = vrot.slane %v20284_v8, 7 }
 0x10c   :  { %16702 = vmatprep.subr.mxu1 %v20248_v1  ;;  %16692 = vmatpush3.msra.mxu0 %v20243_v0  ;;  %v20540_v21 = vsel %vm411_vm2, %v2070_v51, %v2069_v63  ;;  %v2704_v51 = vrot.slane %v20290_v10, 5  ;;  %v2708_v57 = vrot.slane %v20297_v13, 3  ;;  %v2710_v63 = vrot.slane %v20299_v14, 2 }
 0x10d   :  { %16703 = vmatpush3.msra.mxu1 %v20248_v1  ;;  %16693 = vmatprep.subr.mxu0 %v20253_v2  ;;  %v1737_v30 = vsel %vm420_vm5, %v1736_v49, %v1735_v20  ;;  %v2059_v49 = vsel %vm414_vm3, %v2058_v25, %v2057_v45  ;;  %v2385_v25 = vrot.slane %v20299_v14, 1  ;;  %v2395_v45 = vrot.slane %v20340_v33, 3 }
 0x10e   :  { %16704 = vmatprep.subr.mxu1 %v20260_v3  ;;  %16694 = vmatpush3.msra.mxu0 %v20253_v2  ;;  %v20498_v39 = vsel %vm423_vm6, %v1738_v52, %v1737_v30  ;;  %v2376_v52 = vrot.slane %v20284_v8, 6  ;;  %v2060_v56 = vsel %vm417_vm4, %v20299_v14, %v2059_v49  ;;  %v2702_v49 = vrot.slane %v20288_v9, 6 }
 0x10f   :  { %16705 = vmatpush3.msra.mxu1 %v20260_v3  ;;  %16695 = vmatprep.subr.mxu0 %v20265_v4  ;;  %v2062_v62 = vsel %vm420_vm5, %v2061_v37, %v2060_v56  ;;  %v2391_v37 = vrot.slane %v20331_v28, 5  ;;  %v2706_v56 = vrot.slane %v20292_v11, 4  ;;  %vm19992_vm8 = vmmov 0  }
 0x110   :  { %16706 = vmatprep.subr.mxu1 %v20270_v5  ;;  %16696 = vmatpush3.msra.mxu0 %v20265_v4  ;;  %v2378_v12 = vsel %vm405_vm0, %v2377_v55, %v2376_v52  ;;  %v20537_v20 = vsel %vm423_vm6, %v2063_v44, %v2062_v62  ;;  %v2393_v44 = vrot.slane %v20333_v29, 4  ;;  %v2703_v62 = vsel %vm405_vm0, %v2702_v49, %v2701_v46 }
 0x111   :  { %16707 = vmatpush3.msra.mxu1 %v20270_v5  ;;  %16697 = vmatprep.subr.mxu0 %v20277_v6  ;;  %v2380_v24 = vsel %vm408_vm1, %v2379_v58, %v2378_v12  ;;  %v2392_v48 = vsel %vm405_vm0, %v2391_v37, %v2390_v36  ;;  %v2705_v12 = vsel %vm408_vm1, %v2704_v51, %v2703_v62  ;;  %v2718_v36 = vrot.slane %v20333_v29, 5 }
 0x112   :  { %16708 = vmatprep.subr.mxu1 %v20282_v7  ;;  %16698 = vmatpush3.msra.mxu0 %v20277_v6  ;;  %v2382_v30 = vsel %vm411_vm2, %v2381_v61, %v2380_v24  ;;  %v2394_v55 = vsel %vm408_vm1, %v2393_v44, %v2392_v48  ;;  %v2715_v24 = vrot.slane %v20329_v27, 7  ;;  %v2720_v37 = vrot.slane %v20340_v33, 4 }
 0x113   :  { %16699 = vmatprep.mubr.msk.f32.mxu0 %vm431_vm7, %v20428_v26  ;;  %16709 = vmatpush3.msra.mxu1 %v20282_v7  ;;  %v2384_v41 = vsel %vm414_vm3, %v2383_v18, %v2382_v30  ;;  %v20575_v61 = vsel %vm411_vm2, %v2395_v45, %v2394_v55  ;;  %v2712_v18 = vrot.slane %v20301_v15, 1  ;;  %v1087_v30 = vsel %vm417_vm4, %v1086_v31, %v20450_v42 }
 0x114   :  { %16710 = vmatprep.mubr.msk.f32.mxu1 %vm431_vm7, %v20428_v26  ;;  %16700 = vmatmul.mubr.msk.f32.vlgmr.msra.gmra.mxu0 %vm431_vm7, %v20436_v34  ;;  %v2386_v47 = vsel %vm417_vm4, %v2385_v25, %v2384_v41  ;;  %v2716_v25 = vrot.slane %v20331_v28, 6  ;;  %v1090_v31 = vrot.slane %v20308_v19, 3  ;;  %v1094_v42 = vsel %vm405_vm0, %v1093_v43, %v1092_v38 }
 0x115   :  { %16711 = vmatmul.mubr.msk.f32.vlgmr.msra.gmra.mxu1 %vm431_vm7, %v20436_v34  ;;  %16713 = vmatprep.subr.mxu0 %v20315_v22  ;;  %v2387_v52 = vsel %vm420_vm5, %v20301_v15, %v2386_v47  ;;  %v1089_v45 = vsel %vm420_vm5, %v1088_v35, %v1087_v30  ;;  %v1096_v28 = vrot.slane %v20340_v33, 7  ;;  %v1402_v38 = vrot.slane %v20284_v8, 3 }
 0x116   :  { %16724 = vmatprep.subr.mxu1 %v20320_v23  ;;  %16714 = vmatpush3.msra.mxu0 %v20315_v22  ;;  %v20572_v58 = vsel %vm423_vm6, %v2388_v32, %v2387_v52  ;;  %v2707_v32 = vsel %vm411_vm2, %v2706_v56, %v2705_v12  ;;  %v1403_v43 = vrot.slane %v20288_v9, 2  ;;  %v1095_v35 = vsel %vm408_vm1, %v20333_v29, %v1094_v42 }
 0x117   :  { %16725 = vmatpush3.msra.mxu1 %v20320_v23  ;;  %16715 = vmatprep.subr.mxu0 %v20371_v53  ;;  %v2709_v41 = vsel %vm414_vm3, %v2708_v57, %v2707_v32  ;;  %v1091_v33 = vsel %vm423_vm6, %v1090_v31, %v1089_v45  ;;  %v1405_v8 = vrot.slane %v20290_v10, 1  ;;  %v1097_v9 = vsel %vm411_vm2, %v1096_v28, %v1095_v35 }
 0x118   :  { %16726 = vmatprep.subr.mxu1 %v20376_v54  ;;  %16716 = vmatpush3.msra.mxu0 %v20371_v53  ;;  %v2711_v44 = vsel %vm417_vm4, %v2710_v63, %v2709_v41  ;;  %v1404_v29 = vsel %vm405_vm0, %v1403_v43, %v1402_v38  ;;  %v1408_v48 = vrot.slane %v20297_v13, 7  ;;  %v1410_v51 = vrot.slane %v20299_v14, 6 }
 0x119   :  { %16727 = vmatpush3.msra.mxu1 %v20376_v54  ;;  %16717 = vmatprep.subr.mxu0 %v20389_v59  ;;  %v2713_v46 = vsel %vm420_vm5, %v2712_v18, %v2711_v44  ;;  %v1406_v10 = vsel %vm408_vm1, %v1405_v8, %v1404_v29  ;;  %v1414_v52 = vrot.slane %v20308_v19, 4  ;;  %vm5927_vm9 = vcmask 1040384  }
 0x11a   :  { %16728 = vmatprep.subr.mxu1 %v20394_v60  ;;  %16718 = vmatpush3.msra.mxu0 %v20389_v59  ;;  %v20628_v47 = vsel %vm423_vm6, %v20308_v19, %v2713_v46  ;;  %v1407_v49 = vsel %vm411_vm2, %v20292_v11, %v1406_v10  ;;  %v1412_v11 = vrot.slane %v20301_v15, 5  ;;  %vm5929_vm10 = vcmask 1041408  }
 0x11b   :  { %16729 = vmatpush3.msra.mxu1 %v20394_v60  ;;  %16719 = vmatprep.subr.mxu0 %v20408_v16  ;;  %v1409_v13 = vsel %vm414_vm3, %v1408_v48, %v1407_v49  ;;  %vm5931_vm11 = vcmask 1042432   ;;  %vm9719_vm12 = vcmask 257024  }
 0x11c   :  { %16730 = vmatprep.subr.mxu1 %v20413_v17  ;;  %16720 = vmatpush3.msra.mxu0 %v20408_v16  ;;  %v1411_v14 = vsel %vm417_vm4, %v1410_v51, %v1409_v13 }
 0x11d   :  { %16721 = vmatprep.mubr.msk.f32.mxu0 %vm431_vm7, %v20428_v26  ;;  %16731 = vmatpush3.msra.mxu1 %v20413_v17  ;;  %v1413_v15 = vsel %vm420_vm5, %v1412_v11, %v1411_v14 }
 0x11e   :  { %16732 = vmatprep.mubr.msk.f32.mxu1 %vm431_vm7, %v20428_v26  ;;  %16722 = vmatmul.mubr.msk.f32.vlgmr.msra.gmra.mxu0 %vm431_vm7, %v20436_v34  ;;  %v2717_v26 = vsel %vm405_vm0, %v2716_v25, %v2715_v24  ;;  %v1415_v19 = vsel %vm423_vm6, %v1414_v52, %v1413_v15  ;;  %vm11114_vm6 = vcmask 523264  }
 0x11f   :  { %16733 = vmatmul.mubr.msk.f32.vlgmr.msra.gmra.mxu1 %vm431_vm7, %v20436_v34  ;;  %16735 = vmatprep.subr.mxu0 %v20243_v0  ;;  %v2719_v34 = vsel %vm408_vm1, %v2718_v36, %v2717_v26 }
 0x120   :  { %16746 = vmatprep.subr.mxu1 %v20248_v1  ;;  %16736 = vmatpush3.msra.mxu0 %v20243_v0  ;;  %v20619_v27 = vsel %vm411_vm2, %v2720_v37, %v2719_v34 }
 0x121   :  { %16747 = vmatpush3.msra.mxu1 %v20248_v1  ;;  %16737 = vmatprep.subr.mxu0 %v20253_v2 }
 0x122   :  { %16748 = vmatprep.subr.mxu1 %v20260_v3  ;;  %16738 = vmatpush3.msra.mxu0 %v20253_v2 }
 0x123   :  { %16749 = vmatpush3.msra.mxu1 %v20260_v3  ;;  %16739 = vmatprep.subr.mxu0 %v20265_v4 }
 0x124   :  { %16750 = vmatprep.subr.mxu1 %v20270_v5  ;;  %16740 = vmatpush3.msra.mxu0 %v20265_v4 }
 0x125   :  { %16751 = vmatpush3.msra.mxu1 %v20270_v5  ;;  %16741 = vmatprep.subr.mxu0 %v20277_v6 }
 0x126   :  { %16752 = vmatprep.subr.mxu1 %v20282_v7  ;;  %16742 = vmatpush3.msra.mxu0 %v20277_v6 }
 0x127   :  { %16743 = vmatprep.mubr.msk.f32.mxu0 %vm431_vm7, %v1091_v33  ;;  %16753 = vmatpush3.msra.mxu1 %v20282_v7 }
 0x128   :  { %16754 = vmatprep.mubr.msk.f32.mxu1 %vm431_vm7, %v1091_v33  ;;  %16744 = vmatmul.mubr.msk.f32.vlgmr.msra.gmra.mxu0 %vm431_vm7, %v1097_v9 }
 0x129   :  { %16755 = vmatmul.mubr.msk.f32.vlgmr.msra.gmra.mxu1 %vm431_vm7, %v1097_v9  ;;  %16757 = vmatprep.subr.mxu0 %v20315_v22 }
 0x12a   :  { %16768 = vmatprep.subr.mxu1 %v20320_v23  ;;  %16758 = vmatpush3.msra.mxu0 %v20315_v22 }
 0x12b   :  { %16769 = vmatpush3.msra.mxu1 %v20320_v23  ;;  %16759 = vmatprep.subr.mxu0 %v20371_v53 }
 0x12c   :  { %16770 = vmatprep.subr.mxu1 %v20376_v54  ;;  %16760 = vmatpush3.msra.mxu0 %v20371_v53 }
 0x12d   :  { %16771 = vmatpush3.msra.mxu1 %v20376_v54  ;;  %16761 = vmatprep.subr.mxu0 %v20389_v59 }
 0x12e   :  { %16772 = vmatprep.subr.mxu1 %v20394_v60  ;;  %16762 = vmatpush3.msra.mxu0 %v20389_v59 }
 0x12f   :  { %16773 = vmatpush3.msra.mxu1 %v20394_v60  ;;  %16763 = vmatprep.subr.mxu0 %v20408_v16 }
 0x130   :  { %16774 = vmatprep.subr.mxu1 %v20413_v17  ;;  %16764 = vmatpush3.msra.mxu0 %v20408_v16 }
 0x131   :  { %16765 = vmatprep.mubr.msk.f32.mxu0 %vm431_vm7, %v1091_v33  ;;  %16775 = vmatpush3.msra.mxu1 %v20413_v17 }
 0x132   :  { %16776 = vmatprep.mubr.msk.f32.mxu1 %vm431_vm7, %v1091_v33  ;;  %16766 = vmatmul.mubr.msk.f32.vlgmr.msra.gmra.mxu0 %vm431_vm7, %v1097_v9 }
 0x133   :  { %16777 = vmatmul.mubr.msk.f32.vlgmr.msra.gmra.mxu1 %vm431_vm7, %v1097_v9  ;;  %16779 = vmatprep.subr.mxu0 %v20243_v0 }
 0x134   :  { %16790 = vmatprep.subr.mxu1 %v20248_v1  ;;  %16780 = vmatpush3.msra.mxu0 %v20243_v0 }
 0x135   :  { %16791 = vmatpush3.msra.mxu1 %v20248_v1  ;;  %16781 = vmatprep.subr.mxu0 %v20253_v2 }
 0x136   :  { %16792 = vmatprep.subr.mxu1 %v20260_v3  ;;  %16782 = vmatpush3.msra.mxu0 %v20253_v2 }
 0x137   :  { %16793 = vmatpush3.msra.mxu1 %v20260_v3  ;;  %16783 = vmatprep.subr.mxu0 %v20265_v4 }
 0x138   :  { %16794 = vmatprep.subr.mxu1 %v20270_v5  ;;  %16784 = vmatpush3.msra.mxu0 %v20265_v4 }
 0x139   :  { %16795 = vmatpush3.msra.mxu1 %v20270_v5  ;;  %16785 = vmatprep.subr.mxu0 %v20277_v6 }
 0x13a   :  { %16796 = vmatprep.subr.mxu1 %v20282_v7  ;;  %16786 = vmatpush3.msra.mxu0 %v20277_v6 }
 0x13b   :  { %16787 = vmatprep.mubr.msk.f32.mxu0 %vm431_vm7, %v1415_v19  ;;  %16797 = vmatpush3.msra.mxu1 %v20282_v7 }
 0x13c   :  { %16798 = vmatprep.mubr.msk.f32.mxu1 %vm431_vm7, %v1415_v19  ;;  %16788 = vmatmul.mubr.msk.f32.vlgmr.msra.gmra.mxu0 %vm431_vm7, %v20465_v50 }
 0x13d   :  { %16799 = vmatmul.mubr.msk.f32.vlgmr.msra.gmra.mxu1 %vm431_vm7, %v20465_v50  ;;  %16801 = vmatprep.subr.mxu0 %v20315_v22 }
 0x13e   :  { %16812 = vmatprep.subr.mxu1 %v20320_v23  ;;  %16802 = vmatpush3.msra.mxu0 %v20315_v22 }
 0x13f   :  { %16813 = vmatpush3.msra.mxu1 %v20320_v23  ;;  %16803 = vmatprep.subr.mxu0 %v20371_v53 }
 0x140   :  { %16814 = vmatprep.subr.mxu1 %v20376_v54  ;;  %16804 = vmatpush3.msra.mxu0 %v20371_v53 }
 0x141   :  { %16815 = vmatpush3.msra.mxu1 %v20376_v54  ;;  %16805 = vmatprep.subr.mxu0 %v20389_v59 }
 0x142   :  { %16816 = vmatprep.subr.mxu1 %v20394_v60  ;;  %16806 = vmatpush3.msra.mxu0 %v20389_v59 }
 0x143   :  { %16817 = vmatpush3.msra.mxu1 %v20394_v60  ;;  %16807 = vmatprep.subr.mxu0 %v20408_v16 }
 0x144   :  { %16818 = vmatprep.subr.mxu1 %v20413_v17  ;;  %16808 = vmatpush3.msra.mxu0 %v20408_v16 }
 0x145   :  { %16809 = vmatprep.mubr.msk.f32.mxu0 %vm431_vm7, %v1415_v19  ;;  %16819 = vmatpush3.msra.mxu1 %v20413_v17 }
 0x146   :  { %16820 = vmatprep.mubr.msk.f32.mxu1 %vm431_vm7, %v1415_v19  ;;  %16810 = vmatmul.mubr.msk.f32.vlgmr.msra.gmra.mxu0 %vm431_vm7, %v20465_v50 }
 0x147   :  { %16821 = vmatmul.mubr.msk.f32.vlgmr.msra.gmra.mxu1 %vm431_vm7, %v20465_v50  ;;  %16823 = vmatprep.subr.mxu0 %v20243_v0  ;;  %v20975_v50 = vld [vmem:[#allocation6 + $0x60] sm:$0xff] }
 0x148   :  { %16834 = vmatprep.subr.mxu1 %v20248_v1  ;;  %16824 = vmatpush3.msra.mxu0 %v20243_v0 }
 0x149   :  { %16835 = vmatpush3.msra.mxu1 %v20248_v1  ;;  %16825 = vmatprep.subr.mxu0 %v20253_v2 }
 0x14a   :  { %16836 = vmatprep.subr.mxu1 %v20260_v3  ;;  %16826 = vmatpush3.msra.mxu0 %v20253_v2 }
 0x14b   :  { %16837 = vmatpush3.msra.mxu1 %v20260_v3  ;;  %16827 = vmatprep.subr.mxu0 %v20265_v4 }
 0x14c   :  { %16838 = vmatprep.subr.mxu1 %v20270_v5  ;;  %16828 = vmatpush3.msra.mxu0 %v20265_v4 }
 0x14d   :  { %16839 = vmatpush3.msra.mxu1 %v20270_v5  ;;  %16829 = vmatprep.subr.mxu0 %v20277_v6 }
 0x14e   :  { %16840 = vmatprep.subr.mxu1 %v20282_v7  ;;  %16830 = vmatpush3.msra.mxu0 %v20277_v6 }
 0x14f   :  { %16831 = vmatprep.mubr.msk.f32.mxu0 %vm431_vm7, %v20498_v39  ;;  %16841 = vmatpush3.msra.mxu1 %v20282_v7 }
 0x150   :  { %16842 = vmatprep.mubr.msk.f32.mxu1 %vm431_vm7, %v20498_v39  ;;  %16832 = vmatmul.mubr.msk.f32.vlgmr.msra.gmra.mxu0 %vm431_vm7, %v20501_v40 }
 0x151   :  { %16843 = vmatmul.mubr.msk.f32.vlgmr.msra.gmra.mxu1 %vm431_vm7, %v20501_v40  ;;  %16845 = vmatprep.subr.mxu0 %v20315_v22 }
 0x152   :  { %16856 = vmatprep.subr.mxu1 %v20320_v23  ;;  %16846 = vmatpush3.msra.mxu0 %v20315_v22 }
 0x153   :  { %16857 = vmatpush3.msra.mxu1 %v20320_v23  ;;  %16847 = vmatprep.subr.mxu0 %v20371_v53 }
 0x154   :  { %16858 = vmatprep.subr.mxu1 %v20376_v54  ;;  %16848 = vmatpush3.msra.mxu0 %v20371_v53 }
 0x155   :  { %16859 = vmatpush3.msra.mxu1 %v20376_v54  ;;  %16849 = vmatprep.subr.mxu0 %v20389_v59 }
 0x156   :  { %16860 = vmatprep.subr.mxu1 %v20394_v60  ;;  %16850 = vmatpush3.msra.mxu0 %v20389_v59 }
 0x157   :  { %16861 = vmatpush3.msra.mxu1 %v20394_v60  ;;  %16851 = vmatprep.subr.mxu0 %v20408_v16 }
 0x158   :  { %16862 = vmatprep.subr.mxu1 %v20413_v17  ;;  %16852 = vmatpush3.msra.mxu0 %v20408_v16 }
 0x159   :  { %16853 = vmatprep.mubr.msk.f32.mxu0 %vm431_vm7, %v20498_v39  ;;  %16863 = vmatpush3.msra.mxu1 %v20413_v17 }
 0x15a   :  { %16864 = vmatprep.mubr.msk.f32.mxu1 %vm431_vm7, %v20498_v39  ;;  %16854 = vmatmul.mubr.msk.f32.vlgmr.msra.gmra.mxu0 %vm431_vm7, %v20501_v40 }
 0x15b   :  { %16865 = vmatmul.mubr.msk.f32.vlgmr.msra.gmra.mxu1 %vm431_vm7, %v20501_v40  ;;  %16867 = vmatprep.subr.mxu0 %v20243_v0 }
 0x15c   :  { %16878 = vmatprep.subr.mxu1 %v20248_v1  ;;  %16868 = vmatpush3.msra.mxu0 %v20243_v0 }
 0x15d   :  { %16879 = vmatpush3.msra.mxu1 %v20248_v1  ;;  %16869 = vmatprep.subr.mxu0 %v20253_v2 }
 0x15e   :  { %16880 = vmatprep.subr.mxu1 %v20260_v3  ;;  %16870 = vmatpush3.msra.mxu0 %v20253_v2 }
 0x15f   :  { %16881 = vmatpush3.msra.mxu1 %v20260_v3  ;;  %16871 = vmatprep.subr.mxu0 %v20265_v4 }
 0x160   :  { %16882 = vmatprep.subr.mxu1 %v20270_v5  ;;  %16872 = vmatpush3.msra.mxu0 %v20265_v4 }
 0x161   :  { %16883 = vmatpush3.msra.mxu1 %v20270_v5  ;;  %16873 = vmatprep.subr.mxu0 %v20277_v6 }
 0x162   :  { %16884 = vmatprep.subr.mxu1 %v20282_v7  ;;  %16874 = vmatpush3.msra.mxu0 %v20277_v6 }
 0x163   :  { %16875 = vmatprep.mubr.msk.f32.mxu0 %vm431_vm7, %v20537_v20  ;;  %16885 = vmatpush3.msra.mxu1 %v20282_v7 }
 0x164   :  { %16886 = vmatprep.mubr.msk.f32.mxu1 %vm431_vm7, %v20537_v20  ;;  %16876 = vmatmul.mubr.msk.f32.vlgmr.msra.gmra.mxu0 %vm431_vm7, %v20540_v21 }
 0x165   :  { %16887 = vmatmul.mubr.msk.f32.vlgmr.msra.gmra.mxu1 %vm431_vm7, %v20540_v21  ;;  %16889 = vmatprep.subr.mxu0 %v20315_v22 }
 0x166   :  { %16900 = vmatprep.subr.mxu1 %v20320_v23  ;;  %16890 = vmatpush3.msra.mxu0 %v20315_v22 }
 0x167   :  { %16901 = vmatpush3.msra.mxu1 %v20320_v23  ;;  %16891 = vmatprep.subr.mxu0 %v20371_v53 }
 0x168   :  { %16902 = vmatprep.subr.mxu1 %v20376_v54  ;;  %16892 = vmatpush3.msra.mxu0 %v20371_v53 }
 0x169   :  { %16903 = vmatpush3.msra.mxu1 %v20376_v54  ;;  %16893 = vmatprep.subr.mxu0 %v20389_v59 }
 0x16a   :  { %16904 = vmatprep.subr.mxu1 %v20394_v60  ;;  %16894 = vmatpush3.msra.mxu0 %v20389_v59 }
 0x16b   :  { %16905 = vmatpush3.msra.mxu1 %v20394_v60  ;;  %16895 = vmatprep.subr.mxu0 %v20408_v16 }
 0x16c   :  { %16906 = vmatprep.subr.mxu1 %v20413_v17  ;;  %16896 = vmatpush3.msra.mxu0 %v20408_v16 }
 0x16d   :  { %16897 = vmatprep.mubr.msk.f32.mxu0 %vm431_vm7, %v20537_v20  ;;  %16907 = vmatpush3.msra.mxu1 %v20413_v17 }
 0x16e   :  { %16908 = vmatprep.mubr.msk.f32.mxu1 %vm431_vm7, %v20537_v20  ;;  %16898 = vmatmul.mubr.msk.f32.vlgmr.msra.gmra.mxu0 %vm431_vm7, %v20540_v21 }
 0x16f   :  { %16909 = vmatmul.mubr.msk.f32.vlgmr.msra.gmra.mxu1 %vm431_vm7, %v20540_v21  ;;  %16911 = vmatprep.subr.mxu0 %v20243_v0 }
 0x170   :  { %16922 = vmatprep.subr.mxu1 %v20248_v1  ;;  %16912 = vmatpush3.msra.mxu0 %v20243_v0 }
 0x171   :  { %16923 = vmatpush3.msra.mxu1 %v20248_v1  ;;  %16913 = vmatprep.subr.mxu0 %v20253_v2 }
 0x172   :  { %16924 = vmatprep.subr.mxu1 %v20260_v3  ;;  %16914 = vmatpush3.msra.mxu0 %v20253_v2 }
 0x173   :  { %16925 = vmatpush3.msra.mxu1 %v20260_v3  ;;  %16915 = vmatprep.subr.mxu0 %v20265_v4 }
 0x174   :  { %16926 = vmatprep.subr.mxu1 %v20270_v5  ;;  %16916 = vmatpush3.msra.mxu0 %v20265_v4 }
 0x175   :  { %16927 = vmatpush3.msra.mxu1 %v20270_v5  ;;  %16917 = vmatprep.subr.mxu0 %v20277_v6 }
 0x176   :  { %16928 = vmatprep.subr.mxu1 %v20282_v7  ;;  %16918 = vmatpush3.msra.mxu0 %v20277_v6 }
 0x177   :  { %16919 = vmatprep.mubr.msk.f32.mxu0 %vm431_vm7, %v20572_v58  ;;  %16929 = vmatpush3.msra.mxu1 %v20282_v7 }
 0x178   :  { %16930 = vmatprep.mubr.msk.f32.mxu1 %vm431_vm7, %v20572_v58  ;;  %16920 = vmatmul.mubr.msk.f32.vlgmr.msra.gmra.mxu0 %vm431_vm7, %v20575_v61 }
 0x179   :  { %16931 = vmatmul.mubr.msk.f32.vlgmr.msra.gmra.mxu1 %vm431_vm7, %v20575_v61  ;;  %16933 = vmatprep.subr.mxu0 %v20315_v22 }
 0x17a   :  { %16944 = vmatprep.subr.mxu1 %v20320_v23  ;;  %16934 = vmatpush3.msra.mxu0 %v20315_v22 }
 0x17b   :  { %16945 = vmatpush3.msra.mxu1 %v20320_v23  ;;  %16935 = vmatprep.subr.mxu0 %v20371_v53 }
 0x17c   :  { %16946 = vmatprep.subr.mxu1 %v20376_v54  ;;  %16936 = vmatpush3.msra.mxu0 %v20371_v53 }
 0x17d   :  { %16947 = vmatpush3.msra.mxu1 %v20376_v54  ;;  %16937 = vmatprep.subr.mxu0 %v20389_v59 }
 0x17e   :  { %16948 = vmatprep.subr.mxu1 %v20394_v60  ;;  %16938 = vmatpush3.msra.mxu0 %v20389_v59 }
 0x17f   :  { %16949 = vmatpush3.msra.mxu1 %v20394_v60  ;;  %16939 = vmatprep.subr.mxu0 %v20408_v16 }
 0x180   :  { %16950 = vmatprep.subr.mxu1 %v20413_v17  ;;  %16940 = vmatpush3.msra.mxu0 %v20408_v16 }
 0x181   :  { %16941 = vmatprep.mubr.msk.f32.mxu0 %vm431_vm7, %v20572_v58  ;;  %16951 = vmatpush3.msra.mxu1 %v20413_v17 }
 0x182   :  { %16952 = vmatprep.mubr.msk.f32.mxu1 %vm431_vm7, %v20572_v58  ;;  %16942 = vmatmul.mubr.msk.f32.vlgmr.msra.gmra.mxu0 %vm431_vm7, %v20575_v61 }
 0x183   :  { %16953 = vmatmul.mubr.msk.f32.vlgmr.msra.gmra.mxu1 %vm431_vm7, %v20575_v61  ;;  %16955 = vmatprep.subr.mxu0 %v20243_v0 }
 0x184   :  { %16966 = vmatprep.subr.mxu1 %v20248_v1  ;;  %16956 = vmatpush3.msra.mxu0 %v20243_v0  ;;  %v20910_v0 = vld [vmem:[#allocation6 + $0x18] sm:$0xff] }
 0x185   :  { %16967 = vmatpush3.msra.mxu1 %v20248_v1  ;;  %16957 = vmatprep.subr.mxu0 %v20253_v2  ;;  %v20912_v1 = vld [vmem:[#allocation6 + $0x38] sm:$0xff] }
 0x186   :  { %16968 = vmatprep.subr.mxu1 %v20260_v3  ;;  %16958 = vmatpush3.msra.mxu0 %v20253_v2  ;;  %v20921_v2 = vld [vmem:[#allocation6 + $0x10] sm:$0xff] }
 0x187   :  { %16969 = vmatpush3.msra.mxu1 %v20260_v3  ;;  %16959 = vmatprep.subr.mxu0 %v20265_v4  ;;  %v20923_v3 = vld [vmem:[#allocation6 + $0x30] sm:$0xff] }
 0x188   :  { %16970 = vmatprep.subr.mxu1 %v20270_v5  ;;  %16960 = vmatpush3.msra.mxu0 %v20265_v4  ;;  %v20929_v4 = vld [vmem:[#allocation6 + $0x8] sm:$0xff] }
 0x189   :  { %16971 = vmatpush3.msra.mxu1 %v20270_v5  ;;  %16961 = vmatprep.subr.mxu0 %v20277_v6  ;;  %v20931_v5 = vld [vmem:[#allocation6 + $0x28] sm:$0xff] }
 0x18a   :  { %16972 = vmatprep.subr.mxu1 %v20282_v7  ;;  %16962 = vmatpush3.msra.mxu0 %v20277_v6  ;;  %v20937_v6 = vld [vmem:[#allocation6] sm:$0xff] }
 0x18b   :  { %16963 = vmatprep.mubr.msk.f32.mxu0 %vm431_vm7, %v20628_v47  ;;  %16973 = vmatpush3.msra.mxu1 %v20282_v7  ;;  %v20939_v7 = vld [vmem:[#allocation6 + $0x20] sm:$0xff] }
 0x18c   :  { %16974 = vmatprep.mubr.msk.f32.mxu1 %vm431_vm7, %v20628_v47  ;;  %16964 = vmatmul.mubr.msk.f32.vlgmr.msra.gmra.mxu0 %vm431_vm7, %v20619_v27 }
 0x18d   :  { %16975 = vmatmul.mubr.msk.f32.vlgmr.msra.gmra.mxu1 %vm431_vm7, %v20619_v27  ;;  %16977 = vmatprep.subr.mxu0 %v20315_v22 }
 0x18e   :  { %16988 = vmatprep.subr.mxu1 %v20320_v23  ;;  %16978 = vmatpush3.msra.mxu0 %v20315_v22  ;;  %v24162_v22 = vmov 0.0  }
 0x18f   :  { %16989 = vmatpush3.msra.mxu1 %v20320_v23  ;;  %16979 = vmatprep.subr.mxu0 %v20371_v53  ;;  %v20949_v23 = vld [vmem:[#allocation6 + $0x58] sm:$0xff] }
 0x190   :  { %16990 = vmatprep.subr.mxu1 %v20376_v54  ;;  %16980 = vmatpush3.msra.mxu0 %v20371_v53  ;;  %v20951_v53 = vld [vmem:[#allocation6 + $0x78] sm:$0xff] }
 0x191   :  { %16991 = vmatpush3.msra.mxu1 %v20376_v54  ;;  %16981 = vmatprep.subr.mxu0 %v20389_v59  ;;  %v20957_v54 = vld [vmem:[#allocation6 + $0x50] sm:$0xff] }
 0x192   :  { %16992 = vmatprep.subr.mxu1 %v20394_v60  ;;  %16982 = vmatpush3.msra.mxu0 %v20389_v59  ;;  %v20959_v59 = vld [vmem:[#allocation6 + $0x70] sm:$0xff] }
 0x193   :  { %16993 = vmatpush3.msra.mxu1 %v20394_v60  ;;  %16983 = vmatprep.subr.mxu0 %v20408_v16  ;;  %v20965_v60 = vld [vmem:[#allocation6 + $0x48] sm:$0xff] }
 0x194   :  { %16994 = vmatprep.subr.mxu1 %v20413_v17  ;;  %16984 = vmatpush3.msra.mxu0 %v20408_v16  ;;  %v20967_v16 = vld [vmem:[#allocation6 + $0x68] sm:$0xff] }
 0x195   :  { %16985 = vmatprep.mubr.msk.f32.mxu0 %vm431_vm7, %v20628_v47  ;;  %16995 = vmatpush3.msra.mxu1 %v20413_v17  ;;  %v20973_v17 = vld [vmem:[#allocation6 + $0x40] sm:$0xff] }
 0x196   :  { %16996 = vmatprep.mubr.msk.f32.mxu1 %vm431_vm7, %v20628_v47  ;;  %16986 = vmatmul.mubr.msk.f32.vlgmr.msra.gmra.mxu0 %vm431_vm7, %v20619_v27 }
 0x197   :  { %16997 = vmatmul.mubr.msk.f32.vlgmr.msra.gmra.mxu1 %vm431_vm7, %v20619_v27  ;;  %16999 = vmatprep.subr.mxu0 %v20910_v0 }
 0x198   :  { %17010 = vmatprep.subr.mxu1 %v20912_v1  ;;  %17000 = vmatpush3.msra.mxu0 %v20910_v0 }
 0x199   :  { %17011 = vmatpush3.msra.mxu1 %v20912_v1  ;;  %17001 = vmatprep.subr.mxu0 %v20921_v2 }
 0x19a   :  { %17012 = vmatprep.subr.mxu1 %v20923_v3  ;;  %17002 = vmatpush3.msra.mxu0 %v20921_v2 }
 0x19b   :  { %17013 = vmatpush3.msra.mxu1 %v20923_v3  ;;  %17003 = vmatprep.subr.mxu0 %v20929_v4 }
 0x19c   :  { %17014 = vmatprep.subr.mxu1 %v20931_v5  ;;  %17004 = vmatpush3.msra.mxu0 %v20929_v4 }
 0x19d   :  { %17015 = vmatpush3.msra.mxu1 %v20931_v5  ;;  %17005 = vmatprep.subr.mxu0 %v20937_v6 }
 0x19e   :  { %17016 = vmatprep.subr.mxu1 %v20939_v7  ;;  %17006 = vmatpush3.msra.mxu0 %v20937_v6 }
 0x19f   :  { %17007 = vmatprep.mubr.f32.mxu0 %v24162_v22  ;;  %17017 = vmatpush3.msra.mxu1 %v20939_v7 }
 0x1a0   :  { %17018 = vmatprep.mubr.f32.mxu1 %v24162_v22  ;;  %17008 = vmatmul.mubr.f32.vlgmr.msra.gmra.mxu0 %v24162_v22 }
 0x1a1   :  { %17019 = vmatmul.mubr.f32.vlgmr.msra.gmra.mxu1 %v24162_v22  ;;  %17021 = vmatprep.subr.mxu0 %v20949_v23 }
 0x1a2   :  { %17032 = vmatprep.subr.mxu1 %v20951_v53  ;;  %17022 = vmatpush3.msra.mxu0 %v20949_v23 }
 0x1a3   :  { %17033 = vmatpush3.msra.mxu1 %v20951_v53  ;;  %17023 = vmatprep.subr.mxu0 %v20957_v54 }
 0x1a4   :  { %17034 = vmatprep.subr.mxu1 %v20959_v59  ;;  %17024 = vmatpush3.msra.mxu0 %v20957_v54 }
 0x1a5   :  { %17035 = vmatpush3.msra.mxu1 %v20959_v59  ;;  %17025 = vmatprep.subr.mxu0 %v20965_v60 }
 0x1a6   :  { %17036 = vmatprep.subr.mxu1 %v20967_v16  ;;  %17026 = vmatpush3.msra.mxu0 %v20965_v60 }
 0x1a7   :  { %17037 = vmatpush3.msra.mxu1 %v20967_v16  ;;  %17027 = vmatprep.subr.mxu0 %v20973_v17 }
 0x1a8   :  { %17038 = vmatprep.subr.mxu1 %v20975_v50  ;;  %17028 = vmatpush3.msra.mxu0 %v20973_v17 }
 0x1a9   :  { %17029 = vmatprep.mubr.f32.mxu0 %v24162_v22  ;;  %17039 = vmatpush3.msra.mxu1 %v20975_v50 }
 0x1aa   :  { %17040 = vmatprep.mubr.f32.mxu1 %v24162_v22  ;;  %17030 = vmatmul.mubr.f32.vlgmr.msra.gmra.mxu0 %v24162_v22 }
 0x1ab   :  { %17041 = vmatmul.mubr.f32.vlgmr.msra.gmra.mxu1 %v24162_v22  ;;  %17043 = vmatprep.subr.mxu0 %v20910_v0 }
 0x1ac   :  { %17054 = vmatprep.subr.mxu1 %v20912_v1  ;;  %17044 = vmatpush3.msra.mxu0 %v20910_v0 }
 0x1ad   :  { %17055 = vmatpush3.msra.mxu1 %v20912_v1  ;;  %17045 = vmatprep.subr.mxu0 %v20921_v2 }
 0x1ae   :  { %17056 = vmatprep.subr.mxu1 %v20923_v3  ;;  %17046 = vmatpush3.msra.mxu0 %v20921_v2 }
 0x1af   :  { %17057 = vmatpush3.msra.mxu1 %v20923_v3  ;;  %17047 = vmatprep.subr.mxu0 %v20929_v4 }
 0x1b0   :  { %17058 = vmatprep.subr.mxu1 %v20931_v5  ;;  %17048 = vmatpush3.msra.mxu0 %v20929_v4 }
 0x1b1   :  { %17059 = vmatpush3.msra.mxu1 %v20931_v5  ;;  %17049 = vmatprep.subr.mxu0 %v20937_v6 }
 0x1b2   :  { %17060 = vmatprep.subr.mxu1 %v20939_v7  ;;  %17050 = vmatpush3.msra.mxu0 %v20937_v6 }
 0x1b3   :  { %17061 = vmatpush3.msra.mxu1 %v20939_v7  ;;  %17065 = vmatprep.subr.mxu0 %v20949_v23 }
 0x1b4   :  { %17076 = vmatprep.subr.mxu1 %v20951_v53 }
 0x1c1   :  { %v21007_v39 = vpop.f32.mrf.mxu0 }
 0x1c2   :  { %v21009_v40 = vpop.f32.mrf.mxu1 }
 0x1c3   :  { %v21011_v20 = vpop.f32.mrf.mxu0 }
 0x1c4   :  { %v21013_v21 = vpop.f32.mrf.mxu1 }
 0x1ca   :  { %v21015_v55 = vpop.f32.mrf.mxu0 }
 0x1cb   :  { %v21017_v56 = vpop.f32.mrf.mxu1 }
 0x1cc   :  { %v21019_v57 = vpop.f32.mrf.mxu0 }
 0x1cd   :  { %v21021_v58 = vpop.f32.mrf.mxu1 }
 0x1d4   :  { %v21023_v61 = vpop.f32.mrf.mxu0 }
 0x1d5   :  { %v21025_v62 = vpop.f32.mrf.mxu1 }
 0x1d6   :  { %v21027_v63 = vpop.f32.mrf.mxu0 }
 0x1d7   :  { %v21029_v12 = vpop.f32.mrf.mxu1 }
 0x1de   :  { %v21031_v18 = vpop.f32.mrf.mxu0 }
 0x1df   :  { %v21033_v24 = vpop.f32.mrf.mxu1 }
 0x1e0   :  { %v21035_v25 = vpop.f32.mrf.mxu0 }
 0x1e1   :  { %v21037_v30 = vpop.f32.mrf.mxu1 }
 0x1e8   :  { %v21039_v32 = vpop.f32.mrf.mxu0 }
 0x1e9   :  { %v21041_v36 = vpop.f32.mrf.mxu1 }
 0x1ea   :  { %v21043_v37 = vpop.f32.mrf.mxu0 }
 0x1eb   :  { %v21045_v41 = vpop.f32.mrf.mxu1 }
 0x1f2   :  { %v21047_v26 = vpop.f32.mrf.mxu0 }
 0x1f3   :  { %v21049_v31 = vpop.f32.mrf.mxu1 }
 0x1f4   :  { %v21051_v42 = vpop.f32.mrf.mxu0 }
 0x1f5   :  { %v21053_v44 = vpop.f32.mrf.mxu1 }
 0x1fc   :  { %v21055_v34 = vpop.f32.mrf.mxu0 }
 0x1fd   :  { %v21057_v45 = vpop.f32.mrf.mxu1 }
 0x1fe   :  { %v21059_v46 = vpop.f32.mrf.mxu0 }
 0x1ff   :  { %v21061_v27 = vpop.f32.mrf.mxu1 }
 0x206   :  { %v21063_v28 = vpop.f32.mrf.mxu0 }
 0x207   :  { %24195 = vst [vmem:[#allocation40_spill] sm:$0xff] %v21063_v28  ;;  %v21065_v38 = vpop.f32.mrf.mxu1  ;;  %v21149_v28 = vld [vmem:[#allocation7 + $0x2] ss:$0 sm:$0xff] }
 0x208   :  { %v21067_v43 = vpop.f32.mrf.mxu0 }
 0x209   :  { %24196 = vst [vmem:[#allocation41_spill] sm:$0xff] %v21067_v43  ;;  %v21069_v47 = vpop.f32.mrf.mxu1 }
 0x210   :  { %v21071_v35 = vpop.f32.mrf.mxu0 }
 0x211   :  { %24197 = vst [vmem:[#allocation42_spill] sm:$0xff] %v21071_v35  ;;  %v21073_v33 = vpop.f32.mrf.mxu1 }
 0x212   :  { %24198 = vst [vmem:[#allocation43_spill] sm:$0xff] %v21073_v33  ;;  %v21075_v8 = vpop.f32.mrf.mxu0 }
 0x213   :  { %24199 = vst [vmem:[#allocation44_spill] sm:$0xff] %v21075_v8  ;;  %v21077_v9 = vpop.f32.mrf.mxu1 }
 0x214   :  { %24200 = vst [vmem:[#allocation45_spill] sm:$0xff] %v21077_v9 }
 0x21a   :  { %v21079_v29 = vpop.f32.mrf.mxu0 }
 0x21b   :  { %24201 = vst [vmem:[#allocation46_spill] sm:$0xff] %v21079_v29  ;;  %v21081_v10 = vpop.f32.mrf.mxu1 }
 0x21c   :  { %24202 = vst [vmem:[#allocation47_spill] sm:$0xff] %v21081_v10  ;;  %v21083_v48 = vpop.f32.mrf.mxu0 }
 0x21d   :  { %24203 = vst [vmem:[#allocation48_spill] sm:$0xff] %v21083_v48  ;;  %v21085_v49 = vpop.f32.mrf.mxu1 }
 0x21e   :  { %24204 = vst [vmem:[#allocation49_spill] sm:$0xff] %v21085_v49 }
 0x224   :  { %v21087_v51 = vpop.f32.mrf.mxu0 }
 0x225   :  { %24205 = vst [vmem:[#allocation50_spill] sm:$0xff] %v21087_v51  ;;  %v21089_v13 = vpop.f32.mrf.mxu1 }
 0x226   :  { %24206 = vst [vmem:[#allocation51_spill] sm:$0xff] %v21089_v13  ;;  %v21091_v11 = vpop.f32.mrf.mxu0 }
 0x227   :  { %24207 = vst [vmem:[#allocation52_spill] sm:$0xff] %v21091_v11  ;;  %v21093_v14 = vpop.f32.mrf.mxu1 }
 0x228   :  { %24208 = vst [vmem:[#allocation53_spill] sm:$0xff] %v21093_v14 }
 0x22e   :  { %v21095_v52 = vpop.f32.mrf.mxu0 }
 0x22f   :  { %24209 = vst [vmem:[#allocation54_spill] sm:$0xff] %v21095_v52  ;;  %v21097_v15 = vpop.f32.mrf.mxu1 }
 0x230   :  { %24210 = vst [vmem:[#allocation55_spill] sm:$0xff] %v21097_v15  ;;  %v21099_v19 = vpop.f32.mrf.mxu0 }
 0x231   :  { %24211 = vst [vmem:[#allocation56_spill] sm:$0xff] %v21099_v19  ;;  %v21101_v22 = vpop.f32.mrf.mxu1 }
 0x232   :  { %24212 = vst [vmem:[#allocation57_spill] sm:$0xff] %v21101_v22 }
 0x238   :  { %v21103_v29 = vpop.f32.mrf.mxu0 }
 0x239   :  { %24213 = vst [vmem:[#allocation58_spill] sm:$0xff] %v21103_v29  ;;  %v21105_v48 = vpop.f32.mrf.mxu1 }
 0x23a   :  { %24214 = vst [vmem:[#allocation59_spill] sm:$0xff] %v21105_v48  ;;  %v21107_v49 = vpop.f32.mrf.mxu0 }
 0x23b   :  { %24215 = vst [vmem:[#allocation60_spill] sm:$0xff] %v21107_v49  ;;  %v21109_v51 = vpop.f32.mrf.mxu1 }
 0x23c   :  { %24216 = vst [vmem:[#allocation61_spill] sm:$0xff] %v21109_v51  ;;  %v21131_v51 = vld [vmem:[#allocation7] ss:$0 sm:$0xff] }
 0x242   :  { %v21111_v13 = vpop.f32.mrf.mxu0 }
 0x243   :  { %24217 = vst [vmem:[#allocation62_spill] sm:$0xff] %v21111_v13  ;;  %v21113_v11 = vpop.f32.mrf.mxu1  ;;  %v21133_v13 = vld [vmem:[#allocation7 + $0x1] ss:$0 sm:$0xff] }
 0x244   :  { %24218 = vst [vmem:[#allocation63_spill] sm:$0xff] %v21113_v11  ;;  %v21115_v14 = vpop.f32.mrf.mxu0 }
 0x245   :  { %24219 = vst [vmem:[#allocation64_spill] sm:$0xff] %v21115_v14  ;;  %v21117_v52 = vpop.f32.mrf.mxu1 }
 0x246   :  { %24220 = vst [vmem:[#allocation65_spill] sm:$0xff] %v21117_v52 }
 0x24c   :  { %v21119_v15 = vpop.f32.mrf.mxu0 }
 0x24d   :  { %24221 = vst [vmem:[#allocation66_spill] sm:$0xff] %v21119_v15  ;;  %v21121_v19 = vpop.f32.mrf.mxu1  ;;  %v508_v15 = vadd.f32 %v21007_v39, %v21131_v51 }
 0x24e   :  { %24222 = vst [vmem:[#allocation67_spill] sm:$0xff] %v21121_v19  ;;  %v21123_v22 = vpop.f32.mrf.mxu0 }
 0x24f   :  { %24223 = vst [vmem:[#allocation68_spill] sm:$0xff] %v21123_v22  ;;  %v21125_v29 = vpop.f32.mrf.mxu1  ;;  %v589_v22 = vadd.f32 %v21009_v40, %v21133_v13  ;;  %v21147_v40 = vld [vmem:[#allocation7 + $0x3] ss:$0 sm:$0xff] }
 0x250   :  { %24224 = vst [vmem:[#allocation69_spill] sm:$0xff] %v21125_v29 }
 0x256   :  { %v21127_v48 = vpop.f32.mrf.mxu0 }
 0x257   :  { %24225 = vst [vmem:[#allocation70_spill] sm:$0xff] %v21127_v48  ;;  %v21129_v49 = vpop.f32.mrf.mxu1  ;;  %v503_v48 = vadd.f32 %v21131_v51, %v21011_v20  ;;  %v751_v20 = vadd.f32 %v21017_v56, %v21147_v40 }
 0x258   :  { %24226 = vst [vmem:[#allocation71_spill] sm:$0xff] %v21129_v49  ;;  %v21135_v11 = vpop.f32.mrf.mxu0  ;;  %v584_v49 = vadd.f32 %v21133_v13, %v21013_v21 }
 0x259   :  { %24227 = vst [vmem:[#allocation72_spill] sm:$0xff] %v21135_v11  ;;  %v21137_v14 = vpop.f32.mrf.mxu1 }
 0x25a   :  { %24228 = vst [vmem:[#allocation73_spill] sm:$0xff] %v21137_v14 }
 0x260   :  { %v17009_v19 = vpop.f32.mrf.mxu0 }
 0x261   :  { %v17020_v29 = vpop.f32.mrf.mxu1  ;;  %v3105_v52 = vadd.f32 %v17009_v19, %v508_v15 }
 0x262   :  { %v3194_v10 = vadd.f32 %v17020_v29, %v589_v22  ;;  %v3095_v9 = vpop.f32.mrf.mxu0  ;;  %v670_v29 = vadd.f32 %v21015_v55, %v21149_v28 }
 0x263   :  { %v3184_v11 = vpop.f32.mrf.mxu1  ;;  %v15214_v8 = vmul.f32 -1.442695, %v3105_v52  ;;  %v3104_v33 = vadd.f32 %v3095_v9, %v503_v48 }
 0x264   :  { %v15216_v14 = vmul.f32 -1.442695, %v3194_v10  ;;  %v3193_v35 = vadd.f32 %v3184_v11, %v584_v49  ;;  %v665_v10 = vadd.f32 %v21149_v28, %v21019_v57 }
 0x265   :  { %19077 = vpow2.f32 %v15214_v8  ;;  %v15213_v39 = vmul.f32 -1.442695, %v3104_v33  ;;  %v746_v8 = vadd.f32 %v21147_v40, %v21021_v58 }
 0x266   :  { %v15215_v43 = vmul.f32 -1.442695, %v3193_v35  ;;  %19079 = vpow2.f32 %v15216_v14 }
 0x267   :  { %19081 = vpow2.f32 %v15213_v39 }
 0x268   :  { %19083 = vpow2.f32 %v15215_v43 }
 0x26a   :  { %v17031_v22 = vpop.f32.mrf.mxu0 }
 0x26b   :  { %v17042_v21 = vpop.f32.mrf.mxu1  ;;  %v3283_v48 = vadd.f32 %v17031_v22, %v670_v29 }
 0x26c   :  { %v3362_v33 = vadd.f32 %v17042_v21, %v751_v20  ;;  %v3273_v35 = vpop.f32.mrf.mxu0 }
 0x26d   :  { %v3352_v9 = vpop.f32.mrf.mxu1  ;;  %v3282_v11 = vadd.f32 %v3273_v35, %v665_v10  ;;  %19085 = vtanh.f32 %v3283_v48 }
 0x26e   :  { %v3361_v49 = vadd.f32 %v3352_v9, %v746_v8  ;;  %v15218_v43 = vmul.f32 -1.442695, %v3362_v33 }
 0x270   :  { %v15217_v14 = vmul.f32 -1.442695, %v3361_v49  ;;  %19087 = vpow2.f32 %v15218_v43 }
 0x271   :  { %19089 = vtanh.f32 %v3282_v11 }
 0x272   :  { %v19078_v56 = vpop.eup %19077  ;;  %19091 = vpow2.f32 %v15217_v14 }
 0x273   :  { %v19080_v52 = vpop.eup %19079  ;;  %v3113_v15 = vadd.f32 1.0, %v19078_v56 }
 0x274   :  { %v19082_v55 = vpop.eup %19081  ;;  %v3202_v19 = vadd.f32 1.0, %v19080_v52 }
 0x275   :  { %v19084_v58 = vpop.eup %19083  ;;  %19093 = vrcp.f32 %v3113_v15  ;;  %v3112_v39 = vadd.f32 1.0, %v19082_v55 }
 0x276   :  { %19095 = vrcp.f32 %v3202_v19  ;;  %v3201_v20 = vadd.f32 1.0, %v19084_v58 }
 0x277   :  { %19097 = vrcp.f32 %v3112_v39 }
 0x278   :  { %19099 = vrcp.f32 %v3201_v20 }
 0x27a   :  { %v19086_v57 = vpop.eup %19085 }
 0x27d   :  { %v19088_v22 = vpop.eup %19087 }
 0x27e   :  { %v19090_v21 = vpop.eup %19089  ;;  %v3370_v56 = vadd.f32 1.0, %v19088_v22  ;;  %v925_v22 = vadd.f32 %v21025_v62, %v21133_v13  ;;  %v1075_v62 = vadd.f32 %v21033_v24, %v21147_v40 }
 0x27f   :  { %v19092_v29 = vpop.eup %19091 }
 0x280   :  { %v3369_v48 = vadd.f32 1.0, %v19092_v29 }
 0x282   :  { %v19094_v8 = vpop.eup %19093  ;;  %19101 = vrcp.f32 %v3369_v48 }
 0x283   :  { %v19096_v33 = vpop.eup %19095  ;;  %v3378_v35 = vmul.f32 %v19094_v8, %v19086_v57  ;;  %v850_v57 = vadd.f32 %v21023_v61, %v21131_v51  ;;  %v845_v8 = vadd.f32 %v21131_v51, %v21027_v63 }
 0x284   :  { %v19098_v9 = vpop.eup %19097  ;;  %v3376_v10 = vmul.f32 0.0, %v19096_v33  ;;  %v920_v33 = vadd.f32 %v21133_v13, %v21029_v12  ;;  %v1070_v12 = vadd.f32 %v21147_v40, %v21037_v30 }
 0x285   :  { %v19100_v49 = vpop.eup %19099  ;;  %v3377_v43 = vmul.f32 %v19098_v9, %v19090_v21 }
 0x286   :  { %v3375_v11 = vmul.f32 0.0, %v19100_v49  ;;  %v21159_v14 = vadd.f32 %v3378_v35, %v3376_v10 }
 0x288   :  { %v21161_v52 = vadd.f32 %v3377_v43, %v3375_v11  ;;  %19103 = vtanh.f32 %v21159_v14 }
 0x28a   :  { %19105 = vtanh.f32 %v21161_v52 }
 0x28b   :  { %19107 = vrcp.f32 %v3370_v56 }
 0x28f   :  { %v19102_v15 = vpop.eup %19101 }
 0x295   :  { %v19104_v55 = vpop.eup %19103 }
 0x297   :  { %v19106_v19 = vpop.eup %19105 }
 0x298   :  { %v19108_v58 = vpop.eup %19107  ;;  %v3383_v39 = vmul.f32 %v19106_v19, %v19102_v15 }
 0x299   :  { %v3384_v20 = vmul.f32 %v19108_v58, %v19104_v55  ;;  %v1000_v58 = vadd.f32 %v21031_v18, %v21149_v28 }
 0x29a   :  { %17051 = vmatprep.mubr.msk.f32.mxu0 %vm431_vm7, %v3383_v39  ;;  %17062 = vmatprep.mubr.msk.f32.mxu1 %vm431_vm7, %v3383_v39 }
 0x29b   :  { %17052 = vmatmul.mubr.msk.f32.vlgmr.msra.gmra.mxu0 %vm431_vm7, %v3384_v20  ;;  %17063 = vmatmul.mubr.msk.f32.vlgmr.msra.gmra.mxu1 %vm431_vm7, %v3384_v20 }
 0x29c   :  { %17066 = vmatpush3.msra.mxu0 %v20949_v23  ;;  %17077 = vmatpush3.msra.mxu1 %v20951_v53 }
 0x29d   :  { %17067 = vmatprep.subr.mxu0 %v20957_v54  ;;  %17073 = vmatprep.mubr.msk.f32.mxu0 %vm431_vm7, %v3383_v39 }
 0x29e   :  { %17078 = vmatprep.subr.mxu1 %v20959_v59  ;;  %17084 = vmatprep.mubr.msk.f32.mxu1 %vm431_vm7, %v3383_v39 }
 0x29f   :  { %17068 = vmatpush3.msra.mxu0 %v20957_v54  ;;  %17079 = vmatpush3.msra.mxu1 %v20959_v59 }
 0x2a0   :  { %17069 = vmatprep.subr.mxu0 %v20965_v60  ;;  %17080 = vmatprep.subr.mxu1 %v20967_v16 }
 0x2a1   :  { %17070 = vmatpush3.msra.mxu0 %v20965_v60  ;;  %17081 = vmatpush3.msra.mxu1 %v20967_v16 }
 0x2a2   :  { %17071 = vmatprep.subr.mxu0 %v20973_v17  ;;  %17082 = vmatprep.subr.mxu1 %v20975_v50 }
 0x2a3   :  { %17072 = vmatpush3.msra.mxu0 %v20973_v17  ;;  %17083 = vmatpush3.msra.mxu1 %v20975_v50 }
 0x2a4   :  { %17074 = vmatmul.mubr.msk.f32.vlgmr.msra.gmra.mxu0 %vm431_vm7, %v3384_v20  ;;  %17085 = vmatmul.mubr.msk.f32.vlgmr.msra.gmra.mxu1 %vm431_vm7, %v3384_v20 }
 0x2a5   :  { %17087 = vmatprep.subr.mxu0 %v20910_v0  ;;  %17098 = vmatprep.subr.mxu1 %v20912_v1 }
 0x2a6   :  { %17088 = vmatpush3.msra.mxu0 %v20910_v0  ;;  %17099 = vmatpush3.msra.mxu1 %v20912_v1 }
 0x2a7   :  { %17089 = vmatprep.subr.mxu0 %v20921_v2  ;;  %17100 = vmatprep.subr.mxu1 %v20923_v3 }
 0x2a8   :  { %17090 = vmatpush3.msra.mxu0 %v20921_v2  ;;  %17101 = vmatpush3.msra.mxu1 %v20923_v3 }
 0x2a9   :  { %17091 = vmatprep.subr.mxu0 %v20929_v4  ;;  %17102 = vmatprep.subr.mxu1 %v20931_v5 }
 0x2aa   :  { %17092 = vmatpush3.msra.mxu0 %v20929_v4  ;;  %17103 = vmatpush3.msra.mxu1 %v20931_v5 }
 0x2ab   :  { %17093 = vmatprep.subr.mxu0 %v20937_v6  ;;  %17104 = vmatprep.subr.mxu1 %v20939_v7 }
 0x2ac   :  { %17094 = vmatpush3.msra.mxu0 %v20937_v6  ;;  %17105 = vmatpush3.msra.mxu1 %v20939_v7 }
 0x2ad   :  { %17109 = vmatprep.subr.mxu0 %v20949_v23  ;;  %17120 = vmatprep.subr.mxu1 %v20951_v53 }
 0x35b   :  { %v17053_v21 = vpop.f32.mrf.mxu0  ;;  %v17064_v29 = vpop.f32.mrf.mxu1 }
 0x35c   :  { %v3467_v35 = vadd.f32 %v17053_v21, %v850_v57  ;;  %v3556_v9 = vadd.f32 %v17064_v29, %v925_v22  ;;  %v995_v22 = vadd.f32 %v21149_v28, %v21035_v25 }
 0x35d   :  { %v3457_v10 = vpop.f32.mrf.mxu0  ;;  %v3546_v48 = vpop.f32.mrf.mxu1 }
 0x35e   :  { %v15222_v49 = vmul.f32 -1.442695, %v3467_v35  ;;  %v15226_v43 = vmul.f32 -1.442695, %v3556_v9  ;;  %v3466_v11 = vadd.f32 %v3457_v10, %v845_v8  ;;  %v3555_v56 = vadd.f32 %v3546_v48, %v920_v33 }
 0x360   :  { %19109 = vpow2.f32 %v15222_v49  ;;  %v15221_v61 = vmul.f32 -1.442695, %v3466_v11  ;;  %v15225_v15 = vmul.f32 -1.442695, %v3555_v56 }
 0x361   :  { %19111 = vpow2.f32 %v15226_v43 }
 0x362   :  { %19113 = vpow2.f32 %v15221_v61 }
 0x363   :  { %19115 = vpow2.f32 %v15225_v15 }
 0x364   :  { %v17075_v63 = vpop.f32.mrf.mxu0  ;;  %v17086_v55 = vpop.f32.mrf.mxu1 }
 0x365   :  { %v3724_v19 = vadd.f32 %v17086_v55, %v1075_v62  ;;  %v3645_v21 = vadd.f32 %v17075_v63, %v1000_v58 }
 0x366   :  { %v3714_v39 = vpop.f32.mrf.mxu1  ;;  %v3635_v20 = vpop.f32.mrf.mxu0 }
 0x367   :  { %v3723_v57 = vadd.f32 %v3714_v39, %v1070_v12  ;;  %v15232_v29 = vmul.f32 -1.442695, %v3724_v19  ;;  %v3644_v8 = vadd.f32 %v3635_v20, %v995_v22  ;;  %19117 = vtanh.f32 %v3645_v21 }
 0x369   :  { %v15231_v24 = vmul.f32 -1.442695, %v3723_v57  ;;  %19119 = vpow2.f32 %v15232_v29 }
 0x36a   :  { %19121 = vtanh.f32 %v3644_v8 }
 0x36b   :  { %19123 = vpow2.f32 %v15231_v24 }
 0x36d   :  { %v19110_v33 = vpop.eup %19109 }
 0x36e   :  { %v19112_v35 = vpop.eup %19111  ;;  %v3475_v9 = vadd.f32 1.0, %v19110_v33 }
 0x36f   :  { %v19114_v30 = vpop.eup %19113  ;;  %v3564_v10 = vadd.f32 1.0, %v19112_v35  ;;  %v1249_v35 = vadd.f32 %v21041_v36, %v21133_v13  ;;  %v1399_v36 = vadd.f32 %v21049_v31, %v21147_v40 }
 0x370   :  { %v19116_v18 = vpop.eup %19115  ;;  %19125 = vrcp.f32 %v3475_v9  ;;  %v3474_v48 = vadd.f32 1.0, %v19114_v30 }
 0x371   :  { %19127 = vrcp.f32 %v3564_v10  ;;  %v3563_v49 = vadd.f32 1.0, %v19116_v18  ;;  %v1169_v10 = vadd.f32 %v21131_v51, %v21043_v37  ;;  %v1244_v18 = vadd.f32 %v21133_v13, %v21045_v41 }
 0x372   :  { %19129 = vrcp.f32 %v3474_v48  ;;  %v1394_v41 = vadd.f32 %v21147_v40, %v21053_v44 }
 0x373   :  { %19131 = vrcp.f32 %v3563_v49 }
 0x374   :  { %v19118_v25 = vpop.eup %19117 }
 0x376   :  { %v19120_v43 = vpop.eup %19119 }
 0x377   :  { %v19122_v11 = vpop.eup %19121  ;;  %v3732_v57 = vadd.f32 1.0, %v19120_v43 }
 0x378   :  { %v19124_v56 = vpop.eup %19123 }
 0x379   :  { %v3731_v12 = vadd.f32 1.0, %v19124_v56 }
 0x37b   :  { %19133 = vrcp.f32 %v3731_v12  ;;  %v1324_v12 = vadd.f32 %v21047_v26, %v21149_v28 }
 0x37d   :  { %v19126_v61 = vpop.eup %19125 }
 0x37e   :  { %v19128_v15 = vpop.eup %19127  ;;  %v3740_v62 = vmul.f32 %v19126_v61, %v19118_v25 }
 0x37f   :  { %v19130_v63 = vpop.eup %19129  ;;  %v3738_v55 = vmul.f32 %v19128_v15, %v21159_v14 }
 0x380   :  { %v19132_v19 = vpop.eup %19131  ;;  %v3739_v58 = vmul.f32 %v19130_v63, %v19122_v11 }
 0x381   :  { %v21222_v39 = vadd.f32 %v3740_v62, %v3738_v55  ;;  %v3737_v20 = vmul.f32 %v19132_v19, %v21161_v52  ;;  %v1174_v52 = vadd.f32 %v21039_v32, %v21131_v51 }
 0x383   :  { %v21225_v22 = vadd.f32 %v3739_v58, %v3737_v20  ;;  %19135 = vtanh.f32 %v21222_v39 }
 0x385   :  { %19137 = vtanh.f32 %v21225_v22 }
 0x386   :  { %19139 = vrcp.f32 %v3732_v57  ;;  %v1319_v57 = vadd.f32 %v21149_v28, %v21051_v42 }
 0x388   :  { %v19134_v21 = vpop.eup %19133 }
 0x390   :  { %v19136_v29 = vpop.eup %19135 }
 0x392   :  { %v19138_v8 = vpop.eup %19137 }
 0x393   :  { %v19140_v14 = vpop.eup %19139  ;;  %v3745_v24 = vmul.f32 %v19138_v8, %v19134_v21 }
 0x394   :  { %v3746_v33 = vmul.f32 %v19140_v14, %v19136_v29 }
 0x395   :  { %17095 = vmatprep.mubr.msk.f32.mxu0 %vm431_vm7, %v3745_v24  ;;  %17106 = vmatprep.mubr.msk.f32.mxu1 %vm431_vm7, %v3745_v24 }
 0x396   :  { %17096 = vmatmul.mubr.msk.f32.vlgmr.msra.gmra.mxu0 %vm431_vm7, %v3746_v33  ;;  %17107 = vmatmul.mubr.msk.f32.vlgmr.msra.gmra.mxu1 %vm431_vm7, %v3746_v33 }
 0x397   :  { %17110 = vmatpush3.msra.mxu0 %v20949_v23  ;;  %17121 = vmatpush3.msra.mxu1 %v20951_v53 }
 0x398   :  { %17111 = vmatprep.subr.mxu0 %v20957_v54  ;;  %17117 = vmatprep.mubr.msk.f32.mxu0 %vm431_vm7, %v3745_v24 }
 0x399   :  { %17122 = vmatprep.subr.mxu1 %v20959_v59  ;;  %17128 = vmatprep.mubr.msk.f32.mxu1 %vm431_vm7, %v3745_v24 }
 0x39a   :  { %17112 = vmatpush3.msra.mxu0 %v20957_v54  ;;  %17123 = vmatpush3.msra.mxu1 %v20959_v59 }
 0x39b   :  { %17113 = vmatprep.subr.mxu0 %v20965_v60  ;;  %17124 = vmatprep.subr.mxu1 %v20967_v16 }
 0x39c   :  { %17114 = vmatpush3.msra.mxu0 %v20965_v60  ;;  %17125 = vmatpush3.msra.mxu1 %v20967_v16 }
 0x39d   :  { %17115 = vmatprep.subr.mxu0 %v20973_v17  ;;  %17126 = vmatprep.subr.mxu1 %v20975_v50 }
 0x39e   :  { %17116 = vmatpush3.msra.mxu0 %v20973_v17  ;;  %17127 = vmatpush3.msra.mxu1 %v20975_v50 }
 0x39f   :  { %17118 = vmatmul.mubr.msk.f32.vlgmr.msra.gmra.mxu0 %vm431_vm7, %v3746_v33  ;;  %17129 = vmatmul.mubr.msk.f32.vlgmr.msra.gmra.mxu1 %vm431_vm7, %v3746_v33 }
 0x3a0   :  { %17131 = vmatprep.subr.mxu0 %v20910_v0  ;;  %17142 = vmatprep.subr.mxu1 %v20912_v1 }
 0x3a1   :  { %17132 = vmatpush3.msra.mxu0 %v20910_v0  ;;  %17143 = vmatpush3.msra.mxu1 %v20912_v1 }
 0x3a2   :  { %17133 = vmatprep.subr.mxu0 %v20921_v2  ;;  %17144 = vmatprep.subr.mxu1 %v20923_v3 }
 0x3a3   :  { %17134 = vmatpush3.msra.mxu0 %v20921_v2  ;;  %17145 = vmatpush3.msra.mxu1 %v20923_v3 }
 0x3a4   :  { %17135 = vmatprep.subr.mxu0 %v20929_v4  ;;  %17146 = vmatprep.subr.mxu1 %v20931_v5 }
 0x3a5   :  { %17136 = vmatpush3.msra.mxu0 %v20929_v4  ;;  %17147 = vmatpush3.msra.mxu1 %v20931_v5 }
 0x3a6   :  { %17137 = vmatprep.subr.mxu0 %v20937_v6  ;;  %17148 = vmatprep.subr.mxu1 %v20939_v7 }
 0x3a7   :  { %17138 = vmatpush3.msra.mxu0 %v20937_v6  ;;  %17149 = vmatpush3.msra.mxu1 %v20939_v7 }
 0x3a8   :  { %17153 = vmatprep.subr.mxu0 %v20949_v23  ;;  %17164 = vmatprep.subr.mxu1 %v20951_v53 }
 0x456   :  { %v17097_v9 = vpop.f32.mrf.mxu0  ;;  %v17108_v30 = vpop.f32.mrf.mxu1 }
 0x457   :  { %v3829_v48 = vadd.f32 %v17097_v9, %v1174_v52  ;;  %v3918_v49 = vadd.f32 %v17108_v30, %v1249_v35 }
 0x458   :  { %v3819_v25 = vpop.f32.mrf.mxu0  ;;  %v3908_v43 = vpop.f32.mrf.mxu1 }
 0x459   :  { %v15236_v11 = vmul.f32 -1.442695, %v3829_v48  ;;  %v15240_v56 = vmul.f32 -1.442695, %v3918_v49  ;;  %v3828_v61 = vadd.f32 %v3819_v25, %v1169_v10  ;;  %v3917_v15 = vadd.f32 %v3908_v43, %v1244_v18 }
 0x45b   :  { %19141 = vpow2.f32 %v15236_v11  ;;  %v15235_v32 = vmul.f32 -1.442695, %v3828_v61  ;;  %v15239_v62 = vmul.f32 -1.442695, %v3917_v15 }
 0x45c   :  { %19143 = vpow2.f32 %v15240_v56 }
 0x45d   :  { %19145 = vpow2.f32 %v15235_v32 }
 0x45e   :  { %19147 = vpow2.f32 %v15239_v62 }
 0x45f   :  { %v17119_v37 = vpop.f32.mrf.mxu0  ;;  %v17130_v63 = vpop.f32.mrf.mxu1 }
 0x460   :  { %v4086_v55 = vadd.f32 %v17130_v63, %v1399_v36  ;;  %v4007_v21 = vadd.f32 %v17119_v37, %v1324_v12 }
 0x461   :  { %v4076_v19 = vpop.f32.mrf.mxu1  ;;  %v3997_v58 = vpop.f32.mrf.mxu0 }
 0x462   :  { %v4085_v20 = vadd.f32 %v4076_v19, %v1394_v41  ;;  %v15246_v29 = vmul.f32 -1.442695, %v4086_v55  ;;  %v4006_v8 = vadd.f32 %v3997_v58, %v1319_v57  ;;  %19149 = vtanh.f32 %v4007_v21  ;;  %v24229_v58 = vld [vmem:[#allocation40_spill] sm:$0xff] }
 0x464   :  { %v15245_v31 = vmul.f32 -1.442695, %v4085_v20  ;;  %19151 = vpow2.f32 %v15246_v29  ;;  %v1648_v20 = vadd.f32 %v24229_v58, %v21149_v28 }
 0x465   :  { %19153 = vtanh.f32 %v4006_v8  ;;  %v24230_v8 = vld [vmem:[#allocation41_spill] sm:$0xff] }
 0x466   :  { %19155 = vpow2.f32 %v15245_v31  ;;  %v1643_v31 = vadd.f32 %v21149_v28, %v24230_v8  ;;  %v24234_v8 = vld [vmem:[#allocation45_spill] sm:$0xff] }
 0x468   :  { %v19142_v14 = vpop.eup %19141 }
 0x469   :  { %v19144_v24 = vpop.eup %19143  ;;  %v3837_v33 = vadd.f32 1.0, %v19142_v14 }
 0x46a   :  { %v19146_v44 = vpop.eup %19145  ;;  %v3926_v52 = vadd.f32 1.0, %v19144_v24 }
 0x46b   :  { %v19148_v26 = vpop.eup %19147  ;;  %19157 = vrcp.f32 %v3837_v33  ;;  %v3836_v35 = vadd.f32 1.0, %v19146_v44 }
 0x46c   :  { %19159 = vrcp.f32 %v3926_v52  ;;  %v3925_v9 = vadd.f32 1.0, %v19148_v26 }
 0x46d   :  { %19161 = vrcp.f32 %v3836_v35 }
 0x46e   :  { %19163 = vrcp.f32 %v3925_v9 }
 0x46f   :  { %v19150_v42 = vpop.eup %19149 }
 0x471   :  { %v19152_v30 = vpop.eup %19151 }
 0x472   :  { %v19154_v10 = vpop.eup %19153  ;;  %v4094_v36 = vadd.f32 1.0, %v19152_v30 }
 0x473   :  { %v19156_v18 = vpop.eup %19155 }
 0x474   :  { %v4093_v56 = vadd.f32 1.0, %v19156_v18 }
 0x476   :  { %19165 = vrcp.f32 %v4093_v56 }
 0x478   :  { %v19158_v48 = vpop.eup %19157 }
 0x479   :  { %v19160_v49 = vpop.eup %19159  ;;  %v4102_v25 = vmul.f32 %v19158_v48, %v19150_v42 }
 0x47a   :  { %v19162_v43 = vpop.eup %19161  ;;  %v4100_v11 = vmul.f32 %v19160_v49, %v21222_v39 }
 0x47b   :  { %v19164_v61 = vpop.eup %19163  ;;  %v4101_v15 = vmul.f32 %v19162_v43, %v19154_v10 }
 0x47c   :  { %v21286_v32 = vadd.f32 %v4102_v25, %v4100_v11  ;;  %v4099_v62 = vmul.f32 %v19164_v61, %v21225_v22 }
 0x47e   :  { %v21289_v37 = vadd.f32 %v4101_v15, %v4099_v62  ;;  %19167 = vtanh.f32 %v21286_v32 }
 0x480   :  { %19169 = vtanh.f32 %v21289_v37 }
 0x481   :  { %19171 = vrcp.f32 %v4094_v36 }
 0x483   :  { %v19166_v63 = vpop.eup %19165 }
 0x48b   :  { %v19168_v41 = vpop.eup %19167 }
 0x48d   :  { %v19170_v55 = vpop.eup %19169 }
 0x48e   :  { %v19172_v39 = vpop.eup %19171  ;;  %v4107_v12 = vmul.f32 %v19170_v55, %v19166_v63 }
 0x48f   :  { %v4108_v19 = vmul.f32 %v19172_v39, %v19168_v41 }
 0x490   :  { %17139 = vmatprep.mubr.msk.f32.mxu0 %vm431_vm7, %v4107_v12  ;;  %17150 = vmatprep.mubr.msk.f32.mxu1 %vm431_vm7, %v4107_v12 }
 0x491   :  { %17140 = vmatmul.mubr.msk.f32.vlgmr.msra.gmra.mxu0 %vm431_vm7, %v4108_v19  ;;  %17151 = vmatmul.mubr.msk.f32.vlgmr.msra.gmra.mxu1 %vm431_vm7, %v4108_v19 }
 0x492   :  { %17154 = vmatpush3.msra.mxu0 %v20949_v23  ;;  %17165 = vmatpush3.msra.mxu1 %v20951_v53 }
 0x493   :  { %17155 = vmatprep.subr.mxu0 %v20957_v54  ;;  %17161 = vmatprep.mubr.msk.f32.mxu0 %vm431_vm7, %v4107_v12 }
 0x494   :  { %17166 = vmatprep.subr.mxu1 %v20959_v59  ;;  %17172 = vmatprep.mubr.msk.f32.mxu1 %vm431_vm7, %v4107_v12 }
 0x495   :  { %17156 = vmatpush3.msra.mxu0 %v20957_v54  ;;  %17167 = vmatpush3.msra.mxu1 %v20959_v59 }
 0x496   :  { %17157 = vmatprep.subr.mxu0 %v20965_v60  ;;  %17168 = vmatprep.subr.mxu1 %v20967_v16 }
 0x497   :  { %17158 = vmatpush3.msra.mxu0 %v20965_v60  ;;  %17169 = vmatpush3.msra.mxu1 %v20967_v16 }
 0x498   :  { %17159 = vmatprep.subr.mxu0 %v20973_v17  ;;  %17170 = vmatprep.subr.mxu1 %v20975_v50 }
 0x499   :  { %17160 = vmatpush3.msra.mxu0 %v20973_v17  ;;  %17171 = vmatpush3.msra.mxu1 %v20975_v50 }
 0x49a   :  { %17162 = vmatmul.mubr.msk.f32.vlgmr.msra.gmra.mxu0 %vm431_vm7, %v4108_v19  ;;  %17173 = vmatmul.mubr.msk.f32.vlgmr.msra.gmra.mxu1 %vm431_vm7, %v4108_v19 }
 0x49b   :  { %17175 = vmatprep.subr.mxu0 %v20910_v0  ;;  %17186 = vmatprep.subr.mxu1 %v20912_v1 }
 0x49c   :  { %17176 = vmatpush3.msra.mxu0 %v20910_v0  ;;  %17187 = vmatpush3.msra.mxu1 %v20912_v1  ;;  %v1498_v0 = vadd.f32 %v21055_v34, %v21131_v51  ;;  %v1573_v1 = vadd.f32 %v21057_v45, %v21133_v13  ;;  %v1723_v34 = vadd.f32 %v21065_v38, %v21147_v40 }
 0x49d   :  { %17177 = vmatprep.subr.mxu0 %v20921_v2  ;;  %17188 = vmatprep.subr.mxu1 %v20923_v3 }
 0x49e   :  { %17178 = vmatpush3.msra.mxu0 %v20921_v2  ;;  %17189 = vmatpush3.msra.mxu1 %v20923_v3 }
 0x49f   :  { %17179 = vmatprep.subr.mxu0 %v20929_v4  ;;  %17190 = vmatprep.subr.mxu1 %v20931_v5 }
 0x4a0   :  { %17180 = vmatpush3.msra.mxu0 %v20929_v4  ;;  %17191 = vmatpush3.msra.mxu1 %v20931_v5  ;;  %v1493_v4 = vadd.f32 %v21131_v51, %v21059_v46  ;;  %v1568_v5 = vadd.f32 %v21133_v13, %v21061_v27  ;;  %v1718_v27 = vadd.f32 %v21147_v40, %v21069_v47 }
 0x4a1   :  { %17181 = vmatprep.subr.mxu0 %v20937_v6  ;;  %17192 = vmatprep.subr.mxu1 %v20939_v7 }
 0x4a2   :  { %17182 = vmatpush3.msra.mxu0 %v20937_v6  ;;  %17193 = vmatpush3.msra.mxu1 %v20939_v7 }
 0x4a3   :  { %17197 = vmatprep.subr.mxu0 %v20949_v23  ;;  %17208 = vmatprep.subr.mxu1 %v20951_v53 }
 0x551   :  { %v17141_v2 = vpop.f32.mrf.mxu0  ;;  %v17152_v3 = vpop.f32.mrf.mxu1 }
 0x552   :  { %v4191_v6 = vadd.f32 %v17141_v2, %v1498_v0  ;;  %v4280_v7 = vadd.f32 %v17152_v3, %v1573_v1  ;;  %v21364_v3 = vld [vmem:[#allocation6 + $0x78] sm:$0xff] }
 0x553   :  { %v4181_v54 = vpop.f32.mrf.mxu0  ;;  %v4270_v23 = vpop.f32.mrf.mxu1 }
 0x554   :  { %v15250_v59 = vmul.f32 -1.442695, %v4191_v6  ;;  %v15254_v53 = vmul.f32 -1.442695, %v4280_v7  ;;  %v4190_v60 = vadd.f32 %v4181_v54, %v1493_v4  ;;  %v4279_v16 = vadd.f32 %v4270_v23, %v1568_v5  ;;  %v21367_v4 = vld [vmem:[#allocation6 + $0x50] sm:$0xff]  ;;  %v21377_v6 = vld [vmem:[#allocation6 + $0x48] sm:$0xff] }
 0x555   :  { %v21371_v5 = vld [vmem:[#allocation6 + $0x70] sm:$0xff]  ;;  %v21380_v7 = vld [vmem:[#allocation6 + $0x68] sm:$0xff]  ;;  %v21385_v54 = vld [vmem:[#allocation6 + $0x40] sm:$0xff] }
 0x556   :  { %19173 = vpow2.f32 %v15250_v59  ;;  %v15249_v17 = vmul.f32 -1.442695, %v4190_v60  ;;  %v15253_v50 = vmul.f32 -1.442695, %v4279_v16  ;;  %v21388_v23 = vld [vmem:[#allocation6 + $0x60] sm:$0xff]  ;;  %v21395_v59 = vld [vmem:[#allocation6 + $0x18] sm:$0xff] }
 0x557   :  { %19175 = vpow2.f32 %v15254_v53  ;;  %v21398_v53 = vld [vmem:[#allocation6 + $0x38] sm:$0xff]  ;;  %v21403_v60 = vld [vmem:[#allocation6 + $0x10] sm:$0xff] }
 0x558   :  { %19177 = vpow2.f32 %v15249_v17  ;;  %v21406_v16 = vld [vmem:[#allocation6 + $0x30] sm:$0xff]  ;;  %v21411_v17 = vld [vmem:[#allocation6 + $0x8] sm:$0xff] }
 0x559   :  { %19179 = vpow2.f32 %v15253_v50  ;;  %v21414_v50 = vld [vmem:[#allocation6 + $0x28] sm:$0xff] }
 0x55a   :  { %v17163_v45 = vpop.f32.mrf.mxu0  ;;  %v17174_v46 = vpop.f32.mrf.mxu1 }
 0x55b   :  { %v4448_v22 = vadd.f32 %v17174_v46, %v1723_v34  ;;  %v4369_v14 = vadd.f32 %v17163_v45, %v1648_v20  ;;  %v21419_v34 = vld [vmem:[#allocation6] sm:$0xff] }
 0x55c   :  { %v4438_v57 = vpop.f32.mrf.mxu1  ;;  %v4359_v21 = vpop.f32.mrf.mxu0  ;;  %v21422_v45 = vld [vmem:[#allocation6 + $0x20] sm:$0xff] }
 0x55d   :  { %v4447_v29 = vadd.f32 %v4438_v57, %v1718_v27  ;;  %v15260_v24 = vmul.f32 -1.442695, %v4448_v22  ;;  %v4368_v33 = vadd.f32 %v4359_v21, %v1643_v31  ;;  %19181 = vtanh.f32 %v4369_v14  ;;  %v24231_v46 = vld [vmem:[#allocation42_spill] sm:$0xff]  ;;  %v24232_v22 = vld [vmem:[#allocation43_spill] sm:$0xff]  ;;  %v24233_v21 = vld [vmem:[#allocation44_spill] sm:$0xff] }
 0x55e   :  { %v1823_v27 = vadd.f32 %v24231_v46, %v21131_v51  ;;  %v1898_v58 = vadd.f32 %v24232_v22, %v21133_v13  ;;  %v1893_v31 = vadd.f32 %v21133_v13, %v24234_v8  ;;  %v24236_v13 = vld [vmem:[#allocation49_spill] sm:$0xff] }
 0x55f   :  { %v15259_v38 = vmul.f32 -1.442695, %v4447_v29  ;;  %19183 = vpow2.f32 %v15260_v24  ;;  %v1818_v29 = vadd.f32 %v21131_v51, %v24233_v21 }
 0x560   :  { %19185 = vtanh.f32 %v4368_v33 }
 0x561   :  { %19187 = vpow2.f32 %v15259_v38 }
 0x563   :  { %v19174_v44 = vpop.eup %19173 }
 0x564   :  { %v19176_v52 = vpop.eup %19175  ;;  %v4199_v26 = vadd.f32 1.0, %v19174_v44 }
 0x565   :  { %v19178_v47 = vpop.eup %19177  ;;  %v4288_v35 = vadd.f32 1.0, %v19176_v52 }
 0x566   :  { %v19180_v9 = vpop.eup %19179  ;;  %19189 = vrcp.f32 %v4199_v26  ;;  %v4198_v42 = vadd.f32 1.0, %v19178_v47 }
 0x567   :  { %19191 = vrcp.f32 %v4288_v35  ;;  %v4287_v30 = vadd.f32 1.0, %v19180_v9 }
 0x568   :  { %19193 = vrcp.f32 %v4198_v42  ;;  %v24235_v42 = vld [vmem:[#allocation47_spill] sm:$0xff] }
 0x569   :  { %19195 = vrcp.f32 %v4287_v30  ;;  %v2048_v30 = vadd.f32 %v24235_v42, %v21147_v40 }
 0x56a   :  { %v19182_v10 = vpop.eup %19181 }
 0x56c   :  { %v19184_v18 = vpop.eup %19183 }
 0x56d   :  { %v19186_v48 = vpop.eup %19185  ;;  %v4456_v55 = vadd.f32 1.0, %v19184_v18  ;;  %v2043_v18 = vadd.f32 %v21147_v40, %v24236_v13  ;;  %v24240_v13 = vld [vmem:[#allocation51_spill] sm:$0xff] }
 0x56e   :  { %v19188_v49 = vpop.eup %19187 }
 0x56f   :  { %v4455_v15 = vadd.f32 1.0, %v19188_v49  ;;  %v24237_v49 = vld [vmem:[#allocation46_spill] sm:$0xff] }
 0x571   :  { %19197 = vrcp.f32 %v4455_v15 }
 0x573   :  { %v19190_v25 = vpop.eup %19189 }
 0x574   :  { %v19192_v43 = vpop.eup %19191  ;;  %v4464_v11 = vmul.f32 %v19190_v25, %v19182_v10  ;;  %v1973_v25 = vadd.f32 %v24237_v49, %v21149_v28 }
 0x575   :  { %v19194_v56 = vpop.eup %19193  ;;  %v4462_v61 = vmul.f32 %v19192_v43, %v21286_v32 }
 0x576   :  { %v19196_v62 = vpop.eup %19195  ;;  %v4463_v36 = vmul.f32 %v19194_v56, %v19186_v48 }
 0x577   :  { %v21350_v63 = vadd.f32 %v4464_v11, %v4462_v61  ;;  %v4461_v41 = vmul.f32 %v19196_v62, %v21289_v37  ;;  %v21361_v37 = vld [vmem:[#allocation6 + $0x58] sm:$0xff] }
 0x578   :  { %v24238_v61 = vld [vmem:[#allocation48_spill] sm:$0xff] }
 0x579   :  { %v21353_v39 = vadd.f32 %v4463_v36, %v4461_v41  ;;  %19199 = vtanh.f32 %v21350_v63  ;;  %v1968_v15 = vadd.f32 %v21149_v28, %v24238_v61 }
 0x57b   :  { %19201 = vtanh.f32 %v21353_v39 }
 0x57c   :  { %19203 = vrcp.f32 %v4456_v55 }
 0x57e   :  { %v19198_v12 = vpop.eup %19197 }
 0x586   :  { %v19200_v19 = vpop.eup %19199 }
 0x588   :  { %v19202_v0 = vpop.eup %19201 }
 0x589   :  { %v19204_v32 = vpop.eup %19203  ;;  %v4469_v1 = vmul.f32 %v19202_v0, %v19198_v12 }
 0x58a   :  { %v4470_v2 = vmul.f32 %v19204_v32, %v19200_v19 }
 0x58b   :  { %17183 = vmatprep.mubr.msk.f32.mxu0 %vm431_vm7, %v4469_v1  ;;  %17194 = vmatprep.mubr.msk.f32.mxu1 %vm431_vm7, %v4469_v1 }
 0x58c   :  { %17184 = vmatmul.mubr.msk.f32.vlgmr.msra.gmra.mxu0 %vm431_vm7, %v4470_v2  ;;  %17195 = vmatmul.mubr.msk.f32.vlgmr.msra.gmra.mxu1 %vm431_vm7, %v4470_v2 }
 0x58d   :  { %17198 = vmatpush3.msra.mxu0 %v21361_v37  ;;  %17209 = vmatpush3.msra.mxu1 %v21364_v3 }
 0x58e   :  { %17199 = vmatprep.subr.mxu0 %v21367_v4  ;;  %17205 = vmatprep.mubr.msk.f32.mxu0 %vm431_vm7, %v4469_v1 }
 0x58f   :  { %17210 = vmatprep.subr.mxu1 %v21371_v5  ;;  %17216 = vmatprep.mubr.msk.f32.mxu1 %vm431_vm7, %v4469_v1 }
 0x590   :  { %17200 = vmatpush3.msra.mxu0 %v21367_v4  ;;  %17211 = vmatpush3.msra.mxu1 %v21371_v5 }
 0x591   :  { %17201 = vmatprep.subr.mxu0 %v21377_v6  ;;  %17212 = vmatprep.subr.mxu1 %v21380_v7 }
 0x592   :  { %17202 = vmatpush3.msra.mxu0 %v21377_v6  ;;  %17213 = vmatpush3.msra.mxu1 %v21380_v7 }
 0x593   :  { %17203 = vmatprep.subr.mxu0 %v21385_v54  ;;  %17214 = vmatprep.subr.mxu1 %v21388_v23 }
 0x594   :  { %17204 = vmatpush3.msra.mxu0 %v21385_v54  ;;  %17215 = vmatpush3.msra.mxu1 %v21388_v23 }
 0x595   :  { %17206 = vmatmul.mubr.msk.f32.vlgmr.msra.gmra.mxu0 %vm431_vm7, %v4470_v2  ;;  %17217 = vmatmul.mubr.msk.f32.vlgmr.msra.gmra.mxu1 %vm431_vm7, %v4470_v2 }
 0x596   :  { %17219 = vmatprep.subr.mxu0 %v21395_v59  ;;  %17230 = vmatprep.subr.mxu1 %v21398_v53 }
 0x597   :  { %17220 = vmatpush3.msra.mxu0 %v21395_v59  ;;  %17231 = vmatpush3.msra.mxu1 %v21398_v53 }
 0x598   :  { %17221 = vmatprep.subr.mxu0 %v21403_v60  ;;  %17232 = vmatprep.subr.mxu1 %v21406_v16 }
 0x599   :  { %17222 = vmatpush3.msra.mxu0 %v21403_v60  ;;  %17233 = vmatpush3.msra.mxu1 %v21406_v16 }
 0x59a   :  { %17223 = vmatprep.subr.mxu0 %v21411_v17  ;;  %17234 = vmatprep.subr.mxu1 %v21414_v50 }
 0x59b   :  { %17224 = vmatpush3.msra.mxu0 %v21411_v17  ;;  %17235 = vmatpush3.msra.mxu1 %v21414_v50 }
 0x59c   :  { %17225 = vmatprep.subr.mxu0 %v21419_v34  ;;  %17236 = vmatprep.subr.mxu1 %v21422_v45 }
 0x59d   :  { %17226 = vmatpush3.msra.mxu0 %v21419_v34  ;;  %17237 = vmatpush3.msra.mxu1 %v21422_v45 }
 0x59e   :  { %17241 = vmatprep.subr.mxu0 %v21361_v37  ;;  %17252 = vmatprep.subr.mxu1 %v21364_v3 }
 0x64c   :  { %v17185_v20 = vpop.f32.mrf.mxu0  ;;  %v17196_v57 = vpop.f32.mrf.mxu1 }
 0x64d   :  { %v4553_v14 = vadd.f32 %v17185_v20, %v1823_v27  ;;  %v4642_v24 = vadd.f32 %v17196_v57, %v1898_v58 }
 0x64e   :  { %v4543_v33 = vpop.f32.mrf.mxu0  ;;  %v4632_v38 = vpop.f32.mrf.mxu1 }
 0x64f   :  { %v15264_v44 = vmul.f32 -1.442695, %v4553_v14  ;;  %v15268_v52 = vmul.f32 -1.442695, %v4642_v24  ;;  %v4552_v26 = vadd.f32 %v4543_v33, %v1818_v29  ;;  %v4641_v47 = vadd.f32 %v4632_v38, %v1893_v31 }
 0x651   :  { %19205 = vpow2.f32 %v15264_v44  ;;  %v15263_v35 = vmul.f32 -1.442695, %v4552_v26  ;;  %v15267_v9 = vmul.f32 -1.442695, %v4641_v47 }
 0x652   :  { %19207 = vpow2.f32 %v15268_v52 }
 0x653   :  { %19209 = vpow2.f32 %v15263_v35 }
 0x654   :  { %19211 = vpow2.f32 %v15267_v9 }
 0x655   :  { %v17207_v51 = vpop.f32.mrf.mxu0  ;;  %v17218_v10 = vpop.f32.mrf.mxu1 }
 0x656   :  { %v4810_v48 = vadd.f32 %v17218_v10, %v2048_v30  ;;  %v4731_v62 = vadd.f32 %v17207_v51, %v1973_v25  ;;  %v24239_v30 = vld [vmem:[#allocation50_spill] sm:$0xff]  ;;  %v21497_v10 = vld [vmem:[#allocation7 + $0x1] ss:$0 sm:$0xff]  ;;  %v24241_v25 = vld [vmem:[#allocation52_spill] sm:$0xff] }
 0x657   :  { %v4800_v43 = vpop.f32.mrf.mxu1  ;;  %v4721_v11 = vpop.f32.mrf.mxu0 }
 0x658   :  { %v4809_v56 = vadd.f32 %v4800_v43, %v2043_v18  ;;  %v15274_v36 = vmul.f32 -1.442695, %v4810_v48  ;;  %v4730_v41 = vadd.f32 %v4721_v11, %v1968_v15  ;;  %19213 = vtanh.f32 %v4731_v62  ;;  %v24242_v11 = vld [vmem:[#allocation53_spill] sm:$0xff] }
 0x659   :  { %v2223_v18 = vadd.f32 %v21497_v10, %v24240_v13 }
 0x65a   :  { %v15273_v55 = vmul.f32 -1.442695, %v4809_v56  ;;  %19215 = vpow2.f32 %v15274_v36  ;;  %v2218_v56 = vadd.f32 %v21497_v10, %v24242_v11 }
 0x65b   :  { %19217 = vtanh.f32 %v4730_v41 }
 0x65c   :  { %19219 = vpow2.f32 %v15273_v55 }
 0x65e   :  { %v19206_v12 = vpop.eup %19205 }
 0x65f   :  { %v19208_v19 = vpop.eup %19207  ;;  %v4561_v0 = vadd.f32 1.0, %v19206_v12 }
 0x660   :  { %v19210_v40 = vpop.eup %19209  ;;  %v4650_v32 = vadd.f32 1.0, %v19208_v19 }
 0x661   :  { %v19212_v1 = vpop.eup %19211  ;;  %19221 = vrcp.f32 %v4561_v0  ;;  %v4560_v2 = vadd.f32 1.0, %v19210_v40 }
 0x662   :  { %19223 = vrcp.f32 %v4650_v32  ;;  %v4649_v46 = vadd.f32 1.0, %v19212_v1  ;;  %v21505_v32 = vld [vmem:[#allocation7 + $0x3] ss:$0 sm:$0xff]  ;;  %v24243_v1 = vld [vmem:[#allocation55_spill] sm:$0xff] }
 0x663   :  { %19225 = vrcp.f32 %v4560_v2  ;;  %v2373_v2 = vadd.f32 %v21505_v32, %v24243_v1 }
 0x664   :  { %19227 = vrcp.f32 %v4649_v46 }
 0x665   :  { %v19214_v28 = vpop.eup %19213 }
 0x667   :  { %v19216_v27 = vpop.eup %19215 }
 0x668   :  { %v19218_v22 = vpop.eup %19217  ;;  %v4818_v44 = vadd.f32 1.0, %v19216_v27  ;;  %v24244_v27 = vld [vmem:[#allocation57_spill] sm:$0xff] }
 0x669   :  { %v19220_v58 = vpop.eup %19219 }
 0x66a   :  { %v4817_v31 = vadd.f32 1.0, %v19220_v58 }
 0x66c   :  { %19229 = vrcp.f32 %v4817_v31 }
 0x66e   :  { %v19222_v20 = vpop.eup %19221 }
 0x66f   :  { %v19224_v57 = vpop.eup %19223  ;;  %v4826_v21 = vmul.f32 %v19222_v20, %v19214_v28  ;;  %v21511_v20 = vld [vmem:[#allocation7 + $0x2] ss:$0 sm:$0xff] }
 0x670   :  { %v19226_v29 = vpop.eup %19225  ;;  %v4824_v8 = vmul.f32 %v19224_v57, %v21350_v63  ;;  %v24245_v57 = vld [vmem:[#allocation54_spill] sm:$0xff] }
 0x671   :  { %v19228_v14 = vpop.eup %19227  ;;  %v4825_v24 = vmul.f32 %v19226_v29, %v19218_v22  ;;  %v2368_v22 = vadd.f32 %v21505_v32, %v24244_v27 }
 0x672   :  { %v21446_v33 = vadd.f32 %v4826_v21, %v4824_v8  ;;  %v4823_v38 = vmul.f32 %v19228_v14, %v21353_v39  ;;  %v21493_v39 = vld [vmem:[#allocation7] ss:$0 sm:$0xff]  ;;  %v2298_v21 = vadd.f32 %v21511_v20, %v24245_v57  ;;  %v24246_v14 = vld [vmem:[#allocation56_spill] sm:$0xff] }
 0x673   :  { %v2148_v51 = vadd.f32 %v21493_v39, %v24239_v30  ;;  %v2143_v43 = vadd.f32 %v21493_v39, %v24241_v25 }
 0x674   :  { %v21449_v52 = vadd.f32 %v4825_v24, %v4823_v38  ;;  %19231 = vtanh.f32 %v21446_v33  ;;  %v2293_v24 = vadd.f32 %v21511_v20, %v24246_v14 }
 0x676   :  { %19233 = vtanh.f32 %v21449_v52 }
 0x677   :  { %19235 = vrcp.f32 %v4818_v44 }
 0x679   :  { %v19230_v26 = vpop.eup %19229 }
 0x681   :  { %v19232_v47 = vpop.eup %19231 }
 0x683   :  { %v19234_v35 = vpop.eup %19233 }
 0x684   :  { %v19236_v63 = vpop.eup %19235  ;;  %v4831_v9 = vmul.f32 %v19234_v35, %v19230_v26 }
 0x685   :  { %v4832_v42 = vmul.f32 %v19236_v63, %v19232_v47 }
 0x686   :  { %17227 = vmatprep.mubr.msk.f32.mxu0 %vm431_vm7, %v4831_v9  ;;  %17238 = vmatprep.mubr.msk.f32.mxu1 %vm431_vm7, %v4831_v9 }
 0x687   :  { %17228 = vmatmul.mubr.msk.f32.vlgmr.msra.gmra.mxu0 %vm431_vm7, %v4832_v42  ;;  %17239 = vmatmul.mubr.msk.f32.vlgmr.msra.gmra.mxu1 %vm431_vm7, %v4832_v42 }
 0x688   :  { %17242 = vmatpush3.msra.mxu0 %v21361_v37  ;;  %17253 = vmatpush3.msra.mxu1 %v21364_v3 }
 0x689   :  { %17243 = vmatprep.subr.mxu0 %v21367_v4  ;;  %17249 = vmatprep.mubr.msk.f32.mxu0 %vm431_vm7, %v4831_v9 }
 0x68a   :  { %17254 = vmatprep.subr.mxu1 %v21371_v5  ;;  %17260 = vmatprep.mubr.msk.f32.mxu1 %vm431_vm7, %v4831_v9 }
 0x68b   :  { %17244 = vmatpush3.msra.mxu0 %v21367_v4  ;;  %17255 = vmatpush3.msra.mxu1 %v21371_v5 }
 0x68c   :  { %17245 = vmatprep.subr.mxu0 %v21377_v6  ;;  %17256 = vmatprep.subr.mxu1 %v21380_v7 }
 0x68d   :  { %17246 = vmatpush3.msra.mxu0 %v21377_v6  ;;  %17257 = vmatpush3.msra.mxu1 %v21380_v7 }
 0x68e   :  { %17247 = vmatprep.subr.mxu0 %v21385_v54  ;;  %17258 = vmatprep.subr.mxu1 %v21388_v23 }
 0x68f   :  { %17248 = vmatpush3.msra.mxu0 %v21385_v54  ;;  %17259 = vmatpush3.msra.mxu1 %v21388_v23 }
 0x690   :  { %17250 = vmatmul.mubr.msk.f32.vlgmr.msra.gmra.mxu0 %vm431_vm7, %v4832_v42  ;;  %17261 = vmatmul.mubr.msk.f32.vlgmr.msra.gmra.mxu1 %vm431_vm7, %v4832_v42 }
 0x691   :  { %17263 = vmatprep.subr.mxu0 %v21395_v59  ;;  %17274 = vmatprep.subr.mxu1 %v21398_v53 }
 0x692   :  { %17264 = vmatpush3.msra.mxu0 %v21395_v59  ;;  %17275 = vmatpush3.msra.mxu1 %v21398_v53 }
 0x693   :  { %17265 = vmatprep.subr.mxu0 %v21403_v60  ;;  %17276 = vmatprep.subr.mxu1 %v21406_v16 }
 0x694   :  { %17266 = vmatpush3.msra.mxu0 %v21403_v60  ;;  %17277 = vmatpush3.msra.mxu1 %v21406_v16 }
 0x695   :  { %17267 = vmatprep.subr.mxu0 %v21411_v17  ;;  %17278 = vmatprep.subr.mxu1 %v21414_v50 }
 0x696   :  { %17268 = vmatpush3.msra.mxu0 %v21411_v17  ;;  %17279 = vmatpush3.msra.mxu1 %v21414_v50 }
 0x697   :  { %17269 = vmatprep.subr.mxu0 %v21419_v34  ;;  %17280 = vmatprep.subr.mxu1 %v21422_v45 }
 0x698   :  { %17270 = vmatpush3.msra.mxu0 %v21419_v34  ;;  %17281 = vmatpush3.msra.mxu1 %v21422_v45 }
 0x699   :  { %17285 = vmatprep.subr.mxu0 %v21361_v37  ;;  %17296 = vmatprep.subr.mxu1 %v21364_v3 }
 0x747   :  { %v17229_v48 = vpop.f32.mrf.mxu0  ;;  %v17240_v49 = vpop.f32.mrf.mxu1 }
 0x748   :  { %v4915_v61 = vadd.f32 %v17229_v48, %v2148_v51  ;;  %v5004_v15 = vadd.f32 %v17240_v49, %v2223_v18 }
 0x749   :  { %v4905_v62 = vpop.f32.mrf.mxu0  ;;  %v4994_v36 = vpop.f32.mrf.mxu1 }
 0x74a   :  { %v15278_v41 = vmul.f32 -1.442695, %v4915_v61  ;;  %v15282_v55 = vmul.f32 -1.442695, %v5004_v15  ;;  %v4914_v12 = vadd.f32 %v4905_v62, %v2143_v43  ;;  %v5003_v19 = vadd.f32 %v4994_v36, %v2218_v56 }
 0x74c   :  { %19237 = vpow2.f32 %v15278_v41  ;;  %v15277_v0 = vmul.f32 -1.442695, %v4914_v12  ;;  %v15281_v40 = vmul.f32 -1.442695, %v5003_v19 }
 0x74d   :  { %19239 = vpow2.f32 %v15282_v55 }
 0x74e   :  { %19241 = vpow2.f32 %v15277_v0 }
 0x74f   :  { %19243 = vpow2.f32 %v15281_v40 }
 0x750   :  { %v17251_v46 = vpop.f32.mrf.mxu0  ;;  %v17262_v28 = vpop.f32.mrf.mxu1 }
 0x751   :  { %v5172_v58 = vadd.f32 %v17262_v28, %v2373_v2  ;;  %v5093_v38 = vadd.f32 %v17251_v46, %v2298_v21 }
 0x752   :  { %v5162_v29 = vpop.f32.mrf.mxu1  ;;  %v5083_v8 = vpop.f32.mrf.mxu0 }
 0x753   :  { %v5171_v31 = vadd.f32 %v5162_v29, %v2368_v22  ;;  %v15288_v44 = vmul.f32 -1.442695, %v5172_v58  ;;  %v5092_v26 = vadd.f32 %v5083_v8, %v2293_v24  ;;  %19245 = vtanh.f32 %v5093_v38  ;;  %v24250_v58 = vld [vmem:[#allocation61_spill] sm:$0xff] }
 0x755   :  { %v15287_v47 = vmul.f32 -1.442695, %v5171_v31  ;;  %19247 = vpow2.f32 %v15288_v44 }
 0x756   :  { %19249 = vtanh.f32 %v5092_v26  ;;  %v24251_v26 = vld [vmem:[#allocation63_spill] sm:$0xff] }
 0x757   :  { %19251 = vpow2.f32 %v15287_v47  ;;  %v2698_v47 = vadd.f32 %v21505_v32, %v24251_v26 }
 0x759   :  { %v19238_v35 = vpop.eup %19237 }
 0x75a   :  { %v19240_v63 = vpop.eup %19239  ;;  %v4923_v9 = vadd.f32 1.0, %v19238_v35 }
 0x75b   :  { %v19242_v42 = vpop.eup %19241  ;;  %v5012_v30 = vadd.f32 1.0, %v19240_v63 }
 0x75c   :  { %v19244_v51 = vpop.eup %19243  ;;  %19253 = vrcp.f32 %v4923_v9  ;;  %v4922_v13 = vadd.f32 1.0, %v19242_v42  ;;  %v24252_v9 = vld [vmem:[#allocation65_spill] sm:$0xff] }
 0x75d   :  { %19255 = vrcp.f32 %v5012_v30  ;;  %v5011_v18 = vadd.f32 1.0, %v19244_v51  ;;  %v2693_v42 = vadd.f32 %v21505_v32, %v24252_v9  ;;  %v24253_v51 = vld [vmem:[#allocation62_spill] sm:$0xff] }
 0x75e   :  { %19257 = vrcp.f32 %v4922_v13  ;;  %v2623_v13 = vadd.f32 %v21511_v20, %v24253_v51 }
 0x75f   :  { %19259 = vrcp.f32 %v5011_v18 }
 0x760   :  { %v19246_v48 = vpop.eup %19245 }
 0x762   :  { %v19248_v49 = vpop.eup %19247 }
 0x763   :  { %v19250_v25 = vpop.eup %19249  ;;  %v5180_v0 = vadd.f32 1.0, %v19248_v49 }
 0x764   :  { %v19252_v43 = vpop.eup %19251 }
 0x765   :  { %v5179_v36 = vadd.f32 1.0, %v19252_v43 }
 0x767   :  { %19261 = vrcp.f32 %v5179_v36 }
 0x769   :  { %v19254_v11 = vpop.eup %19253 }
 0x76a   :  { %v19256_v56 = vpop.eup %19255  ;;  %v5188_v61 = vmul.f32 %v19254_v11, %v19246_v48 }
 0x76b   :  { %v19258_v15 = vpop.eup %19257  ;;  %v5186_v62 = vmul.f32 %v19256_v56, %v21446_v33 }
 0x76c   :  { %v19260_v41 = vpop.eup %19259  ;;  %v5187_v55 = vmul.f32 %v19258_v15, %v19250_v25  ;;  %v24254_v25 = vld [vmem:[#allocation64_spill] sm:$0xff] }
 0x76d   :  { %v21518_v12 = vadd.f32 %v5188_v61, %v5186_v62  ;;  %v5185_v19 = vmul.f32 %v19260_v41, %v21449_v52  ;;  %v24249_v52 = vld [vmem:[#allocation60_spill] sm:$0xff]  ;;  %v2618_v43 = vadd.f32 %v21511_v20, %v24254_v25 }
 0x76e   :  { %v2468_v22 = vadd.f32 %v21493_v39, %v24249_v52 }
 0x76f   :  { %v21521_v40 = vadd.f32 %v5187_v55, %v5185_v19  ;;  %19263 = vtanh.f32 %v21518_v12 }
 0x771   :  { %19265 = vtanh.f32 %v21521_v40 }
 0x772   :  { %19267 = vrcp.f32 %v5180_v0 }
 0x774   :  { %v19262_v1 = vpop.eup %19261 }
 0x77c   :  { %v19264_v2 = vpop.eup %19263 }
 0x77e   :  { %v19266_v46 = vpop.eup %19265 }
 0x77f   :  { %v19268_v33 = vpop.eup %19267  ;;  %v5193_v28 = vmul.f32 %v19266_v46, %v19262_v1 }
 0x780   :  { %v5194_v27 = vmul.f32 %v19268_v33, %v19264_v2 }
 0x781   :  { %17271 = vmatprep.mubr.msk.f32.mxu0 %vm431_vm7, %v5193_v28  ;;  %17282 = vmatprep.mubr.msk.f32.mxu1 %vm431_vm7, %v5193_v28 }
 0x782   :  { %17272 = vmatmul.mubr.msk.f32.vlgmr.msra.gmra.mxu0 %vm431_vm7, %v5194_v27  ;;  %17283 = vmatmul.mubr.msk.f32.vlgmr.msra.gmra.mxu1 %vm431_vm7, %v5194_v27 }
 0x783   :  { %17286 = vmatpush3.msra.mxu0 %v21361_v37  ;;  %17297 = vmatpush3.msra.mxu1 %v21364_v3 }
 0x784   :  { %17287 = vmatprep.subr.mxu0 %v21367_v4  ;;  %17293 = vmatprep.mubr.msk.f32.mxu0 %vm431_vm7, %v5193_v28 }
 0x785   :  { %17298 = vmatprep.subr.mxu1 %v21371_v5  ;;  %17304 = vmatprep.mubr.msk.f32.mxu1 %vm431_vm7, %v5193_v28 }
 0x786   :  { %17288 = vmatpush3.msra.mxu0 %v21367_v4  ;;  %17299 = vmatpush3.msra.mxu1 %v21371_v5 }
 0x787   :  { %17289 = vmatprep.subr.mxu0 %v21377_v6  ;;  %17300 = vmatprep.subr.mxu1 %v21380_v7 }
 0x788   :  { %17290 = vmatpush3.msra.mxu0 %v21377_v6  ;;  %17301 = vmatpush3.msra.mxu1 %v21380_v7 }
 0x789   :  { %17291 = vmatprep.subr.mxu0 %v21385_v54  ;;  %17302 = vmatprep.subr.mxu1 %v21388_v23 }
 0x78a   :  { %17292 = vmatpush3.msra.mxu0 %v21385_v54  ;;  %17303 = vmatpush3.msra.mxu1 %v21388_v23 }
 0x78b   :  { %17294 = vmatmul.mubr.msk.f32.vlgmr.msra.gmra.mxu0 %vm431_vm7, %v5194_v27  ;;  %17305 = vmatmul.mubr.msk.f32.vlgmr.msra.gmra.mxu1 %vm431_vm7, %v5194_v27 }
 0x78c   :  { %17307 = vmatprep.subr.mxu0 %v21395_v59  ;;  %17318 = vmatprep.subr.mxu1 %v21398_v53 }
 0x78d   :  { %17308 = vmatpush3.msra.mxu0 %v21395_v59  ;;  %17319 = vmatpush3.msra.mxu1 %v21398_v53  ;;  %v24247_v59 = vld [vmem:[#allocation58_spill] sm:$0xff] }
 0x78e   :  { %17309 = vmatprep.subr.mxu0 %v21403_v60  ;;  %17320 = vmatprep.subr.mxu1 %v21406_v16  ;;  %v2473_v53 = vadd.f32 %v21493_v39, %v24247_v59 }
 0x78f   :  { %17310 = vmatpush3.msra.mxu0 %v21403_v60  ;;  %17321 = vmatpush3.msra.mxu1 %v21406_v16  ;;  %v24248_v60 = vld [vmem:[#allocation59_spill] sm:$0xff] }
 0x790   :  { %17311 = vmatprep.subr.mxu0 %v21411_v17  ;;  %17322 = vmatprep.subr.mxu1 %v21414_v50  ;;  %v2548_v16 = vadd.f32 %v21497_v10, %v24248_v60 }
 0x791   :  { %17312 = vmatpush3.msra.mxu0 %v21411_v17  ;;  %17323 = vmatpush3.msra.mxu1 %v21414_v50 }
 0x792   :  { %17313 = vmatprep.subr.mxu0 %v21419_v34  ;;  %17324 = vmatprep.subr.mxu1 %v21422_v45 }
 0x793   :  { %17314 = vmatpush3.msra.mxu0 %v21419_v34  ;;  %17325 = vmatpush3.msra.mxu1 %v21422_v45  ;;  %v2543_v34 = vadd.f32 %v21497_v10, %v24250_v58 }
 0x794   :  { %17329 = vmatprep.subr.mxu0 %v21361_v37  ;;  %17340 = vmatprep.subr.mxu1 %v21364_v3 }
 0x842   :  { %v17273_v17 = vpop.f32.mrf.mxu0  ;;  %v17284_v50 = vpop.f32.mrf.mxu1 }
 0x843   :  { %v5277_v57 = vadd.f32 %v17273_v17, %v2473_v53  ;;  %v5366_v45 = vadd.f32 %v17284_v50, %v2548_v16 }
 0x844   :  { %v5267_v21 = vpop.f32.mrf.mxu0  ;;  %v5356_v29 = vpop.f32.mrf.mxu1 }
 0x845   :  { %v15292_v8 = vmul.f32 -1.442695, %v5277_v57  ;;  %v15296_v31 = vmul.f32 -1.442695, %v5366_v45  ;;  %v5276_v14 = vadd.f32 %v5267_v21, %v2468_v22  ;;  %v5365_v24 = vadd.f32 %v5356_v29, %v2543_v34 }
 0x847   :  { %19269 = vpow2.f32 %v15292_v8  ;;  %v15291_v38 = vmul.f32 -1.442695, %v5276_v14  ;;  %v15295_v44 = vmul.f32 -1.442695, %v5365_v24  ;;  %v24256_v24 = vld [vmem:[#allocation66_spill] sm:$0xff] }
 0x848   :  { %19271 = vpow2.f32 %v15296_v31 }
 0x849   :  { %19273 = vpow2.f32 %v15291_v38  ;;  %v2798_v38 = vadd.f32 %v21493_v39, %v24256_v24 }
 0x84a   :  { %19275 = vpow2.f32 %v15295_v44  ;;  %v24257_v44 = vld [vmem:[#allocation67_spill] sm:$0xff] }
 0x84b   :  { %v17295_v35 = vpop.f32.mrf.mxu0  ;;  %v17306_v63 = vpop.f32.mrf.mxu1  ;;  %v2873_v26 = vadd.f32 %v21497_v10, %v24257_v44 }
 0x84c   :  { %v5534_v30 = vadd.f32 %v17306_v63, %v2698_v47  ;;  %v5455_v11 = vadd.f32 %v17295_v35, %v2623_v13  ;;  %v24258_v63 = vld [vmem:[#allocation68_spill] sm:$0xff] }
 0x84d   :  { %v5524_v18 = vpop.f32.mrf.mxu1  ;;  %v5445_v48 = vpop.f32.mrf.mxu0  ;;  %v2793_v9 = vadd.f32 %v21493_v39, %v24258_v63 }
 0x84e   :  { %v5533_v49 = vadd.f32 %v5524_v18, %v2693_v42  ;;  %v15302_v56 = vmul.f32 -1.442695, %v5534_v30  ;;  %v5454_v61 = vadd.f32 %v5445_v48, %v2618_v43  ;;  %19277 = vtanh.f32 %v5455_v11  ;;  %v24259_v42 = vld [vmem:[#allocation69_spill] sm:$0xff] }
 0x84f   :  { %v2868_v30 = vadd.f32 %v21497_v10, %v24259_v42  ;;  %v24261_v10 = vld [vmem:[#allocation73_spill] sm:$0xff] }
 0x850   :  { %v15301_v15 = vmul.f32 -1.442695, %v5533_v49  ;;  %19279 = vpow2.f32 %v15302_v56 }
 0x851   :  { %19281 = vtanh.f32 %v5454_v61 }
 0x852   :  { %19283 = vpow2.f32 %v15301_v15  ;;  %v24260_v15 = vld [vmem:[#allocation71_spill] sm:$0xff] }
 0x854   :  { %v19270_v62 = vpop.eup %19269 }
 0x855   :  { %v19272_v36 = vpop.eup %19271  ;;  %v5285_v41 = vadd.f32 1.0, %v19270_v62  ;;  %v3023_v62 = vadd.f32 %v21505_v32, %v24260_v15 }
 0x856   :  { %v19274_v55 = vpop.eup %19273  ;;  %v5374_v19 = vadd.f32 1.0, %v19272_v36 }
 0x857   :  { %v19276_v0 = vpop.eup %19275  ;;  %19285 = vrcp.f32 %v5285_v41  ;;  %v5284_v1 = vadd.f32 1.0, %v19274_v55  ;;  %v3018_v41 = vadd.f32 %v21505_v32, %v24261_v10  ;;  %v21700_v10 = vld [vmem:[#allocation9 + $0x68] sm:$0xff] }
 0x858   :  { %19287 = vrcp.f32 %v5374_v19  ;;  %v5373_v2 = vadd.f32 1.0, %v19276_v0  ;;  %v24262_v19 = vld [vmem:[#allocation70_spill] sm:$0xff] }
 0x859   :  { %19289 = vrcp.f32 %v5284_v1  ;;  %v2948_v0 = vadd.f32 %v21511_v20, %v24262_v19 }
 0x85a   :  { %19291 = vrcp.f32 %v5373_v2 }
 0x85b   :  { %v19278_v46 = vpop.eup %19277 }
 0x85d   :  { %v19280_v33 = vpop.eup %19279 }
 0x85e   :  { %v19282_v28 = vpop.eup %19281  ;;  %v5542_v57 = vadd.f32 1.0, %v19280_v33  ;;  %v24263_v33 = vld [vmem:[#allocation72_spill] sm:$0xff] }
 0x85f   :  { %v19284_v27 = vpop.eup %19283 }
 0x860   :  { %v5541_v50 = vadd.f32 1.0, %v19284_v27 }
 0x862   :  { %19293 = vrcp.f32 %v5541_v50 }
 0x864   :  { %v19286_v59 = vpop.eup %19285 }
 0x865   :  { %v19288_v53 = vpop.eup %19287  ;;  %v5550_v60 = vmul.f32 %v19286_v59, %v19278_v46 }
 0x866   :  { %v19290_v16 = vpop.eup %19289  ;;  %v5548_v17 = vmul.f32 %v19288_v53, %v21518_v12 }
 0x867   :  { %v19292_v52 = vpop.eup %19291  ;;  %v5549_v22 = vmul.f32 %v19290_v16, %v19282_v28  ;;  %v2943_v28 = vadd.f32 %v21511_v20, %v24263_v33 }
 0x868   :  { %v21582_v58 = vadd.f32 %v5550_v60, %v5548_v17  ;;  %v5547_v34 = vmul.f32 %v19292_v52, %v21521_v40  ;;  %v21635_v40 = vld [vmem:[#allocation9 + $0x20] sm:$0xff] }
 0x86a   :  { %v21585_v45 = vadd.f32 %v5549_v22, %v5547_v34  ;;  %19295 = vtanh.f32 %v21582_v58 }
 0x86c   :  { %19297 = vtanh.f32 %v21585_v45 }
 0x86d   :  { %19299 = vrcp.f32 %v5542_v57 }
 0x86f   :  { %v19294_v21 = vpop.eup %19293 }
 0x877   :  { %v19296_v29 = vpop.eup %19295 }
 0x879   :  { %v19298_v8 = vpop.eup %19297 }
 0x87a   :  { %v19300_v12 = vpop.eup %19299  ;;  %v5555_v31 = vmul.f32 %v19298_v8, %v19294_v21 }
 0x87b   :  { %v5556_v14 = vmul.f32 %v19300_v12, %v19296_v29 }
 0x87c   :  { %17315 = vmatprep.mubr.msk.f32.mxu0 %vm431_vm7, %v5555_v31  ;;  %17326 = vmatprep.mubr.msk.f32.mxu1 %vm431_vm7, %v5555_v31 }
 0x87d   :  { %17316 = vmatmul.mubr.msk.f32.vlgmr.msra.gmra.mxu0 %vm431_vm7, %v5556_v14  ;;  %17327 = vmatmul.mubr.msk.f32.vlgmr.msra.gmra.mxu1 %vm431_vm7, %v5556_v14 }
 0x87e   :  { %17330 = vmatpush3.msra.mxu0 %v21361_v37  ;;  %17341 = vmatpush3.msra.mxu1 %v21364_v3  ;;  %v24255_v37 = vmov 0.0   ;;  %v21613_v3 = vld [vmem:[#allocation9 + $0x18] sm:$0xff] }
 0x87f   :  { %17331 = vmatprep.subr.mxu0 %v21367_v4  ;;  %17337 = vmatprep.mubr.msk.f32.mxu0 %vm431_vm7, %v5555_v31 }
 0x880   :  { %17342 = vmatprep.subr.mxu1 %v21371_v5  ;;  %17348 = vmatprep.mubr.msk.f32.mxu1 %vm431_vm7, %v5555_v31 }
 0x881   :  { %17332 = vmatpush3.msra.mxu0 %v21367_v4  ;;  %17343 = vmatpush3.msra.mxu1 %v21371_v5  ;;  %v21615_v4 = vld [vmem:[#allocation9 + $0x38] sm:$0xff]  ;;  %v21617_v5 = vld [vmem:[#allocation9 + $0x10] sm:$0xff] }
 0x882   :  { %17333 = vmatprep.subr.mxu0 %v21377_v6  ;;  %17344 = vmatprep.subr.mxu1 %v21380_v7 }
 0x883   :  { %17334 = vmatpush3.msra.mxu0 %v21377_v6  ;;  %17345 = vmatpush3.msra.mxu1 %v21380_v7  ;;  %v21621_v6 = vld [vmem:[#allocation9 + $0x30] sm:$0xff]  ;;  %v21625_v7 = vld [vmem:[#allocation9 + $0x8] sm:$0xff] }
 0x884   :  { %17335 = vmatprep.subr.mxu0 %v21385_v54  ;;  %17346 = vmatprep.subr.mxu1 %v21388_v23 }
 0x885   :  { %17336 = vmatpush3.msra.mxu0 %v21385_v54  ;;  %17347 = vmatpush3.msra.mxu1 %v21388_v23  ;;  %v21627_v54 = vld [vmem:[#allocation9 + $0x28] sm:$0xff]  ;;  %v21633_v23 = vld [vmem:[#allocation9] sm:$0xff] }
 0x886   :  { %17338 = vmatmul.mubr.msk.f32.vlgmr.msra.gmra.mxu0 %vm431_vm7, %v5556_v14  ;;  %17349 = vmatmul.mubr.msk.f32.vlgmr.msra.gmra.mxu1 %vm431_vm7, %v5556_v14 }
 0x887   :  { %17351 = vmatprep.subr.mxu0 %v24255_v37  ;;  %17362 = vmatprep.subr.mxu1 %v24255_v37 }
 0x888   :  { %17352 = vmatpush3.msra.mxu0 %v21613_v3  ;;  %17363 = vmatpush3.msra.mxu1 %v21615_v4 }
 0x889   :  { %17353 = vmatprep.subr.mxu0 %v24255_v37  ;;  %17364 = vmatprep.subr.mxu1 %v24255_v37 }
 0x88a   :  { %17354 = vmatpush3.msra.mxu0 %v21617_v5  ;;  %17365 = vmatpush3.msra.mxu1 %v21621_v6 }
 0x88b   :  { %17355 = vmatprep.subr.mxu0 %v24255_v37  ;;  %17366 = vmatprep.subr.mxu1 %v24255_v37 }
 0x88c   :  { %17356 = vmatpush3.msra.mxu0 %v21625_v7  ;;  %17367 = vmatpush3.msra.mxu1 %v21627_v54 }
 0x88d   :  { %17357 = vmatprep.subr.mxu0 %v24255_v37  ;;  %17368 = vmatprep.subr.mxu1 %v24255_v37 }
 0x88e   :  { %17358 = vmatpush3.msra.mxu0 %v21633_v23  ;;  %17369 = vmatpush3.msra.mxu1 %v21635_v40 }
 0x88f   :  { %17359 = vmatprep.mubr.msk.f32.mxu0 %vm19992_vm8, %v24255_v37  ;;  %17370 = vmatprep.mubr.msk.f32.mxu1 %vm19992_vm8, %v24255_v37 }
 0x890   :  { %17373 = vmatprep.subr.mxu0 %v24255_v37  ;;  %17384 = vmatprep.subr.mxu1 %v24255_v37 }
 0x93d   :  { %v17317_v47 = vpop.f32.mrf.mxu0  ;;  %v17328_v35 = vpop.f32.mrf.mxu1 }
 0x93e   :  { %v5639_v51 = vadd.f32 %v17317_v47, %v2798_v38  ;;  %v5728_v13 = vadd.f32 %v17328_v35, %v2873_v26 }
 0x93f   :  { %v5629_v18 = vpop.f32.mrf.mxu0  ;;  %v5718_v48 = vpop.f32.mrf.mxu1 }
 0x940   :  { %v15306_v49 = vmul.f32 -1.442695, %v5639_v51  ;;  %v15310_v25 = vmul.f32 -1.442695, %v5728_v13  ;;  %v5638_v43 = vadd.f32 %v5629_v18, %v2793_v9  ;;  %v5727_v11 = vadd.f32 %v5718_v48, %v2868_v30 }
 0x942   :  { %19301 = vpow2.f32 %v15306_v49  ;;  %v15305_v56 = vmul.f32 -1.442695, %v5638_v43  ;;  %v15309_v61 = vmul.f32 -1.442695, %v5727_v11 }
 0x943   :  { %19303 = vpow2.f32 %v15310_v25 }
 0x944   :  { %19305 = vpow2.f32 %v15305_v56  ;;  %v21681_v56 = vld [vmem:[#allocation9 + $0x58] sm:$0xff] }
 0x945   :  { %19307 = vpow2.f32 %v15309_v61  ;;  %v21683_v61 = vld [vmem:[#allocation9 + $0x78] sm:$0xff] }
 0x946   :  { %v17339_v39 = vpop.f32.mrf.mxu0  ;;  %v17350_v36 = vpop.f32.mrf.mxu1 }
 0x947   :  { %v5896_v55 = vadd.f32 %v17350_v36, %v3023_v62  ;;  %v5817_v27 = vadd.f32 %v17339_v39, %v2948_v0  ;;  %v21690_v62 = vld [vmem:[#allocation9 + $0x50] sm:$0xff]  ;;  %v21698_v36 = vld [vmem:[#allocation9 + $0x48] sm:$0xff] }
 0x948   :  { %v5886_v1 = vpop.f32.mrf.mxu1  ;;  %v5807_v2 = vpop.f32.mrf.mxu0  ;;  %v21692_v39 = vld [vmem:[#allocation9 + $0x70] sm:$0xff] }
 0x949   :  { %v5895_v46 = vadd.f32 %v5886_v1, %v3018_v41  ;;  %v15316_v59 = vmul.f32 -1.442695, %v5896_v55  ;;  %v5816_v53 = vadd.f32 %v5807_v2, %v2943_v28  ;;  %19309 = vtanh.f32 %v5817_v27  ;;  %v21706_v41 = vld [vmem:[#allocation9 + $0x40] sm:$0xff] }
 0x94a   :  { %v21710_v55 = vld [vmem:[#allocation9 + $0x60] sm:$0xff] }
 0x94b   :  { %v15315_v60 = vmul.f32 -1.442695, %v5895_v46  ;;  %19311 = vpow2.f32 %v15316_v59  ;;  %v21849_v59 = vld [vmem:[#allocation10] sm:$0xff] }
 0x94c   :  { %19313 = vtanh.f32 %v5816_v53  ;;  %v21853_v53 = vld [vmem:[#allocation10 + $0x20] sm:$0xff] }
 0x94d   :  { %19315 = vpow2.f32 %v15315_v60  ;;  %v21863_v60 = vld [vmem:[#allocation10 + $0x58] sm:$0xff] }
 0x94f   :  { %v19302_v16 = vpop.eup %19301 }
 0x950   :  { %v19304_v17 = vpop.eup %19303  ;;  %v5647_v50 = vadd.f32 1.0, %v19302_v16  ;;  %v21865_v16 = vld [vmem:[#allocation10 + $0x78] sm:$0xff] }
 0x951   :  { %v19306_v32 = vpop.eup %19305  ;;  %v5736_v52 = vadd.f32 1.0, %v19304_v17  ;;  %v21871_v17 = vld [vmem:[#allocation10 + $0x50] sm:$0xff] }
 0x952   :  { %v19308_v22 = vpop.eup %19307  ;;  %19317 = vrcp.f32 %v5647_v50  ;;  %v5646_v34 = vadd.f32 1.0, %v19306_v32  ;;  %v21873_v50 = vld [vmem:[#allocation10 + $0x70] sm:$0xff]  ;;  %v21879_v32 = vld [vmem:[#allocation10 + $0x48] sm:$0xff] }
 0x953   :  { %19319 = vrcp.f32 %v5736_v52  ;;  %v5735_v57 = vadd.f32 1.0, %v19308_v22  ;;  %v21881_v52 = vld [vmem:[#allocation10 + $0x68] sm:$0xff]  ;;  %v21887_v22 = vld [vmem:[#allocation10 + $0x40] sm:$0xff] }
 0x954   :  { %19321 = vrcp.f32 %v5646_v34  ;;  %v21891_v34 = vld [vmem:[#allocation10 + $0x60] sm:$0xff] }
 0x955   :  { %19323 = vrcp.f32 %v5735_v57 }
 0x956   :  { %v19310_v20 = vpop.eup %19309 }
 0x958   :  { %v19312_v21 = vpop.eup %19311 }
 0x959   :  { %v19314_v29 = vpop.eup %19313  ;;  %v5904_v24 = vadd.f32 1.0, %v19312_v21 }
 0x95a   :  { %v19316_v8 = vpop.eup %19315 }
 0x95b   :  { %v5903_v35 = vadd.f32 1.0, %v19316_v8  ;;  %19325 = vrcp.f32 %v5904_v24  ;;  %v15317_v24 = vld [vmem:[#allocation12] ss:$0 sm:$0xff] }
 0x95f   :  { %v19318_v12 = vpop.eup %19317 }
 0x960   :  { %v19320_v31 = vpop.eup %19319  ;;  %v5912_v14 = vmul.f32 %v19318_v12, %v19310_v20 }
 0x961   :  { %v19322_v38 = vpop.eup %19321  ;;  %v5910_v44 = vmul.f32 %v19320_v31, %v21582_v58 }
 0x962   :  { %v19324_v26 = vpop.eup %19323  ;;  %v5911_v47 = vmul.f32 %v19322_v38, %v19314_v29  ;;  %v15319_v38 = vld [vmem:[#allocation12 + $0x1] ss:$0 sm:$0xff] }
 0x963   :  { %v5914_v63 = vadd.f32 %v5912_v14, %v5910_v44  ;;  %v5909_v9 = vmul.f32 %v19324_v26, %v21585_v45 }
 0x965   :  { %19327 = vtanh.f32 %v5914_v63  ;;  %v5913_v42 = vadd.f32 %v5911_v47, %v5909_v9 }
 0x966   :  { %19329 = vrcp.f32 %v5903_v35 }
 0x967   :  { %19331 = vtanh.f32 %v5913_v42  ;;  %v15321_v42 = vld [vmem:[#allocation12 + $0x2] ss:$0 sm:$0xff] }
 0x968   :  { %v19326_v30 = vpop.eup %19325 }
 0x972   :  { %v19328_v51 = vpop.eup %19327 }
 0x973   :  { %v19330_v13 = vpop.eup %19329  ;;  %v21667_v18 = vmul.f32 %v19328_v51, %v19326_v30  ;;  %v15323_v30 = vld [vmem:[#allocation12 + $0x3] ss:$0 sm:$0xff] }
 0x974   :  { %v19332_v48 = vpop.eup %19331 }
 0x975   :  { %v21669_v49 = vmul.f32 %v19332_v48, %v19330_v13  ;;  %v5925_v45 = vrot.slane %v21667_v18, 6  ;;  %v5939_v33 = vrot.slane %v21667_v18, 7 }
 0x977   :  { %v5920_v58 = vrot.slane %v21669_v49, 2  ;;  %v5922_v25 = vrot.slane %v21669_v49, 4  ;;  %v5933_v19 = vrot.slane %v21669_v49, 1  ;;  %v5935_v0 = vrot.slane %v21669_v49, 3 }
 0x978   :  { %v5937_v1 = vrot.slane %v21669_v49, 5 }
 0x979   :  { %v5928_v43 = vsel %vm5927_vm9, %v21669_v49, %v5920_v58  ;;  %v5941_v2 = vsel %vm5927_vm9, %v5933_v19, %v5935_v0  ;;  %v5944_v27 = vsel %vm5927_vm9, %v5920_v58, %v5922_v25 }
 0x97a   :  { %v5930_v11 = vsel %vm5929_vm10, %v5928_v43, %v5922_v25  ;;  %v5942_v46 = vsel %vm5929_vm10, %v5941_v2, %v5937_v1 }
 0x97b   :  { %v5932_v15 = vsel %vm5931_vm11, %v5930_v11, %v5925_v45  ;;  %v5943_v28 = vsel %vm5931_vm11, %v5942_v46, %v5939_v33 }
 0x97c   :  { %17360 = vmatmul.mubr.msk.f32.vlgmr.msra.gmra.mxu0 %vm431_vm7, %v5932_v15  ;;  %17371 = vmatmul.mubr.msk.f32.vlgmr.msra.gmra.mxu1 %vm431_vm7, %v5932_v15 }
 0x97d   :  { %17374 = vmatpush3.msra.mxu0 %v21681_v56  ;;  %17385 = vmatpush3.msra.mxu1 %v21683_v61 }
 0x97e   :  { %17375 = vmatprep.subr.mxu0 %v24255_v37  ;;  %17386 = vmatprep.subr.mxu1 %v24255_v37 }
 0x97f   :  { %17376 = vmatpush3.msra.mxu0 %v21690_v62  ;;  %17387 = vmatpush3.msra.mxu1 %v21692_v39 }
 0x980   :  { %17377 = vmatprep.subr.mxu0 %v24255_v37  ;;  %17388 = vmatprep.subr.mxu1 %v24255_v37 }
 0x981   :  { %17378 = vmatpush3.msra.mxu0 %v21698_v36  ;;  %17389 = vmatpush3.msra.mxu1 %v21700_v10 }
 0x982   :  { %17379 = vmatprep.subr.mxu0 %v24255_v37  ;;  %17390 = vmatprep.subr.mxu1 %v24255_v37 }
 0x983   :  { %17380 = vmatpush3.msra.mxu0 %v21706_v41  ;;  %17381 = vmatprep.mubr.msk.f32.mxu0 %vm19992_vm8, %v24255_v37 }
 0x984   :  { %17391 = vmatpush3.msra.mxu1 %v21710_v55  ;;  %17392 = vmatprep.mubr.msk.f32.mxu1 %vm19992_vm8, %v24255_v37 }
 0x985   :  { %17382 = vmatmul.mubr.msk.f32.vlgmr.msra.gmra.mxu0 %vm431_vm7, %v5932_v15  ;;  %17393 = vmatmul.mubr.msk.f32.vlgmr.msra.gmra.mxu1 %vm431_vm7, %v5932_v15 }
 0x986   :  { %17395 = vmatprep.subr.mxu0 %v24255_v37  ;;  %17406 = vmatprep.subr.mxu1 %v24255_v37 }
 0x987   :  { %17396 = vmatpush3.msra.mxu0 %v21613_v3  ;;  %17407 = vmatpush3.msra.mxu1 %v21615_v4 }
 0x988   :  { %17397 = vmatprep.subr.mxu0 %v24255_v37  ;;  %17408 = vmatprep.subr.mxu1 %v24255_v37 }
 0x989   :  { %17398 = vmatpush3.msra.mxu0 %v21617_v5  ;;  %17409 = vmatpush3.msra.mxu1 %v21621_v6 }
 0x98a   :  { %17399 = vmatprep.subr.mxu0 %v24255_v37  ;;  %17410 = vmatprep.subr.mxu1 %v24255_v37 }
 0x98b   :  { %17400 = vmatpush3.msra.mxu0 %v21625_v7  ;;  %17411 = vmatpush3.msra.mxu1 %v21627_v54 }
 0x98c   :  { %17401 = vmatprep.subr.mxu0 %v24255_v37  ;;  %17412 = vmatprep.subr.mxu1 %v24255_v37 }
 0x98d   :  { %17402 = vmatpush3.msra.mxu0 %v21633_v23  ;;  %17403 = vmatprep.mubr.msk.f32.mxu0 %vm19992_vm8, %v24255_v37 }
 0x98e   :  { %17413 = vmatpush3.msra.mxu1 %v21635_v40  ;;  %17414 = vmatprep.mubr.msk.f32.mxu1 %vm19992_vm8, %v24255_v37 }
 0x98f   :  { %17404 = vmatmul.mubr.msk.f32.vlgmr.msra.gmra.mxu0 %vm431_vm7, %v5943_v28  ;;  %17415 = vmatmul.mubr.msk.f32.vlgmr.msra.gmra.mxu1 %vm431_vm7, %v5943_v28 }
 0x990   :  { %17417 = vmatprep.subr.mxu0 %v24255_v37  ;;  %17428 = vmatprep.subr.mxu1 %v24255_v37 }
 0x991   :  { %17418 = vmatpush3.msra.mxu0 %v21681_v56  ;;  %17429 = vmatpush3.msra.mxu1 %v21683_v61 }
 0x992   :  { %17419 = vmatprep.subr.mxu0 %v24255_v37  ;;  %17430 = vmatprep.subr.mxu1 %v24255_v37 }
 0x993   :  { %17420 = vmatpush3.msra.mxu0 %v21690_v62  ;;  %17431 = vmatpush3.msra.mxu1 %v21692_v39 }
 0x994   :  { %17421 = vmatprep.subr.mxu0 %v24255_v37  ;;  %17432 = vmatprep.subr.mxu1 %v24255_v37 }
 0x995   :  { %17422 = vmatpush3.msra.mxu0 %v21698_v36  ;;  %17433 = vmatpush3.msra.mxu1 %v21700_v10 }
 0x996   :  { %17423 = vmatprep.subr.mxu0 %v24255_v37  ;;  %17434 = vmatprep.subr.mxu1 %v24255_v37 }
 0x997   :  { %17424 = vmatpush3.msra.mxu0 %v21706_v41  ;;  %17425 = vmatprep.mubr.msk.f32.mxu0 %vm19992_vm8, %v24255_v37 }
 0x998   :  { %17435 = vmatpush3.msra.mxu1 %v21710_v55  ;;  %17436 = vmatprep.mubr.msk.f32.mxu1 %vm19992_vm8, %v24255_v37 }
 0x999   :  { %17426 = vmatmul.mubr.msk.f32.vlgmr.msra.gmra.mxu0 %vm431_vm7, %v5943_v28  ;;  %17437 = vmatmul.mubr.msk.f32.vlgmr.msra.gmra.mxu1 %vm431_vm7, %v5943_v28 }
 0x99a   :  { %17439 = vmatprep.subr.mxu0 %v24255_v37  ;;  %17450 = vmatprep.subr.mxu1 %v24255_v37 }
 0x99b   :  { %17440 = vmatpush3.msra.mxu0 %v21613_v3  ;;  %17451 = vmatpush3.msra.mxu1 %v21615_v4  ;;  %v5945_v3 = vsel %vm5929_vm10, %v5944_v27, %v5925_v45 }
 0x99c   :  { %17441 = vmatprep.subr.mxu0 %v24255_v37  ;;  %17452 = vmatprep.subr.mxu1 %v24255_v37  ;;  %v5946_v4 = vsel %vm5931_vm11, %v5945_v3, %v21667_v18 }
 0x99d   :  { %17442 = vmatpush3.msra.mxu0 %v21617_v5  ;;  %17453 = vmatpush3.msra.mxu1 %v21621_v6  ;;  %v21825_v5 = vld [vmem:[#allocation10 + $0x18] sm:$0xff] }
 0x99e   :  { %17443 = vmatprep.subr.mxu0 %v24255_v37  ;;  %17454 = vmatprep.subr.mxu1 %v24255_v37  ;;  %v21827_v6 = vld [vmem:[#allocation10 + $0x38] sm:$0xff] }
 0x99f   :  { %17444 = vmatpush3.msra.mxu0 %v21625_v7  ;;  %17455 = vmatpush3.msra.mxu1 %v21627_v54  ;;  %v21833_v7 = vld [vmem:[#allocation10 + $0x10] sm:$0xff] }
 0x9a0   :  { %17445 = vmatprep.subr.mxu0 %v24255_v37  ;;  %17456 = vmatprep.subr.mxu1 %v24255_v37  ;;  %v21835_v54 = vld [vmem:[#allocation10 + $0x30] sm:$0xff] }
 0x9a1   :  { %17446 = vmatpush3.msra.mxu0 %v21633_v23  ;;  %17447 = vmatprep.mubr.msk.f32.mxu0 %vm19992_vm8, %v24255_v37  ;;  %v21841_v23 = vld [vmem:[#allocation10 + $0x8] sm:$0xff] }
 0x9a2   :  { %17457 = vmatpush3.msra.mxu1 %v21635_v40  ;;  %17458 = vmatprep.mubr.msk.f32.mxu1 %vm19992_vm8, %v24255_v37  ;;  %v21843_v40 = vld [vmem:[#allocation10 + $0x28] sm:$0xff] }
 0x9a3   :  { %17448 = vmatmul.mubr.msk.f32.vlgmr.msra.gmra.mxu0 %vm431_vm7, %v5946_v4  ;;  %17459 = vmatmul.mubr.msk.f32.vlgmr.msra.gmra.mxu1 %vm431_vm7, %v5946_v4 }
 0x9a4   :  { %17461 = vmatprep.subr.mxu0 %v24255_v37  ;;  %17472 = vmatprep.subr.mxu1 %v24255_v37 }
 0x9a5   :  { %17462 = vmatpush3.msra.mxu0 %v21681_v56  ;;  %17473 = vmatpush3.msra.mxu1 %v21683_v61 }
 0x9a6   :  { %17463 = vmatprep.subr.mxu0 %v24255_v37  ;;  %17474 = vmatprep.subr.mxu1 %v24255_v37 }
 0x9a7   :  { %17464 = vmatpush3.msra.mxu0 %v21690_v62  ;;  %17475 = vmatpush3.msra.mxu1 %v21692_v39 }
 0x9a8   :  { %17465 = vmatprep.subr.mxu0 %v24255_v37  ;;  %17476 = vmatprep.subr.mxu1 %v24255_v37 }
 0x9a9   :  { %17466 = vmatpush3.msra.mxu0 %v21698_v36  ;;  %17477 = vmatpush3.msra.mxu1 %v21700_v10 }
 0x9aa   :  { %17467 = vmatprep.subr.mxu0 %v24255_v37  ;;  %17478 = vmatprep.subr.mxu1 %v24255_v37 }
 0x9ab   :  { %17468 = vmatpush3.msra.mxu0 %v21706_v41  ;;  %17469 = vmatprep.mubr.msk.f32.mxu0 %vm19992_vm8, %v24255_v37 }
 0x9ac   :  { %17479 = vmatpush3.msra.mxu1 %v21710_v55  ;;  %17480 = vmatprep.mubr.msk.f32.mxu1 %vm19992_vm8, %v24255_v37 }
 0x9ad   :  { %17470 = vmatmul.mubr.msk.f32.vlgmr.msra.gmra.mxu0 %vm431_vm7, %v5946_v4  ;;  %17481 = vmatmul.mubr.msk.f32.vlgmr.msra.gmra.mxu1 %vm431_vm7, %v5946_v4 }
 0x9ae   :  { %17483 = vmatprep.subr.mxu0 %v24255_v37  ;;  %17494 = vmatprep.subr.mxu1 %v24255_v37 }
 0x9af   :  { %17484 = vmatpush3.msra.mxu0 %v21825_v5  ;;  %17495 = vmatpush3.msra.mxu1 %v21827_v6 }
 0x9b0   :  { %17485 = vmatprep.subr.mxu0 %v24255_v37  ;;  %17496 = vmatprep.subr.mxu1 %v24255_v37 }
 0x9b1   :  { %17486 = vmatpush3.msra.mxu0 %v21833_v7  ;;  %17497 = vmatpush3.msra.mxu1 %v21835_v54 }
 0x9b2   :  { %17487 = vmatprep.subr.mxu0 %v24255_v37  ;;  %17498 = vmatprep.subr.mxu1 %v24255_v37 }
 0x9b3   :  { %17488 = vmatpush3.msra.mxu0 %v21841_v23  ;;  %17499 = vmatpush3.msra.mxu1 %v21843_v40 }
 0x9b4   :  { %17489 = vmatprep.subr.mxu0 %v24255_v37  ;;  %17500 = vmatprep.subr.mxu1 %v24255_v37 }
 0x9b5   :  { %17490 = vmatpush3.msra.mxu0 %v21849_v59  ;;  %17491 = vmatprep.mubr.msk.f32.mxu0 %vm19992_vm8, %v24255_v37 }
 0x9b6   :  { %17501 = vmatpush3.msra.mxu1 %v21853_v53  ;;  %17502 = vmatprep.mubr.msk.f32.mxu1 %vm19992_vm8, %v24255_v37 }
 0x9b7   :  { %17492 = vmatmul.mubr.f32.vlgmr.msra.gmra.mxu0 %v24255_v37  ;;  %17503 = vmatmul.mubr.f32.vlgmr.msra.gmra.mxu1 %v24255_v37 }
 0x9b8   :  { %17505 = vmatprep.subr.mxu0 %v24255_v37  ;;  %17516 = vmatprep.subr.mxu1 %v24255_v37 }
 0x9b9   :  { %17506 = vmatpush3.msra.mxu0 %v21863_v60  ;;  %17517 = vmatpush3.msra.mxu1 %v21865_v16 }
 0x9ba   :  { %17507 = vmatprep.subr.mxu0 %v24255_v37  ;;  %17518 = vmatprep.subr.mxu1 %v24255_v37 }
 0x9bb   :  { %17508 = vmatpush3.msra.mxu0 %v21871_v17  ;;  %17519 = vmatpush3.msra.mxu1 %v21873_v50 }
 0x9bc   :  { %17509 = vmatprep.subr.mxu0 %v24255_v37  ;;  %17520 = vmatprep.subr.mxu1 %v24255_v37 }
 0x9bd   :  { %17510 = vmatpush3.msra.mxu0 %v21879_v32  ;;  %17521 = vmatpush3.msra.mxu1 %v21881_v52 }
 0x9be   :  { %17511 = vmatprep.subr.mxu0 %v24255_v37  ;;  %17522 = vmatprep.subr.mxu1 %v24255_v37 }
 0x9bf   :  { %17512 = vmatpush3.msra.mxu0 %v21887_v22  ;;  %17513 = vmatprep.mubr.msk.f32.mxu0 %vm19992_vm8, %v24255_v37 }
 0x9c0   :  { %17523 = vmatpush3.msra.mxu1 %v21891_v34  ;;  %17524 = vmatprep.mubr.msk.f32.mxu1 %vm19992_vm8, %v24255_v37 }
 0x9c1   :  { %17514 = vmatmul.mubr.f32.vlgmr.msra.gmra.mxu0 %v24255_v37  ;;  %17525 = vmatmul.mubr.f32.vlgmr.msra.gmra.mxu1 %v24255_v37 }
 0x9c2   :  { %17527 = vmatprep.subr.mxu0 %v24255_v37  ;;  %17538 = vmatprep.subr.mxu1 %v24255_v37 }
 0x9c3   :  { %17528 = vmatpush3.msra.mxu0 %v21825_v5  ;;  %17539 = vmatpush3.msra.mxu1 %v21827_v6 }
 0x9c4   :  { %17529 = vmatprep.subr.mxu0 %v24255_v37  ;;  %17540 = vmatprep.subr.mxu1 %v24255_v37 }
 0x9c5   :  { %17530 = vmatpush3.msra.mxu0 %v21833_v7  ;;  %17541 = vmatpush3.msra.mxu1 %v21835_v54 }
 0x9c6   :  { %17531 = vmatprep.subr.mxu0 %v24255_v37  ;;  %17542 = vmatprep.subr.mxu1 %v24255_v37 }
 0x9c7   :  { %17532 = vmatpush3.msra.mxu0 %v21841_v23  ;;  %17543 = vmatpush3.msra.mxu1 %v21843_v40 }
 0x9c8   :  { %17533 = vmatprep.subr.mxu0 %v24255_v37  ;;  %17544 = vmatprep.subr.mxu1 %v24255_v37 }
 0x9c9   :  { %17534 = vmatpush3.msra.mxu0 %v21849_v59  ;;  %17545 = vmatpush3.msra.mxu1 %v21853_v53 }
 0x9ca   :  { %17535 = vmatprep.mubr.msk.f32.mxu0 %vm19992_vm8, %v24255_v37  ;;  %17546 = vmatprep.mubr.msk.f32.mxu1 %vm19992_vm8, %v24255_v37 }
 0x9cb   :  { %17549 = vmatprep.subr.mxu0 %v24255_v37  ;;  %17560 = vmatprep.subr.mxu1 %v24255_v37 }
 0xa3c   :  { %v6067_v57 = vpop.f32.mrf.mxu0  ;;  %v6143_v20 = vpop.f32.mrf.mxu1 }
 0xa3d   :  { %v6068_v55 = vadd.f32 %v15317_v24, %v6067_v57  ;;  %v6144_v19 = vadd.f32 %v15319_v38, %v6143_v20 }
 0xa3e   :  { %v17361_v21 = vpop.f32.mrf.mxu0  ;;  %v17372_v29 = vpop.f32.mrf.mxu1 }
 0xa45   :  { %v6219_v8 = vpop.f32.mrf.mxu0  ;;  %v6295_v12 = vpop.f32.mrf.mxu1 }
 0xa46   :  { %v6296_v4 = vadd.f32 %v15323_v30, %v6295_v12 }
 0xa47   :  { %v17383_v31 = vpop.f32.mrf.mxu0  ;;  %v17394_v14 = vpop.f32.mrf.mxu1 }
 0xa4f   :  { %v6368_v44 = vpop.f32.mrf.mxu0  ;;  %v6438_v26 = vpop.f32.mrf.mxu1 }
 0xa50   :  { %v21925_v47 = vadd.f32 %v15317_v24, %v6368_v44  ;;  %v21927_v35 = vadd.f32 %v15319_v38, %v6438_v26  ;;  %v6220_v26 = vadd.f32 %v15321_v42, %v6219_v8 }
 0xa51   :  { %v17405_v63 = vpop.f32.mrf.mxu0  ;;  %v17416_v9 = vpop.f32.mrf.mxu1 }
 0xa59   :  { %v6508_v51 = vpop.f32.mrf.mxu0  ;;  %v6578_v13 = vpop.f32.mrf.mxu1 }
 0xa5a   :  { %v21929_v18 = vadd.f32 %v15321_v42, %v6508_v51  ;;  %v21931_v48 = vadd.f32 %v15323_v30, %v6578_v13 }
 0xa5b   :  { %v17427_v49 = vpop.f32.mrf.mxu0  ;;  %v17438_v58 = vpop.f32.mrf.mxu1 }
 0xa63   :  { %v6651_v25 = vpop.f32.mrf.mxu0  ;;  %v6721_v45 = vpop.f32.mrf.mxu1 }
 0xa64   :  { %v21933_v43 = vadd.f32 %v15317_v24, %v6651_v25  ;;  %v21935_v11 = vadd.f32 %v15319_v38, %v6721_v45 }
 0xa65   :  { %v17449_v56 = vpop.f32.mrf.mxu0  ;;  %v17460_v61 = vpop.f32.mrf.mxu1 }
 0xa6d   :  { %v6791_v15 = vpop.f32.mrf.mxu0  ;;  %v6861_v62 = vpop.f32.mrf.mxu1 }
 0xa6e   :  { %v21937_v39 = vadd.f32 %v15321_v42, %v6791_v15  ;;  %v21939_v36 = vadd.f32 %v15323_v30, %v6861_v62 }
 0xa6f   :  { %v17471_v10 = vpop.f32.mrf.mxu0  ;;  %v17482_v41 = vpop.f32.mrf.mxu1 }
 0xa77   :  { %v6931_v0 = vpop.f32.mrf.mxu0  ;;  %v7008_v1 = vpop.f32.mrf.mxu1 }
 0xa78   :  { %v6935_v2 = vadd.f32 %v6931_v0, %v6068_v55  ;;  %v7012_v46 = vadd.f32 %v7008_v1, %v6144_v19 }
 0xa79   :  { %v17493_v33 = vpop.f32.mrf.mxu0  ;;  %v17504_v28 = vpop.f32.mrf.mxu1 }
 0xa7a   :  { %v15333_v27 = vmul.f32 -1.442695, %v6935_v2  ;;  %v15334_v3 = vmul.f32 -1.442695, %v7012_v46 }
 0xa7c   :  { %19333 = vpow2.f32 %v15333_v27 }
 0xa7d   :  { %19335 = vpow2.f32 %v15334_v3 }
 0xa81   :  { %v7085_v21 = vpop.f32.mrf.mxu0  ;;  %v7157_v29 = vpop.f32.mrf.mxu1 }
 0xa82   :  { %v7161_v31 = vadd.f32 %v7157_v29, %v6296_v4  ;;  %v7089_v57 = vadd.f32 %v7085_v21, %v6220_v26  ;;  %v22078_v26 = vld [vmem:[#allocation13 + $0x70] sm:$0xff] }
 0xa83   :  { %v17515_v14 = vpop.f32.mrf.mxu0  ;;  %v17526_v44 = vpop.f32.mrf.mxu1 }
 0xa84   :  { %v15335_v63 = vmul.f32 -1.442695, %v7161_v31  ;;  %v22066_v31 = vld [vmem:[#allocation13 + $0x58] sm:$0xff]  ;;  %v22076_v44 = vld [vmem:[#allocation13 + $0x50] sm:$0xff] }
 0xa85   :  { %v22068_v14 = vld [vmem:[#allocation13 + $0x78] sm:$0xff] }
 0xa86   :  { %19337 = vpow2.f32 %v15335_v63  ;;  %v22084_v63 = vld [vmem:[#allocation13 + $0x48] sm:$0xff] }
 0xa87   :  { %19339 = vtanh.f32 %v7089_v57  ;;  %v22086_v57 = vld [vmem:[#allocation13 + $0x68] sm:$0xff] }
 0xa89   :  { %v19334_v20 = vpop.eup %19333 }
 0xa8a   :  { %v19336_v24 = vpop.eup %19335  ;;  %v6939_v38 = vadd.f32 1.0, %v19334_v20  ;;  %v22092_v20 = vld [vmem:[#allocation13 + $0x40] sm:$0xff] }
 0xa8b   :  { %v7016_v9 = vadd.f32 1.0, %v19336_v24  ;;  %v22096_v24 = vld [vmem:[#allocation13 + $0x60] sm:$0xff] }
 0xa8c   :  { %19341 = vrcp.f32 %v6939_v38 }
 0xa8d   :  { %19343 = vrcp.f32 %v7016_v9 }
 0xa93   :  { %v19338_v51 = vpop.eup %19337 }
 0xa94   :  { %v19340_v13 = vpop.eup %19339  ;;  %v7165_v58 = vadd.f32 1.0, %v19338_v51 }
 0xa96   :  { %19345 = vrcp.f32 %v7165_v58 }
 0xa99   :  { %v19342_v49 = vpop.eup %19341 }
 0xa9a   :  { %v19344_v12 = vpop.eup %19343  ;;  %v7169_v30 = vmul.f32 %v19342_v49, %v19340_v13 }
 0xa9b   :  { %v7168_v25 = vmul.f32 0.0, %v19344_v12 }
 0xa9d   :  { %v21941_v45 = vadd.f32 %v7169_v30, %v7168_v25 }
 0xa9f   :  { %19347 = vtanh.f32 %v21941_v45 }
 0xaa3   :  { %v19346_v8 = vpop.eup %19345 }
 0xaac   :  { %v19348_v42 = vpop.eup %19347 }
 0xaad   :  { %v21944_v56 = vmul.f32 %v19348_v42, %v19346_v8 }
 0xaaf   :  { %17536 = vmatmul.mubr.msk.f32.vlgmr.msra.gmra.mxu0 %vm431_vm7, %v21944_v56  ;;  %17547 = vmatmul.mubr.msk.f32.vlgmr.msra.gmra.mxu1 %vm431_vm7, %v21944_v56 }
 0xab0   :  { %17550 = vmatpush3.msra.mxu0 %v21863_v60  ;;  %17561 = vmatpush3.msra.mxu1 %v21865_v16 }
 0xab1   :  { %17551 = vmatprep.subr.mxu0 %v24255_v37  ;;  %17562 = vmatprep.subr.mxu1 %v24255_v37 }
 0xab2   :  { %17552 = vmatpush3.msra.mxu0 %v21871_v17  ;;  %17563 = vmatpush3.msra.mxu1 %v21873_v50 }
 0xab3   :  { %17553 = vmatprep.subr.mxu0 %v24255_v37  ;;  %17564 = vmatprep.subr.mxu1 %v24255_v37 }
 0xab4   :  { %17554 = vmatpush3.msra.mxu0 %v21879_v32  ;;  %17565 = vmatpush3.msra.mxu1 %v21881_v52 }
 0xab5   :  { %17555 = vmatprep.subr.mxu0 %v24255_v37  ;;  %17566 = vmatprep.subr.mxu1 %v24255_v37 }
 0xab6   :  { %17556 = vmatpush3.msra.mxu0 %v21887_v22  ;;  %17557 = vmatprep.mubr.msk.f32.mxu0 %vm19992_vm8, %v24255_v37 }
 0xab7   :  { %17567 = vmatpush3.msra.mxu1 %v21891_v34  ;;  %17568 = vmatprep.mubr.msk.f32.mxu1 %vm19992_vm8, %v24255_v37 }
 0xab8   :  { %17558 = vmatmul.mubr.msk.f32.vlgmr.msra.gmra.mxu0 %vm431_vm7, %v21944_v56  ;;  %17569 = vmatmul.mubr.msk.f32.vlgmr.msra.gmra.mxu1 %vm431_vm7, %v21944_v56 }
 0xab9   :  { %17571 = vmatprep.subr.mxu0 %v24255_v37  ;;  %17582 = vmatprep.subr.mxu1 %v24255_v37 }
 0xaba   :  { %17572 = vmatpush3.msra.mxu0 %v21825_v5  ;;  %17583 = vmatpush3.msra.mxu1 %v21827_v6 }
 0xabb   :  { %17573 = vmatprep.subr.mxu0 %v24255_v37  ;;  %17584 = vmatprep.subr.mxu1 %v24255_v37 }
 0xabc   :  { %17574 = vmatpush3.msra.mxu0 %v21833_v7  ;;  %17585 = vmatpush3.msra.mxu1 %v21835_v54 }
 0xabd   :  { %17575 = vmatprep.subr.mxu0 %v24255_v37  ;;  %17586 = vmatprep.subr.mxu1 %v24255_v37 }
 0xabe   :  { %17576 = vmatpush3.msra.mxu0 %v21841_v23  ;;  %17587 = vmatpush3.msra.mxu1 %v21843_v40 }
 0xabf   :  { %17577 = vmatprep.subr.mxu0 %v24255_v37  ;;  %17588 = vmatprep.subr.mxu1 %v24255_v37 }
 0xac0   :  { %17578 = vmatpush3.msra.mxu0 %v21849_v59  ;;  %17589 = vmatpush3.msra.mxu1 %v21853_v53 }
 0xac1   :  { %17579 = vmatprep.mubr.msk.f32.mxu0 %vm19992_vm8, %v24255_v37  ;;  %17590 = vmatprep.mubr.msk.f32.mxu1 %vm19992_vm8, %v24255_v37 }
 0xac2   :  { %17593 = vmatprep.subr.mxu0 %v24255_v37  ;;  %17604 = vmatprep.subr.mxu1 %v24255_v37 }
 0xb6f   :  { %v7242_v5 = vpop.f32.mrf.mxu0  ;;  %v7319_v6 = vpop.f32.mrf.mxu1 }
 0xb70   :  { %v7246_v7 = vadd.f32 %v7242_v5, %v21925_v47  ;;  %v7323_v54 = vadd.f32 %v7319_v6, %v21927_v35 }
 0xb71   :  { %v17537_v23 = vpop.f32.mrf.mxu0  ;;  %v17548_v40 = vpop.f32.mrf.mxu1 }
 0xb72   :  { %v15337_v59 = vmul.f32 -1.442695, %v7246_v7  ;;  %v15339_v53 = vmul.f32 -1.442695, %v7323_v54 }
 0xb74   :  { %19349 = vpow2.f32 %v15337_v59 }
 0xb75   :  { %19351 = vpow2.f32 %v15339_v53 }
 0xb78   :  { %v7396_v61 = vpop.f32.mrf.mxu0  ;;  %v7468_v15 = vpop.f32.mrf.mxu1 }
 0xb79   :  { %v7472_v62 = vadd.f32 %v7468_v15, %v21931_v48  ;;  %v7400_v19 = vadd.f32 %v7396_v61, %v21929_v18 }
 0xb7a   :  { %v17559_v10 = vpop.f32.mrf.mxu0  ;;  %v17570_v41 = vpop.f32.mrf.mxu1 }
 0xb7b   :  { %v15342_v55 = vmul.f32 -1.442695, %v7472_v62 }
 0xb7d   :  { %19353 = vpow2.f32 %v15342_v55 }
 0xb7e   :  { %19355 = vtanh.f32 %v7400_v19 }
 0xb81   :  { %v19350_v0 = vpop.eup %19349 }
 0xb82   :  { %v19352_v1 = vpop.eup %19351  ;;  %v7250_v47 = vadd.f32 1.0, %v19350_v0 }
 0xb83   :  { %v7327_v35 = vadd.f32 1.0, %v19352_v1 }
 0xb84   :  { %19357 = vrcp.f32 %v7250_v47 }
 0xb85   :  { %19359 = vrcp.f32 %v7327_v35 }
 0xb8a   :  { %v19354_v2 = vpop.eup %19353 }
 0xb8b   :  { %v19356_v46 = vpop.eup %19355  ;;  %v7476_v3 = vadd.f32 1.0, %v19354_v2 }
 0xb8d   :  { %19361 = vrcp.f32 %v7476_v3 }
 0xb91   :  { %v19358_v33 = vpop.eup %19357 }
 0xb92   :  { %v19360_v28 = vpop.eup %19359  ;;  %v7480_v27 = vmul.f32 %v19358_v33, %v19356_v46 }
 0xb93   :  { %v7479_v48 = vmul.f32 %v19360_v28, %v21941_v45 }
 0xb95   :  { %v21999_v4 = vadd.f32 %v7480_v27, %v7479_v48 }
 0xb97   :  { %19363 = vtanh.f32 %v21999_v4 }
 0xb9a   :  { %v19362_v18 = vpop.eup %19361 }
 0xba4   :  { %v19364_v21 = vpop.eup %19363 }
 0xba5   :  { %v22002_v29 = vmul.f32 %v19364_v21, %v19362_v18 }
 0xba7   :  { %17580 = vmatmul.mubr.msk.f32.vlgmr.msra.gmra.mxu0 %vm431_vm7, %v22002_v29  ;;  %17591 = vmatmul.mubr.msk.f32.vlgmr.msra.gmra.mxu1 %vm431_vm7, %v22002_v29 }
 0xba8   :  { %17594 = vmatpush3.msra.mxu0 %v21863_v60  ;;  %17605 = vmatpush3.msra.mxu1 %v21865_v16  ;;  %v22026_v60 = vld [vmem:[#allocation13 + $0x18] sm:$0xff] }
 0xba9   :  { %17595 = vmatprep.subr.mxu0 %v24255_v37  ;;  %17606 = vmatprep.subr.mxu1 %v24255_v37  ;;  %v22028_v16 = vld [vmem:[#allocation13 + $0x38] sm:$0xff] }
 0xbaa   :  { %17596 = vmatpush3.msra.mxu0 %v21871_v17  ;;  %17607 = vmatpush3.msra.mxu1 %v21873_v50  ;;  %v22036_v17 = vld [vmem:[#allocation13 + $0x10] sm:$0xff] }
 0xbab   :  { %17597 = vmatprep.subr.mxu0 %v24255_v37  ;;  %17608 = vmatprep.subr.mxu1 %v24255_v37  ;;  %v22038_v50 = vld [vmem:[#allocation13 + $0x30] sm:$0xff] }
 0xbac   :  { %17598 = vmatpush3.msra.mxu0 %v21879_v32  ;;  %17609 = vmatpush3.msra.mxu1 %v21881_v52  ;;  %v22044_v32 = vld [vmem:[#allocation13 + $0x8] sm:$0xff] }
 0xbad   :  { %17599 = vmatprep.subr.mxu0 %v24255_v37  ;;  %17610 = vmatprep.subr.mxu1 %v24255_v37  ;;  %v22046_v52 = vld [vmem:[#allocation13 + $0x28] sm:$0xff] }
 0xbae   :  { %17600 = vmatpush3.msra.mxu0 %v21887_v22  ;;  %17601 = vmatprep.mubr.msk.f32.mxu0 %vm19992_vm8, %v24255_v37  ;;  %v22052_v22 = vld [vmem:[#allocation13] sm:$0xff] }
 0xbaf   :  { %17611 = vmatpush3.msra.mxu1 %v21891_v34  ;;  %17612 = vmatprep.mubr.msk.f32.mxu1 %vm19992_vm8, %v24255_v37  ;;  %v22056_v34 = vld [vmem:[#allocation13 + $0x20] sm:$0xff] }
 0xbb0   :  { %17602 = vmatmul.mubr.msk.f32.vlgmr.msra.gmra.mxu0 %vm431_vm7, %v22002_v29  ;;  %17613 = vmatmul.mubr.msk.f32.vlgmr.msra.gmra.mxu1 %vm431_vm7, %v22002_v29 }
 0xbb1   :  { %17615 = vmatprep.subr.mxu0 %v24255_v37  ;;  %17626 = vmatprep.subr.mxu1 %v24255_v37 }
 0xbb2   :  { %17616 = vmatpush3.msra.mxu0 %v22026_v60  ;;  %17627 = vmatpush3.msra.mxu1 %v22028_v16 }
 0xbb3   :  { %17617 = vmatprep.subr.mxu0 %v24255_v37  ;;  %17628 = vmatprep.subr.mxu1 %v24255_v37 }
 0xbb4   :  { %17618 = vmatpush3.msra.mxu0 %v22036_v17  ;;  %17629 = vmatpush3.msra.mxu1 %v22038_v50 }
 0xbb5   :  { %17619 = vmatprep.subr.mxu0 %v24255_v37  ;;  %17630 = vmatprep.subr.mxu1 %v24255_v37 }
 0xbb6   :  { %17620 = vmatpush3.msra.mxu0 %v22044_v32  ;;  %17631 = vmatpush3.msra.mxu1 %v22046_v52 }
 0xbb7   :  { %17621 = vmatprep.subr.mxu0 %v24255_v37  ;;  %17632 = vmatprep.subr.mxu1 %v24255_v37 }
 0xbb8   :  { %17622 = vmatpush3.msra.mxu0 %v22052_v22  ;;  %17623 = vmatprep.mubr.msk.f32.mxu0 %vm19992_vm8, %v24255_v37 }
 0xbb9   :  { %17633 = vmatpush3.msra.mxu1 %v22056_v34  ;;  %17634 = vmatprep.mubr.msk.f32.mxu1 %vm19992_vm8, %v24255_v37 }
 0xbba   :  { %17624 = vmatmul.mubr.msk.f32.vlgmr.msra.gmra.mxu0 %vm431_vm7, %v21944_v56  ;;  %17635 = vmatmul.mubr.msk.f32.vlgmr.msra.gmra.mxu1 %vm431_vm7, %v21944_v56 }
 0xbbb   :  { %17637 = vmatprep.subr.mxu0 %v24255_v37  ;;  %17648 = vmatprep.subr.mxu1 %v24255_v37 }
 0xbbc   :  { %17638 = vmatpush3.msra.mxu0 %v22066_v31  ;;  %17649 = vmatpush3.msra.mxu1 %v22068_v14 }
 0xbbd   :  { %17639 = vmatprep.subr.mxu0 %v24255_v37  ;;  %17650 = vmatprep.subr.mxu1 %v24255_v37 }
 0xbbe   :  { %17640 = vmatpush3.msra.mxu0 %v22076_v44  ;;  %17651 = vmatpush3.msra.mxu1 %v22078_v26 }
 0xbbf   :  { %17641 = vmatprep.subr.mxu0 %v24255_v37  ;;  %17652 = vmatprep.subr.mxu1 %v24255_v37 }
 0xbc0   :  { %17642 = vmatpush3.msra.mxu0 %v22084_v63  ;;  %17653 = vmatpush3.msra.mxu1 %v22086_v57 }
 0xbc1   :  { %17643 = vmatprep.subr.mxu0 %v24255_v37  ;;  %17654 = vmatprep.subr.mxu1 %v24255_v37 }
 0xbc2   :  { %17644 = vmatpush3.msra.mxu0 %v22092_v20  ;;  %17645 = vmatprep.mubr.msk.f32.mxu0 %vm19992_vm8, %v24255_v37 }
 0xbc3   :  { %17655 = vmatpush3.msra.mxu1 %v22096_v24  ;;  %17656 = vmatprep.mubr.msk.f32.mxu1 %vm19992_vm8, %v24255_v37 }
 0xbc4   :  { %17646 = vmatmul.mubr.msk.f32.vlgmr.msra.gmra.mxu0 %vm431_vm7, %v21944_v56  ;;  %17657 = vmatmul.mubr.msk.f32.vlgmr.msra.gmra.mxu1 %vm431_vm7, %v21944_v56 }
 0xbc5   :  { %17659 = vmatprep.subr.mxu0 %v24255_v37  ;;  %17670 = vmatprep.subr.mxu1 %v24255_v37 }
 0xbc6   :  { %17660 = vmatpush3.msra.mxu0 %v22026_v60  ;;  %17671 = vmatpush3.msra.mxu1 %v22028_v16 }
 0xbc7   :  { %17661 = vmatprep.subr.mxu0 %v24255_v37  ;;  %17672 = vmatprep.subr.mxu1 %v24255_v37 }
 0xbc8   :  { %17662 = vmatpush3.msra.mxu0 %v22036_v17  ;;  %17673 = vmatpush3.msra.mxu1 %v22038_v50 }
 0xbc9   :  { %17663 = vmatprep.subr.mxu0 %v24255_v37  ;;  %17674 = vmatprep.subr.mxu1 %v24255_v37 }
 0xbca   :  { %17664 = vmatpush3.msra.mxu0 %v22044_v32  ;;  %17675 = vmatpush3.msra.mxu1 %v22046_v52 }
 0xbcb   :  { %17665 = vmatprep.subr.mxu0 %v24255_v37  ;;  %17676 = vmatprep.subr.mxu1 %v24255_v37 }
 0xbcc   :  { %17666 = vmatpush3.msra.mxu0 %v22052_v22  ;;  %17667 = vmatprep.mubr.msk.f32.mxu0 %vm19992_vm8, %v24255_v37 }
 0xbcd   :  { %17677 = vmatpush3.msra.mxu1 %v22056_v34  ;;  %17678 = vmatprep.mubr.msk.f32.mxu1 %vm19992_vm8, %v24255_v37 }
 0xbce   :  { %17668 = vmatmul.mubr.msk.f32.vlgmr.msra.gmra.mxu0 %vm431_vm7, %v22002_v29  ;;  %17679 = vmatmul.mubr.msk.f32.vlgmr.msra.gmra.mxu1 %vm431_vm7, %v22002_v29 }
 0xbcf   :  { %17681 = vmatprep.subr.mxu0 %v24255_v37  ;;  %17692 = vmatprep.subr.mxu1 %v24255_v37 }
 0xbd0   :  { %17682 = vmatpush3.msra.mxu0 %v22066_v31  ;;  %17693 = vmatpush3.msra.mxu1 %v22068_v14 }
 0xbd1   :  { %17683 = vmatprep.subr.mxu0 %v24255_v37  ;;  %17694 = vmatprep.subr.mxu1 %v24255_v37 }
 0xbd2   :  { %17684 = vmatpush3.msra.mxu0 %v22076_v44  ;;  %17695 = vmatpush3.msra.mxu1 %v22078_v26 }
 0xbd3   :  { %17685 = vmatprep.subr.mxu0 %v24255_v37  ;;  %17696 = vmatprep.subr.mxu1 %v24255_v37 }
 0xbd4   :  { %17686 = vmatpush3.msra.mxu0 %v22084_v63  ;;  %17697 = vmatpush3.msra.mxu1 %v22086_v57 }
 0xbd5   :  { %17687 = vmatprep.subr.mxu0 %v24255_v37  ;;  %17698 = vmatprep.subr.mxu1 %v24255_v37 }
 0xbd6   :  { %17688 = vmatpush3.msra.mxu0 %v22092_v20  ;;  %17689 = vmatprep.mubr.msk.f32.mxu0 %vm19992_vm8, %v24255_v37 }
 0xbd7   :  { %17699 = vmatpush3.msra.mxu1 %v22096_v24  ;;  %17700 = vmatprep.mubr.msk.f32.mxu1 %vm19992_vm8, %v24255_v37 }
 0xbd8   :  { %17690 = vmatmul.mubr.msk.f32.vlgmr.msra.gmra.mxu0 %vm431_vm7, %v22002_v29  ;;  %17701 = vmatmul.mubr.msk.f32.vlgmr.msra.gmra.mxu1 %vm431_vm7, %v22002_v29 }
 0xbd9   :  { %17703 = vmatprep.subr.mxu0 %v24255_v37  ;;  %17714 = vmatprep.subr.mxu1 %v24255_v37 }
 0xbda   :  { %17704 = vmatpush3.msra.mxu0 %v22026_v60  ;;  %17715 = vmatpush3.msra.mxu1 %v22028_v16  ;;  %v22227_v60 = vld [vmem:[#allocation15 + $0x38] sm:$0xff]  ;;  %v22235_v16 = vld [vmem:[#allocation15 + $0x10] sm:$0xff] }
 0xbdb   :  { %17705 = vmatprep.subr.mxu0 %v24255_v37  ;;  %17716 = vmatprep.subr.mxu1 %v24255_v37 }
 0xbdc   :  { %17706 = vmatpush3.msra.mxu0 %v22036_v17  ;;  %17717 = vmatpush3.msra.mxu1 %v22038_v50  ;;  %v22237_v17 = vld [vmem:[#allocation15 + $0x30] sm:$0xff]  ;;  %v22243_v50 = vld [vmem:[#allocation15 + $0x8] sm:$0xff] }
 0xbdd   :  { %17707 = vmatprep.subr.mxu0 %v24255_v37  ;;  %17718 = vmatprep.subr.mxu1 %v24255_v37 }
 0xbde   :  { %17708 = vmatpush3.msra.mxu0 %v22044_v32  ;;  %17719 = vmatpush3.msra.mxu1 %v22046_v52  ;;  %v22245_v32 = vld [vmem:[#allocation15 + $0x28] sm:$0xff]  ;;  %v22251_v52 = vld [vmem:[#allocation15] sm:$0xff] }
 0xbdf   :  { %17709 = vmatprep.subr.mxu0 %v24255_v37  ;;  %17720 = vmatprep.subr.mxu1 %v24255_v37 }
 0xbe0   :  { %17710 = vmatpush3.msra.mxu0 %v22052_v22  ;;  %17721 = vmatpush3.msra.mxu1 %v22056_v34  ;;  %v22255_v22 = vld [vmem:[#allocation15 + $0x20] sm:$0xff]  ;;  %v22265_v34 = vld [vmem:[#allocation15 + $0x58] sm:$0xff] }
 0xbe1   :  { %17711 = vmatprep.mubr.msk.f32.mxu0 %vm19992_vm8, %v24255_v37  ;;  %17722 = vmatprep.mubr.msk.f32.mxu1 %vm19992_vm8, %v24255_v37 }
 0xbe2   :  { %17725 = vmatprep.subr.mxu0 %v24255_v37  ;;  %17736 = vmatprep.subr.mxu1 %v24255_v37 }
 0xc67   :  { %v7553_v38 = vpop.f32.mrf.mxu0  ;;  %v7630_v9 = vpop.f32.mrf.mxu1 }
 0xc68   :  { %v7557_v51 = vadd.f32 %v7553_v38, %v21933_v43  ;;  %v7634_v13 = vadd.f32 %v7630_v9, %v21935_v11 }
 0xc69   :  { %v17581_v49 = vpop.f32.mrf.mxu0  ;;  %v17592_v12 = vpop.f32.mrf.mxu1 }
 0xc6a   :  { %v15344_v30 = vmul.f32 -1.442695, %v7557_v51  ;;  %v15346_v58 = vmul.f32 -1.442695, %v7634_v13 }
 0xc6c   :  { %19365 = vpow2.f32 %v15344_v30 }
 0xc6d   :  { %19367 = vpow2.f32 %v15346_v58  ;;  %v22335_v58 = vld [vmem:[#allocation16] ss:$0 sm:$0xff] }
 0xc70   :  { %v7707_v25 = vpop.f32.mrf.mxu0  ;;  %v7779_v45 = vpop.f32.mrf.mxu1 }
 0xc71   :  { %v7783_v8 = vadd.f32 %v7779_v45, %v21939_v36  ;;  %v7711_v6 = vadd.f32 %v7707_v25, %v21937_v39  ;;  %v22337_v25 = vld [vmem:[#allocation16 + $0x1] ss:$0 sm:$0xff] }
 0xc72   :  { %v17603_v42 = vpop.f32.mrf.mxu0  ;;  %v17614_v56 = vpop.f32.mrf.mxu1 }
 0xc73   :  { %v15349_v5 = vmul.f32 -1.442695, %v7783_v8 }
 0xc75   :  { %19369 = vpow2.f32 %v15349_v5 }
 0xc76   :  { %19371 = vtanh.f32 %v7711_v6 }
 0xc79   :  { %v19366_v7 = vpop.eup %19365 }
 0xc7a   :  { %v19368_v54 = vpop.eup %19367  ;;  %v7561_v43 = vadd.f32 1.0, %v19366_v7  ;;  %v22184_v11 = vpop.f32.mrf.mxu0 }
 0xc7b   :  { %v22186_v23 = vpop.f32.mrf.mxu1  ;;  %v7638_v40 = vadd.f32 1.0, %v19368_v54  ;;  %v7913_v45 = vadd.f32 %v22335_v58, %v22184_v11 }
 0xc7c   :  { %19373 = vrcp.f32 %v7561_v43  ;;  %v17625_v59 = vpop.f32.mrf.mxu0  ;;  %v7989_v8 = vadd.f32 %v22337_v25, %v22186_v23 }
 0xc7d   :  { %v17636_v53 = vpop.f32.mrf.mxu1  ;;  %19375 = vrcp.f32 %v7638_v40  ;;  %v22343_v59 = vld [vmem:[#allocation16 + $0x3] ss:$0 sm:$0xff] }
 0xc82   :  { %v19370_v62 = vpop.eup %19369 }
 0xc83   :  { %v19372_v10 = vpop.eup %19371  ;;  %v7787_v0 = vadd.f32 1.0, %v19370_v62 }
 0xc84   :  { %v22188_v36 = vpop.f32.mrf.mxu0  ;;  %v22190_v61 = vpop.f32.mrf.mxu1 }
 0xc85   :  { %19377 = vrcp.f32 %v7787_v0  ;;  %v8141_v53 = vadd.f32 %v22343_v59, %v22190_v61 }
 0xc86   :  { %v17647_v15 = vpop.f32.mrf.mxu0  ;;  %v17658_v39 = vpop.f32.mrf.mxu1 }
 0xc87   :  { %v22347_v39 = vld [vmem:[#allocation16 + $0x2] ss:$0 sm:$0xff] }
 0xc89   :  { %v19374_v41 = vpop.eup %19373 }
 0xc8a   :  { %v19376_v55 = vpop.eup %19375  ;;  %v7791_v19 = vmul.f32 %v19374_v41, %v19372_v10  ;;  %v8065_v41 = vadd.f32 %v22347_v39, %v22188_v36 }
 0xc8b   :  { %v7790_v1 = vmul.f32 %v19376_v55, %v21999_v4  ;;  %v22225_v4 = vld [vmem:[#allocation15 + $0x18] sm:$0xff] }
 0xc8d   :  { %v7792_v47 = vadd.f32 %v7791_v19, %v7790_v1 }
 0xc8e   :  { %v22193_v35 = vpop.f32.mrf.mxu0  ;;  %v22195_v2 = vpop.f32.mrf.mxu1 }
 0xc8f   :  { %19379 = vtanh.f32 %v7792_v47 }
 0xc90   :  { %v17669_v46 = vpop.f32.mrf.mxu0  ;;  %v17680_v33 = vpop.f32.mrf.mxu1 }
 0xc92   :  { %v19378_v18 = vpop.eup %19377 }
 0xc98   :  { %v22197_v28 = vpop.f32.mrf.mxu0  ;;  %v22199_v27 = vpop.f32.mrf.mxu1 }
 0xc9a   :  { %v17691_v3 = vpop.f32.mrf.mxu0  ;;  %v17702_v48 = vpop.f32.mrf.mxu1 }
 0xc9c   :  { %v19380_v21 = vpop.eup %19379 }
 0xc9d   :  { %v22201_v29 = vmul.f32 %v19380_v21, %v19378_v18 }
 0xc9f   :  { %17712 = vmatmul.mubr.msk.f32.vlgmr.msra.gmra.mxu0 %vm431_vm7, %v22201_v29  ;;  %17723 = vmatmul.mubr.msk.f32.vlgmr.msra.gmra.mxu1 %vm431_vm7, %v22201_v29 }
 0xca0   :  { %17726 = vmatpush3.msra.mxu0 %v22066_v31  ;;  %17737 = vmatpush3.msra.mxu1 %v22068_v14  ;;  %v22267_v31 = vld [vmem:[#allocation15 + $0x78] sm:$0xff]  ;;  %v22273_v14 = vld [vmem:[#allocation15 + $0x50] sm:$0xff] }
 0xca1   :  { %17727 = vmatprep.subr.mxu0 %v24255_v37  ;;  %17738 = vmatprep.subr.mxu1 %v24255_v37 }
 0xca2   :  { %17728 = vmatpush3.msra.mxu0 %v22076_v44  ;;  %17739 = vmatpush3.msra.mxu1 %v22078_v26  ;;  %v22275_v44 = vld [vmem:[#allocation15 + $0x70] sm:$0xff]  ;;  %v22281_v26 = vld [vmem:[#allocation15 + $0x48] sm:$0xff] }
 0xca3   :  { %17729 = vmatprep.subr.mxu0 %v24255_v37  ;;  %17740 = vmatprep.subr.mxu1 %v24255_v37 }
 0xca4   :  { %17730 = vmatpush3.msra.mxu0 %v22084_v63  ;;  %17741 = vmatpush3.msra.mxu1 %v22086_v57  ;;  %v22283_v63 = vld [vmem:[#allocation15 + $0x68] sm:$0xff]  ;;  %v22289_v57 = vld [vmem:[#allocation15 + $0x40] sm:$0xff] }
 0xca5   :  { %17731 = vmatprep.subr.mxu0 %v24255_v37  ;;  %17742 = vmatprep.subr.mxu1 %v24255_v37 }
 0xca6   :  { %17732 = vmatpush3.msra.mxu0 %v22092_v20  ;;  %17733 = vmatprep.mubr.msk.f32.mxu0 %vm19992_vm8, %v24255_v37  ;;  %v22293_v20 = vld [vmem:[#allocation15 + $0x60] sm:$0xff] }
 0xca7   :  { %17743 = vmatpush3.msra.mxu1 %v22096_v24  ;;  %17744 = vmatprep.mubr.msk.f32.mxu1 %vm19992_vm8, %v24255_v37 }
 0xca8   :  { %17734 = vmatmul.mubr.msk.f32.vlgmr.msra.gmra.mxu0 %vm431_vm7, %v22201_v29  ;;  %17745 = vmatmul.mubr.msk.f32.vlgmr.msra.gmra.mxu1 %vm431_vm7, %v22201_v29 }
 0xca9   :  { %17747 = vmatprep.subr.mxu0 %v24255_v37  ;;  %17758 = vmatprep.subr.mxu1 %v24255_v37 }
 0xcaa   :  { %17748 = vmatpush3.msra.mxu0 %v22225_v4  ;;  %17759 = vmatpush3.msra.mxu1 %v22227_v60 }
 0xcab   :  { %17749 = vmatprep.subr.mxu0 %v24255_v37  ;;  %17760 = vmatprep.subr.mxu1 %v24255_v37 }
 0xcac   :  { %17750 = vmatpush3.msra.mxu0 %v22235_v16  ;;  %17761 = vmatpush3.msra.mxu1 %v22237_v17 }
 0xcad   :  { %17751 = vmatprep.subr.mxu0 %v24255_v37  ;;  %17762 = vmatprep.subr.mxu1 %v24255_v37 }
 0xcae   :  { %17752 = vmatpush3.msra.mxu0 %v22243_v50  ;;  %17763 = vmatpush3.msra.mxu1 %v22245_v32 }
 0xcaf   :  { %17753 = vmatprep.subr.mxu0 %v24255_v37  ;;  %17764 = vmatprep.subr.mxu1 %v24255_v37 }
 0xcb0   :  { %17754 = vmatpush3.msra.mxu0 %v22251_v52  ;;  %17755 = vmatprep.mubr.msk.f32.mxu0 %vm19992_vm8, %v24255_v37 }
 0xcb1   :  { %17765 = vmatpush3.msra.mxu1 %v22255_v22  ;;  %17766 = vmatprep.mubr.msk.f32.mxu1 %vm19992_vm8, %v24255_v37 }
 0xcb2   :  { %17756 = vmatmul.mubr.f32.vlgmr.msra.gmra.mxu0 %v24255_v37  ;;  %17767 = vmatmul.mubr.f32.vlgmr.msra.gmra.mxu1 %v24255_v37 }
 0xcb3   :  { %17769 = vmatprep.subr.mxu0 %v24255_v37  ;;  %17780 = vmatprep.subr.mxu1 %v24255_v37 }
 0xcb4   :  { %17770 = vmatpush3.msra.mxu0 %v22265_v34  ;;  %17781 = vmatpush3.msra.mxu1 %v22267_v31 }
 0xcb5   :  { %17771 = vmatprep.subr.mxu0 %v24255_v37  ;;  %17782 = vmatprep.subr.mxu1 %v24255_v37 }
 0xcb6   :  { %17772 = vmatpush3.msra.mxu0 %v22273_v14  ;;  %17783 = vmatpush3.msra.mxu1 %v22275_v44 }
 0xcb7   :  { %17773 = vmatprep.subr.mxu0 %v24255_v37  ;;  %17784 = vmatprep.subr.mxu1 %v24255_v37 }
 0xcb8   :  { %17774 = vmatpush3.msra.mxu0 %v22281_v26  ;;  %17785 = vmatpush3.msra.mxu1 %v22283_v63 }
 0xcb9   :  { %17775 = vmatprep.subr.mxu0 %v24255_v37  ;;  %17786 = vmatprep.subr.mxu1 %v24255_v37 }
 0xcba   :  { %17776 = vmatpush3.msra.mxu0 %v22289_v57  ;;  %17777 = vmatprep.mubr.msk.f32.mxu0 %vm19992_vm8, %v24255_v37 }
 0xcbb   :  { %17787 = vmatpush3.msra.mxu1 %v22293_v20  ;;  %17788 = vmatprep.mubr.msk.f32.mxu1 %vm19992_vm8, %v24255_v37 }
 0xcbc   :  { %17778 = vmatmul.mubr.f32.vlgmr.msra.gmra.mxu0 %v24255_v37  ;;  %17789 = vmatmul.mubr.f32.vlgmr.msra.gmra.mxu1 %v24255_v37 }
 0xcbd   :  { %17791 = vmatprep.subr.mxu0 %v24255_v37  ;;  %17802 = vmatprep.subr.mxu1 %v24255_v37 }
 0xcbe   :  { %17792 = vmatpush3.msra.mxu0 %v22225_v4  ;;  %17803 = vmatpush3.msra.mxu1 %v22227_v60 }
 0xcbf   :  { %17793 = vmatprep.subr.mxu0 %v24255_v37  ;;  %17804 = vmatprep.subr.mxu1 %v24255_v37 }
 0xcc0   :  { %17794 = vmatpush3.msra.mxu0 %v22235_v16  ;;  %17805 = vmatpush3.msra.mxu1 %v22237_v17 }
 0xcc1   :  { %17795 = vmatprep.subr.mxu0 %v24255_v37  ;;  %17806 = vmatprep.subr.mxu1 %v24255_v37 }
 0xcc2   :  { %17796 = vmatpush3.msra.mxu0 %v22243_v50  ;;  %17807 = vmatpush3.msra.mxu1 %v22245_v32 }
 0xcc3   :  { %17797 = vmatprep.subr.mxu0 %v24255_v37  ;;  %17808 = vmatprep.subr.mxu1 %v24255_v37 }
 0xcc4   :  { %17798 = vmatpush3.msra.mxu0 %v22251_v52  ;;  %17809 = vmatpush3.msra.mxu1 %v22255_v22 }
 0xcc5   :  { %17799 = vmatprep.mubr.msk.f32.mxu0 %vm19992_vm8, %v24255_v37  ;;  %17810 = vmatprep.mubr.msk.f32.mxu1 %vm19992_vm8, %v24255_v37 }
 0xcc6   :  { %17813 = vmatprep.subr.mxu0 %v24255_v37  ;;  %17824 = vmatprep.subr.mxu1 %v24255_v37 }
 0xd5f   :  { %v22327_v24 = vpop.f32.mrf.mxu0  ;;  %v22329_v38 = vpop.f32.mrf.mxu1 }
 0xd61   :  { %v17713_v9 = vpop.f32.mrf.mxu0  ;;  %v17724_v51 = vpop.f32.mrf.mxu1 }
 0xd68   :  { %v22331_v13 = vpop.f32.mrf.mxu0  ;;  %v22333_v49 = vpop.f32.mrf.mxu1 }
 0xd6a   :  { %v17735_v12 = vpop.f32.mrf.mxu0  ;;  %v17746_v30 = vpop.f32.mrf.mxu1 }
 0xd72   :  { %v8773_v42 = vpop.f32.mrf.mxu0  ;;  %v8850_v56 = vpop.f32.mrf.mxu1 }
 0xd73   :  { %v8777_v5 = vadd.f32 %v8773_v42, %v7913_v45  ;;  %v8854_v6 = vadd.f32 %v8850_v56, %v7989_v8  ;;  %v8421_v42 = vadd.f32 %v22343_v59, %v22199_v27 }
 0xd74   :  { %v17757_v7 = vpop.f32.mrf.mxu0  ;;  %v17768_v54 = vpop.f32.mrf.mxu1 }
 0xd75   :  { %v15366_v43 = vmul.f32 -1.442695, %v8777_v5  ;;  %v15367_v40 = vmul.f32 -1.442695, %v8854_v6 }
 0xd77   :  { %19381 = vpow2.f32 %v15366_v43 }
 0xd78   :  { %19383 = vpow2.f32 %v15367_v40 }
 0xd7c   :  { %v8927_v15 = vpop.f32.mrf.mxu0  ;;  %v8999_v11 = vpop.f32.mrf.mxu1 }
 0xd7d   :  { %v9003_v23 = vadd.f32 %v8999_v11, %v8141_v53  ;;  %v8931_v19 = vadd.f32 %v8927_v15, %v8065_v41 }
 0xd7e   :  { %v17779_v62 = vpop.f32.mrf.mxu0  ;;  %v17790_v10 = vpop.f32.mrf.mxu1 }
 0xd7f   :  { %v15368_v55 = vmul.f32 -1.442695, %v9003_v23 }
 0xd81   :  { %19385 = vpow2.f32 %v15368_v55 }
 0xd82   :  { %19387 = vtanh.f32 %v8931_v19 }
 0xd84   :  { %v19382_v0 = vpop.eup %19381 }
 0xd85   :  { %v19384_v1 = vpop.eup %19383  ;;  %v8781_v47 = vadd.f32 1.0, %v19382_v0 }
 0xd86   :  { %v8858_v46 = vadd.f32 1.0, %v19384_v1 }
 0xd87   :  { %19389 = vrcp.f32 %v8781_v47 }
 0xd88   :  { %19391 = vrcp.f32 %v8858_v46 }
 0xd8e   :  { %v19386_v61 = vpop.eup %19385 }
 0xd8f   :  { %v19388_v33 = vpop.eup %19387  ;;  %v9007_v21 = vadd.f32 1.0, %v19386_v61 }
 0xd91   :  { %19393 = vrcp.f32 %v9007_v21  ;;  %v8704_v21 = vadd.f32 %v22343_v59, %v22333_v49 }
 0xd94   :  { %v19390_v3 = vpop.eup %19389 }
 0xd95   :  { %v19392_v48 = vpop.eup %19391  ;;  %v9011_v18 = vmul.f32 %v19390_v3, %v19388_v33 }
 0xd96   :  { %v9010_v9 = vmul.f32 0.0, %v19392_v48 }
 0xd98   :  { %v22351_v51 = vadd.f32 %v9011_v18, %v9010_v9 }
 0xd9a   :  { %19395 = vtanh.f32 %v22351_v51 }
 0xd9e   :  { %v19394_v36 = vpop.eup %19393 }
 0xda7   :  { %v19396_v12 = vpop.eup %19395 }
 0xda8   :  { %v22354_v30 = vmul.f32 %v19396_v12, %v19394_v36 }
 0xdaa   :  { %17800 = vmatmul.mubr.msk.f32.vlgmr.msra.gmra.mxu0 %vm431_vm7, %v22354_v30  ;;  %17811 = vmatmul.mubr.msk.f32.vlgmr.msra.gmra.mxu1 %vm431_vm7, %v22354_v30 }
 0xdab   :  { %17814 = vmatpush3.msra.mxu0 %v22265_v34  ;;  %17825 = vmatpush3.msra.mxu1 %v22267_v31 }
 0xdac   :  { %17815 = vmatprep.subr.mxu0 %v24255_v37  ;;  %17826 = vmatprep.subr.mxu1 %v24255_v37 }
 0xdad   :  { %17816 = vmatpush3.msra.mxu0 %v22273_v14  ;;  %17827 = vmatpush3.msra.mxu1 %v22275_v44 }
 0xdae   :  { %17817 = vmatprep.subr.mxu0 %v24255_v37  ;;  %17828 = vmatprep.subr.mxu1 %v24255_v37 }
 0xdaf   :  { %17818 = vmatpush3.msra.mxu0 %v22281_v26  ;;  %17829 = vmatpush3.msra.mxu1 %v22283_v63 }
 0xdb0   :  { %17819 = vmatprep.subr.mxu0 %v24255_v37  ;;  %17830 = vmatprep.subr.mxu1 %v24255_v37 }
 0xdb1   :  { %17820 = vmatpush3.msra.mxu0 %v22289_v57  ;;  %17821 = vmatprep.mubr.msk.f32.mxu0 %vm19992_vm8, %v24255_v37 }
 0xdb2   :  { %17831 = vmatpush3.msra.mxu1 %v22293_v20  ;;  %17832 = vmatprep.mubr.msk.f32.mxu1 %vm19992_vm8, %v24255_v37 }
 0xdb3   :  { %17822 = vmatmul.mubr.msk.f32.vlgmr.msra.gmra.mxu0 %vm431_vm7, %v22354_v30  ;;  %17833 = vmatmul.mubr.msk.f32.vlgmr.msra.gmra.mxu1 %vm431_vm7, %v22354_v30 }
 0xdb4   :  { %17835 = vmatprep.subr.mxu0 %v24255_v37  ;;  %17846 = vmatprep.subr.mxu1 %v24255_v37 }
 0xdb5   :  { %17836 = vmatpush3.msra.mxu0 %v22225_v4  ;;  %17847 = vmatpush3.msra.mxu1 %v22227_v60  ;;  %v8211_v4 = vadd.f32 %v22335_v58, %v22193_v35  ;;  %v8281_v60 = vadd.f32 %v22337_v25, %v22195_v2  ;;  %v8351_v2 = vadd.f32 %v22347_v39, %v22197_v28 }
 0xdb6   :  { %17837 = vmatprep.subr.mxu0 %v24255_v37  ;;  %17848 = vmatprep.subr.mxu1 %v24255_v37 }
 0xdb7   :  { %17838 = vmatpush3.msra.mxu0 %v22235_v16  ;;  %17849 = vmatpush3.msra.mxu1 %v22237_v17 }
 0xdb8   :  { %17839 = vmatprep.subr.mxu0 %v24255_v37  ;;  %17850 = vmatprep.subr.mxu1 %v24255_v37 }
 0xdb9   :  { %17840 = vmatpush3.msra.mxu0 %v22243_v50  ;;  %17851 = vmatpush3.msra.mxu1 %v22245_v32 }
 0xdba   :  { %17841 = vmatprep.subr.mxu0 %v24255_v37  ;;  %17852 = vmatprep.subr.mxu1 %v24255_v37 }
 0xdbb   :  { %17842 = vmatpush3.msra.mxu0 %v22251_v52  ;;  %17853 = vmatpush3.msra.mxu1 %v22255_v22 }
 0xdbc   :  { %17843 = vmatprep.mubr.msk.f32.mxu0 %vm19992_vm8, %v24255_v37  ;;  %17854 = vmatprep.mubr.msk.f32.mxu1 %vm19992_vm8, %v24255_v37 }
 0xdbd   :  { %17857 = vmatprep.subr.mxu0 %v24255_v37  ;;  %17868 = vmatprep.subr.mxu1 %v24255_v37 }
 0xe6a   :  { %v9084_v16 = vpop.f32.mrf.mxu0  ;;  %v9161_v17 = vpop.f32.mrf.mxu1 }
 0xe6b   :  { %v9088_v50 = vadd.f32 %v9084_v16, %v8211_v4  ;;  %v9165_v32 = vadd.f32 %v9161_v17, %v8281_v60  ;;  %v15383_v4 = vld [vmem:[%s24146_s18] ss:$0 sm:$0xff]  ;;  %s24292_s18 = sld [smem:[#allocation87_spill]] }
 0xe6c   :  { %v17801_v52 = vpop.f32.mrf.mxu0  ;;  %v17812_v22 = vpop.f32.mrf.mxu1 }
 0xe6d   :  { %v15370_v45 = vmul.f32 -1.442695, %v9088_v50  ;;  %v15372_v8 = vmul.f32 -1.442695, %v9165_v32 }
 0xe6f   :  { %19397 = vpow2.f32 %v15370_v45 }
 0xe70   :  { %19399 = vpow2.f32 %v15372_v8 }
 0xe73   :  { %v9238_v56 = vpop.f32.mrf.mxu0  ;;  %v9310_v5 = vpop.f32.mrf.mxu1 }
 0xe74   :  { %v9314_v6 = vadd.f32 %v9310_v5, %v8421_v42  ;;  %v9242_v43 = vadd.f32 %v9238_v56, %v8351_v2 }
 0xe75   :  { %v17823_v35 = vpop.f32.mrf.mxu0  ;;  %v17834_v7 = vpop.f32.mrf.mxu1 }
 0xe76   :  { %v15375_v54 = vmul.f32 -1.442695, %v9314_v6 }
 0xe78   :  { %19401 = vpow2.f32 %v15375_v54 }
 0xe79   :  { %19403 = vtanh.f32 %v9242_v43 }
 0xe7c   :  { %v19398_v40 = vpop.eup %19397 }
 0xe7d   :  { %v19400_v53 = vpop.eup %19399  ;;  %v9092_v15 = vadd.f32 1.0, %v19398_v40 }
 0xe7e   :  { %v9169_v11 = vadd.f32 1.0, %v19400_v53 }
 0xe7f   :  { %19405 = vrcp.f32 %v9092_v15 }
 0xe80   :  { %19407 = vrcp.f32 %v9169_v11 }
 0xe85   :  { %v19402_v23 = vpop.eup %19401 }
 0xe86   :  { %v19404_v27 = vpop.eup %19403  ;;  %v9318_v55 = vadd.f32 1.0, %v19402_v23 }
 0xe88   :  { %19409 = vrcp.f32 %v9318_v55  ;;  %v22496_v55 = vld [vmem:[#allocation18 + $0x38] sm:$0xff] }
 0xe8c   :  { %v19406_v62 = vpop.eup %19405 }
 0xe8d   :  { %v19408_v10 = vpop.eup %19407  ;;  %v9322_v41 = vmul.f32 %v19406_v62, %v19404_v27 }
 0xe8e   :  { %v9321_v19 = vmul.f32 %v19408_v10, %v22351_v51 }
 0xe90   :  { %v22413_v0 = vadd.f32 %v9322_v41, %v9321_v19  ;;  %v22494_v41 = vld [vmem:[#allocation18 + $0x18] sm:$0xff]  ;;  %v22498_v19 = vld [vmem:[#allocation18 + $0x10] sm:$0xff] }
 0xe92   :  { %19411 = vtanh.f32 %v22413_v0 }
 0xe95   :  { %v19410_v28 = vpop.eup %19409 }
 0xe9f   :  { %v19412_v1 = vpop.eup %19411 }
 0xea0   :  { %v22416_v47 = vmul.f32 %v19412_v1, %v19410_v28  ;;  %v22508_v28 = vld [vmem:[#allocation18 + $0x28] sm:$0xff]  ;;  %v22514_v1 = vld [vmem:[#allocation18] sm:$0xff] }
 0xea2   :  { %17844 = vmatmul.mubr.msk.f32.vlgmr.msra.gmra.mxu0 %vm431_vm7, %v22416_v47  ;;  %17855 = vmatmul.mubr.msk.f32.vlgmr.msra.gmra.mxu1 %vm431_vm7, %v22416_v47 }
 0xea3   :  { %17858 = vmatpush3.msra.mxu0 %v22265_v34  ;;  %17869 = vmatpush3.msra.mxu1 %v22267_v31  ;;  %v9640_v34 = vld [vmem:[#allocation27 + $0x18] sm:$0xff]  ;;  %v9639_v31 = vld [vmem:[#allocation27 + $0x10] sm:$0xff] }
 0xea4   :  { %17859 = vmatprep.subr.mxu0 %v24255_v37  ;;  %17870 = vmatprep.subr.mxu1 %v24255_v37 }
 0xea5   :  { %17860 = vmatpush3.msra.mxu0 %v22273_v14  ;;  %17871 = vmatpush3.msra.mxu1 %v22275_v44  ;;  %v9638_v14 = vld [vmem:[#allocation27 + $0x8] sm:$0xff]  ;;  %v9637_v44 = vld [vmem:[#allocation27] sm:$0xff] }
 0xea6   :  { %17861 = vmatprep.subr.mxu0 %v24255_v37  ;;  %17872 = vmatprep.subr.mxu1 %v24255_v37 }
 0xea7   :  { %17862 = vmatpush3.msra.mxu0 %v22281_v26  ;;  %17873 = vmatpush3.msra.mxu1 %v22283_v63  ;;  %v8494_v26 = vadd.f32 %v22335_v58, %v22327_v24  ;;  %v8564_v63 = vadd.f32 %v22337_v25, %v22329_v38  ;;  %v8634_v38 = vadd.f32 %v22347_v39, %v22331_v13 }
 0xea8   :  { %17863 = vmatprep.subr.mxu0 %v24255_v37  ;;  %17874 = vmatprep.subr.mxu1 %v24255_v37 }
 0xea9   :  { %17864 = vmatpush3.msra.mxu0 %v22289_v57  ;;  %17865 = vmatprep.mubr.msk.f32.mxu0 %vm19992_vm8, %v24255_v37 }
 0xeaa   :  { %17875 = vmatpush3.msra.mxu1 %v22293_v20  ;;  %17876 = vmatprep.mubr.msk.f32.mxu1 %vm19992_vm8, %v24255_v37 }
 0xeab   :  { %17866 = vmatmul.mubr.msk.f32.vlgmr.msra.gmra.mxu0 %vm431_vm7, %v22416_v47  ;;  %17877 = vmatmul.mubr.msk.f32.vlgmr.msra.gmra.mxu1 %vm431_vm7, %v22416_v47 }
 0xeac   :  { %17879 = vmatprep.subr.mxu0 %v24255_v37  ;;  %17890 = vmatprep.subr.mxu1 %v24255_v37 }
 0xead   :  { %17880 = vmatpush3.msra.mxu0 %v9640_v34  ;;  %17891 = vmatpush3.msra.mxu1 %v9640_v34 }
 0xeae   :  { %17881 = vmatprep.subr.mxu0 %v24255_v37  ;;  %17892 = vmatprep.subr.mxu1 %v24255_v37 }
 0xeaf   :  { %17882 = vmatpush3.msra.mxu0 %v9639_v31  ;;  %17893 = vmatpush3.msra.mxu1 %v9639_v31 }
 0xeb0   :  { %17883 = vmatprep.subr.mxu0 %v24255_v37  ;;  %17894 = vmatprep.subr.mxu1 %v24255_v37 }
 0xeb1   :  { %17884 = vmatpush3.msra.mxu0 %v9638_v14  ;;  %17895 = vmatpush3.msra.mxu1 %v9638_v14 }
 0xeb2   :  { %17885 = vmatprep.subr.mxu0 %v24255_v37  ;;  %17896 = vmatprep.subr.mxu1 %v24255_v37 }
 0xeb3   :  { %17886 = vmatpush3.msra.mxu0 %v9637_v44  ;;  %17887 = vmatprep.mubr.msk.f32.mxu0 %vm19992_vm8, %v24255_v37 }
 0xeb4   :  { %17897 = vmatpush3.msra.mxu1 %v9637_v44  ;;  %17898 = vmatprep.mubr.msk.f32.mxu1 %vm19992_vm8, %v24255_v37 }
 0xeb5   :  { %17888 = vmatmul.mubr.msk.f32.vlgmr.msra.gmra.mxu0 %vm431_vm7, %v22354_v30  ;;  %17899 = vmatmul.mubr.msk.f32.vlgmr.msra.gmra.mxu1 %vm431_vm7, %v22416_v47 }
 0xeb6   :  { %17901 = vmatprep.subr.mxu0 %v24255_v37  ;;  %17909 = vmatprep.mubr.msk.f32.mxu0 %vm19992_vm8, %v24255_v37 }
 0xeb7   :  { %17902 = vmatpush3.msra.mxu0 %v9640_v34  ;;  %17912 = vmatprep.subr.mxu1 %v24255_v37  ;;  %v22516_v34 = vld [vmem:[#allocation18 + $0x20] sm:$0xff] }
 0xeb8   :  { %17903 = vmatprep.subr.mxu0 %v24255_v37  ;;  %17920 = vmatprep.mubr.msk.f32.mxu1 %vm19992_vm8, %v24255_v37 }
 0xeb9   :  { %17904 = vmatpush3.msra.mxu0 %v9639_v31  ;;  %17913 = vmatpush3.msra.mxu1 %v22494_v41 }
 0xeba   :  { %17905 = vmatprep.subr.mxu0 %v24255_v37  ;;  %17914 = vmatprep.subr.mxu1 %v24255_v37 }
 0xebb   :  { %17906 = vmatpush3.msra.mxu0 %v9638_v14  ;;  %17915 = vmatpush3.msra.mxu1 %v22498_v19 }
 0xebc   :  { %17907 = vmatprep.subr.mxu0 %v24255_v37  ;;  %17916 = vmatprep.subr.mxu1 %v24255_v37 }
 0xebd   :  { %17908 = vmatpush3.msra.mxu0 %v9637_v44 }
 0xebe   :  { %17923 = vmatprep.subr.mxu0 %v24255_v37 }
 0xf62   :  { %v9395_v57 = vpop.f32.mrf.mxu0  ;;  %v9472_v20 = vpop.f32.mrf.mxu1 }
 0xf63   :  { %v9399_v46 = vadd.f32 %v9395_v57, %v8494_v26  ;;  %v9476_v61 = vadd.f32 %v9472_v20, %v8564_v63 }
 0xf64   :  { %v17845_v33 = vpop.f32.mrf.mxu0  ;;  %v17856_v3 = vpop.f32.mrf.mxu1 }
 0xf65   :  { %v15377_v48 = vmul.f32 -1.442695, %v9399_v46  ;;  %v15379_v18 = vmul.f32 -1.442695, %v9476_v61 }
 0xf67   :  { %19413 = vpow2.f32 %v15377_v48 }
 0xf68   :  { %19415 = vpow2.f32 %v15379_v18 }
 0xf6b   :  { %v9549_v9 = vpop.f32.mrf.mxu0  ;;  %v9621_v51 = vpop.f32.mrf.mxu1 }
 0xf6c   :  { %v9625_v36 = vadd.f32 %v9621_v51, %v8704_v21  ;;  %v9553_v12 = vadd.f32 %v9549_v9, %v8634_v38 }
 0xf6d   :  { %v17867_v24 = vpop.f32.mrf.mxu0  ;;  %v17878_v58 = vpop.f32.mrf.mxu1 }
 0xf6e   :  { %v15382_v25 = vmul.f32 -1.442695, %v9625_v36 }
 0xf70   :  { %19417 = vpow2.f32 %v15382_v25 }
 0xf71   :  { %19419 = vtanh.f32 %v9553_v12 }
 0xf74   :  { %v19414_v60 = vpop.eup %19413 }
 0xf75   :  { %v19416_v16 = vpop.eup %19415  ;;  %v9403_v17 = vadd.f32 1.0, %v19414_v60  ;;  %v9714_v50 = vpop.f32.mrf.mxu0 }
 0xf76   :  { %v9789_v49 = vpop.f32.mrf.mxu1  ;;  %v9480_v59 = vadd.f32 1.0, %v19416_v16  ;;  %v9715_v32 = vadd.f32 %v15383_v4, %v9714_v50 }
 0xf77   :  { %v9790_v52 = vadd.f32 %v15383_v4, %v9789_v49  ;;  %19421 = vrcp.f32 %v9403_v17  ;;  %v17889_v22 = vpop.f32.mrf.mxu0 }
 0xf78   :  { %v17900_v45 = vpop.f32.mrf.mxu1  ;;  %19423 = vrcp.f32 %v9480_v59  ;;  %v9718_v13 = vmul.f32 %v9715_v32, %v22201_v29 }
 0xf79   :  { %v9793_v8 = vmul.f32 %v9790_v52, %v22201_v29 }
 0xf7a   :  { %v9720_v39 = vsel %vm9719_vm12, %v9718_v13, 0.0 }
 0xf7b   :  { %9721 = vadd.xlane.f32.xlu0 %v9720_v39  ;;  %v9794_v42 = vsel %vm9719_vm12, %v9793_v8, 0.0 }
 0xf7d   :  { %v19418_v56 = vpop.eup %19417 }
 0xf7e   :  { %v19420_v5 = vpop.eup %19419  ;;  %v9629_v2 = vadd.f32 1.0, %v19418_v56  ;;  %v22531_v56 = vld [vmem:[#allocation18 + $0x58] sm:$0xff] }
 0xf7f   :  { %9795 = vadd.xlane.f32.xlu0 %v9794_v42 }
 0xf80   :  { %19425 = vrcp.f32 %v9629_v2  ;;  %v22559_v2 = vld [vmem:[#allocation18 + $0x60] sm:$0xff] }
 0xf84   :  { %v19422_v6 = vpop.eup %19421 }
 0xf85   :  { %v19424_v35 = vpop.eup %19423  ;;  %v9633_v7 = vmul.f32 %v19422_v6, %v19420_v5  ;;  %v22533_v5 = vld [vmem:[#allocation18 + $0x78] sm:$0xff]  ;;  %v22547_v6 = vld [vmem:[#allocation18 + $0x48] sm:$0xff] }
 0xf86   :  { %v9632_v54 = vmul.f32 %v19424_v35, %v22413_v0  ;;  %v22502_v0 = vld [vmem:[#allocation18 + $0x30] sm:$0xff]  ;;  %v22549_v35 = vld [vmem:[#allocation18 + $0x68] sm:$0xff] }
 0xf88   :  { %v9634_v43 = vadd.f32 %v9633_v7, %v9632_v54  ;;  %v22555_v7 = vld [vmem:[#allocation18 + $0x40] sm:$0xff] }
 0xf8a   :  { %19427 = vtanh.f32 %v9634_v43 }
 0xf8d   :  { %v19426_v40 = vpop.eup %19425 }
 0xf97   :  { %v19428_v53 = vpop.eup %19427 }
 0xf98   :  { %v22486_v15 = vmul.f32 %v19428_v53, %v19426_v40  ;;  %v22706_v53 = vld [vmem:[#allocation19 + $0x38] sm:$0xff] }
 0xf9a   :  { %17910 = vmatmul.mubr.msk.f32.vlgmr.msra.gmra.mxu0 %vm431_vm7, %v22486_v15 }
 0xf9b   :  { %17931 = vmatprep.mubr.msk.f32.mxu0 %vm19992_vm8, %v24255_v37  ;;  %17924 = vmatpush3.msra.mxu0 %v22496_v55 }
 0xf9c   :  { %17925 = vmatprep.subr.mxu0 %v24255_v37 }
 0xf9d   :  { %17926 = vmatpush3.msra.mxu0 %v22502_v0 }
 0xf9e   :  { %17927 = vmatprep.subr.mxu0 %v24255_v37 }
 0xf9f   :  { %17928 = vmatpush3.msra.mxu0 %v22508_v28 }
 0xfa0   :  { %17929 = vmatprep.subr.mxu0 %v24255_v37 }
 0xfa1   :  { %17930 = vmatpush3.msra.mxu0 %v22516_v34 }
 0xfa2   :  { %17945 = vmatprep.subr.mxu0 %v24255_v37 }
0x1004   :  { %v9722_v31 = vpop.xlane.xlu0 %9721 }
0x1008   :  { %v9796_v14 = vpop.xlane.xlu0 %9795 }
0x1009   :  { %v9874_v44 = vmax.f32 %v9722_v31, %v9796_v14 }
0x105a   :  { %v9866_v11 = vpop.f32.mrf.mxu0 }
0x105b   :  { %v9867_v23 = vadd.f32 %v15383_v4, %v9866_v11  ;;  %v22714_v11 = vld [vmem:[#allocation19 + $0x30] sm:$0xff] }
0x105c   :  { %v17911_v27 = vpop.f32.mrf.mxu0 }
0x105d   :  { %v9870_v62 = vmul.f32 %v9867_v23, %v22201_v29  ;;  %v22506_v29 = vld [vmem:[#allocation18 + $0x8] sm:$0xff]  ;;  %v22716_v23 = vld [vmem:[#allocation19 + $0x70] sm:$0xff] }
0x105e   :  { %17917 = vmatpush3.msra.mxu1 %v22506_v29  ;;  %v22722_v27 = vld [vmem:[#allocation19 + $0x28] sm:$0xff] }
0x105f   :  { %v9871_v10 = vsel %vm9719_vm12, %v9870_v62, 0.0  ;;  %17918 = vmatprep.subr.mxu1 %v24255_v37  ;;  %v22724_v62 = vld [vmem:[#allocation19 + $0x68] sm:$0xff]  ;;  %vm15117_vm12 = vcmask 3072  }
0x1060   :  { %9872 = vadd.xlane.f32.xlu1 %v9871_v10  ;;  %17919 = vmatpush3.msra.mxu1 %v22514_v1  ;;  %v22730_v10 = vld [vmem:[#allocation19 + $0x20] sm:$0xff] }
0x1061   :  { %17934 = vmatprep.subr.mxu1 %v24255_v37 }
0x10e9   :  { %v9873_v26 = vpop.xlane.xlu1 %9872 }
0x10ea   :  { %v9875_v63 = vmax.f32 %v9874_v44, %v9873_v26  ;;  %v22778_v44 = vld [vmem:[#allocation19 + $0xf8] sm:$0xff] }
0x10ec   :  { %v9876_v57 = vsub.f32 %v9722_v31, %v9875_v63  ;;  %v9879_v20 = vsub.f32 %v9796_v14, %v9875_v63  ;;  %v9882_v46 = vsub.f32 %v9873_v26, %v9875_v63  ;;  %v22766_v31 = vld [vmem:[#allocation19 + $0x40] sm:$0xff]  ;;  %v22776_v14 = vld [vmem:[#allocation19 + $0xb8] sm:$0xff]  ;;  %v22784_v26 = vld [vmem:[#allocation19 + $0xb0] sm:$0xff] }
0x10ed   :  { %v22786_v63 = vld [vmem:[#allocation19 + $0xf0] sm:$0xff] }
0x10ee   :  { %v9877_v61 = vmul.f32 1.442695, %v9876_v57  ;;  %v9880_v33 = vmul.f32 1.442695, %v9879_v20  ;;  %v9883_v3 = vmul.f32 1.442695, %v9882_v46 }
0x10ef   :  { %v22792_v57 = vld [vmem:[#allocation19 + $0xa8] sm:$0xff]  ;;  %v22800_v46 = vld [vmem:[#allocation19 + $0xa0] sm:$0xff] }
0x10f0   :  { %19429 = vpow2.f32 %v9877_v61  ;;  %v22794_v20 = vld [vmem:[#allocation19 + $0xe8] sm:$0xff]  ;;  %v22802_v61 = vld [vmem:[#allocation19 + $0xe0] sm:$0xff] }
0x10f1   :  { %19431 = vpow2.f32 %v9880_v33  ;;  %v22808_v33 = vld [vmem:[#allocation19 + $0x98] sm:$0xff] }
0x10f2   :  { %19433 = vpow2.f32 %v9883_v3  ;;  %v22810_v3 = vld [vmem:[#allocation19 + $0xd8] sm:$0xff] }
0x10fd   :  { %v19430_v48 = vpop.eup %19429 }
0x10fe   :  { %v19432_v18 = vpop.eup %19431 }
0x10ff   :  { %v9885_v21 = vadd.f32 %v19432_v18, %v19430_v48  ;;  %v19434_v9 = vpop.eup %19433 }
0x1101   :  { %v9886_v51 = vadd.f32 %v19434_v9, %v9885_v21  ;;  %v22824_v21 = vld [vmem:[#allocation19 + $0x88] sm:$0xff] }
0x1103   :  { %19435 = vrcp.f32 %v9886_v51  ;;  %v22832_v51 = vld [vmem:[#allocation19 + $0x80] sm:$0xff] }
0x1110   :  { %v19436_v36 = vpop.eup %19435 }
0x1111   :  { %v9888_v24 = vmul.f32 %v19436_v36, %v19430_v48  ;;  %v9889_v58 = vmul.f32 %v19436_v36, %v19432_v18  ;;  %v9890_v38 = vmul.f32 %v19436_v36, %v19434_v9  ;;  %v22816_v48 = vld [vmem:[#allocation19 + $0x90] sm:$0xff]  ;;  %v22826_v9 = vld [vmem:[#allocation19 + $0xc8] sm:$0xff]  ;;  %v22836_v36 = vld [vmem:[#allocation19 + $0xc0] sm:$0xff] }
0x1112   :  { %v22818_v18 = vld [vmem:[#allocation19 + $0xd0] sm:$0xff] }
0x1113   :  { %vm9891_vm13 = vcmp.gt.f32.partialorder %v9889_v58, %v9888_v24  ;;  %vm9894_vm14 = vcmp.gt.f32.partialorder %v9890_v38, %v9888_v24  ;;  %vm9901_vm15 = vcmp.ge.f32.partialorder %v9888_v24, %v9889_v58  ;;  %vm9904_vm0 = vcmp.gt.f32.partialorder %v9890_v38, %v9889_v58 }
0x1114   :  { %v9892_v25 = vsel %vm9891_vm13, %v9889_v58, 0.0  ;;  %v9895_v12 = vsel %vm9894_vm14, %v9890_v38, 0.0  ;;  %v9902_v4 = vsel %vm9901_vm15, %v9888_v24, 0.0  ;;  %v9905_v60 = vsel %vm9904_vm0, %v9890_v38, 0.0 }
0x1115   :  { %v9896_v16 = vadd.f32 %v9895_v12, %v9892_v25  ;;  %v9906_v17 = vadd.f32 %v9905_v60, %v9902_v4  ;;  %vm9911_vm1 = vcmp.ge.f32.partialorder %v9888_v24, %v9890_v38  ;;  %vm9914_vm2 = vcmp.ge.f32.partialorder %v9889_v58, %v9890_v38 }
0x1116   :  { %v9912_v50 = vsel %vm9911_vm1, %v9888_v24, 0.0  ;;  %v9915_v49 = vsel %vm9914_vm2, %v9889_v58, 0.0 }
0x1117   :  { %vm9897_vm3 = vcmp.le.f32.partialorder %v9896_v16, 0.8  ;;  %vm9907_vm4 = vcmp.le.f32.partialorder %v9906_v17, 0.8  ;;  %v9916_v59 = vadd.f32 %v9915_v49, %v9912_v50  ;;  %v9975_v17 = vld [vmem:[#allocation21] sm:$0x1] }
0x1118   :  { %v9898_v32 = vsel %vm9897_vm3, %v9888_v24, 0.0  ;;  %v9908_v52 = vsel %vm9907_vm4, %v9889_v58, 0.0  ;;  %v9977_v50 = vld [vmem:[#allocation21 + $0x1] sm:$0x1] }
0x1119   :  { %v9899_v22 = vmul.f32 %v9898_v32, %v22354_v30  ;;  %v9909_v45 = vmul.f32 %v9908_v52, %v22416_v47  ;;  %vm9917_vm5 = vcmp.le.f32.partialorder %v9916_v59, 0.8  ;;  %v22539_v30 = vld [vmem:[#allocation18 + $0x50] sm:$0xff] }
0x111a   :  { %v9918_v13 = vsel %vm9917_vm5, %v9890_v38, 0.0  ;;  %v22541_v47 = vld [vmem:[#allocation18 + $0x70] sm:$0xff] }
0x111b   :  { %v9910_v39 = vadd.f32 %v9909_v45, %v9899_v22  ;;  %v9919_v8 = vmul.f32 %v9918_v13, %v22486_v15  ;;  %v22708_v15 = vld [vmem:[#allocation19 + $0x78] sm:$0xff]  ;;  %v9979_v13 = vld [vmem:[#allocation21 + $0x2] sm:$0x1] }
0x111d   :  { %v22529_v42 = vadd.f32 %v9919_v8, %v9910_v39  ;;  %v9981_v39 = vld [vmem:[#allocation21 + $0x3] sm:$0x1] }
0x111f   :  { %17921 = vmatmul.mubr.msk.f32.vlgmr.msra.gmra.mxu1 %vm431_vm7, %v22529_v42  ;;  %17932 = vmatmul.mubr.msk.f32.vlgmr.msra.gmra.mxu0 %vm431_vm7, %v22529_v42  ;;  %v10265_v54 = vrot.slane %v22529_v42, 1  ;;  %v10548_v43 = vrot.slane %v22529_v42, 2  ;;  %v10831_v40 = vrot.slane %v22529_v42, 3 }
0x1120   :  { %17935 = vmatpush3.msra.mxu1 %v22531_v56  ;;  %17946 = vmatpush3.msra.mxu0 %v22533_v5 }
0x1121   :  { %17936 = vmatprep.subr.mxu1 %v24255_v37  ;;  %17947 = vmatprep.subr.mxu0 %v24255_v37 }
0x1122   :  { %17937 = vmatpush3.msra.mxu1 %v22539_v30  ;;  %17948 = vmatpush3.msra.mxu0 %v22541_v47 }
0x1123   :  { %17938 = vmatprep.subr.mxu1 %v24255_v37  ;;  %17949 = vmatprep.subr.mxu0 %v24255_v37 }
0x1124   :  { %17939 = vmatpush3.msra.mxu1 %v22547_v6  ;;  %17950 = vmatpush3.msra.mxu0 %v22549_v35 }
0x1125   :  { %17940 = vmatprep.subr.mxu1 %v24255_v37  ;;  %17951 = vmatprep.subr.mxu0 %v24255_v37 }
0x1126   :  { %17941 = vmatpush3.msra.mxu1 %v22555_v7  ;;  %17942 = vmatprep.mubr.msk.f32.mxu1 %vm19992_vm8, %v24255_v37 }
0x1127   :  { %17952 = vmatpush3.msra.mxu0 %v22559_v2  ;;  %17953 = vmatprep.mubr.msk.f32.mxu0 %vm19992_vm8, %v24255_v37 }
0x1128   :  { %17943 = vmatmul.mubr.msk.f32.vlgmr.msra.gmra.mxu1 %vm431_vm7, %v22529_v42  ;;  %17954 = vmatmul.mubr.msk.f32.vlgmr.msra.gmra.mxu0 %vm431_vm7, %v22529_v42 }
0x1129   :  { %17956 = vmatprep.subr.mxu1 %v24255_v37  ;;  %17967 = vmatprep.subr.mxu0 %v24255_v37 }
0x112a   :  { %17957 = vmatpush3.msra.mxu1 %v22494_v41  ;;  %17968 = vmatpush3.msra.mxu0 %v22496_v55 }
0x112b   :  { %17958 = vmatprep.subr.mxu1 %v24255_v37  ;;  %17969 = vmatprep.subr.mxu0 %v24255_v37 }
0x112c   :  { %17959 = vmatpush3.msra.mxu1 %v22498_v19  ;;  %17970 = vmatpush3.msra.mxu0 %v22502_v0 }
0x112d   :  { %17960 = vmatprep.subr.mxu1 %v24255_v37  ;;  %17971 = vmatprep.subr.mxu0 %v24255_v37 }
0x112e   :  { %17961 = vmatpush3.msra.mxu1 %v22506_v29  ;;  %17972 = vmatpush3.msra.mxu0 %v22508_v28 }
0x112f   :  { %17962 = vmatprep.subr.mxu1 %v24255_v37  ;;  %17973 = vmatprep.subr.mxu0 %v24255_v37 }
0x1130   :  { %17963 = vmatpush3.msra.mxu1 %v22514_v1  ;;  %17964 = vmatprep.mubr.msk.f32.mxu1 %vm19992_vm8, %v24255_v37 }
0x1131   :  { %17974 = vmatpush3.msra.mxu0 %v22516_v34  ;;  %17975 = vmatprep.mubr.msk.f32.mxu0 %vm19992_vm8, %v24255_v37 }
0x1132   :  { %17965 = vmatmul.mubr.msk.f32.vlgmr.msra.gmra.mxu1 %vm431_vm7, %v10265_v54  ;;  %17976 = vmatmul.mubr.msk.f32.vlgmr.msra.gmra.mxu0 %vm431_vm7, %v10265_v54 }
0x1133   :  { %17978 = vmatprep.subr.mxu1 %v24255_v37  ;;  %17989 = vmatprep.subr.mxu0 %v24255_v37 }
0x1134   :  { %17979 = vmatpush3.msra.mxu1 %v22531_v56  ;;  %17990 = vmatpush3.msra.mxu0 %v22533_v5 }
0x1135   :  { %17980 = vmatprep.subr.mxu1 %v24255_v37  ;;  %17991 = vmatprep.subr.mxu0 %v24255_v37 }
0x1136   :  { %17981 = vmatpush3.msra.mxu1 %v22539_v30  ;;  %17992 = vmatpush3.msra.mxu0 %v22541_v47 }
0x1137   :  { %17982 = vmatprep.subr.mxu1 %v24255_v37  ;;  %17993 = vmatprep.subr.mxu0 %v24255_v37 }
0x1138   :  { %17983 = vmatpush3.msra.mxu1 %v22547_v6  ;;  %17994 = vmatpush3.msra.mxu0 %v22549_v35 }
0x1139   :  { %17984 = vmatprep.subr.mxu1 %v24255_v37  ;;  %17995 = vmatprep.subr.mxu0 %v24255_v37 }
0x113a   :  { %17985 = vmatpush3.msra.mxu1 %v22555_v7  ;;  %17986 = vmatprep.mubr.msk.f32.mxu1 %vm19992_vm8, %v24255_v37 }
0x113b   :  { %17996 = vmatpush3.msra.mxu0 %v22559_v2  ;;  %17997 = vmatprep.mubr.msk.f32.mxu0 %vm19992_vm8, %v24255_v37 }
0x113c   :  { %17987 = vmatmul.mubr.msk.f32.vlgmr.msra.gmra.mxu1 %vm431_vm7, %v10265_v54  ;;  %17998 = vmatmul.mubr.msk.f32.vlgmr.msra.gmra.mxu0 %vm431_vm7, %v10265_v54 }
0x113d   :  { %18000 = vmatprep.subr.mxu1 %v24255_v37  ;;  %18011 = vmatprep.subr.mxu0 %v24255_v37 }
0x113e   :  { %18001 = vmatpush3.msra.mxu1 %v22494_v41  ;;  %18012 = vmatpush3.msra.mxu0 %v22496_v55 }
0x113f   :  { %18002 = vmatprep.subr.mxu1 %v24255_v37  ;;  %18013 = vmatprep.subr.mxu0 %v24255_v37 }
0x1140   :  { %18003 = vmatpush3.msra.mxu1 %v22498_v19  ;;  %18014 = vmatpush3.msra.mxu0 %v22502_v0 }
0x1141   :  { %18004 = vmatprep.subr.mxu1 %v24255_v37  ;;  %18015 = vmatprep.subr.mxu0 %v24255_v37 }
0x1142   :  { %18005 = vmatpush3.msra.mxu1 %v22506_v29  ;;  %18016 = vmatpush3.msra.mxu0 %v22508_v28 }
0x1143   :  { %18006 = vmatprep.subr.mxu1 %v24255_v37  ;;  %18017 = vmatprep.subr.mxu0 %v24255_v37 }
0x1144   :  { %18007 = vmatpush3.msra.mxu1 %v22514_v1  ;;  %18008 = vmatprep.mubr.msk.f32.mxu1 %vm19992_vm8, %v24255_v37 }
0x1145   :  { %18018 = vmatpush3.msra.mxu0 %v22516_v34  ;;  %18019 = vmatprep.mubr.msk.f32.mxu0 %vm19992_vm8, %v24255_v37 }
0x1146   :  { %18009 = vmatmul.mubr.msk.f32.vlgmr.msra.gmra.mxu1 %vm431_vm7, %v10548_v43  ;;  %18020 = vmatmul.mubr.msk.f32.vlgmr.msra.gmra.mxu0 %vm431_vm7, %v10548_v43 }
0x1147   :  { %18022 = vmatprep.subr.mxu1 %v24255_v37  ;;  %18033 = vmatprep.subr.mxu0 %v24255_v37 }
0x1148   :  { %18023 = vmatpush3.msra.mxu1 %v22531_v56  ;;  %18034 = vmatpush3.msra.mxu0 %v22533_v5 }
0x1149   :  { %18024 = vmatprep.subr.mxu1 %v24255_v37  ;;  %18035 = vmatprep.subr.mxu0 %v24255_v37 }
0x114a   :  { %18025 = vmatpush3.msra.mxu1 %v22539_v30  ;;  %18036 = vmatpush3.msra.mxu0 %v22541_v47 }
0x114b   :  { %18026 = vmatprep.subr.mxu1 %v24255_v37  ;;  %18037 = vmatprep.subr.mxu0 %v24255_v37 }
0x114c   :  { %18027 = vmatpush3.msra.mxu1 %v22547_v6  ;;  %18038 = vmatpush3.msra.mxu0 %v22549_v35 }
0x114d   :  { %18028 = vmatprep.subr.mxu1 %v24255_v37  ;;  %18039 = vmatprep.subr.mxu0 %v24255_v37 }
0x114e   :  { %18029 = vmatpush3.msra.mxu1 %v22555_v7  ;;  %18030 = vmatprep.mubr.msk.f32.mxu1 %vm19992_vm8, %v24255_v37 }
0x114f   :  { %18040 = vmatpush3.msra.mxu0 %v22559_v2  ;;  %18041 = vmatprep.mubr.msk.f32.mxu0 %vm19992_vm8, %v24255_v37 }
0x1150   :  { %18031 = vmatmul.mubr.msk.f32.vlgmr.msra.gmra.mxu1 %vm431_vm7, %v10548_v43  ;;  %18042 = vmatmul.mubr.msk.f32.vlgmr.msra.gmra.mxu0 %vm431_vm7, %v10548_v43 }
0x1151   :  { %18044 = vmatprep.subr.mxu1 %v24255_v37  ;;  %18055 = vmatprep.subr.mxu0 %v24255_v37 }
0x1152   :  { %18045 = vmatpush3.msra.mxu1 %v22494_v41  ;;  %18056 = vmatpush3.msra.mxu0 %v22496_v55  ;;  %v22732_v41 = vld [vmem:[#allocation19 + $0x60] sm:$0xff]  ;;  %v22738_v55 = vld [vmem:[#allocation19 + $0x18] sm:$0xff] }
0x1153   :  { %18046 = vmatprep.subr.mxu1 %v24255_v37  ;;  %18057 = vmatprep.subr.mxu0 %v24255_v37 }
0x1154   :  { %18047 = vmatpush3.msra.mxu1 %v22498_v19  ;;  %18058 = vmatpush3.msra.mxu0 %v22502_v0  ;;  %v22740_v19 = vld [vmem:[#allocation19 + $0x58] sm:$0xff]  ;;  %v22746_v0 = vld [vmem:[#allocation19 + $0x10] sm:$0xff] }
0x1155   :  { %18048 = vmatprep.subr.mxu1 %v24255_v37  ;;  %18059 = vmatprep.subr.mxu0 %v24255_v37 }
0x1156   :  { %18049 = vmatpush3.msra.mxu1 %v22506_v29  ;;  %18060 = vmatpush3.msra.mxu0 %v22508_v28  ;;  %v22748_v29 = vld [vmem:[#allocation19 + $0x50] sm:$0xff]  ;;  %v22754_v28 = vld [vmem:[#allocation19 + $0x8] sm:$0xff] }
0x1157   :  { %18050 = vmatprep.subr.mxu1 %v24255_v37  ;;  %18061 = vmatprep.subr.mxu0 %v24255_v37 }
0x1158   :  { %18051 = vmatpush3.msra.mxu1 %v22514_v1  ;;  %18052 = vmatprep.mubr.msk.f32.mxu1 %vm19992_vm8, %v24255_v37  ;;  %v22756_v1 = vld [vmem:[#allocation19 + $0x48] sm:$0xff] }
0x1159   :  { %18062 = vmatpush3.msra.mxu0 %v22516_v34  ;;  %18063 = vmatprep.mubr.msk.f32.mxu0 %vm19992_vm8, %v24255_v37  ;;  %v22762_v34 = vld [vmem:[#allocation19] sm:$0xff] }
0x115a   :  { %18053 = vmatmul.mubr.msk.f32.vlgmr.msra.gmra.mxu1 %vm431_vm7, %v10831_v40  ;;  %18064 = vmatmul.mubr.msk.f32.vlgmr.msra.gmra.mxu0 %vm431_vm7, %v10831_v40 }
0x115b   :  { %18066 = vmatprep.subr.mxu1 %v24255_v37  ;;  %18077 = vmatprep.subr.mxu0 %v24255_v37 }
0x115c   :  { %18067 = vmatpush3.msra.mxu1 %v22531_v56  ;;  %18078 = vmatpush3.msra.mxu0 %v22533_v5 }
0x115d   :  { %18068 = vmatprep.subr.mxu1 %v24255_v37  ;;  %18079 = vmatprep.subr.mxu0 %v24255_v37 }
0x115e   :  { %18069 = vmatpush3.msra.mxu1 %v22539_v30  ;;  %18080 = vmatpush3.msra.mxu0 %v22541_v47 }
0x115f   :  { %18070 = vmatprep.subr.mxu1 %v24255_v37  ;;  %18081 = vmatprep.subr.mxu0 %v24255_v37 }
0x1160   :  { %18071 = vmatpush3.msra.mxu1 %v22547_v6  ;;  %18082 = vmatpush3.msra.mxu0 %v22549_v35 }
0x1161   :  { %18072 = vmatprep.subr.mxu1 %v24255_v37  ;;  %18083 = vmatprep.subr.mxu0 %v24255_v37 }
0x1162   :  { %18073 = vmatpush3.msra.mxu1 %v22555_v7  ;;  %18074 = vmatprep.mubr.msk.f32.mxu1 %vm19992_vm8, %v24255_v37 }
0x1163   :  { %18084 = vmatpush3.msra.mxu0 %v22559_v2  ;;  %18085 = vmatprep.mubr.msk.f32.mxu0 %vm19992_vm8, %v24255_v37 }
0x1164   :  { %18075 = vmatmul.mubr.msk.f32.vlgmr.msra.gmra.mxu1 %vm431_vm7, %v10831_v40  ;;  %18086 = vmatmul.mubr.msk.f32.vlgmr.msra.gmra.mxu0 %vm431_vm7, %v10831_v40  ;;  %vm14902_vm7 = vcmask 519168  }
0x1165   :  { %18088 = vmatprep.subr.mxu1 %v24255_v37  ;;  %18107 = vmatprep.subr.mxu0 %v24255_v37 }
0x1166   :  { %18089 = vmatpush3.msra.mxu1 %v22706_v53  ;;  %18108 = vmatpush3.msra.mxu0 %v22708_v15 }
0x1167   :  { %18090 = vmatprep.subr.mxu1 %v24255_v37  ;;  %18109 = vmatprep.subr.mxu0 %v24255_v37 }
0x1168   :  { %18091 = vmatpush3.msra.mxu1 %v22714_v11  ;;  %18110 = vmatpush3.msra.mxu0 %v22716_v23 }
0x1169   :  { %18092 = vmatprep.subr.mxu1 %v24255_v37  ;;  %18111 = vmatprep.subr.mxu0 %v24255_v37 }
0x116a   :  { %18093 = vmatpush3.msra.mxu1 %v22722_v27  ;;  %18112 = vmatpush3.msra.mxu0 %v22724_v62 }
0x116b   :  { %18094 = vmatprep.subr.mxu1 %v24255_v37  ;;  %18113 = vmatprep.subr.mxu0 %v24255_v37 }
0x116c   :  { %18095 = vmatpush3.msra.mxu1 %v22730_v10  ;;  %18114 = vmatpush3.msra.mxu0 %v22732_v41 }
0x116d   :  { %18096 = vmatprep.subr.mxu1 %v24255_v37  ;;  %18115 = vmatprep.subr.mxu0 %v24255_v37 }
0x116e   :  { %18097 = vmatpush3.msra.mxu1 %v22738_v55  ;;  %18116 = vmatpush3.msra.mxu0 %v22740_v19 }
0x116f   :  { %18098 = vmatprep.subr.mxu1 %v24255_v37  ;;  %18117 = vmatprep.subr.mxu0 %v24255_v37 }
0x1170   :  { %18099 = vmatpush3.msra.mxu1 %v22746_v0  ;;  %18118 = vmatpush3.msra.mxu0 %v22748_v29 }
0x1171   :  { %18100 = vmatprep.subr.mxu1 %v24255_v37  ;;  %18119 = vmatprep.subr.mxu0 %v24255_v37 }
0x1172   :  { %18101 = vmatpush3.msra.mxu1 %v22754_v28  ;;  %18120 = vmatpush3.msra.mxu0 %v22756_v1 }
0x1173   :  { %18102 = vmatprep.subr.mxu1 %v24255_v37  ;;  %18121 = vmatprep.subr.mxu0 %v24255_v37 }
0x1174   :  { %18103 = vmatpush3.msra.mxu1 %v22762_v34  ;;  %18104 = vmatprep.mubr.msk.f32.mxu1 %vm19992_vm8, %v24255_v37 }
0x1175   :  { %18122 = vmatpush3.msra.mxu0 %v22766_v31  ;;  %18123 = vmatprep.mubr.msk.f32.mxu0 %vm19992_vm8, %v24255_v37 }
0x1176   :  { %18105 = vmatmul.mubr.f32.vlgmr.msra.gmra.mxu1 %v24255_v37  ;;  %18124 = vmatmul.mubr.f32.vlgmr.msra.gmra.mxu0 %v24255_v37 }
0x1177   :  { %18126 = vmatprep.subr.mxu1 %v24255_v37  ;;  %18145 = vmatprep.subr.mxu0 %v24255_v37 }
0x1178   :  { %18127 = vmatpush3.msra.mxu1 %v22776_v14  ;;  %18146 = vmatpush3.msra.mxu0 %v22778_v44 }
0x1179   :  { %18128 = vmatprep.subr.mxu1 %v24255_v37  ;;  %18147 = vmatprep.subr.mxu0 %v24255_v37 }
0x117a   :  { %18129 = vmatpush3.msra.mxu1 %v22784_v26  ;;  %18148 = vmatpush3.msra.mxu0 %v22786_v63 }
0x117b   :  { %18130 = vmatprep.subr.mxu1 %v24255_v37  ;;  %18149 = vmatprep.subr.mxu0 %v24255_v37 }
0x117c   :  { %18131 = vmatpush3.msra.mxu1 %v22792_v57  ;;  %18150 = vmatpush3.msra.mxu0 %v22794_v20 }
0x117d   :  { %18132 = vmatprep.subr.mxu1 %v24255_v37  ;;  %18151 = vmatprep.subr.mxu0 %v24255_v37 }
0x117e   :  { %18133 = vmatpush3.msra.mxu1 %v22800_v46  ;;  %18152 = vmatpush3.msra.mxu0 %v22802_v61 }
0x117f   :  { %18134 = vmatprep.subr.mxu1 %v24255_v37  ;;  %18153 = vmatprep.subr.mxu0 %v24255_v37 }
0x1180   :  { %18135 = vmatpush3.msra.mxu1 %v22808_v33  ;;  %18154 = vmatpush3.msra.mxu0 %v22810_v3 }
0x1181   :  { %18136 = vmatprep.subr.mxu1 %v24255_v37  ;;  %18155 = vmatprep.subr.mxu0 %v24255_v37 }
0x1182   :  { %18137 = vmatpush3.msra.mxu1 %v22816_v48  ;;  %18156 = vmatpush3.msra.mxu0 %v22818_v18 }
0x1183   :  { %18138 = vmatprep.subr.mxu1 %v24255_v37  ;;  %18157 = vmatprep.subr.mxu0 %v24255_v37 }
0x1184   :  { %18139 = vmatpush3.msra.mxu1 %v22824_v21  ;;  %18158 = vmatpush3.msra.mxu0 %v22826_v9 }
0x1185   :  { %18140 = vmatprep.subr.mxu1 %v24255_v37  ;;  %18159 = vmatprep.subr.mxu0 %v24255_v37 }
0x1186   :  { %18141 = vmatpush3.msra.mxu1 %v22832_v51  ;;  %18142 = vmatprep.mubr.msk.f32.mxu1 %vm19992_vm8, %v24255_v37 }
0x1187   :  { %18160 = vmatpush3.msra.mxu0 %v22836_v36  ;;  %18161 = vmatprep.mubr.msk.f32.mxu0 %vm19992_vm8, %v24255_v37 }
0x1188   :  { %18143 = vmatmul.mubr.f32.vlgmr.msra.gmra.mxu1 %v24255_v37  ;;  %18162 = vmatmul.mubr.f32.vlgmr.msra.gmra.mxu0 %v24255_v37 }
0x1189   :  { %18164 = vmatprep.subr.mxu1 %v24255_v37  ;;  %18183 = vmatprep.subr.mxu0 %v24255_v37 }
0x118a   :  { %18165 = vmatpush3.msra.mxu1 %v22706_v53  ;;  %18184 = vmatpush3.msra.mxu0 %v22708_v15 }
0x118b   :  { %18166 = vmatprep.subr.mxu1 %v24255_v37  ;;  %18185 = vmatprep.subr.mxu0 %v24255_v37 }
0x118c   :  { %18167 = vmatpush3.msra.mxu1 %v22714_v11  ;;  %18186 = vmatpush3.msra.mxu0 %v22716_v23 }
0x118d   :  { %18168 = vmatprep.subr.mxu1 %v24255_v37  ;;  %18187 = vmatprep.subr.mxu0 %v24255_v37 }
0x118e   :  { %18169 = vmatpush3.msra.mxu1 %v22722_v27  ;;  %18188 = vmatpush3.msra.mxu0 %v22724_v62 }
0x118f   :  { %18170 = vmatprep.subr.mxu1 %v24255_v37  ;;  %18189 = vmatprep.subr.mxu0 %v24255_v37 }
0x1190   :  { %18171 = vmatpush3.msra.mxu1 %v22730_v10  ;;  %18190 = vmatpush3.msra.mxu0 %v22732_v41 }
0x1191   :  { %18172 = vmatprep.subr.mxu1 %v24255_v37  ;;  %18191 = vmatprep.subr.mxu0 %v24255_v37 }
0x1192   :  { %18173 = vmatpush3.msra.mxu1 %v22738_v55  ;;  %18192 = vmatpush3.msra.mxu0 %v22740_v19 }
0x1193   :  { %18174 = vmatprep.subr.mxu1 %v24255_v37  ;;  %18193 = vmatprep.subr.mxu0 %v24255_v37 }
0x1194   :  { %18175 = vmatpush3.msra.mxu1 %v22746_v0  ;;  %18194 = vmatpush3.msra.mxu0 %v22748_v29 }
0x1195   :  { %18176 = vmatprep.subr.mxu1 %v24255_v37  ;;  %18195 = vmatprep.subr.mxu0 %v24255_v37 }
0x1196   :  { %18177 = vmatpush3.msra.mxu1 %v22754_v28  ;;  %18196 = vmatpush3.msra.mxu0 %v22756_v1 }
0x1197   :  { %18178 = vmatprep.subr.mxu1 %v24255_v37  ;;  %18197 = vmatprep.subr.mxu0 %v24255_v37 }
0x1198   :  { %18179 = vmatpush3.msra.mxu1 %v22762_v34  ;;  %18198 = vmatpush3.msra.mxu0 %v22766_v31 }
0x1199   :  { %18180 = vmatprep.mubr.msk.f32.mxu1 %vm19992_vm8, %v24255_v37  ;;  %18199 = vmatprep.mubr.msk.f32.mxu0 %vm19992_vm8, %v24255_v37 }
0x119a   :  { %18202 = vmatprep.subr.mxu1 %v24255_v37  ;;  %18221 = vmatprep.subr.mxu0 %v24255_v37 }
0x11df   :  { %v10051_v24 = vpop.f32.mrf.mxu1  ;;  %v10121_v58 = vpop.f32.mrf.mxu0 }
0x11e1   :  { %v17922_v38 = vpop.f32.mrf.mxu1  ;;  %v17933_v25 = vpop.f32.mrf.mxu0 }
0x11e8   :  { %v10191_v12 = vpop.f32.mrf.mxu1  ;;  %v10261_v4 = vpop.f32.mrf.mxu0 }
0x11ea   :  { %v17944_v60 = vpop.f32.mrf.mxu1  ;;  %v17955_v16 = vpop.f32.mrf.mxu0 }
0x11f2   :  { %v10334_v49 = vpop.f32.mrf.mxu1  ;;  %v10404_v59 = vpop.f32.mrf.mxu0 }
0x11f3   :  { %v22886_v32 = vadd.f32 %v10334_v49, %v9975_v17  ;;  %v22888_v52 = vadd.f32 %v10404_v59, %v9977_v50 }
0x11f4   :  { %v17966_v22 = vpop.f32.mrf.mxu1  ;;  %v17977_v45 = vpop.f32.mrf.mxu0 }
0x11fc   :  { %v10474_v8 = vpop.f32.mrf.mxu1  ;;  %v10544_v42 = vpop.f32.mrf.mxu0 }
0x11fd   :  { %v22890_v56 = vadd.f32 %v10474_v8, %v9979_v13  ;;  %v22892_v5 = vadd.f32 %v10544_v42, %v9981_v39 }
0x11fe   :  { %v17988_v30 = vpop.f32.mrf.mxu1  ;;  %v17999_v47 = vpop.f32.mrf.mxu0 }
0x1206   :  { %v10617_v6 = vpop.f32.mrf.mxu1  ;;  %v10687_v35 = vpop.f32.mrf.mxu0 }
0x1207   :  { %v22894_v7 = vadd.f32 %v10617_v6, %v9975_v17  ;;  %v22896_v2 = vadd.f32 %v10687_v35, %v9977_v50 }
0x1208   :  { %v18010_v54 = vpop.f32.mrf.mxu1  ;;  %v18021_v43 = vpop.f32.mrf.mxu0 }
0x1209   :  { %24264 = vst [vmem:[#allocation40_spill] sm:$0xff] %v22896_v2 }
0x1210   :  { %v10757_v40 = vpop.f32.mrf.mxu1  ;;  %v10827_v38 = vpop.f32.mrf.mxu0 }
0x1211   :  { %v22898_v25 = vadd.f32 %v10757_v40, %v9979_v13  ;;  %v22900_v60 = vadd.f32 %v10827_v38, %v9981_v39  ;;  %v10052_v38 = vadd.f32 %v10051_v24, %v9975_v17 }
0x1212   :  { %v18032_v16 = vpop.f32.mrf.mxu1  ;;  %v18043_v49 = vpop.f32.mrf.mxu0 }
0x1213   :  { %24265 = vst [vmem:[#allocation41_spill] sm:$0xff] %v22898_v25  ;;  %24266 = vst [vmem:[#allocation42_spill] sm:$0xff] %v22900_v60  ;;  %v10122_v60 = vadd.f32 %v10121_v58, %v9977_v50 }
0x121a   :  { %v10900_v59 = vpop.f32.mrf.mxu1  ;;  %v10970_v22 = vpop.f32.mrf.mxu0 }
0x121b   :  { %v22902_v45 = vadd.f32 %v10900_v59, %v9975_v17  ;;  %v22904_v8 = vadd.f32 %v10970_v22, %v9977_v50 }
0x121c   :  { %v18054_v42 = vpop.f32.mrf.mxu1  ;;  %v18065_v30 = vpop.f32.mrf.mxu0 }
0x121d   :  { %24267 = vst [vmem:[#allocation43_spill] sm:$0xff] %v22902_v45  ;;  %24268 = vst [vmem:[#allocation44_spill] sm:$0xff] %v22904_v8  ;;  %v10192_v42 = vadd.f32 %v10191_v12, %v9979_v13  ;;  %v10262_v30 = vadd.f32 %v10261_v4, %v9981_v39 }
0x1224   :  { %v11040_v47 = vpop.f32.mrf.mxu1  ;;  %v11110_v6 = vpop.f32.mrf.mxu0 }
0x1225   :  { %v22906_v35 = vadd.f32 %v11040_v47, %v9979_v13  ;;  %v22908_v54 = vadd.f32 %v11110_v6, %v9981_v39 }
0x1226   :  { %v18076_v43 = vpop.f32.mrf.mxu1  ;;  %v18087_v40 = vpop.f32.mrf.mxu0 }
0x1227   :  { %24269 = vst [vmem:[#allocation45_spill] sm:$0xff] %v22906_v35  ;;  %24270 = vst [vmem:[#allocation47_spill] sm:$0xff] %v22908_v54 }
0x1236   :  { %v11183_v16 = vpop.f32.mrf.mxu1  ;;  %v11260_v49 = vpop.f32.mrf.mxu0 }
0x1237   :  { %v11187_v25 = vadd.f32 %v11183_v16, %v10052_v38  ;;  %v11264_v2 = vadd.f32 %v11260_v49, %v10122_v60 }
0x1238   :  { %v18106_v59 = vpop.f32.mrf.mxu1  ;;  %v18125_v45 = vpop.f32.mrf.mxu0 }
0x1239   :  { %v15403_v22 = vmul.f32 -1.442695, %v11187_v25  ;;  %v15404_v8 = vmul.f32 -1.442695, %v11264_v2 }
0x123b   :  { %19437 = vpow2.f32 %v15403_v22 }
0x123c   :  { %19439 = vpow2.f32 %v15404_v8 }
0x1248   :  { %v19438_v47 = vpop.eup %19437  ;;  %v11337_v35 = vpop.f32.mrf.mxu1 }
0x1249   :  { %v11409_v6 = vpop.f32.mrf.mxu0  ;;  %v19440_v54 = vpop.eup %19439  ;;  %v11191_v43 = vadd.f32 1.0, %v19438_v47  ;;  %v11341_v40 = vadd.f32 %v11337_v35, %v10192_v42 }
0x124a   :  { %v11413_v24 = vadd.f32 %v11409_v6, %v10262_v30  ;;  %v11268_v58 = vadd.f32 1.0, %v19440_v54  ;;  %v18144_v17 = vpop.f32.mrf.mxu1 }
0x124b   :  { %v18163_v50 = vpop.f32.mrf.mxu0  ;;  %19441 = vrcp.f32 %v11191_v43 }
0x124c   :  { %v15405_v60 = vmul.f32 -1.442695, %v11413_v24  ;;  %19443 = vrcp.f32 %v11268_v58 }
0x124d   :  { %19445 = vtanh.f32 %v11341_v40 }
0x124e   :  { %19447 = vpow2.f32 %v15405_v60 }
0x1258   :  { %v19442_v2 = vpop.eup %19441 }
0x1259   :  { %v19444_v25 = vpop.eup %19443 }
0x125a   :  { %v19446_v45 = vpop.eup %19445  ;;  %v11420_v12 = vmul.f32 0.0, %v19444_v25 }
0x125b   :  { %v19448_v4 = vpop.eup %19447  ;;  %v11421_v13 = vmul.f32 %v19446_v45, %v19442_v2 }
0x125c   :  { %v11417_v39 = vadd.f32 1.0, %v19448_v4 }
0x125d   :  { %v22910_v8 = vadd.f32 %v11421_v13, %v11420_v12 }
0x125e   :  { %19449 = vrcp.f32 %v11417_v39 }
0x125f   :  { %19451 = vtanh.f32 %v22910_v8 }
0x126b   :  { %v19450_v35 = vpop.eup %19449 }
0x126c   :  { %v19452_v54 = vpop.eup %19451 }
0x126d   :  { %v22913_v38 = vmul.f32 %v19452_v54, %v19450_v35 }
0x126f   :  { %18181 = vmatmul.mubr.msk.f32.vlgmr.msra.gmra.mxu1 %vm11114_vm6, %v22913_v38  ;;  %18200 = vmatmul.mubr.msk.f32.vlgmr.msra.gmra.mxu0 %vm11114_vm6, %v22913_v38 }
0x1270   :  { %18203 = vmatpush3.msra.mxu1 %v22776_v14  ;;  %18222 = vmatpush3.msra.mxu0 %v22778_v44 }
0x1271   :  { %18204 = vmatprep.subr.mxu1 %v24255_v37  ;;  %18223 = vmatprep.subr.mxu0 %v24255_v37 }
0x1272   :  { %18205 = vmatpush3.msra.mxu1 %v22784_v26  ;;  %18224 = vmatpush3.msra.mxu0 %v22786_v63 }
0x1273   :  { %18206 = vmatprep.subr.mxu1 %v24255_v37  ;;  %18225 = vmatprep.subr.mxu0 %v24255_v37 }
0x1274   :  { %18207 = vmatpush3.msra.mxu1 %v22792_v57  ;;  %18226 = vmatpush3.msra.mxu0 %v22794_v20 }
0x1275   :  { %18208 = vmatprep.subr.mxu1 %v24255_v37  ;;  %18227 = vmatprep.subr.mxu0 %v24255_v37 }
0x1276   :  { %18209 = vmatpush3.msra.mxu1 %v22800_v46  ;;  %18228 = vmatpush3.msra.mxu0 %v22802_v61 }
0x1277   :  { %18210 = vmatprep.subr.mxu1 %v24255_v37  ;;  %18229 = vmatprep.subr.mxu0 %v24255_v37 }
0x1278   :  { %18211 = vmatpush3.msra.mxu1 %v22808_v33  ;;  %18230 = vmatpush3.msra.mxu0 %v22810_v3 }
0x1279   :  { %18212 = vmatprep.subr.mxu1 %v24255_v37  ;;  %18231 = vmatprep.subr.mxu0 %v24255_v37 }
0x127a   :  { %18213 = vmatpush3.msra.mxu1 %v22816_v48  ;;  %18232 = vmatpush3.msra.mxu0 %v22818_v18 }
0x127b   :  { %18214 = vmatprep.subr.mxu1 %v24255_v37  ;;  %18233 = vmatprep.subr.mxu0 %v24255_v37 }
0x127c   :  { %18215 = vmatpush3.msra.mxu1 %v22824_v21  ;;  %18234 = vmatpush3.msra.mxu0 %v22826_v9 }
0x127d   :  { %18216 = vmatprep.subr.mxu1 %v24255_v37  ;;  %18235 = vmatprep.subr.mxu0 %v24255_v37 }
0x127e   :  { %18217 = vmatpush3.msra.mxu1 %v22832_v51  ;;  %18218 = vmatprep.mubr.msk.f32.mxu1 %vm19992_vm8, %v24255_v37 }
0x127f   :  { %18236 = vmatpush3.msra.mxu0 %v22836_v36  ;;  %18237 = vmatprep.mubr.msk.f32.mxu0 %vm19992_vm8, %v24255_v37 }
0x1280   :  { %18219 = vmatmul.mubr.msk.f32.vlgmr.msra.gmra.mxu1 %vm11114_vm6, %v22913_v38  ;;  %18238 = vmatmul.mubr.msk.f32.vlgmr.msra.gmra.mxu0 %vm11114_vm6, %v22913_v38 }
0x1281   :  { %18240 = vmatprep.subr.mxu1 %v24255_v37  ;;  %18259 = vmatprep.subr.mxu0 %v24255_v37 }
0x1282   :  { %18241 = vmatpush3.msra.mxu1 %v22706_v53  ;;  %18260 = vmatpush3.msra.mxu0 %v22708_v15 }
0x1283   :  { %18242 = vmatprep.subr.mxu1 %v24255_v37  ;;  %18261 = vmatprep.subr.mxu0 %v24255_v37 }
0x1284   :  { %18243 = vmatpush3.msra.mxu1 %v22714_v11  ;;  %18262 = vmatpush3.msra.mxu0 %v22716_v23 }
0x1285   :  { %18244 = vmatprep.subr.mxu1 %v24255_v37  ;;  %18263 = vmatprep.subr.mxu0 %v24255_v37 }
0x1286   :  { %18245 = vmatpush3.msra.mxu1 %v22722_v27  ;;  %18264 = vmatpush3.msra.mxu0 %v22724_v62 }
0x1287   :  { %18246 = vmatprep.subr.mxu1 %v24255_v37  ;;  %18265 = vmatprep.subr.mxu0 %v24255_v37 }
0x1288   :  { %18247 = vmatpush3.msra.mxu1 %v22730_v10  ;;  %18266 = vmatpush3.msra.mxu0 %v22732_v41 }
0x1289   :  { %18248 = vmatprep.subr.mxu1 %v24255_v37  ;;  %18267 = vmatprep.subr.mxu0 %v24255_v37 }
0x128a   :  { %18249 = vmatpush3.msra.mxu1 %v22738_v55  ;;  %18268 = vmatpush3.msra.mxu0 %v22740_v19 }
0x128b   :  { %18250 = vmatprep.subr.mxu1 %v24255_v37  ;;  %18269 = vmatprep.subr.mxu0 %v24255_v37 }
0x128c   :  { %18251 = vmatpush3.msra.mxu1 %v22746_v0  ;;  %18270 = vmatpush3.msra.mxu0 %v22748_v29 }
0x128d   :  { %18252 = vmatprep.subr.mxu1 %v24255_v37  ;;  %18271 = vmatprep.subr.mxu0 %v24255_v37 }
0x128e   :  { %18253 = vmatpush3.msra.mxu1 %v22754_v28  ;;  %18272 = vmatpush3.msra.mxu0 %v22756_v1 }
0x128f   :  { %18254 = vmatprep.subr.mxu1 %v24255_v37  ;;  %18273 = vmatprep.subr.mxu0 %v24255_v37 }
0x1290   :  { %18255 = vmatpush3.msra.mxu1 %v22762_v34  ;;  %18274 = vmatpush3.msra.mxu0 %v22766_v31 }
0x1291   :  { %18256 = vmatprep.mubr.msk.f32.mxu1 %vm19992_vm8, %v24255_v37  ;;  %18275 = vmatprep.mubr.msk.f32.mxu0 %vm19992_vm8, %v24255_v37 }
0x1292   :  { %18278 = vmatprep.subr.mxu1 %v24255_v37  ;;  %18297 = vmatprep.subr.mxu0 %v24255_v37 }
0x132f   :  { %v11494_v16 = vpop.f32.mrf.mxu1  ;;  %v11571_v49 = vpop.f32.mrf.mxu0 }
0x1330   :  { %v11498_v59 = vadd.f32 %v11494_v16, %v22886_v32  ;;  %v11575_v22 = vadd.f32 %v11571_v49, %v22888_v52 }
0x1331   :  { %v18182_v42 = vpop.f32.mrf.mxu1  ;;  %v18201_v30 = vpop.f32.mrf.mxu0 }
0x1332   :  { %v15407_v47 = vmul.f32 -1.442695, %v11498_v59  ;;  %v15409_v6 = vmul.f32 -1.442695, %v11575_v22 }
0x1334   :  { %19453 = vpow2.f32 %v15407_v47 }
0x1335   :  { %19455 = vpow2.f32 %v15409_v6 }
0x1340   :  { %v11648_v43 = vpop.f32.mrf.mxu1  ;;  %v11720_v40 = vpop.f32.mrf.mxu0 }
0x1341   :  { %v19454_v24 = vpop.eup %19453  ;;  %v11652_v58 = vadd.f32 %v11648_v43, %v22890_v56  ;;  %v11724_v17 = vadd.f32 %v11720_v40, %v22892_v5 }
0x1342   :  { %v19456_v50 = vpop.eup %19455  ;;  %v11502_v60 = vadd.f32 1.0, %v19454_v24  ;;  %v18220_v2 = vpop.f32.mrf.mxu1 }
0x1343   :  { %v18239_v25 = vpop.f32.mrf.mxu0  ;;  %v11579_v32 = vadd.f32 1.0, %v19456_v50  ;;  %19457 = vtanh.f32 %v11652_v58  ;;  %v15412_v52 = vmul.f32 -1.442695, %v11724_v17 }
0x1344   :  { %19459 = vrcp.f32 %v11502_v60 }
0x1345   :  { %19461 = vrcp.f32 %v11579_v32  ;;  %v23205_v32 = vld [vmem:[#allocation22 + $0xb8] sm:$0xff] }
0x1346   :  { %19463 = vpow2.f32 %v15412_v52  ;;  %v23207_v52 = vld [vmem:[#allocation22 + $0xf8] sm:$0xff] }
0x1350   :  { %v19458_v45 = vpop.eup %19457 }
0x1351   :  { %v19460_v12 = vpop.eup %19459 }
0x1352   :  { %v19462_v4 = vpop.eup %19461  ;;  %v11732_v13 = vmul.f32 %v19460_v12, %v19458_v45  ;;  %v23215_v45 = vld [vmem:[#allocation22 + $0xb0] sm:$0xff] }
0x1353   :  { %v19464_v39 = vpop.eup %19463  ;;  %v11731_v35 = vmul.f32 %v19462_v4, %v22910_v8  ;;  %v23217_v12 = vld [vmem:[#allocation22 + $0xf0] sm:$0xff]  ;;  %v23223_v4 = vld [vmem:[#allocation22 + $0xa8] sm:$0xff] }
0x1354   :  { %v11728_v56 = vadd.f32 1.0, %v19464_v39  ;;  %v23231_v39 = vld [vmem:[#allocation22 + $0xa0] sm:$0xff] }
0x1355   :  { %v23000_v54 = vadd.f32 %v11732_v13, %v11731_v35  ;;  %v23225_v13 = vld [vmem:[#allocation22 + $0xe8] sm:$0xff]  ;;  %v23233_v35 = vld [vmem:[#allocation22 + $0xe0] sm:$0xff] }
0x1356   :  { %19465 = vrcp.f32 %v11728_v56  ;;  %v23239_v56 = vld [vmem:[#allocation22 + $0x98] sm:$0xff] }
0x1357   :  { %19467 = vtanh.f32 %v23000_v54 }
0x1363   :  { %v19466_v5 = vpop.eup %19465 }
0x1364   :  { %v19468_v16 = vpop.eup %19467 }
0x1365   :  { %v23003_v49 = vmul.f32 %v19468_v16, %v19466_v5  ;;  %v23247_v5 = vld [vmem:[#allocation22 + $0x90] sm:$0xff] }
0x1366   :  { %v23249_v16 = vld [vmem:[#allocation22 + $0xd0] sm:$0xff] }
0x1367   :  { %18257 = vmatmul.mubr.msk.f32.vlgmr.msra.gmra.mxu1 %vm11114_vm6, %v23003_v49  ;;  %18276 = vmatmul.mubr.msk.f32.vlgmr.msra.gmra.mxu0 %vm11114_vm6, %v23003_v49 }
0x1368   :  { %18279 = vmatpush3.msra.mxu1 %v22776_v14  ;;  %18298 = vmatpush3.msra.mxu0 %v22778_v44 }
0x1369   :  { %18280 = vmatprep.subr.mxu1 %v24255_v37  ;;  %18299 = vmatprep.subr.mxu0 %v24255_v37 }
0x136a   :  { %18281 = vmatpush3.msra.mxu1 %v22784_v26  ;;  %18300 = vmatpush3.msra.mxu0 %v22786_v63 }
0x136b   :  { %18282 = vmatprep.subr.mxu1 %v24255_v37  ;;  %18301 = vmatprep.subr.mxu0 %v24255_v37 }
0x136c   :  { %18283 = vmatpush3.msra.mxu1 %v22792_v57  ;;  %18302 = vmatpush3.msra.mxu0 %v22794_v20 }
0x136d   :  { %18284 = vmatprep.subr.mxu1 %v24255_v37  ;;  %18303 = vmatprep.subr.mxu0 %v24255_v37 }
0x136e   :  { %18285 = vmatpush3.msra.mxu1 %v22800_v46  ;;  %18304 = vmatpush3.msra.mxu0 %v22802_v61 }
0x136f   :  { %18286 = vmatprep.subr.mxu1 %v24255_v37  ;;  %18305 = vmatprep.subr.mxu0 %v24255_v37 }
0x1370   :  { %18287 = vmatpush3.msra.mxu1 %v22808_v33  ;;  %18306 = vmatpush3.msra.mxu0 %v22810_v3 }
0x1371   :  { %18288 = vmatprep.subr.mxu1 %v24255_v37  ;;  %18307 = vmatprep.subr.mxu0 %v24255_v37 }
0x1372   :  { %18289 = vmatpush3.msra.mxu1 %v22816_v48  ;;  %18308 = vmatpush3.msra.mxu0 %v22818_v18 }
0x1373   :  { %18290 = vmatprep.subr.mxu1 %v24255_v37  ;;  %18309 = vmatprep.subr.mxu0 %v24255_v37 }
0x1374   :  { %18291 = vmatpush3.msra.mxu1 %v22824_v21  ;;  %18310 = vmatpush3.msra.mxu0 %v22826_v9 }
0x1375   :  { %18292 = vmatprep.subr.mxu1 %v24255_v37  ;;  %18311 = vmatprep.subr.mxu0 %v24255_v37 }
0x1376   :  { %18293 = vmatpush3.msra.mxu1 %v22832_v51  ;;  %18294 = vmatprep.mubr.msk.f32.mxu1 %vm19992_vm8, %v24255_v37 }
0x1377   :  { %18312 = vmatpush3.msra.mxu0 %v22836_v36  ;;  %18313 = vmatprep.mubr.msk.f32.mxu0 %vm19992_vm8, %v24255_v37 }
0x1378   :  { %18295 = vmatmul.mubr.msk.f32.vlgmr.msra.gmra.mxu1 %vm11114_vm6, %v23003_v49  ;;  %18314 = vmatmul.mubr.msk.f32.vlgmr.msra.gmra.mxu0 %vm11114_vm6, %v23003_v49 }
0x1379   :  { %18316 = vmatprep.subr.mxu1 %v24255_v37  ;;  %18335 = vmatprep.subr.mxu0 %v24255_v37 }
0x137a   :  { %18317 = vmatpush3.msra.mxu1 %v22706_v53  ;;  %18336 = vmatpush3.msra.mxu0 %v22708_v15 }
0x137b   :  { %18318 = vmatprep.subr.mxu1 %v24255_v37  ;;  %18337 = vmatprep.subr.mxu0 %v24255_v37 }
0x137c   :  { %18319 = vmatpush3.msra.mxu1 %v22714_v11  ;;  %18338 = vmatpush3.msra.mxu0 %v22716_v23  ;;  %v24271_v23 = vld [vmem:[#allocation40_spill] sm:$0xff] }
0x137d   :  { %18320 = vmatprep.subr.mxu1 %v24255_v37  ;;  %18339 = vmatprep.subr.mxu0 %v24255_v37 }
0x137e   :  { %18321 = vmatpush3.msra.mxu1 %v22722_v27  ;;  %18340 = vmatpush3.msra.mxu0 %v22724_v62 }
0x137f   :  { %18322 = vmatprep.subr.mxu1 %v24255_v37  ;;  %18341 = vmatprep.subr.mxu0 %v24255_v37 }
0x1380   :  { %18323 = vmatpush3.msra.mxu1 %v22730_v10  ;;  %18342 = vmatpush3.msra.mxu0 %v22732_v41 }
0x1381   :  { %18324 = vmatprep.subr.mxu1 %v24255_v37  ;;  %18343 = vmatprep.subr.mxu0 %v24255_v37 }
0x1382   :  { %18325 = vmatpush3.msra.mxu1 %v22738_v55  ;;  %18344 = vmatpush3.msra.mxu0 %v22740_v19 }
0x1383   :  { %18326 = vmatprep.subr.mxu1 %v24255_v37  ;;  %18345 = vmatprep.subr.mxu0 %v24255_v37 }
0x1384   :  { %18327 = vmatpush3.msra.mxu1 %v22746_v0  ;;  %18346 = vmatpush3.msra.mxu0 %v22748_v29 }
0x1385   :  { %18328 = vmatprep.subr.mxu1 %v24255_v37  ;;  %18347 = vmatprep.subr.mxu0 %v24255_v37 }
0x1386   :  { %18329 = vmatpush3.msra.mxu1 %v22754_v28  ;;  %18348 = vmatpush3.msra.mxu0 %v22756_v1  ;;  %v24272_v28 = vld [vmem:[#allocation41_spill] sm:$0xff] }
0x1387   :  { %18330 = vmatprep.subr.mxu1 %v24255_v37  ;;  %18349 = vmatprep.subr.mxu0 %v24255_v37 }
0x1388   :  { %18331 = vmatpush3.msra.mxu1 %v22762_v34  ;;  %18350 = vmatpush3.msra.mxu0 %v22766_v31  ;;  %v24273_v34 = vld [vmem:[#allocation42_spill] sm:$0xff] }
0x1389   :  { %18332 = vmatprep.mubr.msk.f32.mxu1 %vm19992_vm8, %v24255_v37  ;;  %18351 = vmatprep.mubr.msk.f32.mxu0 %vm19992_vm8, %v24255_v37 }
0x138a   :  { %18354 = vmatprep.subr.mxu1 %v24255_v37  ;;  %18373 = vmatprep.subr.mxu0 %v24255_v37 }
0x1427   :  { %v11805_v53 = vpop.f32.mrf.mxu1  ;;  %v11882_v15 = vpop.f32.mrf.mxu0 }
0x1428   :  { %v11809_v11 = vadd.f32 %v11805_v53, %v22894_v7  ;;  %v11886_v27 = vadd.f32 %v11882_v15, %v24271_v23  ;;  %v23255_v53 = vld [vmem:[#allocation22 + $0x88] sm:$0xff]  ;;  %v23267_v23 = vld [vmem:[#allocation22 + $0xc0] sm:$0xff] }
0x1429   :  { %v18258_v62 = vpop.f32.mrf.mxu1  ;;  %v18277_v10 = vpop.f32.mrf.mxu0  ;;  %v23257_v15 = vld [vmem:[#allocation22 + $0xc8] sm:$0xff] }
0x142a   :  { %v15414_v41 = vmul.f32 -1.442695, %v11809_v11  ;;  %v15416_v55 = vmul.f32 -1.442695, %v11886_v27  ;;  %v23263_v11 = vld [vmem:[#allocation22 + $0x80] sm:$0xff] }
0x142b   :  { %v24274_v27 = vld [vmem:[#allocation43_spill] sm:$0xff]  ;;  %v24275_v10 = vld [vmem:[#allocation44_spill] sm:$0xff] }
0x142c   :  { %19469 = vpow2.f32 %v15414_v41 }
0x142d   :  { %19471 = vpow2.f32 %v15416_v55 }
0x1438   :  { %v11959_v19 = vpop.f32.mrf.mxu1  ;;  %v12031_v0 = vpop.f32.mrf.mxu0 }
0x1439   :  { %v19470_v29 = vpop.eup %19469  ;;  %v11963_v1 = vadd.f32 %v11959_v19, %v24272_v28  ;;  %v12035_v31 = vadd.f32 %v12031_v0, %v24273_v34 }
0x143a   :  { %v19472_v8 = vpop.eup %19471  ;;  %v11813_v59 = vadd.f32 1.0, %v19470_v29  ;;  %v18296_v22 = vpop.f32.mrf.mxu1 }
0x143b   :  { %v18315_v42 = vpop.f32.mrf.mxu0  ;;  %v11890_v7 = vadd.f32 1.0, %v19472_v8  ;;  %19473 = vtanh.f32 %v11963_v1  ;;  %v15419_v30 = vmul.f32 -1.442695, %v12035_v31  ;;  %v24276_v31 = vld [vmem:[#allocation45_spill] sm:$0xff] }
0x143c   :  { %19475 = vrcp.f32 %v11813_v59  ;;  %v24277_v59 = vld [vmem:[#allocation47_spill] sm:$0xff] }
0x143d   :  { %19477 = vrcp.f32 %v11890_v7 }
0x143e   :  { %19479 = vpow2.f32 %v15419_v30 }
0x1448   :  { %v19474_v47 = vpop.eup %19473 }
0x1449   :  { %v19476_v6 = vpop.eup %19475 }
0x144a   :  { %v19478_v43 = vpop.eup %19477  ;;  %v12043_v40 = vmul.f32 %v19476_v6, %v19474_v47 }
0x144b   :  { %v19480_v24 = vpop.eup %19479  ;;  %v12042_v58 = vmul.f32 %v19478_v43, %v23000_v54  ;;  %v23241_v54 = vld [vmem:[#allocation22 + $0xd8] sm:$0xff] }
0x144c   :  { %v12039_v17 = vadd.f32 1.0, %v19480_v24 }
0x144d   :  { %v23090_v50 = vadd.f32 %v12043_v40, %v12042_v58 }
0x144e   :  { %19481 = vrcp.f32 %v12039_v17 }
0x144f   :  { %19483 = vtanh.f32 %v23090_v50 }
0x145b   :  { %v19482_v60 = vpop.eup %19481 }
0x145c   :  { %v19484_v2 = vpop.eup %19483 }
0x145d   :  { %v23093_v25 = vmul.f32 %v19484_v2, %v19482_v60 }
0x145f   :  { %18333 = vmatmul.mubr.msk.f32.vlgmr.msra.gmra.mxu1 %vm11114_vm6, %v23093_v25  ;;  %18352 = vmatmul.mubr.msk.f32.vlgmr.msra.gmra.mxu0 %vm11114_vm6, %v23093_v25 }
0x1460   :  { %18355 = vmatpush3.msra.mxu1 %v22776_v14  ;;  %18374 = vmatpush3.msra.mxu0 %v22778_v44  ;;  %v23133_v14 = vld [vmem:[#allocation22 + $0x38] sm:$0xff] }
0x1461   :  { %18356 = vmatprep.subr.mxu1 %v24255_v37  ;;  %18375 = vmatprep.subr.mxu0 %v24255_v37  ;;  %v23135_v44 = vld [vmem:[#allocation22 + $0x78] sm:$0xff] }
0x1462   :  { %18357 = vmatpush3.msra.mxu1 %v22784_v26  ;;  %18376 = vmatpush3.msra.mxu0 %v22786_v63  ;;  %v23143_v26 = vld [vmem:[#allocation22 + $0x30] sm:$0xff] }
0x1463   :  { %18358 = vmatprep.subr.mxu1 %v24255_v37  ;;  %18377 = vmatprep.subr.mxu0 %v24255_v37  ;;  %v23145_v63 = vld [vmem:[#allocation22 + $0x70] sm:$0xff] }
0x1464   :  { %18359 = vmatpush3.msra.mxu1 %v22792_v57  ;;  %18378 = vmatpush3.msra.mxu0 %v22794_v20  ;;  %v23151_v57 = vld [vmem:[#allocation22 + $0x28] sm:$0xff] }
0x1465   :  { %18360 = vmatprep.subr.mxu1 %v24255_v37  ;;  %18379 = vmatprep.subr.mxu0 %v24255_v37  ;;  %v23153_v20 = vld [vmem:[#allocation22 + $0x68] sm:$0xff] }
0x1466   :  { %18361 = vmatpush3.msra.mxu1 %v22800_v46  ;;  %18380 = vmatpush3.msra.mxu0 %v22802_v61  ;;  %v23159_v46 = vld [vmem:[#allocation22 + $0x20] sm:$0xff] }
0x1467   :  { %18362 = vmatprep.subr.mxu1 %v24255_v37  ;;  %18381 = vmatprep.subr.mxu0 %v24255_v37  ;;  %v23161_v61 = vld [vmem:[#allocation22 + $0x60] sm:$0xff] }
0x1468   :  { %18363 = vmatpush3.msra.mxu1 %v22808_v33  ;;  %18382 = vmatpush3.msra.mxu0 %v22810_v3  ;;  %v23167_v33 = vld [vmem:[#allocation22 + $0x18] sm:$0xff] }
0x1469   :  { %18364 = vmatprep.subr.mxu1 %v24255_v37  ;;  %18383 = vmatprep.subr.mxu0 %v24255_v37  ;;  %v23169_v3 = vld [vmem:[#allocation22 + $0x58] sm:$0xff] }
0x146a   :  { %18365 = vmatpush3.msra.mxu1 %v22816_v48  ;;  %18384 = vmatpush3.msra.mxu0 %v22818_v18  ;;  %v23175_v48 = vld [vmem:[#allocation22 + $0x10] sm:$0xff] }
0x146b   :  { %18366 = vmatprep.subr.mxu1 %v24255_v37  ;;  %18385 = vmatprep.subr.mxu0 %v24255_v37  ;;  %v23177_v18 = vld [vmem:[#allocation22 + $0x50] sm:$0xff] }
0x146c   :  { %18367 = vmatpush3.msra.mxu1 %v22824_v21  ;;  %18386 = vmatpush3.msra.mxu0 %v22826_v9  ;;  %v23183_v21 = vld [vmem:[#allocation22 + $0x8] sm:$0xff] }
0x146d   :  { %18368 = vmatprep.subr.mxu1 %v24255_v37  ;;  %18387 = vmatprep.subr.mxu0 %v24255_v37  ;;  %v23185_v9 = vld [vmem:[#allocation22 + $0x48] sm:$0xff] }
0x146e   :  { %18369 = vmatpush3.msra.mxu1 %v22832_v51  ;;  %18370 = vmatprep.mubr.msk.f32.mxu1 %vm19992_vm8, %v24255_v37  ;;  %v23191_v51 = vld [vmem:[#allocation22] sm:$0xff] }
0x146f   :  { %18388 = vmatpush3.msra.mxu0 %v22836_v36  ;;  %18389 = vmatprep.mubr.msk.f32.mxu0 %vm19992_vm8, %v24255_v37  ;;  %v23195_v36 = vld [vmem:[#allocation22 + $0x40] sm:$0xff] }
0x1470   :  { %18371 = vmatmul.mubr.msk.f32.vlgmr.msra.gmra.mxu1 %vm11114_vm6, %v23093_v25  ;;  %18390 = vmatmul.mubr.msk.f32.vlgmr.msra.gmra.mxu0 %vm11114_vm6, %v23093_v25 }
0x1471   :  { %18392 = vmatprep.subr.mxu1 %v24255_v37  ;;  %18411 = vmatprep.subr.mxu0 %v24255_v37 }
0x1472   :  { %18393 = vmatpush3.msra.mxu1 %v23133_v14  ;;  %18412 = vmatpush3.msra.mxu0 %v23135_v44 }
0x1473   :  { %18394 = vmatprep.subr.mxu1 %v24255_v37  ;;  %18413 = vmatprep.subr.mxu0 %v24255_v37 }
0x1474   :  { %18395 = vmatpush3.msra.mxu1 %v23143_v26  ;;  %18414 = vmatpush3.msra.mxu0 %v23145_v63 }
0x1475   :  { %18396 = vmatprep.subr.mxu1 %v24255_v37  ;;  %18415 = vmatprep.subr.mxu0 %v24255_v37 }
0x1476   :  { %18397 = vmatpush3.msra.mxu1 %v23151_v57  ;;  %18416 = vmatpush3.msra.mxu0 %v23153_v20 }
0x1477   :  { %18398 = vmatprep.subr.mxu1 %v24255_v37  ;;  %18417 = vmatprep.subr.mxu0 %v24255_v37 }
0x1478   :  { %18399 = vmatpush3.msra.mxu1 %v23159_v46  ;;  %18418 = vmatpush3.msra.mxu0 %v23161_v61 }
0x1479   :  { %18400 = vmatprep.subr.mxu1 %v24255_v37  ;;  %18419 = vmatprep.subr.mxu0 %v24255_v37 }
0x147a   :  { %18401 = vmatpush3.msra.mxu1 %v23167_v33  ;;  %18420 = vmatpush3.msra.mxu0 %v23169_v3 }
0x147b   :  { %18402 = vmatprep.subr.mxu1 %v24255_v37  ;;  %18421 = vmatprep.subr.mxu0 %v24255_v37 }
0x147c   :  { %18403 = vmatpush3.msra.mxu1 %v23175_v48  ;;  %18422 = vmatpush3.msra.mxu0 %v23177_v18 }
0x147d   :  { %18404 = vmatprep.subr.mxu1 %v24255_v37  ;;  %18423 = vmatprep.subr.mxu0 %v24255_v37 }
0x147e   :  { %18405 = vmatpush3.msra.mxu1 %v23183_v21  ;;  %18424 = vmatpush3.msra.mxu0 %v23185_v9 }
0x147f   :  { %18406 = vmatprep.subr.mxu1 %v24255_v37  ;;  %18425 = vmatprep.subr.mxu0 %v24255_v37 }
0x1480   :  { %18407 = vmatpush3.msra.mxu1 %v23191_v51  ;;  %18408 = vmatprep.mubr.msk.f32.mxu1 %vm19992_vm8, %v24255_v37 }
0x1481   :  { %18426 = vmatpush3.msra.mxu0 %v23195_v36  ;;  %18427 = vmatprep.mubr.msk.f32.mxu0 %vm19992_vm8, %v24255_v37 }
0x1482   :  { %18409 = vmatmul.mubr.msk.f32.vlgmr.msra.gmra.mxu1 %vm11114_vm6, %v22913_v38  ;;  %18428 = vmatmul.mubr.msk.f32.vlgmr.msra.gmra.mxu0 %vm11114_vm6, %v22913_v38 }
0x1483   :  { %18430 = vmatprep.subr.mxu1 %v24255_v37  ;;  %18449 = vmatprep.subr.mxu0 %v24255_v37 }
0x1484   :  { %18431 = vmatpush3.msra.mxu1 %v23205_v32  ;;  %18450 = vmatpush3.msra.mxu0 %v23207_v52 }
0x1485   :  { %18432 = vmatprep.subr.mxu1 %v24255_v37  ;;  %18451 = vmatprep.subr.mxu0 %v24255_v37 }
0x1486   :  { %18433 = vmatpush3.msra.mxu1 %v23215_v45  ;;  %18452 = vmatpush3.msra.mxu0 %v23217_v12 }
0x1487   :  { %18434 = vmatprep.subr.mxu1 %v24255_v37  ;;  %18453 = vmatprep.subr.mxu0 %v24255_v37 }
0x1488   :  { %18435 = vmatpush3.msra.mxu1 %v23223_v4  ;;  %18454 = vmatpush3.msra.mxu0 %v23225_v13 }
0x1489   :  { %18436 = vmatprep.subr.mxu1 %v24255_v37  ;;  %18455 = vmatprep.subr.mxu0 %v24255_v37 }
0x148a   :  { %18437 = vmatpush3.msra.mxu1 %v23231_v39  ;;  %18456 = vmatpush3.msra.mxu0 %v23233_v35 }
0x148b   :  { %18438 = vmatprep.subr.mxu1 %v24255_v37  ;;  %18457 = vmatprep.subr.mxu0 %v24255_v37 }
0x148c   :  { %18439 = vmatpush3.msra.mxu1 %v23239_v56  ;;  %18458 = vmatpush3.msra.mxu0 %v23241_v54 }
0x148d   :  { %18440 = vmatprep.subr.mxu1 %v24255_v37  ;;  %18459 = vmatprep.subr.mxu0 %v24255_v37 }
0x148e   :  { %18441 = vmatpush3.msra.mxu1 %v23247_v5  ;;  %18460 = vmatpush3.msra.mxu0 %v23249_v16 }
0x148f   :  { %18442 = vmatprep.subr.mxu1 %v24255_v37  ;;  %18461 = vmatprep.subr.mxu0 %v24255_v37 }
0x1490   :  { %18443 = vmatpush3.msra.mxu1 %v23255_v53  ;;  %18462 = vmatpush3.msra.mxu0 %v23257_v15 }
0x1491   :  { %18444 = vmatprep.subr.mxu1 %v24255_v37  ;;  %18463 = vmatprep.subr.mxu0 %v24255_v37 }
0x1492   :  { %18445 = vmatpush3.msra.mxu1 %v23263_v11  ;;  %18446 = vmatprep.mubr.msk.f32.mxu1 %vm19992_vm8, %v24255_v37 }
0x1493   :  { %18464 = vmatpush3.msra.mxu0 %v23267_v23  ;;  %18465 = vmatprep.mubr.msk.f32.mxu0 %vm19992_vm8, %v24255_v37 }
0x1494   :  { %18447 = vmatmul.mubr.msk.f32.vlgmr.msra.gmra.mxu1 %vm11114_vm6, %v22913_v38  ;;  %18466 = vmatmul.mubr.msk.f32.vlgmr.msra.gmra.mxu0 %vm11114_vm6, %v22913_v38 }
0x1495   :  { %18468 = vmatprep.subr.mxu1 %v24255_v37  ;;  %18487 = vmatprep.subr.mxu0 %v24255_v37 }
0x1496   :  { %18469 = vmatpush3.msra.mxu1 %v23133_v14  ;;  %18488 = vmatpush3.msra.mxu0 %v23135_v44 }
0x1497   :  { %18470 = vmatprep.subr.mxu1 %v24255_v37  ;;  %18489 = vmatprep.subr.mxu0 %v24255_v37 }
0x1498   :  { %18471 = vmatpush3.msra.mxu1 %v23143_v26  ;;  %18490 = vmatpush3.msra.mxu0 %v23145_v63 }
0x1499   :  { %18472 = vmatprep.subr.mxu1 %v24255_v37  ;;  %18491 = vmatprep.subr.mxu0 %v24255_v37 }
0x149a   :  { %18473 = vmatpush3.msra.mxu1 %v23151_v57  ;;  %18492 = vmatpush3.msra.mxu0 %v23153_v20 }
0x149b   :  { %18474 = vmatprep.subr.mxu1 %v24255_v37  ;;  %18493 = vmatprep.subr.mxu0 %v24255_v37 }
0x149c   :  { %18475 = vmatpush3.msra.mxu1 %v23159_v46  ;;  %18494 = vmatpush3.msra.mxu0 %v23161_v61 }
0x149d   :  { %18476 = vmatprep.subr.mxu1 %v24255_v37  ;;  %18495 = vmatprep.subr.mxu0 %v24255_v37 }
0x149e   :  { %18477 = vmatpush3.msra.mxu1 %v23167_v33  ;;  %18496 = vmatpush3.msra.mxu0 %v23169_v3 }
0x149f   :  { %18478 = vmatprep.subr.mxu1 %v24255_v37  ;;  %18497 = vmatprep.subr.mxu0 %v24255_v37 }
0x14a0   :  { %18479 = vmatpush3.msra.mxu1 %v23175_v48  ;;  %18498 = vmatpush3.msra.mxu0 %v23177_v18 }
0x14a1   :  { %18480 = vmatprep.subr.mxu1 %v24255_v37  ;;  %18499 = vmatprep.subr.mxu0 %v24255_v37 }
0x14a2   :  { %18481 = vmatpush3.msra.mxu1 %v23183_v21  ;;  %18500 = vmatpush3.msra.mxu0 %v23185_v9 }
0x14a3   :  { %18482 = vmatprep.subr.mxu1 %v24255_v37  ;;  %18501 = vmatprep.subr.mxu0 %v24255_v37 }
0x14a4   :  { %18483 = vmatpush3.msra.mxu1 %v23191_v51  ;;  %18484 = vmatprep.mubr.msk.f32.mxu1 %vm19992_vm8, %v24255_v37 }
0x14a5   :  { %18502 = vmatpush3.msra.mxu0 %v23195_v36  ;;  %18503 = vmatprep.mubr.msk.f32.mxu0 %vm19992_vm8, %v24255_v37 }
0x14a6   :  { %18485 = vmatmul.mubr.msk.f32.vlgmr.msra.gmra.mxu1 %vm11114_vm6, %v23003_v49  ;;  %18504 = vmatmul.mubr.msk.f32.vlgmr.msra.gmra.mxu0 %vm11114_vm6, %v23003_v49 }
0x14a7   :  { %18506 = vmatprep.subr.mxu1 %v24255_v37  ;;  %18525 = vmatprep.subr.mxu0 %v24255_v37 }
0x14a8   :  { %18507 = vmatpush3.msra.mxu1 %v23205_v32  ;;  %18526 = vmatpush3.msra.mxu0 %v23207_v52 }
0x14a9   :  { %18508 = vmatprep.subr.mxu1 %v24255_v37  ;;  %18527 = vmatprep.subr.mxu0 %v24255_v37 }
0x14aa   :  { %18509 = vmatpush3.msra.mxu1 %v23215_v45  ;;  %18528 = vmatpush3.msra.mxu0 %v23217_v12 }
0x14ab   :  { %18510 = vmatprep.subr.mxu1 %v24255_v37  ;;  %18529 = vmatprep.subr.mxu0 %v24255_v37 }
0x14ac   :  { %18511 = vmatpush3.msra.mxu1 %v23223_v4  ;;  %18530 = vmatpush3.msra.mxu0 %v23225_v13 }
0x14ad   :  { %18512 = vmatprep.subr.mxu1 %v24255_v37  ;;  %18531 = vmatprep.subr.mxu0 %v24255_v37 }
0x14ae   :  { %18513 = vmatpush3.msra.mxu1 %v23231_v39  ;;  %18532 = vmatpush3.msra.mxu0 %v23233_v35 }
0x14af   :  { %18514 = vmatprep.subr.mxu1 %v24255_v37  ;;  %18533 = vmatprep.subr.mxu0 %v24255_v37 }
0x14b0   :  { %18515 = vmatpush3.msra.mxu1 %v23239_v56  ;;  %18534 = vmatpush3.msra.mxu0 %v23241_v54 }
0x14b1   :  { %18516 = vmatprep.subr.mxu1 %v24255_v37  ;;  %18535 = vmatprep.subr.mxu0 %v24255_v37 }
0x14b2   :  { %18517 = vmatpush3.msra.mxu1 %v23247_v5  ;;  %18536 = vmatpush3.msra.mxu0 %v23249_v16 }
0x14b3   :  { %18518 = vmatprep.subr.mxu1 %v24255_v37  ;;  %18537 = vmatprep.subr.mxu0 %v24255_v37 }
0x14b4   :  { %18519 = vmatpush3.msra.mxu1 %v23255_v53  ;;  %18538 = vmatpush3.msra.mxu0 %v23257_v15 }
0x14b5   :  { %18520 = vmatprep.subr.mxu1 %v24255_v37  ;;  %18539 = vmatprep.subr.mxu0 %v24255_v37 }
0x14b6   :  { %18521 = vmatpush3.msra.mxu1 %v23263_v11  ;;  %18522 = vmatprep.mubr.msk.f32.mxu1 %vm19992_vm8, %v24255_v37 }
0x14b7   :  { %18540 = vmatpush3.msra.mxu0 %v23267_v23  ;;  %18541 = vmatprep.mubr.msk.f32.mxu0 %vm19992_vm8, %v24255_v37 }
0x14b8   :  { %18523 = vmatmul.mubr.msk.f32.vlgmr.msra.gmra.mxu1 %vm11114_vm6, %v23003_v49  ;;  %18542 = vmatmul.mubr.msk.f32.vlgmr.msra.gmra.mxu0 %vm11114_vm6, %v23003_v49 }
0x14b9   :  { %18544 = vmatprep.subr.mxu1 %v24255_v37  ;;  %18563 = vmatprep.subr.mxu0 %v24255_v37 }
0x14ba   :  { %18545 = vmatpush3.msra.mxu1 %v23133_v14  ;;  %18564 = vmatpush3.msra.mxu0 %v23135_v44 }
0x14bb   :  { %18546 = vmatprep.subr.mxu1 %v24255_v37  ;;  %18565 = vmatprep.subr.mxu0 %v24255_v37 }
0x14bc   :  { %18547 = vmatpush3.msra.mxu1 %v23143_v26  ;;  %18566 = vmatpush3.msra.mxu0 %v23145_v63 }
0x14bd   :  { %18548 = vmatprep.subr.mxu1 %v24255_v37  ;;  %18567 = vmatprep.subr.mxu0 %v24255_v37 }
0x14be   :  { %18549 = vmatpush3.msra.mxu1 %v23151_v57  ;;  %18568 = vmatpush3.msra.mxu0 %v23153_v20 }
0x14bf   :  { %18550 = vmatprep.subr.mxu1 %v24255_v37  ;;  %18569 = vmatprep.subr.mxu0 %v24255_v37 }
0x14c0   :  { %18551 = vmatpush3.msra.mxu1 %v23159_v46  ;;  %18570 = vmatpush3.msra.mxu0 %v23161_v61 }
0x14c1   :  { %18552 = vmatprep.subr.mxu1 %v24255_v37  ;;  %18571 = vmatprep.subr.mxu0 %v24255_v37 }
0x14c2   :  { %18553 = vmatpush3.msra.mxu1 %v23167_v33  ;;  %18572 = vmatpush3.msra.mxu0 %v23169_v3 }
0x14c3   :  { %18554 = vmatprep.subr.mxu1 %v24255_v37  ;;  %18573 = vmatprep.subr.mxu0 %v24255_v37 }
0x14c4   :  { %18555 = vmatpush3.msra.mxu1 %v23175_v48  ;;  %18574 = vmatpush3.msra.mxu0 %v23177_v18 }
0x14c5   :  { %18556 = vmatprep.subr.mxu1 %v24255_v37  ;;  %18575 = vmatprep.subr.mxu0 %v24255_v37 }
0x14c6   :  { %18557 = vmatpush3.msra.mxu1 %v23183_v21  ;;  %18576 = vmatpush3.msra.mxu0 %v23185_v9 }
0x14c7   :  { %18558 = vmatprep.subr.mxu1 %v24255_v37  ;;  %18577 = vmatprep.subr.mxu0 %v24255_v37 }
0x14c8   :  { %18559 = vmatpush3.msra.mxu1 %v23191_v51  ;;  %18560 = vmatprep.mubr.msk.f32.mxu1 %vm19992_vm8, %v24255_v37 }
0x14c9   :  { %18578 = vmatpush3.msra.mxu0 %v23195_v36  ;;  %18579 = vmatprep.mubr.msk.f32.mxu0 %vm19992_vm8, %v24255_v37 }
0x14ca   :  { %18561 = vmatmul.mubr.msk.f32.vlgmr.msra.gmra.mxu1 %vm11114_vm6, %v23093_v25  ;;  %18580 = vmatmul.mubr.msk.f32.vlgmr.msra.gmra.mxu0 %vm11114_vm6, %v23093_v25 }
0x14cb   :  { %18582 = vmatprep.subr.mxu1 %v24255_v37  ;;  %18601 = vmatprep.subr.mxu0 %v24255_v37 }
0x14cc   :  { %18583 = vmatpush3.msra.mxu1 %v23205_v32  ;;  %18602 = vmatpush3.msra.mxu0 %v23207_v52 }
0x14cd   :  { %18584 = vmatprep.subr.mxu1 %v24255_v37  ;;  %18603 = vmatprep.subr.mxu0 %v24255_v37 }
0x14ce   :  { %18585 = vmatpush3.msra.mxu1 %v23215_v45  ;;  %18604 = vmatpush3.msra.mxu0 %v23217_v12 }
0x14cf   :  { %18586 = vmatprep.subr.mxu1 %v24255_v37  ;;  %18605 = vmatprep.subr.mxu0 %v24255_v37 }
0x14d0   :  { %18587 = vmatpush3.msra.mxu1 %v23223_v4  ;;  %18606 = vmatpush3.msra.mxu0 %v23225_v13 }
0x14d1   :  { %18588 = vmatprep.subr.mxu1 %v24255_v37  ;;  %18607 = vmatprep.subr.mxu0 %v24255_v37 }
0x14d2   :  { %18589 = vmatpush3.msra.mxu1 %v23231_v39  ;;  %18608 = vmatpush3.msra.mxu0 %v23233_v35 }
0x14d3   :  { %18590 = vmatprep.subr.mxu1 %v24255_v37  ;;  %18609 = vmatprep.subr.mxu0 %v24255_v37 }
0x14d4   :  { %18591 = vmatpush3.msra.mxu1 %v23239_v56  ;;  %18610 = vmatpush3.msra.mxu0 %v23241_v54 }
0x14d5   :  { %18592 = vmatprep.subr.mxu1 %v24255_v37  ;;  %18611 = vmatprep.subr.mxu0 %v24255_v37 }
0x14d6   :  { %18593 = vmatpush3.msra.mxu1 %v23247_v5  ;;  %18612 = vmatpush3.msra.mxu0 %v23249_v16 }
0x14d7   :  { %18594 = vmatprep.subr.mxu1 %v24255_v37  ;;  %18613 = vmatprep.subr.mxu0 %v24255_v37 }
0x14d8   :  { %18595 = vmatpush3.msra.mxu1 %v23255_v53  ;;  %18614 = vmatpush3.msra.mxu0 %v23257_v15 }
0x14d9   :  { %18596 = vmatprep.subr.mxu1 %v24255_v37  ;;  %18615 = vmatprep.subr.mxu0 %v24255_v37 }
0x14da   :  { %18597 = vmatpush3.msra.mxu1 %v23263_v11  ;;  %18598 = vmatprep.mubr.msk.f32.mxu1 %vm19992_vm8, %v24255_v37 }
0x14db   :  { %18616 = vmatpush3.msra.mxu0 %v23267_v23  ;;  %18617 = vmatprep.mubr.msk.f32.mxu0 %vm19992_vm8, %v24255_v37 }
0x14dc   :  { %18599 = vmatmul.mubr.msk.f32.vlgmr.msra.gmra.mxu1 %vm11114_vm6, %v23093_v25  ;;  %18618 = vmatmul.mubr.msk.f32.vlgmr.msra.gmra.mxu0 %vm11114_vm6, %v23093_v25 }
0x14dd   :  { %18620 = vmatprep.subr.mxu1 %v24255_v37  ;;  %18639 = vmatprep.subr.mxu0 %v24255_v37 }
0x14de   :  { %18621 = vmatpush3.msra.mxu1 %v23133_v14  ;;  %18640 = vmatpush3.msra.mxu0 %v23135_v44 }
0x14df   :  { %18622 = vmatprep.subr.mxu1 %v24255_v37  ;;  %18641 = vmatprep.subr.mxu0 %v24255_v37 }
0x14e0   :  { %18623 = vmatpush3.msra.mxu1 %v23143_v26  ;;  %18642 = vmatpush3.msra.mxu0 %v23145_v63 }
0x14e1   :  { %18624 = vmatprep.subr.mxu1 %v24255_v37  ;;  %18643 = vmatprep.subr.mxu0 %v24255_v37 }
0x14e2   :  { %18625 = vmatpush3.msra.mxu1 %v23151_v57  ;;  %18644 = vmatpush3.msra.mxu0 %v23153_v20 }
0x14e3   :  { %18626 = vmatprep.subr.mxu1 %v24255_v37  ;;  %18645 = vmatprep.subr.mxu0 %v24255_v37 }
0x14e4   :  { %18627 = vmatpush3.msra.mxu1 %v23159_v46  ;;  %18646 = vmatpush3.msra.mxu0 %v23161_v61 }
0x14e5   :  { %18628 = vmatprep.subr.mxu1 %v24255_v37  ;;  %18647 = vmatprep.subr.mxu0 %v24255_v37 }
0x14e6   :  { %18629 = vmatpush3.msra.mxu1 %v23167_v33  ;;  %18648 = vmatpush3.msra.mxu0 %v23169_v3 }
0x14e7   :  { %18630 = vmatprep.subr.mxu1 %v24255_v37  ;;  %18649 = vmatprep.subr.mxu0 %v24255_v37 }
0x14e8   :  { %18631 = vmatpush3.msra.mxu1 %v23175_v48  ;;  %18650 = vmatpush3.msra.mxu0 %v23177_v18 }
0x14e9   :  { %18632 = vmatprep.subr.mxu1 %v24255_v37  ;;  %18651 = vmatprep.subr.mxu0 %v24255_v37 }
0x14ea   :  { %18633 = vmatpush3.msra.mxu1 %v23183_v21  ;;  %18652 = vmatpush3.msra.mxu0 %v23185_v9  ;;  %v23536_v9 = vld [vmem:[#allocation24 + $0x38] sm:$0xff] }
0x14eb   :  { %18634 = vmatprep.subr.mxu1 %v24255_v37  ;;  %18653 = vmatprep.subr.mxu0 %v24255_v37 }
0x14ec   :  { %18635 = vmatpush3.msra.mxu1 %v23191_v51  ;;  %18654 = vmatpush3.msra.mxu0 %v23195_v36  ;;  %v23538_v51 = vld [vmem:[#allocation24 + $0x78] sm:$0xff] }
0x14ed   :  { %18636 = vmatprep.mubr.msk.f32.mxu1 %vm19992_vm8, %v24255_v37  ;;  %18655 = vmatprep.mubr.msk.f32.mxu0 %vm19992_vm8, %v24255_v37 }
0x14ee   :  { %18658 = vmatprep.subr.mxu1 %v24255_v37  ;;  %18677 = vmatprep.subr.mxu0 %v24255_v37 }
0x151f   :  { %v12116_v38 = vpop.f32.mrf.mxu1  ;;  %v12193_v49 = vpop.f32.mrf.mxu0 }
0x1520   :  { %v12120_v62 = vadd.f32 %v12116_v38, %v24274_v27  ;;  %v12197_v41 = vadd.f32 %v12193_v49, %v24275_v10  ;;  %v23612_v49 = vld [vmem:[#allocation24 + $0xb8] sm:$0xff] }
0x1521   :  { %v18334_v55 = vpop.f32.mrf.mxu1  ;;  %v18353_v19 = vpop.f32.mrf.mxu0  ;;  %v23614_v27 = vld [vmem:[#allocation24 + $0xf8] sm:$0xff] }
0x1522   :  { %v15421_v0 = vmul.f32 -1.442695, %v12120_v62  ;;  %v15423_v29 = vmul.f32 -1.442695, %v12197_v41  ;;  %v23620_v41 = vld [vmem:[#allocation24 + $0xb0] sm:$0xff]  ;;  %v23628_v19 = vld [vmem:[#allocation24 + $0xa8] sm:$0xff] }
0x1523   :  { %v23622_v55 = vld [vmem:[#allocation24 + $0xf0] sm:$0xff] }
0x1524   :  { %19485 = vpow2.f32 %v15421_v0  ;;  %v23630_v0 = vld [vmem:[#allocation24 + $0xe8] sm:$0xff] }
0x1525   :  { %19487 = vpow2.f32 %v15423_v29  ;;  %v23636_v29 = vld [vmem:[#allocation24 + $0xa0] sm:$0xff] }
0x1530   :  { %v12270_v28 = vpop.f32.mrf.mxu1  ;;  %v12342_v1 = vpop.f32.mrf.mxu0 }
0x1531   :  { %v19486_v34 = vpop.eup %19485  ;;  %v12274_v8 = vadd.f32 %v12270_v28, %v24276_v31  ;;  %v12346_v22 = vadd.f32 %v12342_v1, %v24277_v59  ;;  %v23638_v28 = vld [vmem:[#allocation24 + $0xe0] sm:$0xff]  ;;  %v23644_v1 = vld [vmem:[#allocation24 + $0x98] sm:$0xff]  ;;  %v23652_v31 = vld [vmem:[#allocation24 + $0x90] sm:$0xff] }
0x1532   :  { %v19488_v42 = vpop.eup %19487  ;;  %v12124_v7 = vadd.f32 1.0, %v19486_v34  ;;  %v18372_v30 = vpop.f32.mrf.mxu1  ;;  %v23646_v34 = vld [vmem:[#allocation24 + $0xd8] sm:$0xff]  ;;  %v23660_v59 = vld [vmem:[#allocation24 + $0x88] sm:$0xff] }
0x1533   :  { %v18391_v47 = vpop.f32.mrf.mxu0  ;;  %v12201_v6 = vadd.f32 1.0, %v19488_v42  ;;  %19489 = vtanh.f32 %v12274_v8  ;;  %v15426_v43 = vmul.f32 -1.442695, %v12346_v22  ;;  %v23654_v8 = vld [vmem:[#allocation24 + $0xd0] sm:$0xff]  ;;  %v23662_v22 = vld [vmem:[#allocation24 + $0xc8] sm:$0xff]  ;;  %v23668_v42 = vld [vmem:[#allocation24 + $0x80] sm:$0xff] }
0x1534   :  { %19491 = vrcp.f32 %v12124_v7  ;;  %v23672_v7 = vld [vmem:[#allocation24 + $0xc0] sm:$0xff] }
0x1535   :  { %19493 = vrcp.f32 %v12201_v6 }
0x1536   :  { %19495 = vpow2.f32 %v15426_v43 }
0x1540   :  { %v19490_v40 = vpop.eup %19489 }
0x1541   :  { %v19492_v24 = vpop.eup %19491 }
0x1542   :  { %v19494_v58 = vpop.eup %19493  ;;  %v12354_v17 = vmul.f32 %v19492_v24, %v19490_v40  ;;  %v23483_v60 = vpop.f32.mrf.mxu1 }
0x1543   :  { %v23485_v2 = vpop.f32.mrf.mxu0  ;;  %v19496_v25 = vpop.eup %19495  ;;  %v12353_v14 = vmul.f32 %v19494_v58, %v23090_v50 }
0x1544   :  { %v12350_v44 = vadd.f32 1.0, %v19496_v25  ;;  %v18410_v26 = vpop.f32.mrf.mxu1 }
0x1545   :  { %v18429_v63 = vpop.f32.mrf.mxu0  ;;  %v12355_v57 = vadd.f32 %v12354_v17, %v12353_v14 }
0x1546   :  { %19497 = vrcp.f32 %v12350_v44 }
0x1547   :  { %19499 = vtanh.f32 %v12355_v57 }
0x1553   :  { %v19498_v20 = vpop.eup %19497 }
0x1554   :  { %v19500_v46 = vpop.eup %19499  ;;  %v23488_v61 = vpop.f32.mrf.mxu1 }
0x1555   :  { %v23490_v33 = vpop.f32.mrf.mxu0  ;;  %v23492_v3 = vmul.f32 %v19500_v46, %v19498_v20 }
0x1556   :  { %v18448_v48 = vpop.f32.mrf.mxu1 }
0x1557   :  { %24278 = vst [vmem:[#allocation49_spill] sm:$0xff] %v23492_v3  ;;  %v18467_v18 = vpop.f32.mrf.mxu0  ;;  %18637 = vmatmul.mubr.msk.f32.vlgmr.msra.gmra.mxu1 %vm11114_vm6, %v23492_v3  ;;  %18656 = vmatmul.mubr.msk.f32.vlgmr.msra.gmra.mxu0 %vm11114_vm6, %v23492_v3  ;;  %v23738_v48 = vld [vmem:[#allocation25] sm:$0x1] }
0x1558   :  { %18659 = vmatpush3.msra.mxu1 %v23205_v32  ;;  %18678 = vmatpush3.msra.mxu0 %v23207_v52  ;;  %v23546_v52 = vld [vmem:[#allocation24 + $0x30] sm:$0xff]  ;;  %v23740_v18 = vld [vmem:[#allocation25 + $0x1] sm:$0x1] }
0x1559   :  { %18660 = vmatprep.subr.mxu1 %v24255_v37  ;;  %18679 = vmatprep.subr.mxu0 %v24255_v37 }
0x155a   :  { %18661 = vmatpush3.msra.mxu1 %v23215_v45  ;;  %18680 = vmatpush3.msra.mxu0 %v23217_v12  ;;  %v23548_v45 = vld [vmem:[#allocation24 + $0x70] sm:$0xff]  ;;  %v23554_v12 = vld [vmem:[#allocation24 + $0x28] sm:$0xff] }
0x155b   :  { %18662 = vmatprep.subr.mxu1 %v24255_v37  ;;  %18681 = vmatprep.subr.mxu0 %v24255_v37 }
0x155c   :  { %18663 = vmatpush3.msra.mxu1 %v23223_v4  ;;  %18682 = vmatpush3.msra.mxu0 %v23225_v13  ;;  %v23556_v4 = vld [vmem:[#allocation24 + $0x68] sm:$0xff]  ;;  %v23562_v13 = vld [vmem:[#allocation24 + $0x20] sm:$0xff] }
0x155d   :  { %18664 = vmatprep.subr.mxu1 %v24255_v37  ;;  %18683 = vmatprep.subr.mxu0 %v24255_v37 }
0x155e   :  { %18665 = vmatpush3.msra.mxu1 %v23231_v39  ;;  %18684 = vmatpush3.msra.mxu0 %v23233_v35  ;;  %v23564_v39 = vld [vmem:[#allocation24 + $0x60] sm:$0xff]  ;;  %v23570_v35 = vld [vmem:[#allocation24 + $0x18] sm:$0xff] }
0x155f   :  { %18666 = vmatprep.subr.mxu1 %v24255_v37  ;;  %18685 = vmatprep.subr.mxu0 %v24255_v37 }
0x1560   :  { %18667 = vmatpush3.msra.mxu1 %v23239_v56  ;;  %18686 = vmatpush3.msra.mxu0 %v23241_v54  ;;  %v23572_v56 = vld [vmem:[#allocation24 + $0x58] sm:$0xff]  ;;  %v23578_v54 = vld [vmem:[#allocation24 + $0x10] sm:$0xff] }
0x1561   :  { %18668 = vmatprep.subr.mxu1 %v24255_v37  ;;  %18687 = vmatprep.subr.mxu0 %v24255_v37 }
0x1562   :  { %18669 = vmatpush3.msra.mxu1 %v23247_v5  ;;  %18688 = vmatpush3.msra.mxu0 %v23249_v16  ;;  %v23580_v5 = vld [vmem:[#allocation24 + $0x50] sm:$0xff]  ;;  %v23586_v16 = vld [vmem:[#allocation24 + $0x8] sm:$0xff] }
0x1563   :  { %18670 = vmatprep.subr.mxu1 %v24255_v37  ;;  %18689 = vmatprep.subr.mxu0 %v24255_v37 }
0x1564   :  { %18671 = vmatpush3.msra.mxu1 %v23255_v53  ;;  %18690 = vmatpush3.msra.mxu0 %v23257_v15  ;;  %v23588_v53 = vld [vmem:[#allocation24 + $0x48] sm:$0xff]  ;;  %v23594_v15 = vld [vmem:[#allocation24] sm:$0xff] }
0x1565   :  { %18672 = vmatprep.subr.mxu1 %v24255_v37  ;;  %18691 = vmatprep.subr.mxu0 %v24255_v37 }
0x1566   :  { %v23526_v50 = vpop.f32.mrf.mxu1  ;;  %v23528_v21 = vpop.f32.mrf.mxu0  ;;  %18673 = vmatpush3.msra.mxu1 %v23263_v11  ;;  %18674 = vmatprep.mubr.msk.f32.mxu1 %vm19992_vm8, %v24255_v37  ;;  %v23598_v11 = vld [vmem:[#allocation24 + $0x40] sm:$0xff] }
0x1567   :  { %18692 = vmatpush3.msra.mxu0 %v23267_v23  ;;  %18693 = vmatprep.mubr.msk.f32.mxu0 %vm19992_vm8, %v24255_v37 }
0x1568   :  { %v18486_v36 = vpop.f32.mrf.mxu1  ;;  %v18505_v32 = vpop.f32.mrf.mxu0  ;;  %18675 = vmatmul.mubr.msk.f32.vlgmr.msra.gmra.mxu1 %vm11114_vm6, %v23492_v3  ;;  %18694 = vmatmul.mubr.msk.f32.vlgmr.msra.gmra.mxu0 %vm11114_vm6, %v23492_v3 }
0x1569   :  { %18696 = vmatprep.subr.mxu1 %v24255_v37  ;;  %18715 = vmatprep.subr.mxu0 %v24255_v37  ;;  %v12502_v36 = vadd.f32 %v23483_v60, %v23738_v48  ;;  %v12572_v32 = vadd.f32 %v23485_v2, %v23740_v18 }
0x156a   :  { %18697 = vmatpush3.msra.mxu1 %v23536_v9  ;;  %18716 = vmatpush3.msra.mxu0 %v23538_v51 }
0x156b   :  { %18698 = vmatprep.subr.mxu1 %v24255_v37  ;;  %18717 = vmatprep.subr.mxu0 %v24255_v37 }
0x156c   :  { %18699 = vmatpush3.msra.mxu1 %v23546_v52  ;;  %18718 = vmatpush3.msra.mxu0 %v23548_v45 }
0x156d   :  { %18700 = vmatprep.subr.mxu1 %v24255_v37  ;;  %18719 = vmatprep.subr.mxu0 %v24255_v37 }
0x156e   :  { %18701 = vmatpush3.msra.mxu1 %v23554_v12  ;;  %18720 = vmatpush3.msra.mxu0 %v23556_v4 }
0x156f   :  { %18702 = vmatprep.subr.mxu1 %v24255_v37  ;;  %18721 = vmatprep.subr.mxu0 %v24255_v37 }
0x1570   :  { %18703 = vmatpush3.msra.mxu1 %v23562_v13  ;;  %18722 = vmatpush3.msra.mxu0 %v23564_v39 }
0x1571   :  { %18704 = vmatprep.subr.mxu1 %v24255_v37  ;;  %18723 = vmatprep.subr.mxu0 %v24255_v37 }
0x1572   :  { %18705 = vmatpush3.msra.mxu1 %v23570_v35  ;;  %18724 = vmatpush3.msra.mxu0 %v23572_v56 }
0x1573   :  { %18706 = vmatprep.subr.mxu1 %v24255_v37  ;;  %18725 = vmatprep.subr.mxu0 %v24255_v37 }
0x1574   :  { %18707 = vmatpush3.msra.mxu1 %v23578_v54  ;;  %18726 = vmatpush3.msra.mxu0 %v23580_v5 }
0x1575   :  { %18708 = vmatprep.subr.mxu1 %v24255_v37  ;;  %18727 = vmatprep.subr.mxu0 %v24255_v37 }
0x1576   :  { %18709 = vmatpush3.msra.mxu1 %v23586_v16  ;;  %18728 = vmatpush3.msra.mxu0 %v23588_v53 }
0x1577   :  { %18710 = vmatprep.subr.mxu1 %v24255_v37  ;;  %18729 = vmatprep.subr.mxu0 %v24255_v37 }
0x1578   :  { %v23602_v23 = vpop.f32.mrf.mxu1  ;;  %v23604_v38 = vpop.f32.mrf.mxu0  ;;  %18711 = vmatpush3.msra.mxu1 %v23594_v15  ;;  %18712 = vmatprep.mubr.msk.f32.mxu1 %vm19992_vm8, %v24255_v37 }
0x1579   :  { %18730 = vmatpush3.msra.mxu0 %v23598_v11  ;;  %18731 = vmatprep.mubr.msk.f32.mxu0 %vm19992_vm8, %v24255_v37 }
0x157a   :  { %v18524_v62 = vpop.f32.mrf.mxu1  ;;  %v18543_v10 = vpop.f32.mrf.mxu0  ;;  %18713 = vmatmul.mubr.f32.vlgmr.msra.gmra.mxu1 %v24255_v37  ;;  %18732 = vmatmul.mubr.f32.vlgmr.msra.gmra.mxu0 %v24255_v37 }
0x157b   :  { %18734 = vmatprep.subr.mxu1 %v24255_v37  ;;  %18753 = vmatprep.subr.mxu0 %v24255_v37 }
0x157c   :  { %18735 = vmatpush3.msra.mxu1 %v23612_v49  ;;  %18754 = vmatpush3.msra.mxu0 %v23614_v27 }
0x157d   :  { %18736 = vmatprep.subr.mxu1 %v24255_v37  ;;  %18755 = vmatprep.subr.mxu0 %v24255_v37 }
0x157e   :  { %18737 = vmatpush3.msra.mxu1 %v23620_v41  ;;  %18756 = vmatpush3.msra.mxu0 %v23622_v55 }
0x157f   :  { %18738 = vmatprep.subr.mxu1 %v24255_v37  ;;  %18757 = vmatprep.subr.mxu0 %v24255_v37 }
0x1580   :  { %18739 = vmatpush3.msra.mxu1 %v23628_v19  ;;  %18758 = vmatpush3.msra.mxu0 %v23630_v0 }
0x1581   :  { %18740 = vmatprep.subr.mxu1 %v24255_v37  ;;  %18759 = vmatprep.subr.mxu0 %v24255_v37 }
0x1582   :  { %18741 = vmatpush3.msra.mxu1 %v23636_v29  ;;  %18760 = vmatpush3.msra.mxu0 %v23638_v28 }
0x1583   :  { %18742 = vmatprep.subr.mxu1 %v24255_v37  ;;  %18761 = vmatprep.subr.mxu0 %v24255_v37 }
0x1584   :  { %18743 = vmatpush3.msra.mxu1 %v23644_v1  ;;  %18762 = vmatpush3.msra.mxu0 %v23646_v34 }
0x1585   :  { %18744 = vmatprep.subr.mxu1 %v24255_v37  ;;  %18763 = vmatprep.subr.mxu0 %v24255_v37 }
0x1586   :  { %18745 = vmatpush3.msra.mxu1 %v23652_v31  ;;  %18764 = vmatpush3.msra.mxu0 %v23654_v8 }
0x1587   :  { %18746 = vmatprep.subr.mxu1 %v24255_v37  ;;  %18765 = vmatprep.subr.mxu0 %v24255_v37 }
0x1588   :  { %18747 = vmatpush3.msra.mxu1 %v23660_v59  ;;  %18766 = vmatpush3.msra.mxu0 %v23662_v22 }
0x1589   :  { %18748 = vmatprep.subr.mxu1 %v24255_v37  ;;  %18767 = vmatprep.subr.mxu0 %v24255_v37 }
0x158a   :  { %v23676_v30 = vpop.f32.mrf.mxu1  ;;  %v23678_v47 = vpop.f32.mrf.mxu0  ;;  %18749 = vmatpush3.msra.mxu1 %v23668_v42  ;;  %18750 = vmatprep.mubr.msk.f32.mxu1 %vm19992_vm8, %v24255_v37 }
0x158b   :  { %18768 = vmatpush3.msra.mxu0 %v23672_v7  ;;  %18769 = vmatprep.mubr.msk.f32.mxu0 %vm19992_vm8, %v24255_v37 }
0x158c   :  { %v18562_v6 = vpop.f32.mrf.mxu1  ;;  %v18581_v43 = vpop.f32.mrf.mxu0  ;;  %18751 = vmatmul.mubr.f32.vlgmr.msra.gmra.mxu1 %v24255_v37  ;;  %18770 = vmatmul.mubr.f32.vlgmr.msra.gmra.mxu0 %v24255_v37 }
0x158d   :  { %18772 = vmatprep.subr.mxu1 %v24255_v37  ;;  %18791 = vmatprep.subr.mxu0 %v24255_v37 }
0x158e   :  { %18773 = vmatpush3.msra.mxu1 %v23536_v9  ;;  %18792 = vmatpush3.msra.mxu0 %v23538_v51 }
0x158f   :  { %18774 = vmatprep.subr.mxu1 %v24255_v37  ;;  %18793 = vmatprep.subr.mxu0 %v24255_v37 }
0x1590   :  { %18775 = vmatpush3.msra.mxu1 %v23546_v52  ;;  %18794 = vmatpush3.msra.mxu0 %v23548_v45 }
0x1591   :  { %18776 = vmatprep.subr.mxu1 %v24255_v37  ;;  %18795 = vmatprep.subr.mxu0 %v24255_v37 }
0x1592   :  { %18777 = vmatpush3.msra.mxu1 %v23554_v12  ;;  %18796 = vmatpush3.msra.mxu0 %v23556_v4 }
0x1593   :  { %18778 = vmatprep.subr.mxu1 %v24255_v37  ;;  %18797 = vmatprep.subr.mxu0 %v24255_v37 }
0x1594   :  { %18779 = vmatpush3.msra.mxu1 %v23562_v13  ;;  %18798 = vmatpush3.msra.mxu0 %v23564_v39 }
0x1595   :  { %18780 = vmatprep.subr.mxu1 %v24255_v37  ;;  %18799 = vmatprep.subr.mxu0 %v24255_v37 }
0x1596   :  { %18781 = vmatpush3.msra.mxu1 %v23570_v35  ;;  %18800 = vmatpush3.msra.mxu0 %v23572_v56 }
0x1597   :  { %18782 = vmatprep.subr.mxu1 %v24255_v37  ;;  %18801 = vmatprep.subr.mxu0 %v24255_v37 }
0x1598   :  { %18783 = vmatpush3.msra.mxu1 %v23578_v54  ;;  %18802 = vmatpush3.msra.mxu0 %v23580_v5 }
0x1599   :  { %18784 = vmatprep.subr.mxu1 %v24255_v37  ;;  %18803 = vmatprep.subr.mxu0 %v24255_v37 }
0x159a   :  { %18785 = vmatpush3.msra.mxu1 %v23586_v16  ;;  %18804 = vmatpush3.msra.mxu0 %v23588_v53 }
0x159b   :  { %18786 = vmatprep.subr.mxu1 %v24255_v37  ;;  %18805 = vmatprep.subr.mxu0 %v24255_v37 }
0x159c   :  { %v23718_v40 = vpop.f32.mrf.mxu1  ;;  %v23720_v24 = vpop.f32.mrf.mxu0  ;;  %18787 = vmatpush3.msra.mxu1 %v23594_v15  ;;  %18806 = vmatpush3.msra.mxu0 %v23598_v11 }
0x159d   :  { %24279 = vst [vmem:[#allocation46_spill] sm:$0xff] %v23718_v40  ;;  %24280 = vst [vmem:[#allocation48_spill] sm:$0xff] %v23720_v24  ;;  %18788 = vmatprep.mubr.msk.f32.mxu1 %vm19992_vm8, %v24255_v37  ;;  %18807 = vmatprep.mubr.msk.f32.mxu0 %vm19992_vm8, %v24255_v37 }
0x159e   :  { %v18600_v58 = vpop.f32.mrf.mxu1  ;;  %v18619_v17 = vpop.f32.mrf.mxu0  ;;  %18810 = vmatprep.subr.mxu1 %v24255_v37  ;;  %18829 = vmatprep.subr.mxu0 %v24255_v37 }
0x1617   :  { %v23730_v25 = vpop.f32.mrf.mxu1  ;;  %v23732_v14 = vpop.f32.mrf.mxu0 }
0x1618   :  { %24281 = vst [vmem:[#allocation50_spill] sm:$0xff] %v23730_v25  ;;  %24282 = vst [vmem:[#allocation51_spill] sm:$0xff] %v23732_v14 }
0x1619   :  { %v18638_v44 = vpop.f32.mrf.mxu1  ;;  %v18657_v26 = vpop.f32.mrf.mxu0 }
0x1628   :  { %v23734_v63 = vpop.f32.mrf.mxu1  ;;  %v23736_v57 = vpop.f32.mrf.mxu0 }
0x1629   :  { %24283 = vst [vmem:[#allocation52_spill] sm:$0xff] %v23734_v63  ;;  %24284 = vst [vmem:[#allocation53_spill] sm:$0xff] %v23736_v57 }
0x162a   :  { %v18676_v20 = vpop.f32.mrf.mxu1  ;;  %v18695_v46 = vpop.f32.mrf.mxu0 }
0x162b   :  { %v23746_v20 = vld [vmem:[#allocation25 + $0x2] sm:$0x1]  ;;  %v23748_v46 = vld [vmem:[#allocation25 + $0x3] sm:$0x1] }
0x162c   :  { %v12642_v60 = vadd.f32 %v23488_v61, %v23746_v20  ;;  %v12712_v2 = vadd.f32 %v23490_v33, %v23748_v46 }
0x163a   :  { %v13624_v62 = vpop.f32.mrf.mxu1  ;;  %v13701_v10 = vpop.f32.mrf.mxu0 }
0x163b   :  { %v13628_v6 = vadd.f32 %v13624_v62, %v12502_v36  ;;  %v13705_v43 = vadd.f32 %v13701_v10, %v12572_v32 }
0x163c   :  { %v18714_v58 = vpop.f32.mrf.mxu1  ;;  %v18733_v17 = vpop.f32.mrf.mxu0 }
0x163d   :  { %v15443_v44 = vmul.f32 -1.442695, %v13628_v6  ;;  %v15444_v26 = vmul.f32 -1.442695, %v13705_v43 }
0x163f   :  { %19501 = vpow2.f32 %v15443_v44 }
0x1640   :  { %19503 = vpow2.f32 %v15444_v26 }
0x164c   :  { %v19502_v3 = vpop.eup %19501  ;;  %v13778_v57 = vpop.f32.mrf.mxu1 }
0x164d   :  { %v13850_v36 = vpop.f32.mrf.mxu0  ;;  %v19504_v32 = vpop.eup %19503  ;;  %v13632_v62 = vadd.f32 1.0, %v19502_v3  ;;  %v13782_v10 = vadd.f32 %v13778_v57, %v12642_v60 }
0x164e   :  { %v13854_v6 = vadd.f32 %v13850_v36, %v12712_v2  ;;  %v13709_v43 = vadd.f32 1.0, %v19504_v32  ;;  %v18752_v58 = vpop.f32.mrf.mxu1 }
0x164f   :  { %v18771_v17 = vpop.f32.mrf.mxu0  ;;  %19505 = vrcp.f32 %v13632_v62  ;;  %v12992_v58 = vadd.f32 %v23604_v38, %v23748_v46 }
0x1650   :  { %v15445_v44 = vmul.f32 -1.442695, %v13854_v6  ;;  %19507 = vrcp.f32 %v13709_v43  ;;  %v12922_v43 = vadd.f32 %v23602_v23, %v23746_v20 }
0x1651   :  { %19509 = vtanh.f32 %v13782_v10 }
0x1652   :  { %19511 = vpow2.f32 %v15445_v44 }
0x165c   :  { %v19506_v26 = vpop.eup %19505 }
0x165d   :  { %v19508_v61 = vpop.eup %19507 }
0x165e   :  { %v19510_v63 = vpop.eup %19509  ;;  %v13861_v14 = vmul.f32 0.0, %v19508_v61 }
0x165f   :  { %v19512_v33 = vpop.eup %19511  ;;  %v13862_v25 = vmul.f32 %v19510_v63, %v19506_v26 }
0x1660   :  { %v13858_v24 = vadd.f32 1.0, %v19512_v33 }
0x1661   :  { %v23754_v40 = vadd.f32 %v13862_v25, %v13861_v14  ;;  %v12852_v25 = vadd.f32 %v23528_v21, %v23740_v18 }
0x1662   :  { %19513 = vrcp.f32 %v13858_v24  ;;  %v12782_v24 = vadd.f32 %v23526_v50, %v23738_v48 }
0x1663   :  { %19515 = vtanh.f32 %v23754_v40 }
0x166f   :  { %v19514_v3 = vpop.eup %19513 }
0x1670   :  { %v19516_v57 = vpop.eup %19515 }
0x1671   :  { %v23757_v60 = vmul.f32 %v19516_v57, %v19514_v3 }
0x1673   :  { %18789 = vmatmul.mubr.msk.f32.vlgmr.msra.gmra.mxu1 %vm11114_vm6, %v23757_v60  ;;  %18808 = vmatmul.mubr.msk.f32.vlgmr.msra.gmra.mxu0 %vm11114_vm6, %v23757_v60 }
0x1674   :  { %18811 = vmatpush3.msra.mxu1 %v23612_v49  ;;  %18830 = vmatpush3.msra.mxu0 %v23614_v27 }
0x1675   :  { %18812 = vmatprep.subr.mxu1 %v24255_v37  ;;  %18831 = vmatprep.subr.mxu0 %v24255_v37 }
0x1676   :  { %18813 = vmatpush3.msra.mxu1 %v23620_v41  ;;  %18832 = vmatpush3.msra.mxu0 %v23622_v55 }
0x1677   :  { %18814 = vmatprep.subr.mxu1 %v24255_v37  ;;  %18833 = vmatprep.subr.mxu0 %v24255_v37 }
0x1678   :  { %18815 = vmatpush3.msra.mxu1 %v23628_v19  ;;  %18834 = vmatpush3.msra.mxu0 %v23630_v0 }
0x1679   :  { %18816 = vmatprep.subr.mxu1 %v24255_v37  ;;  %18835 = vmatprep.subr.mxu0 %v24255_v37 }
0x167a   :  { %18817 = vmatpush3.msra.mxu1 %v23636_v29  ;;  %18836 = vmatpush3.msra.mxu0 %v23638_v28 }
0x167b   :  { %18818 = vmatprep.subr.mxu1 %v24255_v37  ;;  %18837 = vmatprep.subr.mxu0 %v24255_v37 }
0x167c   :  { %18819 = vmatpush3.msra.mxu1 %v23644_v1  ;;  %18838 = vmatpush3.msra.mxu0 %v23646_v34 }
0x167d   :  { %18820 = vmatprep.subr.mxu1 %v24255_v37  ;;  %18839 = vmatprep.subr.mxu0 %v24255_v37 }
0x167e   :  { %18821 = vmatpush3.msra.mxu1 %v23652_v31  ;;  %18840 = vmatpush3.msra.mxu0 %v23654_v8 }
0x167f   :  { %18822 = vmatprep.subr.mxu1 %v24255_v37  ;;  %18841 = vmatprep.subr.mxu0 %v24255_v37 }
0x1680   :  { %18823 = vmatpush3.msra.mxu1 %v23660_v59  ;;  %18842 = vmatpush3.msra.mxu0 %v23662_v22 }
0x1681   :  { %18824 = vmatprep.subr.mxu1 %v24255_v37  ;;  %18843 = vmatprep.subr.mxu0 %v24255_v37 }
0x1682   :  { %18825 = vmatpush3.msra.mxu1 %v23668_v42  ;;  %18826 = vmatprep.mubr.msk.f32.mxu1 %vm19992_vm8, %v24255_v37 }
0x1683   :  { %18844 = vmatpush3.msra.mxu0 %v23672_v7  ;;  %18845 = vmatprep.mubr.msk.f32.mxu0 %vm19992_vm8, %v24255_v37 }
0x1684   :  { %18827 = vmatmul.mubr.msk.f32.vlgmr.msra.gmra.mxu1 %vm11114_vm6, %v23757_v60  ;;  %18846 = vmatmul.mubr.msk.f32.vlgmr.msra.gmra.mxu0 %vm11114_vm6, %v23757_v60 }
0x1685   :  { %18848 = vmatprep.subr.mxu1 %v24255_v37  ;;  %18867 = vmatprep.subr.mxu0 %v24255_v37 }
0x1686   :  { %18849 = vmatpush3.msra.mxu1 %v23536_v9  ;;  %18868 = vmatpush3.msra.mxu0 %v23538_v51 }
0x1687   :  { %18850 = vmatprep.subr.mxu1 %v24255_v37  ;;  %18869 = vmatprep.subr.mxu0 %v24255_v37 }
0x1688   :  { %18851 = vmatpush3.msra.mxu1 %v23546_v52  ;;  %18870 = vmatpush3.msra.mxu0 %v23548_v45 }
0x1689   :  { %18852 = vmatprep.subr.mxu1 %v24255_v37  ;;  %18871 = vmatprep.subr.mxu0 %v24255_v37 }
0x168a   :  { %18853 = vmatpush3.msra.mxu1 %v23554_v12  ;;  %18872 = vmatpush3.msra.mxu0 %v23556_v4 }
0x168b   :  { %18854 = vmatprep.subr.mxu1 %v24255_v37  ;;  %18873 = vmatprep.subr.mxu0 %v24255_v37 }
0x168c   :  { %18855 = vmatpush3.msra.mxu1 %v23562_v13  ;;  %18874 = vmatpush3.msra.mxu0 %v23564_v39 }
0x168d   :  { %18856 = vmatprep.subr.mxu1 %v24255_v37  ;;  %18875 = vmatprep.subr.mxu0 %v24255_v37 }
0x168e   :  { %18857 = vmatpush3.msra.mxu1 %v23570_v35  ;;  %18876 = vmatpush3.msra.mxu0 %v23572_v56 }
0x168f   :  { %18858 = vmatprep.subr.mxu1 %v24255_v37  ;;  %18877 = vmatprep.subr.mxu0 %v24255_v37 }
0x1690   :  { %18859 = vmatpush3.msra.mxu1 %v23578_v54  ;;  %18878 = vmatpush3.msra.mxu0 %v23580_v5 }
0x1691   :  { %18860 = vmatprep.subr.mxu1 %v24255_v37  ;;  %18879 = vmatprep.subr.mxu0 %v24255_v37 }
0x1692   :  { %18861 = vmatpush3.msra.mxu1 %v23586_v16  ;;  %18880 = vmatpush3.msra.mxu0 %v23588_v53 }
0x1693   :  { %18862 = vmatprep.subr.mxu1 %v24255_v37  ;;  %18881 = vmatprep.subr.mxu0 %v24255_v37 }
0x1694   :  { %18863 = vmatpush3.msra.mxu1 %v23594_v15  ;;  %18882 = vmatpush3.msra.mxu0 %v23598_v11 }
0x1695   :  { %18864 = vmatprep.mubr.msk.f32.mxu1 %vm19992_vm8, %v24255_v37  ;;  %18883 = vmatprep.mubr.msk.f32.mxu0 %vm19992_vm8, %v24255_v37 }
0x1696   :  { %18886 = vmatprep.subr.mxu1 %v24255_v37  ;;  %18905 = vmatprep.subr.mxu0 %v24255_v37 }
0x1733   :  { %v13935_v14 = vpop.f32.mrf.mxu1  ;;  %v14012_v63 = vpop.f32.mrf.mxu0 }
0x1734   :  { %v13939_v2 = vadd.f32 %v13935_v14, %v12782_v24  ;;  %v14016_v36 = vadd.f32 %v14012_v63, %v12852_v25 }
0x1735   :  { %v18790_v32 = vpop.f32.mrf.mxu1  ;;  %v18809_v62 = vpop.f32.mrf.mxu0 }
0x1736   :  { %v15447_v10 = vmul.f32 -1.442695, %v13939_v2  ;;  %v15449_v6 = vmul.f32 -1.442695, %v14016_v36 }
0x1738   :  { %19517 = vpow2.f32 %v15447_v10 }
0x1739   :  { %19519 = vpow2.f32 %v15449_v6 }
0x1744   :  { %v14089_v50 = vpop.f32.mrf.mxu1  ;;  %v14161_v17 = vpop.f32.mrf.mxu0 }
0x1745   :  { %v19518_v44 = vpop.eup %19517  ;;  %v14093_v21 = vadd.f32 %v14089_v50, %v12922_v43  ;;  %v14165_v26 = vadd.f32 %v14161_v17, %v12992_v58 }
0x1746   :  { %v19520_v61 = vpop.eup %19519  ;;  %v13943_v33 = vadd.f32 1.0, %v19518_v44  ;;  %v18828_v3 = vpop.f32.mrf.mxu1 }
0x1747   :  { %v18847_v57 = vpop.f32.mrf.mxu0  ;;  %v14020_v24 = vadd.f32 1.0, %v19520_v61  ;;  %19521 = vtanh.f32 %v14093_v21  ;;  %v15452_v25 = vmul.f32 -1.442695, %v14165_v26 }
0x1748   :  { %19523 = vrcp.f32 %v13943_v33 }
0x1749   :  { %19525 = vrcp.f32 %v14020_v24 }
0x174a   :  { %19527 = vpow2.f32 %v15452_v25 }
0x1754   :  { %v19522_v14 = vpop.eup %19521 }
0x1755   :  { %v19524_v23 = vpop.eup %19523 }
0x1756   :  { %v19526_v63 = vpop.eup %19525  ;;  %v14173_v2 = vmul.f32 %v19524_v23, %v19522_v14 }
0x1757   :  { %v19528_v38 = vpop.eup %19527  ;;  %v14172_v36 = vmul.f32 %v19526_v63, %v23754_v40 }
0x1758   :  { %v14169_v32 = vadd.f32 1.0, %v19528_v38 }
0x1759   :  { %v23848_v62 = vadd.f32 %v14173_v2, %v14172_v36 }
0x175a   :  { %19529 = vrcp.f32 %v14169_v32 }
0x175b   :  { %19531 = vtanh.f32 %v23848_v62 }
0x1767   :  { %v19530_v10 = vpop.eup %19529 }
0x1768   :  { %v19532_v6 = vpop.eup %19531 }
0x1769   :  { %v23851_v43 = vmul.f32 %v19532_v6, %v19530_v10 }
0x176b   :  { %18865 = vmatmul.mubr.msk.f32.vlgmr.msra.gmra.mxu1 %vm11114_vm6, %v23851_v43  ;;  %18884 = vmatmul.mubr.msk.f32.vlgmr.msra.gmra.mxu0 %vm11114_vm6, %v23851_v43  ;;  %v14799_v38 = vrot.slane %v23851_v43, 7 }
0x176c   :  { %18887 = vmatpush3.msra.mxu1 %v23612_v49  ;;  %18906 = vmatpush3.msra.mxu0 %v23614_v27 }
0x176d   :  { %18888 = vmatprep.subr.mxu1 %v24255_v37  ;;  %18907 = vmatprep.subr.mxu0 %v24255_v37 }
0x176e   :  { %18889 = vmatpush3.msra.mxu1 %v23620_v41  ;;  %18908 = vmatpush3.msra.mxu0 %v23622_v55 }
0x176f   :  { %18890 = vmatprep.subr.mxu1 %v24255_v37  ;;  %18909 = vmatprep.subr.mxu0 %v24255_v37 }
0x1770   :  { %18891 = vmatpush3.msra.mxu1 %v23628_v19  ;;  %18910 = vmatpush3.msra.mxu0 %v23630_v0 }
0x1771   :  { %18892 = vmatprep.subr.mxu1 %v24255_v37  ;;  %18911 = vmatprep.subr.mxu0 %v24255_v37 }
0x1772   :  { %18893 = vmatpush3.msra.mxu1 %v23636_v29  ;;  %18912 = vmatpush3.msra.mxu0 %v23638_v28 }
0x1773   :  { %18894 = vmatprep.subr.mxu1 %v24255_v37  ;;  %18913 = vmatprep.subr.mxu0 %v24255_v37 }
0x1774   :  { %18895 = vmatpush3.msra.mxu1 %v23644_v1  ;;  %18914 = vmatpush3.msra.mxu0 %v23646_v34 }
0x1775   :  { %18896 = vmatprep.subr.mxu1 %v24255_v37  ;;  %18915 = vmatprep.subr.mxu0 %v24255_v37 }
0x1776   :  { %18897 = vmatpush3.msra.mxu1 %v23652_v31  ;;  %18916 = vmatpush3.msra.mxu0 %v23654_v8 }
0x1777   :  { %18898 = vmatprep.subr.mxu1 %v24255_v37  ;;  %18917 = vmatprep.subr.mxu0 %v24255_v37 }
0x1778   :  { %18899 = vmatpush3.msra.mxu1 %v23660_v59  ;;  %18918 = vmatpush3.msra.mxu0 %v23662_v22 }
0x1779   :  { %18900 = vmatprep.subr.mxu1 %v24255_v37  ;;  %18919 = vmatprep.subr.mxu0 %v24255_v37 }
0x177a   :  { %18901 = vmatpush3.msra.mxu1 %v23668_v42  ;;  %18902 = vmatprep.mubr.msk.f32.mxu1 %vm19992_vm8, %v24255_v37 }
0x177b   :  { %18920 = vmatpush3.msra.mxu0 %v23672_v7  ;;  %18921 = vmatprep.mubr.msk.f32.mxu0 %vm19992_vm8, %v24255_v37 }
0x177c   :  { %18903 = vmatmul.mubr.msk.f32.vlgmr.msra.gmra.mxu1 %vm11114_vm6, %v23851_v43  ;;  %18922 = vmatmul.mubr.msk.f32.vlgmr.msra.gmra.mxu0 %vm11114_vm6, %v23851_v43 }
0x177d   :  { %18924 = vmatprep.subr.mxu1 %v24255_v37  ;;  %18943 = vmatprep.subr.mxu0 %v24255_v37 }
0x177e   :  { %18925 = vmatpush3.msra.mxu1 %v23536_v9  ;;  %18944 = vmatpush3.msra.mxu0 %v23538_v51  ;;  %v13062_v9 = vadd.f32 %v23676_v30, %v23738_v48  ;;  %v13132_v51 = vadd.f32 %v23678_v47, %v23740_v18 }
0x177f   :  { %18926 = vmatprep.subr.mxu1 %v24255_v37  ;;  %18945 = vmatprep.subr.mxu0 %v24255_v37 }
0x1780   :  { %18927 = vmatpush3.msra.mxu1 %v23546_v52  ;;  %18946 = vmatpush3.msra.mxu0 %v23548_v45 }
0x1781   :  { %18928 = vmatprep.subr.mxu1 %v24255_v37  ;;  %18947 = vmatprep.subr.mxu0 %v24255_v37 }
0x1782   :  { %18929 = vmatpush3.msra.mxu1 %v23554_v12  ;;  %18948 = vmatpush3.msra.mxu0 %v23556_v4 }
0x1783   :  { %18930 = vmatprep.subr.mxu1 %v24255_v37  ;;  %18949 = vmatprep.subr.mxu0 %v24255_v37 }
0x1784   :  { %18931 = vmatpush3.msra.mxu1 %v23562_v13  ;;  %18950 = vmatpush3.msra.mxu0 %v23564_v39 }
0x1785   :  { %18932 = vmatprep.subr.mxu1 %v24255_v37  ;;  %18951 = vmatprep.subr.mxu0 %v24255_v37 }
0x1786   :  { %18933 = vmatpush3.msra.mxu1 %v23570_v35  ;;  %18952 = vmatpush3.msra.mxu0 %v23572_v56 }
0x1787   :  { %18934 = vmatprep.subr.mxu1 %v24255_v37  ;;  %18953 = vmatprep.subr.mxu0 %v24255_v37 }
0x1788   :  { %18935 = vmatpush3.msra.mxu1 %v23578_v54  ;;  %18954 = vmatpush3.msra.mxu0 %v23580_v5  ;;  %v24285_v54 = vld [vmem:[#allocation46_spill] sm:$0xff] }
0x1789   :  { %18936 = vmatprep.subr.mxu1 %v24255_v37  ;;  %18955 = vmatprep.subr.mxu0 %v24255_v37  ;;  %v13202_v5 = vadd.f32 %v24285_v54, %v23746_v20 }
0x178a   :  { %18937 = vmatpush3.msra.mxu1 %v23586_v16  ;;  %18956 = vmatpush3.msra.mxu0 %v23588_v53  ;;  %v24286_v16 = vld [vmem:[#allocation48_spill] sm:$0xff] }
0x178b   :  { %18938 = vmatprep.subr.mxu1 %v24255_v37  ;;  %18957 = vmatprep.subr.mxu0 %v24255_v37  ;;  %v13272_v53 = vadd.f32 %v24286_v16, %v23748_v46 }
0x178c   :  { %18939 = vmatpush3.msra.mxu1 %v23594_v15  ;;  %18958 = vmatpush3.msra.mxu0 %v23598_v11 }
0x178d   :  { %18940 = vmatprep.mubr.msk.f32.mxu1 %vm19992_vm8, %v24255_v37  ;;  %18959 = vmatprep.mubr.msk.f32.mxu0 %vm19992_vm8, %v24255_v37 }
0x178e   :  { %18962 = vmatprep.subr.mxu1 %v24255_v37  ;;  %18981 = vmatprep.subr.mxu0 %v24255_v37 }
0x182b   :  { %v14246_v52 = vpop.f32.mrf.mxu1  ;;  %v14323_v45 = vpop.f32.mrf.mxu0 }
0x182c   :  { %v14250_v12 = vadd.f32 %v14246_v52, %v13062_v9  ;;  %v14327_v4 = vadd.f32 %v14323_v45, %v13132_v51  ;;  %v24289_v51 = vld [vmem:[#allocation52_spill] sm:$0xff]  ;;  %v24290_v45 = vld [vmem:[#allocation53_spill] sm:$0xff] }
0x182d   :  { %v18866_v13 = vpop.f32.mrf.mxu1  ;;  %v18885_v39 = vpop.f32.mrf.mxu0  ;;  %v13485_v52 = vadd.f32 %v24289_v51, %v23746_v20 }
0x182e   :  { %v15454_v35 = vmul.f32 -1.442695, %v14250_v12  ;;  %v15456_v56 = vmul.f32 -1.442695, %v14327_v4  ;;  %v13555_v12 = vadd.f32 %v24290_v45, %v23748_v46 }
0x1830   :  { %19533 = vpow2.f32 %v15454_v35 }
0x1831   :  { %19535 = vpow2.f32 %v15456_v56 }
0x183c   :  { %v14400_v15 = vpop.f32.mrf.mxu1  ;;  %v14472_v11 = vpop.f32.mrf.mxu0 }
0x183d   :  { %v19534_v30 = vpop.eup %19533  ;;  %v14404_v47 = vadd.f32 %v14400_v15, %v13202_v5  ;;  %v14476_v40 = vadd.f32 %v14472_v11, %v13272_v53 }
0x183e   :  { %v19536_v58 = vpop.eup %19535  ;;  %v14254_v50 = vadd.f32 1.0, %v19534_v30  ;;  %v18904_v17 = vpop.f32.mrf.mxu1 }
0x183f   :  { %v18923_v44 = vpop.f32.mrf.mxu0  ;;  %v14331_v21 = vadd.f32 1.0, %v19536_v58  ;;  %19537 = vtanh.f32 %v14404_v47  ;;  %v15459_v26 = vmul.f32 -1.442695, %v14476_v40 }
0x1840   :  { %19539 = vrcp.f32 %v14254_v50 }
0x1841   :  { %19541 = vrcp.f32 %v14331_v21 }
0x1842   :  { %19543 = vpow2.f32 %v15459_v26 }
0x184c   :  { %v19538_v61 = vpop.eup %19537 }
0x184d   :  { %v19540_v33 = vpop.eup %19539 }
0x184e   :  { %v19542_v3 = vpop.eup %19541  ;;  %v14484_v57 = vmul.f32 %v19540_v33, %v19538_v61  ;;  %v14897_v61 = vlaneseq }
0x184f   :  { %v19544_v24 = vpop.eup %19543  ;;  %v14483_v25 = vmul.f32 %v19542_v3, %v23848_v62  ;;  %v14806_v62 = vsel %vm5927_vm9, %v23757_v60, %v14799_v38  ;;  %vm15023_vm9 = vcmask 392192  }
0x1850   :  { %v14480_v14 = vadd.f32 1.0, %v19544_v24  ;;  %v24044_v33 = vshrl.u32 %v14897_v61, 7 }
0x1851   :  { %v23942_v23 = vadd.f32 %v14484_v57, %v14483_v25  ;;  %v15467_v57 = vld [vmem:[#allocation28] ss:$0 sm:$0xff] }
0x1852   :  { %19545 = vrcp.f32 %v14480_v14  ;;  %v14899_v3 = vsub.s32 0, %v24044_v33  ;;  %v24291_v14 = vld [vmem:[#allocation49_spill] sm:$0xff] }
0x1853   :  { %19547 = vtanh.f32 %v23942_v23 }
0x185f   :  { %v19546_v63 = vpop.eup %19545 }
0x1860   :  { %v19548_v2 = vpop.eup %19547 }
0x1861   :  { %v14487_v36 = vmul.f32 %v19548_v2, %v19546_v63 }
0x1863   :  { %18941 = vmatmul.mubr.msk.f32.vlgmr.msra.gmra.mxu1 %vm11114_vm6, %v14487_v36  ;;  %18960 = vmatmul.mubr.msk.f32.vlgmr.msra.gmra.mxu0 %vm11114_vm6, %v14487_v36  ;;  %v14801_v32 = vrot.slane %v14487_v36, 6 }
0x1864   :  { %18963 = vmatpush3.msra.mxu1 %v23612_v49  ;;  %18982 = vmatpush3.msra.mxu0 %v23614_v27  ;;  %v14816_v49 = vld [vmem:[%s24147_s19 + $0x38] sm:$0xff]  ;;  %v14815_v27 = vld [vmem:[%s24147_s19 + $0x30] sm:$0xff] }
0x1865   :  { %18964 = vmatprep.subr.mxu1 %v24255_v37  ;;  %18983 = vmatprep.subr.mxu0 %v24255_v37  ;;  %v23955_v10 = vsel %vm5929_vm10, %v14806_v62, %v14801_v32  ;;  %v14940_v32 = vld [vmem:[%s24149_s21 + $0x30] sm:$0xff]  ;;  %v14939_v62 = vld [vmem:[%s24149_s21 + $0x28] sm:$0xff]  ;;  %vm15110_vm10 = vcmask 60416  }
0x1866   :  { %18965 = vmatpush3.msra.mxu1 %v23620_v41  ;;  %18984 = vmatpush3.msra.mxu0 %v23622_v55  ;;  %v14814_v41 = vld [vmem:[%s24147_s19 + $0x28] sm:$0xff]  ;;  %v14813_v55 = vld [vmem:[%s24147_s19 + $0x20] sm:$0xff] }
0x1867   :  { %18966 = vmatprep.subr.mxu1 %v24255_v37  ;;  %18985 = vmatprep.subr.mxu0 %v24255_v37 }
0x1868   :  { %18967 = vmatpush3.msra.mxu1 %v23628_v19  ;;  %18986 = vmatpush3.msra.mxu0 %v23630_v0  ;;  %v14812_v19 = vld [vmem:[%s24147_s19 + $0x18] sm:$0xff]  ;;  %v14811_v0 = vld [vmem:[%s24147_s19 + $0x10] sm:$0xff] }
0x1869   :  { %18968 = vmatprep.subr.mxu1 %v24255_v37  ;;  %18987 = vmatprep.subr.mxu0 %v24255_v37 }
0x186a   :  { %18969 = vmatpush3.msra.mxu1 %v23636_v29  ;;  %18988 = vmatpush3.msra.mxu0 %v23638_v28  ;;  %v14810_v29 = vld [vmem:[%s24147_s19 + $0x8] sm:$0xff]  ;;  %v14809_v28 = vld [vmem:[%s24147_s19] sm:$0xff] }
0x186b   :  { %18970 = vmatprep.subr.mxu1 %v24255_v37  ;;  %18989 = vmatprep.subr.mxu0 %v24255_v37 }
0x186c   :  { %18971 = vmatpush3.msra.mxu1 %v23644_v1  ;;  %18990 = vmatpush3.msra.mxu0 %v23646_v34  ;;  %v24287_v1 = vld [vmem:[#allocation50_spill] sm:$0xff] }
0x186d   :  { %18972 = vmatprep.subr.mxu1 %v24255_v37  ;;  %18991 = vmatprep.subr.mxu0 %v24255_v37  ;;  %v13345_v34 = vadd.f32 %v24287_v1, %v23738_v48 }
0x186e   :  { %18973 = vmatpush3.msra.mxu1 %v23652_v31  ;;  %18992 = vmatpush3.msra.mxu0 %v23654_v8  ;;  %v24288_v31 = vld [vmem:[#allocation51_spill] sm:$0xff] }
0x186f   :  { %18974 = vmatprep.subr.mxu1 %v24255_v37  ;;  %18993 = vmatprep.subr.mxu0 %v24255_v37  ;;  %v13415_v8 = vadd.f32 %v24288_v31, %v23740_v18 }
0x1870   :  { %18975 = vmatpush3.msra.mxu1 %v23660_v59  ;;  %18994 = vmatpush3.msra.mxu0 %v23662_v22 }
0x1871   :  { %18976 = vmatprep.subr.mxu1 %v24255_v37  ;;  %18995 = vmatprep.subr.mxu0 %v24255_v37 }
0x1872   :  { %18977 = vmatpush3.msra.mxu1 %v23668_v42  ;;  %18978 = vmatprep.mubr.msk.f32.mxu1 %vm19992_vm8, %v24255_v37 }
0x1873   :  { %18996 = vmatpush3.msra.mxu0 %v23672_v7  ;;  %18997 = vmatprep.mubr.msk.f32.mxu0 %vm19992_vm8, %v24255_v37 }
0x1874   :  { %18979 = vmatmul.mubr.msk.f32.vlgmr.msra.gmra.mxu1 %vm11114_vm6, %v14487_v36  ;;  %18998 = vmatmul.mubr.msk.f32.vlgmr.msra.gmra.mxu0 %vm11114_vm6, %v14487_v36  ;;  %v14941_v36 = vld [vmem:[%s24149_s21 + $0x38] sm:$0xff] }
0x1875   :  { %19000 = vmatprep.subr.mxu1 %v24255_v37  ;;  %19016 = vmatprep.mubr.msk.f32.mxu1 %vm19992_vm8, %v24255_v37 }
0x1876   :  { %19019 = vmatprep.subr.mxu0 %v24255_v37  ;;  %19035 = vmatprep.mubr.msk.f32.mxu0 %vm19992_vm8, %v24255_v37 }
0x1877   :  { %19001 = vmatpush3.msra.mxu1 %v14816_v49  ;;  %19020 = vmatpush3.msra.mxu0 %v14941_v36  ;;  %v14937_v49 = vld [vmem:[%s24149_s21 + $0x18] sm:$0xff] }
0x1878   :  { %19002 = vmatprep.subr.mxu1 %v24255_v37  ;;  %19021 = vmatprep.subr.mxu0 %v24255_v37 }
0x1879   :  { %19003 = vmatpush3.msra.mxu1 %v14815_v27  ;;  %19022 = vmatpush3.msra.mxu0 %v14940_v32  ;;  %v14936_v27 = vld [vmem:[%s24149_s21 + $0x10] sm:$0xff] }
0x187a   :  { %19004 = vmatprep.subr.mxu1 %v24255_v37  ;;  %19023 = vmatprep.subr.mxu0 %v24255_v37 }
0x187b   :  { %19005 = vmatpush3.msra.mxu1 %v14814_v41  ;;  %19024 = vmatpush3.msra.mxu0 %v14939_v62  ;;  %v14935_v41 = vld [vmem:[%s24149_s21 + $0x8] sm:$0xff] }
0x187c   :  { %19006 = vmatprep.subr.mxu1 %v24255_v37  ;;  %19025 = vmatprep.subr.mxu0 %v24255_v37 }
0x187d   :  { %19007 = vmatpush3.msra.mxu1 %v14813_v55  ;;  %v14934_v55 = vld [vmem:[%s24149_s21] sm:$0xff] }
0x187e   :  { %19008 = vmatprep.subr.mxu1 %v24255_v37 }
0x187f   :  { %19009 = vmatpush3.msra.mxu1 %v14812_v19  ;;  %v15021_v19 = vld [vmem:[%s24151_s23 + $0x28] sm:$0xff] }
0x1880   :  { %19010 = vmatprep.subr.mxu1 %v24255_v37 }
0x1881   :  { %19011 = vmatpush3.msra.mxu1 %v14811_v0  ;;  %v15020_v0 = vld [vmem:[%s24151_s23 + $0x20] sm:$0xff] }
0x1882   :  { %19012 = vmatprep.subr.mxu1 %v24255_v37 }
0x1883   :  { %19013 = vmatpush3.msra.mxu1 %v14810_v29  ;;  %v15019_v29 = vld [vmem:[%s24151_s23 + $0x18] sm:$0xff] }
0x1884   :  { %19014 = vmatprep.subr.mxu1 %v24255_v37 }
0x1885   :  { %19015 = vmatpush3.msra.mxu1 %v14809_v28  ;;  %v15018_v28 = vld [vmem:[%s24151_s23 + $0x10] sm:$0xff] }
0x1886   :  { %19038 = vmatprep.subr.mxu1 %v24255_v37 }
0x1923   :  { %v14557_v59 = vpop.f32.mrf.mxu1  ;;  %v14634_v22 = vpop.f32.mrf.mxu0 }
0x1924   :  { %v14561_v42 = vadd.f32 %v14557_v59, %v13345_v34  ;;  %v14638_v7 = vadd.f32 %v14634_v22, %v13415_v8 }
0x1925   :  { %v18942_v60 = vpop.f32.mrf.mxu1  ;;  %v18961_v6 = vpop.f32.mrf.mxu0 }
0x1926   :  { %v15461_v43 = vmul.f32 -1.442695, %v14561_v42  ;;  %v15463_v9 = vmul.f32 -1.442695, %v14638_v7 }
0x1928   :  { %19549 = vpow2.f32 %v15461_v43 }
0x1929   :  { %19551 = vpow2.f32 %v15463_v9 }
0x1934   :  { %v14711_v48 = vpop.f32.mrf.mxu1  ;;  %v14783_v4 = vpop.f32.mrf.mxu0 }
0x1935   :  { %v19550_v13 = vpop.eup %19549  ;;  %v14715_v18 = vadd.f32 %v14711_v48, %v13485_v52  ;;  %v14787_v39 = vadd.f32 %v14783_v4, %v13555_v12 }
0x1936   :  { %v19552_v35 = vpop.eup %19551  ;;  %v14565_v56 = vadd.f32 1.0, %v19550_v13  ;;  %v18980_v54 = vpop.f32.mrf.mxu1 }
0x1937   :  { %v18999_v5 = vpop.f32.mrf.mxu0  ;;  %v14642_v16 = vadd.f32 1.0, %v19552_v35  ;;  %19553 = vtanh.f32 %v14715_v18  ;;  %v15466_v53 = vmul.f32 -1.442695, %v14787_v39 }
0x1938   :  { %19555 = vrcp.f32 %v14565_v56 }
0x1939   :  { %19557 = vrcp.f32 %v14642_v16 }
0x193a   :  { %19559 = vpow2.f32 %v15466_v53 }
0x1944   :  { %v19554_v15 = vpop.eup %19553 }
0x1945   :  { %v19556_v20 = vpop.eup %19555 }
0x1946   :  { %v19558_v11 = vpop.eup %19557  ;;  %v14795_v30 = vmul.f32 %v19556_v20, %v19554_v15  ;;  %v15017_v20 = vld [vmem:[%s24151_s23 + $0x8] sm:$0xff] }
0x1947   :  { %v19560_v46 = vpop.eup %19559  ;;  %v14794_v47 = vmul.f32 %v19558_v11, %v23942_v23  ;;  %v14900_v23 = vrot.slane %v24291_v14, %v14899_v3  ;;  %v15016_v11 = vld [vmem:[%s24151_s23] sm:$0xff] }
0x1948   :  { %v14791_v40 = vadd.f32 1.0, %v19560_v46 }
0x1949   :  { %v14796_v58 = vadd.f32 %v14795_v30, %v14794_v47  ;;  %v14942_v30 = vld [vmem:[%s24150_s22] sm:$0x1] }
0x194a   :  { %19561 = vrcp.f32 %v14791_v40 }
0x194b   :  { %19563 = vtanh.f32 %v14796_v58  ;;  %v15107_v58 = vld [vmem:[%s24154_s26] sm:$0xf] }
0x1957   :  { %v19562_v50 = vpop.eup %19561 }
0x1958   :  { %v19564_v17 = vpop.eup %19563 }
0x1959   :  { %v14798_v44 = vmul.f32 %v19564_v17, %v19562_v50  ;;  %v15108_v50 = vld [vmem:[#allocation4] sm:$0xf] }
0x195a   :  { %v15109_v17 = vmul.f32 %v15108_v50, %v15107_v58 }
0x195b   :  { %v14804_v21 = vrot.slane %v14798_v44, 5 }
0x195c   :  { %v15111_v44 = vsel %vm15110_vm10, %v15109_v17, 0.0 }
0x195d   :  { %v24038_v26 = vsel %vm5931_vm11, %v23955_v10, %v14804_v21  ;;  %v14938_v10 = vld [vmem:[%s24149_s21 + $0x20] sm:$0xff]  ;;  %vm15103_vm11 = vcmask 125952  }
0x195e   :  { %19017 = vmatmul.mubr.msk.f32.vlgmr.msra.gmra.mxu1 %vm11114_vm6, %v24038_v26  ;;  %19026 = vmatpush3.msra.mxu0 %v14938_v10 }
0x195f   :  { %19050 = vmatprep.mubr.msk.f32.mxu1 %vm19992_vm8, %v24255_v37  ;;  %19027 = vmatprep.subr.mxu0 %v24255_v37  ;;  %vm14906_vm8 = vcmask 1043456  }
0x1960   :  { %19028 = vmatpush3.msra.mxu0 %v14937_v49  ;;  %19039 = vmatpush3.msra.mxu1 %v15021_v19 }
0x1961   :  { %19029 = vmatprep.subr.mxu0 %v24255_v37  ;;  %19040 = vmatprep.subr.mxu1 %v24255_v37 }
0x1962   :  { %19030 = vmatpush3.msra.mxu0 %v14936_v27  ;;  %19041 = vmatpush3.msra.mxu1 %v15020_v0 }
0x1963   :  { %19031 = vmatprep.subr.mxu0 %v24255_v37  ;;  %19042 = vmatprep.subr.mxu1 %v24255_v37 }
0x1964   :  { %19032 = vmatpush3.msra.mxu0 %v14935_v41  ;;  %19043 = vmatpush3.msra.mxu1 %v15019_v29 }
0x1965   :  { %19033 = vmatprep.subr.mxu0 %v24255_v37  ;;  %19044 = vmatprep.subr.mxu1 %v24255_v37 }
0x1966   :  { %19034 = vmatpush3.msra.mxu0 %v14934_v55  ;;  %19045 = vmatpush3.msra.mxu1 %v15018_v28 }
0x1967   :  { %19046 = vmatprep.subr.mxu1 %v24255_v37 }
0x1968   :  { %19047 = vmatpush3.msra.mxu1 %v15017_v20 }
0x1969   :  { %19048 = vmatprep.subr.mxu1 %v24255_v37  ;;  %v15022_v37 = vld [vmem:[%s24152_s24] sm:$0x1] }
0x196a   :  { %19049 = vmatpush3.msra.mxu1 %v15016_v11 }
0x1a1e   :  { %v14893_v24 = vpop.f32.mrf.mxu1 }
0x1a1f   :  { %v14894_v25 = vadd.f32 %v15467_v57, %v14893_v24  ;;  %v15097_v57 = vld [vmem:[%s24153_s25] sm:$0xf] }
0x1a20   :  { %v19018_v63 = vpop.f32.mrf.mxu1 }
0x1a21   :  { %v14901_v2 = vmul.f32 %v14900_v23, %v14894_v25  ;;  %v15115_v63 = vld [vmem:[%s24292_s18] sm:$0xf] }
0x1a23   :  { %v14903_v38 = vsel %vm14902_vm7, %v14901_v2, 0.0 }
0x1a24   :  { %14904 = vadd.xlane.f32.xlu1 %v14903_v38 }
0x1a28   :  { %15112 = vadd.xlane.f32.xlu1 %v15111_v44 }
0x1aad   :  { %v14905_v1 = vpop.xlane.xlu1 %14904 }
0x1aae   :  { %v14907_v34 = vsel %vm14906_vm8, %v14905_v1, -inf }
0x1aaf   :  { %v14908_v31 = vrot.slane %v14907_v34, 4 }
0x1ab1   :  { %v14909_v8 = vmax.f32 %v14907_v34, %v14908_v31  ;;  %v15113_v23 = vpop.xlane.xlu1 %15112 }
0x1ab3   :  { %v14910_v59 = vrot.slane %v14909_v8, 2 }
0x1ab5   :  { %v14911_v22 = vmax.f32 %v14909_v8, %v14910_v59 }
0x1ab7   :  { %v14912_v42 = vrot.slane %v14911_v22, 1 }
0x1ab9   :  { %v14913_v7 = vmax.f32 %v14911_v22, %v14912_v42 }
0x1abb   :  { %v14914_v60 = vsub.f32 %v14905_v1, %v14913_v7 }
0x1abd   :  { %v14915_v6 = vmul.f32 1.442695, %v14914_v60 }
0x1abf   :  { %19565 = vpow2.f32 %v14915_v6 }
0x1acc   :  { %v19566_v43 = vpop.eup %19565 }
0x1acd   :  { %v14917_v9 = vsel %vm14906_vm8, %v19566_v43, 0.0 }
0x1ace   :  { %v14918_v51 = vrot.slane %v14917_v9, 4 }
0x1ad0   :  { %v14919_v52 = vadd.f32 %v14918_v51, %v14917_v9 }
0x1ad2   :  { %v14920_v45 = vrot.slane %v14919_v52, 2 }
0x1ad4   :  { %v14921_v12 = vadd.f32 %v14920_v45, %v14919_v52 }
0x1ad6   :  { %v14922_v48 = vrot.slane %v14921_v12, 1 }
0x1ad8   :  { %v14923_v4 = vadd.f32 %v14922_v48, %v14921_v12 }
0x1ada   :  { %19567 = vrcp.f32 %v14923_v4 }
0x1ae7   :  { %v19568_v13 = vpop.eup %19567 }
0x1ae8   :  { %v14925_v18 = vmul.f32 %v19568_v13, %v19566_v43 }
0x1aea   :  { %v14926_v39 = vmul.f32 %v14925_v18, %v24038_v26 }
0x1aec   :  { %v14927_v35 = vsel %vm14902_vm7, %v14926_v39, 0.0 }
0x1aed   :  { %v14928_v56 = vrot.slane %v14927_v35, 4 }
0x1aef   :  { %v14929_v54 = vadd.f32 %v14928_v56, %v14927_v35 }
0x1af1   :  { %v14930_v5 = vrot.slane %v14929_v54, 2 }
0x1af3   :  { %v14931_v16 = vadd.f32 %v14930_v5, %v14929_v54 }
0x1af5   :  { %v14932_v53 = vrot.slane %v14931_v16, 1 }
0x1af7   :  { %v14933_v15 = vadd.f32 %v14932_v53, %v14931_v16 }
0x1af9   :  { %19036 = vmatmul.mubr.msk.f32.vlgmr.msra.gmra.mxu0 %vm11114_vm6, %v14933_v15 }
0x1bb9   :  { %v15012_v46 = vpop.f32.mrf.mxu0 }
0x1bba   :  { %v15013_v47 = vadd.f32 %v15012_v46, %v14942_v30 }
0x1bbb   :  { %v19037_v40 = vpop.f32.mrf.mxu0 }
0x1bbc   :  { %19051 = vmatmul.mubr.msk.f32.vlgmr.msra.gmra.mxu1 %vm15023_vm9, %v15013_v47 }
0x1c7c   :  { %v15093_v21 = vpop.f32.mrf.mxu1 }
0x1c7d   :  { %v15094_v26 = vadd.f32 %v15093_v21, %v15022_v37 }
0x1c7e   :  { %v19052_v61 = vpop.f32.mrf.mxu1 }
0x1c7f   :  { %v15101_v24 = vrot.slane %v15094_v26, %v14899_v3 }
0x1c81   :  { %v15102_v25 = vmul.f32 %v15101_v24, %v15097_v57 }
0x1c83   :  { %v15104_v14 = vsel %vm15103_vm11, %v15102_v25, 0.0 }
0x1c84   :  { %15105 = vadd.xlane.f32.xlu0 %v15104_v14 }
0x1d0d   :  { %v15106_v2 = vpop.xlane.xlu0 %15105 }
0x1d0e   :  { %v15114_v38 = vadd.f32 %v15113_v23, %v15106_v2 }
0x1d10   :  { %v15116_v36 = vadd.f32 %v15115_v63, %v15114_v38 }
0x1d12   :  { %15118 = vst.msk [vmem:[%s24293_s5] sm:$0xf] %vm15117_vm12, %v15116_v36 }
0x1d13   :  { %15123 = vsyncpa [#allocation3], 1 }
0x1d14   :  { %15124 = vsyncpa [#allocation5], 1 }
0x1d15   :  { %15125 = vsyncpa [#allocation8], 1 }
0x1d16   :  { %15126 = vsyncpa [#allocation11], 1 }
0x1d17   :  { %15127 = vsyncpa [#allocation14], 1 }
0x1d18   :  { %15128 = vsyncpa [#allocation17], 1 }
0x1d19   :  { %15129 = vsyncpa [#allocation20], 1 }
0x1d1a   :  { %15130 = vsyncpa [#allocation23], 1 }
0x1d1b   :  { %15131 = vsyncpa [#allocation26], 1 }
0x1d1c   :  { %15132 = vsyncpa [#allocation29], 1 }

</bundles_post_ra>
